<compile_context>
chip_gen: v7x
topology: tpu7x:2x2x1
jax: 0.10.0
libtpu: 0.0.40
codegen_flags: <defaults>
</compile_context>

<pallas_src>
import functools

import jax
import jax.numpy as jnp
from jax.experimental import pallas as pl
from jax.experimental.pallas import tpu as pltpu

N_COLORS = 3
N_FEATS = 32
SF = 2                         # scale[0] % 2 == 0  ->  sf = 2
N_TAIL = N_COLORS * SF * SF    # 12
CIN_K = 16                     # head channels after dx-fold: 3*3 = 9, padded to 16


def _round_up(x, m):
    return (x + m - 1) // m * m


def _fused_sr_kernel(xin_ref, vmask_ref,
                     wh_ref, bh_ref, w1_ref, b1_ref, w2_ref, b2_ref,
                     wt_ref, bt_ref,
                     o_ref, *, TH, Wp):
    """One (batch, row-tile) step of the fused SR network.

    Flat layout: index p = y*Wp + c, c=0 is the left zero-pad column, c in
    [1, W] are image columns.  A 3x3 conv = 3 MXU dots (one per dy) with the
    dx taps folded into K.
    """
    t = pl.program_id(1)
    base = t * (TH * Wp)

    def conv_head(out_rows):
        # head input already has the dx taps folded into channels (wrapper-side).
        L = out_rows * Wp
        acc = None
        for dy in range(3):
            start = pl.multiple_of(base + dy * Wp, 8)
            xs = xin_ref[pl.ds(start, L), :]                    # (L, CIN_K) bf16
            d = jnp.dot(xs, wh_ref[dy], preferred_element_type=jnp.float32)
            acc = d if acc is None else acc + d
        return acc + bh_ref[...]

    def conv_feat(src, out_rows, w_ref, b_ref):
        # src: ((out_rows+2)*Wp, 32) f32 value; dx taps built via XLU rolls.
        R = src.shape[0]
        L = out_rows * Wp
        xl = pltpu.roll(src, 1, axis=0)          # xl[p] = src[p-1]  (dx = -1 tap)
        xr = pltpu.roll(src, R - 1, axis=0)      # xr[p] = src[p+1]  (dx = +1 tap)
        xcat = jnp.concatenate([xl, src, xr], axis=1).astype(jnp.bfloat16)
        acc = None
        for dy in range(3):
            xs = xcat[dy * Wp: dy * Wp + L, :]                  # (L, 96) bf16
            d = jnp.dot(xs, w_ref[dy], preferred_element_type=jnp.float32)
            acc = d if acc is None else acc + d
        # roll wrap-around artifacts land only in pad columns (masked/cropped).
        return acc + b_ref[...]

    def mask(acc, halo):
        # zero out padded rows / pad columns with a select (exact zeros, no NaN
        # propagation, single VPU pass); mask is applied AFTER the bias add.
        L = acc.shape[0]
        start = pl.multiple_of(base + (4 - halo) * Wp, 8)
        m = vmask_ref[pl.ds(start, L), :]                       # (L, 1) f32
        return jnp.where(m > 0.0, acc, 0.0)

    # head: image rows [t*TH-3, t*TH+TH+3)
    h = mask(conv_head(TH + 6), halo=3)
    # residual block conv1 + ReLU
    r = mask(jnp.maximum(conv_feat(h, TH + 4, w1_ref, b1_ref), 0.0), halo=2)
    # residual block conv2 + skip connection
    r = conv_feat(r, TH + 2, w2_ref, b2_ref)
    f = mask(h[2 * Wp: 2 * Wp + (TH + 2) * Wp, :] + r, halo=1)
    # tail: 32 -> 3*SF*SF (pad columns / padded rows are cropped by the wrapper)
    tail = conv_feat(f, TH, wt_ref, bt_ref)
    o_ref[...] = tail.astype(o_ref.dtype)


def fused_sr_lowres(params, x_nhwc, *, tile_rows=32):
    """head/resblock/tail in one fused Pallas kernel.

    Returns the tail-conv output (N, H, W, 3*SF*SF) in float32 (pre pixel-shuffle).
    """
    N, H, W, C = x_nhwc.shape
    Wp = _round_up(W + 2, 8)                 # pad columns so per-dy slices are 8-aligned
    TH = max(1, min(H, tile_rows))
    nT = pl.cdiv(H, TH)
    if N * nT < 2 and H > 1:
        # v7x megacore: keep >= 2 parallel grid steps so both TensorCores are busy.
        TH = max(1, (H + 1) // 2)
        nT = pl.cdiv(H, TH)
    H_pad = nT * TH
    rows_total = H_pad + 8                   # 4 halo rows top + 4 (+ragged) bottom

    # --- head input: dx taps folded into channels (im2col along dx), K = 9 -> 16
    xc = jnp.pad(x_nhwc.astype(jnp.float32),
                 ((0, 0), (0, 0), (1, Wp - 1 - W), (0, 0)))            # (N,H,Wp,3)
    g0 = jnp.pad(xc, ((0, 0), (0, 0), (1, 0), (0, 0)))[:, :, :Wp, :]   # col x-1
    g2 = jnp.pad(xc, ((0, 0), (0, 0), (0, 1), (0, 0)))[:, :, 1:, :]    # col x+1
    xcat = jnp.concatenate([g0, xc, g2], axis=-1)                      # (N,H,Wp,9)
    xcat = jnp.pad(xcat, ((0, 0), (4, H_pad - H + 4), (0, 0), (0, CIN_K - 3 * C)))
    x_flat = xcat.reshape(N, rows_total * Wp, CIN_K).astype(jnp.bfloat16)

    # --- validity mask: 1 inside the image (row in [0,H), col in [1,W]), else 0
    rvalid = (jnp.arange(rows_total) >= 4) & (jnp.arange(rows_total) < 4 + H)
    cvalid = (jnp.arange(Wp) >= 1) & (jnp.arange(Wp) <= W)
    vmask = (rvalid[:, None] & cvalid[None, :]).astype(jnp.float32)
    vmask = vmask.reshape(rows_total * Wp, 1)

    # --- weights: (3,3,Cin,Cout) -> (3, 3*Cin, Cout) bf16, dx folded into K
    def prep(w, b, k_pad=None):
        kh, kw, cin, cout = w.shape
        wk = w.reshape(kh, kw * cin, cout)
        if k_pad is not None and k_pad > kw * cin:
            wk = jnp.pad(wk, ((0, 0), (0, k_pad - kw * cin), (0, 0)))
        return wk.astype(jnp.bfloat16), b.reshape(1, cout).astype(jnp.float32)

    wh, bh = prep(params["head_w"], params["head_b"], k_pad=CIN_K)
    w1, b1 = prep(params["b1_w"], params["b1_b"])
    w2, b2 = prep(params["b2_w"], params["b2_b"])
    wt, bt = prep(params["tail_w"], params["tail_b"])

    def rep(shape):
        return pl.BlockSpec(shape, lambda n, t: (0,) * len(shape))

    out = pl.pallas_call(
        functools.partial(_fused_sr_kernel, TH=TH, Wp=Wp),
        out_shape=jax.ShapeDtypeStruct((N, nT, TH * Wp, N_TAIL), jnp.bfloat16),
        grid=(N, nT),
        in_specs=[
            # whole padded image per batch, resident across the row-tile axis
            pl.BlockSpec((None, rows_total * Wp, CIN_K), lambda n, t: (n, 0, 0)),
            rep((rows_total * Wp, 1)),
            rep(wh.shape), rep(bh.shape),
            rep(w1.shape), rep(b1.shape),
            rep(w2.shape), rep(b2.shape),
            rep(wt.shape), rep(bt.shape),
        ],
        out_specs=pl.BlockSpec((None, None, TH * Wp, N_TAIL),
                               lambda n, t: (n, t, 0, 0)),
        compiler_params=pltpu.CompilerParams(
            dimension_semantics=("parallel", "parallel")),
    )(x_flat, vmask, wh, bh, w1, b1, w2, b2, wt, bt)

    # (N, nT, TH*Wp, 12) -> (N, H, W, 12): drop padded rows and pad columns.
    out = out.reshape(N, H_pad, Wp, N_TAIL)[:, :H, 1:W + 1, :].astype(jnp.float32)
    return out


# ---------------------------------------------------------------------------
# Model parameters (deterministic init) and forward pass
# ---------------------------------------------------------------------------
def init_params(key):
    ks = jax.random.split(key, 4)

    def conv_init(k, cin, cout):
        fan_in = 9 * cin
        w = jax.random.normal(k, (3, 3, cin, cout), jnp.float32) / jnp.sqrt(fan_in)
        b = jnp.zeros((cout,), jnp.float32)
        return w, b

    hw, hb = conv_init(ks[0], N_COLORS, N_FEATS)
    b1w, b1b = conv_init(ks[1], N_FEATS, N_FEATS)
    b2w, b2b = conv_init(ks[2], N_FEATS, N_FEATS)
    tw, tb = conv_init(ks[3], N_FEATS, N_TAIL)
    return {
        "head_w": hw, "head_b": hb,
        "b1_w": b1w, "b1_b": b1b,
        "b2_w": b2w, "b2_b": b2b,
        "tail_w": tw, "tail_b": tb,
    }


@functools.partial(jax.jit, static_argnums=(2, 3, 4, 5))
def model_forward(params, x_nchw, outH, outW, h_old, w_old):
    """Model.forward(x, outH, outW, h_old, w_old): x is NCHW, output (N,3,outH,outW)."""
    x = jnp.transpose(x_nchw, (0, 2, 3, 1))            # NCHW -> NHWC
    t = fused_sr_lowres(params, x)                     # (N, H, W, 3*SF*SF)
    N, H, W, _ = t.shape
    # pixel shuffle x SF
    t = t.reshape(N, H, W, N_COLORS, SF, SF)
    t = t.transpose(0, 1, 4, 2, 5, 3).reshape(N, H * SF, W * SF, N_COLORS)
    # crop away input padding, then arbitrary-scale resize to (outH, outW)
    # TODO(synk): resize semantics of the real h2a2sr arbitrary-scale upsampler unknown.
    t = t[:, :h_old * SF, :w_old * SF, :]
    t = jax.image.resize(t, (N, outH, outW, N_COLORS), method="bilinear")
    return jnp.transpose(t, (0, 3, 1, 2))              # back to NCHW


# ---------------------------------------------------------------------------
if __name__ == "__main__":
    key = jax.random.PRNGKey(0)
    pkey, xkey = jax.random.split(key)
    params = init_params(pkey)

    # input padded to 16x16, original size 14x15, target output 29x31
    x = jax.random.normal(xkey, (2, N_COLORS, 16, 16), jnp.float32)
    h_old, w_old = 14, 15
    outH, outW = 29, 31

    out = model_forward(params, x, outH, outW, h_old, w_old)
    out = jax.block_until_ready(out)

    assert out.shape == (2, N_COLORS, outH, outW), out.shape
    assert bool(jnp.all(jnp.isfinite(out)))
    print("KERNEL_OK")
</pallas_src>

<mosaic_0001>
module attributes {stable_mosaic.version = 11 : i64} {
  func.func @_fused_sr_kernel(%arg0: i32, %arg1: i32, %arg2: memref<1x576x16xbf16, #tpu.memory_space<vmem>>, %arg3: memref<576x1xf32, #tpu.memory_space<vmem>>, %arg4: memref<3x16x32xbf16, #tpu.memory_space<vmem>>, %arg5: memref<1x32xf32, #tpu.memory_space<vmem>>, %arg6: memref<3x96x32xbf16, #tpu.memory_space<vmem>>, %arg7: memref<1x32xf32, #tpu.memory_space<vmem>>, %arg8: memref<3x96x32xbf16, #tpu.memory_space<vmem>>, %arg9: memref<1x32xf32, #tpu.memory_space<vmem>>, %arg10: memref<3x96x12xbf16, #tpu.memory_space<vmem>>, %arg11: memref<1x12xf32, #tpu.memory_space<vmem>>, %arg12: memref<1x1x384x12xbf16, #tpu.memory_space<vmem>>) attributes {dimension_semantics = [#tpu.dimension_semantics<parallel>, #tpu.dimension_semantics<parallel>], iteration_bounds = array<i64: 2, 1>, scalar_prefetch = 0 : i64, scratch_operands = 0 : i64, tpu.core_type = #tpu.core_type<tc>, window_params = [{transform_indices = @transform_0, window_bounds = array<i64: 1, 576, 16>}, {pipeline_mode = #tpu.pipeline_mode<synchronous>, transform_indices = @transform_1, window_bounds = array<i64: 576, 1>}, {pipeline_mode = #tpu.pipeline_mode<synchronous>, transform_indices = @transform_2, window_bounds = array<i64: 3, 16, 32>}, {pipeline_mode = #tpu.pipeline_mode<synchronous>, transform_indices = @transform_3, window_bounds = array<i64: 1, 32>}, {pipeline_mode = #tpu.pipeline_mode<synchronous>, transform_indices = @transform_4, window_bounds = array<i64: 3, 96, 32>}, {pipeline_mode = #tpu.pipeline_mode<synchronous>, transform_indices = @transform_5, window_bounds = array<i64: 1, 32>}, {pipeline_mode = #tpu.pipeline_mode<synchronous>, transform_indices = @transform_6, window_bounds = array<i64: 3, 96, 32>}, {pipeline_mode = #tpu.pipeline_mode<synchronous>, transform_indices = @transform_7, window_bounds = array<i64: 1, 32>}, {pipeline_mode = #tpu.pipeline_mode<synchronous>, transform_indices = @transform_8, window_bounds = array<i64: 3, 96, 12>}, {pipeline_mode = #tpu.pipeline_mode<synchronous>, transform_indices = @transform_9, window_bounds = array<i64: 1, 12>}, {transform_indices = @transform_10, window_bounds = array<i64: 1, 1, 384, 12>}]} {
    %c384_i32 = arith.constant 384 : i32
    %0 = arith.muli %arg1, %c384_i32 : i32
    %c0_i32 = arith.constant 0 : i32
    %1 = arith.addi %0, %c0_i32 : i32
    %2 = tpu.assume_multiple %1, 8 : i32
    %c0 = arith.constant 0 : index
    %3 = arith.index_cast %2 : i32 to index
    %c0_0 = arith.constant 0 : index
    %4 = vector.load %arg2[%c0, %3, %c0_0] : memref<1x576x16xbf16, #tpu.memory_space<vmem>>, vector<1x528x16xbf16>
    %5 = vector.shape_cast %4 : vector<1x528x16xbf16> to vector<528x16xbf16>
    %c0_1 = arith.constant 0 : index
    %c0_2 = arith.constant 0 : index
    %c0_3 = arith.constant 0 : index
    %6 = vector.load %arg4[%c0_1, %c0_2, %c0_3] : memref<3x16x32xbf16, #tpu.memory_space<vmem>>, vector<1x16x32xbf16>
    %7 = vector.shape_cast %6 : vector<1x16x32xbf16> to vector<16x32xbf16>
    %cst = arith.constant dense<0.000000e+00> : vector<528x32xf32>
    %8 = tpu.matmul %5, %7, %cst {dimension_numbers = #tpu.dot_dimension_numbers<[1], [0], [0], [1], [0, 0, 1, 1], [], []>} : vector<528x16xbf16>, vector<16x32xbf16>, vector<528x32xf32> -> vector<528x32xf32>
    %c24_i32 = arith.constant 24 : i32
    %9 = arith.addi %0, %c24_i32 : i32
    %10 = tpu.assume_multiple %9, 8 : i32
    %c0_4 = arith.constant 0 : index
    %11 = arith.index_cast %10 : i32 to index
    %c0_5 = arith.constant 0 : index
    %12 = vector.load %arg2[%c0_4, %11, %c0_5] : memref<1x576x16xbf16, #tpu.memory_space<vmem>>, vector<1x528x16xbf16>
    %13 = vector.shape_cast %12 : vector<1x528x16xbf16> to vector<528x16xbf16>
    %c1 = arith.constant 1 : index
    %c0_6 = arith.constant 0 : index
    %c0_7 = arith.constant 0 : index
    %14 = vector.load %arg4[%c1, %c0_6, %c0_7] : memref<3x16x32xbf16, #tpu.memory_space<vmem>>, vector<1x16x32xbf16>
    %15 = vector.shape_cast %14 : vector<1x16x32xbf16> to vector<16x32xbf16>
    %cst_8 = arith.constant dense<0.000000e+00> : vector<528x32xf32>
    %16 = tpu.matmul %13, %15, %cst_8 {dimension_numbers = #tpu.dot_dimension_numbers<[1], [0], [0], [1], [0, 0, 1, 1], [], []>} : vector<528x16xbf16>, vector<16x32xbf16>, vector<528x32xf32> -> vector<528x32xf32>
    %17 = arith.addf %8, %16 : vector<528x32xf32>
    %c48_i32 = arith.constant 48 : i32
    %18 = arith.addi %0, %c48_i32 : i32
    %19 = tpu.assume_multiple %18, 8 : i32
    %c0_9 = arith.constant 0 : index
    %20 = arith.index_cast %19 : i32 to index
    %c0_10 = arith.constant 0 : index
    %21 = vector.load %arg2[%c0_9, %20, %c0_10] : memref<1x576x16xbf16, #tpu.memory_space<vmem>>, vector<1x528x16xbf16>
    %22 = vector.shape_cast %21 : vector<1x528x16xbf16> to vector<528x16xbf16>
    %c2 = arith.constant 2 : index
    %c0_11 = arith.constant 0 : index
    %c0_12 = arith.constant 0 : index
    %23 = vector.load %arg4[%c2, %c0_11, %c0_12] : memref<3x16x32xbf16, #tpu.memory_space<vmem>>, vector<1x16x32xbf16>
    %24 = vector.shape_cast %23 : vector<1x16x32xbf16> to vector<16x32xbf16>
    %cst_13 = arith.constant dense<0.000000e+00> : vector<528x32xf32>
    %25 = tpu.matmul %22, %24, %cst_13 {dimension_numbers = #tpu.dot_dimension_numbers<[1], [0], [0], [1], [0, 0, 1, 1], [], []>} : vector<528x16xbf16>, vector<16x32xbf16>, vector<528x32xf32> -> vector<528x32xf32>
    %26 = arith.addf %17, %25 : vector<528x32xf32>
    %c0_14 = arith.constant 0 : index
    %c0_15 = arith.constant 0 : index
    %27 = vector.load %arg5[%c0_14, %c0_15] : memref<1x32xf32, #tpu.memory_space<vmem>>, vector<1x32xf32>
    %28 = vector.broadcast %27 : vector<1x32xf32> to vector<528x32xf32>
    %29 = arith.addf %26, %28 : vector<528x32xf32>
    %c24_i32_16 = arith.constant 24 : i32
    %30 = arith.addi %0, %c24_i32_16 : i32
    %31 = tpu.assume_multiple %30, 8 : i32
    %32 = arith.index_cast %31 : i32 to index
    %c0_17 = arith.constant 0 : index
    %33 = vector.load %arg3[%32, %c0_17] : memref<576x1xf32, #tpu.memory_space<vmem>>, vector<528x1xf32>
    %cst_18 = arith.constant 0.000000e+00 : f32
    %34 = vector.broadcast %cst_18 : f32 to vector<528x1xf32>
    %35 = arith.cmpf ogt, %33, %34 : vector<528x1xf32>
    %cst_19 = arith.constant 0.000000e+00 : f32
    %36 = vector.shape_cast %35 : vector<528x1xi1> to vector<528x1xi1>
    %37 = vector.broadcast %36 : vector<528x1xi1> to vector<528x32xi1>
    %38 = vector.broadcast %cst_19 : f32 to vector<528x32xf32>
    %39 = arith.select %37, %29, %38 : vector<528x32xi1>, vector<528x32xf32>
    %c1_i32 = arith.constant 1 : i32
    %40 = tpu.dynamic_rotate %39 by %c1_i32 dim 0 : vector<528x32xf32>, i32 -> vector<528x32xf32>
    %c527_i32 = arith.constant 527 : i32
    %41 = tpu.dynamic_rotate %39 by %c527_i32 dim 0 : vector<528x32xf32>, i32 -> vector<528x32xf32>
    %42 = tpu.concatenate %40, %39, %41 in 1 : vector<528x32xf32>, vector<528x32xf32>, vector<528x32xf32> -> vector<528x96xf32>
    %43 = arith.truncf %42 : vector<528x96xf32> to vector<528x96xbf16>
    %44 = vector.extract_strided_slice %43 {offsets = [0, 0], sizes = [480, 96], strides = [1, 1]} : vector<528x96xbf16> to vector<480x96xbf16>
    %c0_20 = arith.constant 0 : index
    %c0_21 = arith.constant 0 : index
    %c0_22 = arith.constant 0 : index
    %45 = vector.load %arg6[%c0_20, %c0_21, %c0_22] : memref<3x96x32xbf16, #tpu.memory_space<vmem>>, vector<1x96x32xbf16>
    %46 = vector.shape_cast %45 : vector<1x96x32xbf16> to vector<96x32xbf16>
    %cst_23 = arith.constant dense<0.000000e+00> : vector<480x32xf32>
    %47 = tpu.matmul %44, %46, %cst_23 {dimension_numbers = #tpu.dot_dimension_numbers<[1], [0], [0], [1], [0, 0, 1, 1], [], []>} : vector<480x96xbf16>, vector<96x32xbf16>, vector<480x32xf32> -> vector<480x32xf32>
    %48 = vector.extract_strided_slice %43 {offsets = [24, 0], sizes = [480, 96], strides = [1, 1]} : vector<528x96xbf16> to vector<480x96xbf16>
    %c1_24 = arith.constant 1 : index
    %c0_25 = arith.constant 0 : index
    %c0_26 = arith.constant 0 : index
    %49 = vector.load %arg6[%c1_24, %c0_25, %c0_26] : memref<3x96x32xbf16, #tpu.memory_space<vmem>>, vector<1x96x32xbf16>
    %50 = vector.shape_cast %49 : vector<1x96x32xbf16> to vector<96x32xbf16>
    %cst_27 = arith.constant dense<0.000000e+00> : vector<480x32xf32>
    %51 = tpu.matmul %48, %50, %cst_27 {dimension_numbers = #tpu.dot_dimension_numbers<[1], [0], [0], [1], [0, 0, 1, 1], [], []>} : vector<480x96xbf16>, vector<96x32xbf16>, vector<480x32xf32> -> vector<480x32xf32>
    %52 = arith.addf %47, %51 : vector<480x32xf32>
    %53 = vector.extract_strided_slice %43 {offsets = [48, 0], sizes = [480, 96], strides = [1, 1]} : vector<528x96xbf16> to vector<480x96xbf16>
    %c2_28 = arith.constant 2 : index
    %c0_29 = arith.constant 0 : index
    %c0_30 = arith.constant 0 : index
    %54 = vector.load %arg6[%c2_28, %c0_29, %c0_30] : memref<3x96x32xbf16, #tpu.memory_space<vmem>>, vector<1x96x32xbf16>
    %55 = vector.shape_cast %54 : vector<1x96x32xbf16> to vector<96x32xbf16>
    %cst_31 = arith.constant dense<0.000000e+00> : vector<480x32xf32>
    %56 = tpu.matmul %53, %55, %cst_31 {dimension_numbers = #tpu.dot_dimension_numbers<[1], [0], [0], [1], [0, 0, 1, 1], [], []>} : vector<480x96xbf16>, vector<96x32xbf16>, vector<480x32xf32> -> vector<480x32xf32>
    %57 = arith.addf %52, %56 : vector<480x32xf32>
    %c0_32 = arith.constant 0 : index
    %c0_33 = arith.constant 0 : index
    %58 = vector.load %arg7[%c0_32, %c0_33] : memref<1x32xf32, #tpu.memory_space<vmem>>, vector<1x32xf32>
    %59 = vector.broadcast %58 : vector<1x32xf32> to vector<480x32xf32>
    %60 = arith.addf %57, %59 : vector<480x32xf32>
    %cst_34 = arith.constant 0.000000e+00 : f32
    %61 = vector.broadcast %cst_34 : f32 to vector<480x32xf32>
    %62 = arith.maximumf %60, %61 : vector<480x32xf32>
    %c48_i32_35 = arith.constant 48 : i32
    %63 = arith.addi %0, %c48_i32_35 : i32
    %64 = tpu.assume_multiple %63, 8 : i32
    %65 = arith.index_cast %64 : i32 to index
    %c0_36 = arith.constant 0 : index
    %66 = vector.load %arg3[%65, %c0_36] : memref<576x1xf32, #tpu.memory_space<vmem>>, vector<480x1xf32>
    %cst_37 = arith.constant 0.000000e+00 : f32
    %67 = vector.broadcast %cst_37 : f32 to vector<480x1xf32>
    %68 = arith.cmpf ogt, %66, %67 : vector<480x1xf32>
    %cst_38 = arith.constant 0.000000e+00 : f32
    %69 = vector.shape_cast %68 : vector<480x1xi1> to vector<480x1xi1>
    %70 = vector.broadcast %69 : vector<480x1xi1> to vector<480x32xi1>
    %71 = vector.broadcast %cst_38 : f32 to vector<480x32xf32>
    %72 = arith.select %70, %62, %71 : vector<480x32xi1>, vector<480x32xf32>
    %c1_i32_39 = arith.constant 1 : i32
    %73 = tpu.dynamic_rotate %72 by %c1_i32_39 dim 0 : vector<480x32xf32>, i32 -> vector<480x32xf32>
    %c479_i32 = arith.constant 479 : i32
    %74 = tpu.dynamic_rotate %72 by %c479_i32 dim 0 : vector<480x32xf32>, i32 -> vector<480x32xf32>
    %75 = tpu.concatenate %73, %72, %74 in 1 : vector<480x32xf32>, vector<480x32xf32>, vector<480x32xf32> -> vector<480x96xf32>
    %76 = arith.truncf %75 : vector<480x96xf32> to vector<480x96xbf16>
    %77 = vector.extract_strided_slice %76 {offsets = [0, 0], sizes = [432, 96], strides = [1, 1]} : vector<480x96xbf16> to vector<432x96xbf16>
    %c0_40 = arith.constant 0 : index
    %c0_41 = arith.constant 0 : index
    %c0_42 = arith.constant 0 : index
    %78 = vector.load %arg8[%c0_40, %c0_41, %c0_42] : memref<3x96x32xbf16, #tpu.memory_space<vmem>>, vector<1x96x32xbf16>
    %79 = vector.shape_cast %78 : vector<1x96x32xbf16> to vector<96x32xbf16>
    %cst_43 = arith.constant dense<0.000000e+00> : vector<432x32xf32>
    %80 = tpu.matmul %77, %79, %cst_43 {dimension_numbers = #tpu.dot_dimension_numbers<[1], [0], [0], [1], [0, 0, 1, 1], [], []>} : vector<432x96xbf16>, vector<96x32xbf16>, vector<432x32xf32> -> vector<432x32xf32>
    %81 = vector.extract_strided_slice %76 {offsets = [24, 0], sizes = [432, 96], strides = [1, 1]} : vector<480x96xbf16> to vector<432x96xbf16>
    %c1_44 = arith.constant 1 : index
    %c0_45 = arith.constant 0 : index
    %c0_46 = arith.constant 0 : index
    %82 = vector.load %arg8[%c1_44, %c0_45, %c0_46] : memref<3x96x32xbf16, #tpu.memory_space<vmem>>, vector<1x96x32xbf16>
    %83 = vector.shape_cast %82 : vector<1x96x32xbf16> to vector<96x32xbf16>
    %cst_47 = arith.constant dense<0.000000e+00> : vector<432x32xf32>
    %84 = tpu.matmul %81, %83, %cst_47 {dimension_numbers = #tpu.dot_dimension_numbers<[1], [0], [0], [1], [0, 0, 1, 1], [], []>} : vector<432x96xbf16>, vector<96x32xbf16>, vector<432x32xf32> -> vector<432x32xf32>
    %85 = arith.addf %80, %84 : vector<432x32xf32>
    %86 = vector.extract_strided_slice %76 {offsets = [48, 0], sizes = [432, 96], strides = [1, 1]} : vector<480x96xbf16> to vector<432x96xbf16>
    %c2_48 = arith.constant 2 : index
    %c0_49 = arith.constant 0 : index
    %c0_50 = arith.constant 0 : index
    %87 = vector.load %arg8[%c2_48, %c0_49, %c0_50] : memref<3x96x32xbf16, #tpu.memory_space<vmem>>, vector<1x96x32xbf16>
    %88 = vector.shape_cast %87 : vector<1x96x32xbf16> to vector<96x32xbf16>
    %cst_51 = arith.constant dense<0.000000e+00> : vector<432x32xf32>
    %89 = tpu.matmul %86, %88, %cst_51 {dimension_numbers = #tpu.dot_dimension_numbers<[1], [0], [0], [1], [0, 0, 1, 1], [], []>} : vector<432x96xbf16>, vector<96x32xbf16>, vector<432x32xf32> -> vector<432x32xf32>
    %90 = arith.addf %85, %89 : vector<432x32xf32>
    %c0_52 = arith.constant 0 : index
    %c0_53 = arith.constant 0 : index
    %91 = vector.load %arg9[%c0_52, %c0_53] : memref<1x32xf32, #tpu.memory_space<vmem>>, vector<1x32xf32>
    %92 = vector.broadcast %91 : vector<1x32xf32> to vector<432x32xf32>
    %93 = arith.addf %90, %92 : vector<432x32xf32>
    %94 = vector.extract_strided_slice %39 {offsets = [48, 0], sizes = [432, 32], strides = [1, 1]} : vector<528x32xf32> to vector<432x32xf32>
    %95 = arith.addf %94, %93 : vector<432x32xf32>
    %c72_i32 = arith.constant 72 : i32
    %96 = arith.addi %0, %c72_i32 : i32
    %97 = tpu.assume_multiple %96, 8 : i32
    %98 = arith.index_cast %97 : i32 to index
    %c0_54 = arith.constant 0 : index
    %99 = vector.load %arg3[%98, %c0_54] : memref<576x1xf32, #tpu.memory_space<vmem>>, vector<432x1xf32>
    %cst_55 = arith.constant 0.000000e+00 : f32
    %100 = vector.broadcast %cst_55 : f32 to vector<432x1xf32>
    %101 = arith.cmpf ogt, %99, %100 : vector<432x1xf32>
    %cst_56 = arith.constant 0.000000e+00 : f32
    %102 = vector.shape_cast %101 : vector<432x1xi1> to vector<432x1xi1>
    %103 = vector.broadcast %102 : vector<432x1xi1> to vector<432x32xi1>
    %104 = vector.broadcast %cst_56 : f32 to vector<432x32xf32>
    %105 = arith.select %103, %95, %104 : vector<432x32xi1>, vector<432x32xf32>
    %c1_i32_57 = arith.constant 1 : i32
    %106 = tpu.dynamic_rotate %105 by %c1_i32_57 dim 0 : vector<432x32xf32>, i32 -> vector<432x32xf32>
    %c431_i32 = arith.constant 431 : i32
    %107 = tpu.dynamic_rotate %105 by %c431_i32 dim 0 : vector<432x32xf32>, i32 -> vector<432x32xf32>
    %108 = tpu.concatenate %106, %105, %107 in 1 : vector<432x32xf32>, vector<432x32xf32>, vector<432x32xf32> -> vector<432x96xf32>
    %109 = arith.truncf %108 : vector<432x96xf32> to vector<432x96xbf16>
    %110 = vector.extract_strided_slice %109 {offsets = [0, 0], sizes = [384, 96], strides = [1, 1]} : vector<432x96xbf16> to vector<384x96xbf16>
    %c0_58 = arith.constant 0 : index
    %c0_59 = arith.constant 0 : index
    %c0_60 = arith.constant 0 : index
    %111 = vector.load %arg10[%c0_58, %c0_59, %c0_60] : memref<3x96x12xbf16, #tpu.memory_space<vmem>>, vector<1x96x12xbf16>
    %112 = vector.shape_cast %111 : vector<1x96x12xbf16> to vector<96x12xbf16>
    %cst_61 = arith.constant dense<0.000000e+00> : vector<384x12xf32>
    %113 = tpu.matmul %110, %112, %cst_61 {dimension_numbers = #tpu.dot_dimension_numbers<[1], [0], [0], [1], [0, 0, 1, 1], [], []>} : vector<384x96xbf16>, vector<96x12xbf16>, vector<384x12xf32> -> vector<384x12xf32>
    %114 = vector.extract_strided_slice %109 {offsets = [24, 0], sizes = [384, 96], strides = [1, 1]} : vector<432x96xbf16> to vector<384x96xbf16>
    %c1_62 = arith.constant 1 : index
    %c0_63 = arith.constant 0 : index
    %c0_64 = arith.constant 0 : index
    %115 = vector.load %arg10[%c1_62, %c0_63, %c0_64] : memref<3x96x12xbf16, #tpu.memory_space<vmem>>, vector<1x96x12xbf16>
    %116 = vector.shape_cast %115 : vector<1x96x12xbf16> to vector<96x12xbf16>
    %cst_65 = arith.constant dense<0.000000e+00> : vector<384x12xf32>
    %117 = tpu.matmul %114, %116, %cst_65 {dimension_numbers = #tpu.dot_dimension_numbers<[1], [0], [0], [1], [0, 0, 1, 1], [], []>} : vector<384x96xbf16>, vector<96x12xbf16>, vector<384x12xf32> -> vector<384x12xf32>
    %118 = arith.addf %113, %117 : vector<384x12xf32>
    %119 = vector.extract_strided_slice %109 {offsets = [48, 0], sizes = [384, 96], strides = [1, 1]} : vector<432x96xbf16> to vector<384x96xbf16>
    %c2_66 = arith.constant 2 : index
    %c0_67 = arith.constant 0 : index
    %c0_68 = arith.constant 0 : index
    %120 = vector.load %arg10[%c2_66, %c0_67, %c0_68] : memref<3x96x12xbf16, #tpu.memory_space<vmem>>, vector<1x96x12xbf16>
    %121 = vector.shape_cast %120 : vector<1x96x12xbf16> to vector<96x12xbf16>
    %cst_69 = arith.constant dense<0.000000e+00> : vector<384x12xf32>
    %122 = tpu.matmul %119, %121, %cst_69 {dimension_numbers = #tpu.dot_dimension_numbers<[1], [0], [0], [1], [0, 0, 1, 1], [], []>} : vector<384x96xbf16>, vector<96x12xbf16>, vector<384x12xf32> -> vector<384x12xf32>
    %123 = arith.addf %118, %122 : vector<384x12xf32>
    %c0_70 = arith.constant 0 : index
    %c0_71 = arith.constant 0 : index
    %124 = vector.load %arg11[%c0_70, %c0_71] : memref<1x12xf32, #tpu.memory_space<vmem>>, vector<1x12xf32>
    %125 = vector.broadcast %124 : vector<1x12xf32> to vector<384x12xf32>
    %126 = arith.addf %123, %125 : vector<384x12xf32>
    %127 = arith.truncf %126 : vector<384x12xf32> to vector<384x12xbf16>
    %c0_72 = arith.constant 0 : index
    %c0_73 = arith.constant 0 : index
    %c0_74 = arith.constant 0 : index
    %c0_75 = arith.constant 0 : index
    %128 = vector.load %arg12[%c0_72, %c0_73, %c0_74, %c0_75] : memref<1x1x384x12xbf16, #tpu.memory_space<vmem>>, vector<1x1x384x12xbf16>
    %129 = vector.shape_cast %128 : vector<1x1x384x12xbf16> to vector<384x12xbf16>
    %130 = vector.shape_cast %127 : vector<384x12xbf16> to vector<1x1x384x12xbf16>
    tpu.vector_store %arg12[%c0_72, %c0_73, %c0_74, %c0_75], %130 {strides = array<i32>} : memref<1x1x384x12xbf16, #tpu.memory_space<vmem>>, vector<1x1x384x12xbf16>,
    return
  }
  func.func @transform_0(%arg0: i32, %arg1: i32) -> (i32, i32, i32) {
    %c0_i32 = arith.constant 0 : i32
    %c0_i32_0 = arith.constant 0 : i32
    %c0_i32_1 = arith.constant 0 : i32
    return %arg0, %c0_i32, %c0_i32_0 : i32, i32, i32
  }
  func.func @transform_1(%arg0: i32, %arg1: i32) -> (i32, i32) {
    %c0_i32 = arith.constant 0 : i32
    %c0_i32_0 = arith.constant 0 : i32
    %c0_i32_1 = arith.constant 0 : i32
    return %c0_i32, %c0_i32_0 : i32, i32
  }
  func.func @transform_2(%arg0: i32, %arg1: i32) -> (i32, i32, i32) {
    %c0_i32 = arith.constant 0 : i32
    %c0_i32_0 = arith.constant 0 : i32
    %c0_i32_1 = arith.constant 0 : i32
    %c0_i32_2 = arith.constant 0 : i32
    return %c0_i32, %c0_i32_0, %c0_i32_1 : i32, i32, i32
  }
  func.func @transform_3(%arg0: i32, %arg1: i32) -> (i32, i32) {
    %c0_i32 = arith.constant 0 : i32
    %c0_i32_0 = arith.constant 0 : i32
    %c0_i32_1 = arith.constant 0 : i32
    return %c0_i32, %c0_i32_0 : i32, i32
  }
  func.func @transform_4(%arg0: i32, %arg1: i32) -> (i32, i32, i32) {
    %c0_i32 = arith.constant 0 : i32
    %c0_i32_0 = arith.constant 0 : i32
    %c0_i32_1 = arith.constant 0 : i32
    %c0_i32_2 = arith.constant 0 : i32
    return %c0_i32, %c0_i32_0, %c0_i32_1 : i32, i32, i32
  }
  func.func @transform_5(%arg0: i32, %arg1: i32) -> (i32, i32) {
    %c0_i32 = arith.constant 0 : i32
    %c0_i32_0 = arith.constant 0 : i32
    %c0_i32_1 = arith.constant 0 : i32
    return %c0_i32, %c0_i32_0 : i32, i32
  }
  func.func @transform_6(%arg0: i32, %arg1: i32) -> (i32, i32, i32) {
    %c0_i32 = arith.constant 0 : i32
    %c0_i32_0 = arith.constant 0 : i32
    %c0_i32_1 = arith.constant 0 : i32
    %c0_i32_2 = arith.constant 0 : i32
    return %c0_i32, %c0_i32_0, %c0_i32_1 : i32, i32, i32
  }
  func.func @transform_7(%arg0: i32, %arg1: i32) -> (i32, i32) {
    %c0_i32 = arith.constant 0 : i32
    %c0_i32_0 = arith.constant 0 : i32
    %c0_i32_1 = arith.constant 0 : i32
    return %c0_i32, %c0_i32_0 : i32, i32
  }
  func.func @transform_8(%arg0: i32, %arg1: i32) -> (i32, i32, i32) {
    %c0_i32 = arith.constant 0 : i32
    %c0_i32_0 = arith.constant 0 : i32
    %c0_i32_1 = arith.constant 0 : i32
    %c0_i32_2 = arith.constant 0 : i32
    return %c0_i32, %c0_i32_0, %c0_i32_1 : i32, i32, i32
  }
  func.func @transform_9(%arg0: i32, %arg1: i32) -> (i32, i32) {
    %c0_i32 = arith.constant 0 : i32
    %c0_i32_0 = arith.constant 0 : i32
    %c0_i32_1 = arith.constant 0 : i32
    return %c0_i32, %c0_i32_0 : i32, i32
  }
  func.func @transform_10(%arg0: i32, %arg1: i32) -> (i32, i32, i32, i32) {
    %c0_i32 = arith.constant 0 : i32
    %c0_i32_0 = arith.constant 0 : i32
    %c0_i32_1 = arith.constant 0 : i32
    return %arg0, %arg1, %c0_i32, %c0_i32_0 : i32, i32, i32, i32
  }
}

</mosaic_0001>

<bundles_post_ra>
// kernel: model_forward.1
= control target key start
LH: loop header
LB: loop body
LE: loop exit
PB: predicated region body
PF: predicated region fallthrough
CT: control target
= control target key end

     0   :  { %s14695_s13 = smov 0   ;;  %s14697_s14 = smov 0   ;;  %s21229_s0 = inlined_call_operand.vmem [shape: bf16[2,576,16], index: 0, kind: input, shape index: {}]   ;;  %s21230_s1 = inlined_call_operand.vmem [shape: f32[576,1], index: 1, kind: input, shape index: {}]   ;;  %s21231_s2 = inlined_call_operand.vmem [shape: bf16[3,16,32], index: 2, kind: input, shape index: {}]   ;;  %s21232_s3 = inlined_call_operand.vmem [shape: f32[1,32], index: 3, kind: input, shape index: {}]   ;;  %s21233_s4 = inlined_call_operand.vmem [shape: bf16[3,96,32], index: 4, kind: input, shape index: {}]   ;;  %s21234_s5 = inlined_call_operand.vmem [shape: f32[1,32], index: 5, kind: input, shape index: {}]   ;;  %s21235_s6 = inlined_call_operand.vmem [shape: bf16[3,96,32], index: 6, kind: input, shape index: {}]   ;;  %s21236_s7 = inlined_call_operand.vmem [shape: f32[1,32], index: 7, kind: input, shape index: {}]   ;;  %s21237_s8 = inlined_call_operand.vmem [shape: bf16[3,96,12], index: 8, kind: input, shape index: {}]   ;;  %s21238_s9 = inlined_call_operand.vmem [shape: f32[1,12], index: 9, kind: input, shape index: {}]   ;;  %s21239_s10 = inlined_call_operand.vmem [shape: bf16[2,1,384,12], index: 10, kind: output, shape index: {}]  }
   0x1   :  { %s14699_s15 = smov 0  }
   0x2 LB: > { %s32_s16 = sadd.s32 1, %s14629_s14  ;;  %p10750_p0 = scmp.ge.s32.totalorder %s14633_s15, 1  ;;  %s14633_s15 = sphi %s14699_s15, %s20_s15   ;;  %s14629_s14 = sphi %s14697_s14, %s21988_s14   ;;  %s14625_s13 = sphi %s14695_s13, %s21987_s13  }
   0x3   : > { %p34_p1 = scmp.ge.s32.totalorder %s32_s16, 2  ;;  %p326_p2 = scmp.lt.s32.totalorder %s14633_s15, 3 }
   0x5   : > { %s21990_s16 = smov (%p34_p1, %s32_s16), 0  ;;  %p327_p3 = pnand %p10750_p0, %p326_p2 }
   0x7   : > { %330 = sbr.rel (%p327_p3) target bundleno = 2835 (0xb13), region = 60 }
   0xe   : > { %v14449_v0 = vld [vmem:[%s21231_s2 + $0x8] sm:$0xff]   ;;  %v21242_v1 = vmov 0.0   ;;  %p368_p4 = scmp.lt.s32.totalorder %s14625_s13, 1  ;;  %v14451_v2 = vld [vmem:[%s21231_s2] sm:$0xff]   ;;  %vm21345_vm0 = vmmov 0   ;;  %vm701_vm1 = vcmask 130048  }
   0xf   : > { %12140 = vmatprep.subr.bf16.mxu0 %v21242_v1  ;;  %13298 = vmatprep.subr.bf16.mxu1 %v21242_v1  ;;  %v11093_v47 = vld [vmem:[%s21230_s1 + $0x28] sm:$0xff]  ;;  %v21240_v48 = vmov 0   ;;  %v11094_v51 = vld [vmem:[%s21230_s1 + $0x30] sm:$0xff]  ;;  %v11099_v57 = vld [vmem:[%s21230_s1 + $0x58] sm:$0xff]  ;;  %s14638_s28 = smov 32   ;;  %s14639_s19 = smov 64  }
  0x10   : > { %12141 = vmatpush3.bf16.msra.mxu0 %v14449_v0  ;;  %12142 = vmatprep.mubr.msk.bf16.mxu0 %vm21345_vm0, %v21242_v1  ;;  %s21992_s13 = smov (!%p368_p4, %s14625_s13), 1  ;;  %vm2514_vm2 = vcmp.gt.f32.partialorder %v11093_v47, 0.0  ;;  %vm2515_vm3 = vcmp.gt.f32.partialorder %v11094_v51, 0.0  ;;  %v11097_v54 = vld [vmem:[%s21230_s1 + $0x48] sm:$0xff]  ;;  %vm2520_vm5 = vcmp.gt.f32.partialorder %v11099_v57, 0.0  ;;  %v11103_v62 = vld [vmem:[%s21230_s1 + $0x78] sm:$0xff] }
  0x11   : > { %12274 = vmatprep.subr.bf16.mxu0 %v21242_v1  ;;  %13299 = vmatpush3.bf16.msra.mxu1 %v14451_v2  ;;  %s13516_s21 = smul.u32 288, %s21992_s13  ;;  %v2580_v49 = vsel %vm2514_vm2, 1, %v21240_v48  ;;  %v2581_v52 = vsel %vm2515_vm3, 1, %v21240_v48  ;;  %vm2518_vm4 = vcmp.gt.f32.partialorder %v11097_v54, 0.0  ;;  %v2586_v58 = vsel %vm2520_vm5, 1, %v21240_v48  ;;  %v11101_v60 = vld [vmem:[%s21230_s1 + $0x68] sm:$0xff] }
  0x12   : > { %12316 = vmatprep.mubr.msk.bf16.mxu1 %vm21345_vm0, %v21242_v1  ;;  %13547 = vset.pattern.permute.xlu0 %v21240_v48  ;;  %v2584_v55 = vsel %vm2518_vm4, 1, %v21240_v48  ;;  %vm2522_vm6 = vcmp.gt.f32.partialorder %v11101_v60, 0.0  ;;  %vm2524_vm7 = vcmp.gt.f32.partialorder %v11103_v62, 0.0  ;;  %v11096_v62 = vld [vmem:[%s21230_s1 + $0x40] sm:$0xff]  ;;  %s13517_s26 = smul.u32 192, %s21992_s13 }
  0x13   : > { %s14732_s24 = scalar_lea.vmem %s21229_s0, %s13516_s21  ;;  %13548 = vset.pattern.permute.xlu1 %v21240_v48  ;;  %2651 = vperm.xlu0 %13547, %v2580_v49   ;;  %v2588_v61 = vsel %vm2522_vm6, 1, %v21240_v48  ;;  %v2590_v63 = vsel %vm2524_vm7, 1, %v21240_v48  ;;  %vm2517_vm7 = vcmp.gt.f32.partialorder %v11096_v62, 0.0 }
  0x14   : > { %v14450_v3 = vld [vmem:[%s14732_s24 + $0xc] sm:$0xff]   ;;  %v14452_v4 = vld [vmem:[%s14732_s24 + $0x14] sm:$0xff]   ;;  %v14453_v6 = vld [vmem:[%s14732_s24 + $0x1c] sm:$0xff]   ;;  %s21075_s12 = scalar_lea.vmem %s21239_s10, %s13517_s26 }
  0x15   : > { %12143 = vmatmul.mubr.msk.bf16.vlgmr.msra.gmra.mrb[0].mxu0 %vm701_vm1, %v14450_v3  ;;  %v14462_v5 = vld [vmem:[%s14732_s24 + $0x50] sm:$0xff]   ;;  %v14464_v7 = vld [vmem:[%s14732_s24 + $0x58] sm:$0xff]   ;;  %v14454_v8 = vld [vmem:[%s14732_s24 + $0x24] sm:$0xff]  }
  0x16   : > { %12275 = vmatpush3.bf16.msra.mxu0 %v14451_v2  ;;  %12146 = vmatprep.mubr.msk.bf16.mxu0 %vm21345_vm0, %v21242_v1  ;;  %v14466_v9 = vld [vmem:[%s14732_s24 + $0x60] sm:$0xff]   ;;  %v14455_v10 = vld [vmem:[%s14732_s24 + $0x2c] sm:$0xff]   ;;  %v14456_v12 = vld [vmem:[%s14732_s24 + $0x34] sm:$0xff]  }
  0x17   : > { %12408 = vmatprep.subr.bf16.mxu0 %v21242_v1  ;;  %12317 = vmatmul.mubr.msk.bf16.vlgmr.msra.gmra.mrb[0].mxu1 %vm701_vm1, %v14462_v5  ;;  %v14468_v11 = vld [vmem:[%s14732_s24 + $0x68] sm:$0xff]   ;;  %v14470_v13 = vld [vmem:[%s14732_s24 + $0x70] sm:$0xff]   ;;  %v14457_v14 = vld [vmem:[%s14732_s24 + $0x3c] sm:$0xff]  }
  0x18   : > { %12320 = vmatprep.mubr.msk.bf16.mxu1 %vm21345_vm0, %v21242_v1  ;;  %v14472_v15 = vld [vmem:[%s14732_s24 + $0x78] sm:$0xff]   ;;  %v14458_v16 = vld [vmem:[%s14732_s24 + $0x44] sm:$0xff]   ;;  %v14459_v18 = vld [vmem:[%s14732_s24 + $0x4c] sm:$0xff]   ;;  %2654 = vperm.xlu0 %13547, %v2581_v52  }
  0x19   : > { %v14474_v17 = vld [vmem:[%s14732_s24 + $0x80] sm:$0xff]   ;;  %v14476_v19 = vld [vmem:[%s14732_s24 + $0x88] sm:$0xff]   ;;  %v14460_v20 = vld [vmem:[%s14732_s24 + $0x54] sm:$0xff]  }
  0x1a   : > { %v14478_v21 = vld [vmem:[%s14732_s24 + $0x90] sm:$0xff]   ;;  %v14461_v22 = vld [vmem:[%s14732_s24 + $0x5c] sm:$0xff]   ;;  %v14463_v24 = vld [vmem:[%s14732_s24 + $0x64] sm:$0xff]  }
  0x1b   : > { %v14480_v23 = vld [vmem:[%s14732_s24 + $0x98] sm:$0xff]   ;;  %v14482_v25 = vld [vmem:[%s14732_s24 + $0xa0] sm:$0xff]   ;;  %v14465_v26 = vld [vmem:[%s14732_s24 + $0x6c] sm:$0xff]  }
  0x1c   : > { %v14484_v27 = vld [vmem:[%s14732_s24 + $0xa8] sm:$0xff]   ;;  %v14467_v28 = vld [vmem:[%s14732_s24 + $0x74] sm:$0xff]   ;;  %v14469_v30 = vld [vmem:[%s14732_s24 + $0x7c] sm:$0xff]   ;;  %2663 = vperm.xlu0 %13547, %v2584_v55  }
  0x1d   : > { %12147 = vmatmul.mubr.msk.bf16.gmra.mrb[4].mxu0 %vm701_vm1, %v14452_v4  ;;  %v14486_v29 = vld [vmem:[%s14732_s24 + $0xb0] sm:$0xff]   ;;  %v14488_v31 = vld [vmem:[%s14732_s24 + $0xb8] sm:$0xff]   ;;  %v14471_v32 = vld [vmem:[%s14732_s24 + $0x84] sm:$0xff]  }
  0x1e   : > { %12150 = vmatprep.mubr.msk.bf16.mxu0 %vm21345_vm0, %v21242_v1  ;;  %v14490_v33 = vld [vmem:[%s14732_s24 + $0xc0] sm:$0xff]   ;;  %v14473_v34 = vld [vmem:[%s14732_s24 + $0x8c] sm:$0xff]   ;;  %v14475_v36 = vld [vmem:[%s14732_s24 + $0x94] sm:$0xff]  }
  0x1f   : > { %12321 = vmatmul.mubr.msk.bf16.gmra.mrb[4].mxu1 %vm701_vm1, %v14464_v7  ;;  %v14492_v35 = vld [vmem:[%s14732_s24 + $0xc8] sm:$0xff]   ;;  %v14494_v37 = vld [vmem:[%s14732_s24 + $0xd0] sm:$0xff]   ;;  %v14477_v38 = vld [vmem:[%s14732_s24 + $0x9c] sm:$0xff]  }
  0x20   : > { %12324 = vmatprep.mubr.msk.bf16.mxu1 %vm21345_vm0, %v21242_v1  ;;  %v14496_v39 = vld [vmem:[%s14732_s24 + $0xd8] sm:$0xff]   ;;  %v14479_v40 = vld [vmem:[%s14732_s24 + $0xa4] sm:$0xff]   ;;  %v14481_v42 = vld [vmem:[%s14732_s24 + $0xac] sm:$0xff]   ;;  %2669 = vperm.xlu0 %13547, %v2586_v58  }
  0x21   : > { %v14498_v41 = vld [vmem:[%s14732_s24 + $0xe0] sm:$0xff]   ;;  %v14500_v43 = vld [vmem:[%s14732_s24 + $0xe8] sm:$0xff]   ;;  %v14483_v44 = vld [vmem:[%s14732_s24 + $0xb4] sm:$0xff]  }
  0x22   : > { %v14502_v45 = vld [vmem:[%s14732_s24 + $0xf0] sm:$0xff]   ;;  %v14485_v46 = vld [vmem:[%s14732_s24 + $0xbc] sm:$0xff]   ;;  %v14487_v53 = vld [vmem:[%s14732_s24 + $0xc4] sm:$0xff]  }
  0x23   : > { %v14504_v50 = vld [vmem:[%s14732_s24 + $0xf8] sm:$0xff]   ;;  %v14506_v56 = vld [vmem:[%s14732_s24 + $0x100] sm:$0xff]   ;;  %v14489_v59 = vld [vmem:[%s14732_s24 + $0xcc] sm:$0xff]  }
  0x24   : > { %2675 = vperm.xlu0 %13547, %v2588_v61   ;;  %v14491_v0 = vld [vmem:[%s14732_s24 + $0xd4] sm:$0xff]   ;;  %v11105_v2 = vld [vmem:[%s21230_s1 + $0x88] sm:$0xff]  ;;  %v14501_v49 = vld [vmem:[%s14732_s24 + $0xfc] sm:$0xff]  }
  0x25   : > { %12151 = vmatmul.mubr.msk.bf16.gmra.mrb[8].mxu0 %vm701_vm1, %v14453_v6  ;;  %vm2526_vm8 = vcmp.gt.f32.partialorder %v11105_v2, 0.0  ;;  %v11107_v4 = vld [vmem:[%s21230_s1 + $0x98] sm:$0xff]  ;;  %v11109_v7 = vld [vmem:[%s21230_s1 + $0xa8] sm:$0xff] }
  0x26   : > { %12154 = vmatprep.mubr.msk.bf16.mxu0 %vm21345_vm0, %v21242_v1  ;;  %v2592_v3 = vsel %vm2526_vm8, 1, %v21240_v48  ;;  %vm2528_vm9 = vcmp.gt.f32.partialorder %v11107_v4, 0.0  ;;  %v14493_v6 = vld [vmem:[%s14732_s24 + $0xdc] sm:$0xff]   ;;  %vm2530_vm10 = vcmp.gt.f32.partialorder %v11109_v7, 0.0  ;;  %v14503_v2 = vld [vmem:[%s14732_s24 + $0x104] sm:$0xff]  }
  0x27   : > { %12325 = vmatmul.mubr.msk.bf16.gmra.mrb[8].mxu1 %vm701_vm1, %v14466_v9  ;;  %v2594_v5 = vsel %vm2528_vm9, 1, %v21240_v48  ;;  %v11111_v9 = vld [vmem:[%s21230_s1 + $0xb8] sm:$0xff]  ;;  %v11128_v4 = vld [vmem:[%s21230_s1 + $0x140] sm:$0xff] }
  0x28   : > { %12328 = vmatprep.mubr.msk.bf16.mxu1 %vm21345_vm0, %v21242_v1  ;;  %2681 = vperm.xlu0 %13547, %v2590_v63   ;;  %vm2532_vm11 = vcmp.gt.f32.partialorder %v11111_v9, 0.0  ;;  %v11095_v55 = vld [vmem:[%s21230_s1 + $0x38] sm:$0xff]  ;;  %vm2549_vm8 = vcmp.gt.f32.partialorder %v11128_v4, 0.0  ;;  %v11098_v9 = vld [vmem:[%s21230_s1 + $0x50] sm:$0xff]  ;;  %v11108_v4 = vld [vmem:[%s21230_s1 + $0xa0] sm:$0xff] }
  0x29   : > { %vm2516_vm5 = vcmp.gt.f32.partialorder %v11095_v55, 0.0  ;;  %vm2519_vm9 = vcmp.gt.f32.partialorder %v11098_v9, 0.0  ;;  %v14509_v9 = vld [vmem:[%s14732_s24 + $0x8] sm:$0xff]  }
  0x2a   : > { %v2582_v58 = vsel %vm2516_vm5, 1, %v21240_v48  ;;  %vm2529_vm5 = vcmp.gt.f32.partialorder %v11108_v4, 0.0 }
  0x2b   : > { %2657 = vperm.xlu1 %13548, %v2582_v58  }
  0x2c   : > { %2687 = vperm.xlu0 %13547, %v2592_v3   ;;  %v2583_v3 = vsel %vm2517_vm7, 1, %v21240_v48 }
  0x2d   : > { %12155 = vmatmul.mubr.msk.bf16.gmra.mrb[12].mxu0 %vm701_vm1, %v14454_v8  ;;  %v2596_v8 = vsel %vm2530_vm10, 1, %v21240_v48 }
  0x2e   : > { %12158 = vmatprep.mubr.msk.bf16.mxu0 %vm21345_vm0, %v21242_v1 }
  0x2f   : > { %12329 = vmatmul.mubr.msk.bf16.gmra.mrb[12].mxu1 %vm701_vm1, %v14468_v11  ;;  %2660 = vperm.xlu1 %13548, %v2583_v3  }
  0x30   : > { %12332 = vmatprep.mubr.msk.bf16.mxu1 %vm21345_vm0, %v21242_v1  ;;  %2693 = vperm.xlu0 %13547, %v2594_v5  }
  0x34   : > { %2699 = vperm.xlu0 %13547, %v2596_v8   ;;  %v2615_v8 = vsel %vm2549_vm8, 1, %v21240_v48 }
  0x35   : > { %12159 = vmatmul.mubr.msk.bf16.gmra.mrb[16].mxu0 %vm701_vm1, %v14455_v10  ;;  %v2598_v10 = vsel %vm2532_vm11, 1, %v21240_v48 }
  0x36   : > { %12162 = vmatprep.mubr.msk.bf16.mxu0 %vm21345_vm0, %v21242_v1 }
  0x37   : > { %12333 = vmatmul.mubr.msk.bf16.gmra.mrb[16].mxu1 %vm701_vm1, %v14470_v13  ;;  %v14495_v13 = vld [vmem:[%s14732_s24 + $0xe4] sm:$0xff]  }
  0x38   : > { %12336 = vmatprep.mubr.msk.bf16.mxu1 %vm21345_vm0, %v21242_v1  ;;  %2705 = vperm.xlu0 %13547, %v2598_v10  }
  0x3d   : > { %12163 = vmatmul.mubr.msk.bf16.gmra.mrb[20].mxu0 %vm701_vm1, %v14456_v12 }
  0x3e   : > { %12166 = vmatprep.mubr.msk.bf16.mxu0 %vm21345_vm0, %v21242_v1 }
  0x3f   : > { %12337 = vmatmul.mubr.msk.bf16.gmra.mrb[20].mxu1 %vm701_vm1, %v14472_v15 }
  0x40   : > { %12340 = vmatprep.mubr.msk.bf16.mxu1 %vm21345_vm0, %v21242_v1 }
  0x45   : > { %12167 = vmatmul.mubr.msk.bf16.gmra.mrb[24].mxu0 %vm701_vm1, %v14457_v14  ;;  %v11113_v14 = vld [vmem:[%s21230_s1 + $0xc8] sm:$0xff] }
  0x46   : > { %12170 = vmatprep.mubr.msk.bf16.mxu0 %vm21345_vm0, %v21242_v1  ;;  %vm2534_vm12 = vcmp.gt.f32.partialorder %v11113_v14, 0.0  ;;  %v11130_v14 = vld [vmem:[%s21230_s1 + $0x150] sm:$0xff] }
  0x47   : > { %12341 = vmatmul.mubr.msk.bf16.gmra.mrb[24].mxu1 %vm701_vm1, %v14474_v17  ;;  %v2600_v17 = vsel %vm2534_vm12, 1, %v21240_v48  ;;  %vm2551_vm10 = vcmp.gt.f32.partialorder %v11130_v14, 0.0 }
  0x48   : > { %12344 = vmatprep.mubr.msk.bf16.mxu1 %vm21345_vm0, %v21242_v1  ;;  %2711 = vperm.xlu0 %13547, %v2600_v17   ;;  %v2617_v17 = vsel %vm2551_vm10, 1, %v21240_v48 }
  0x4d   : > { %12171 = vmatmul.mubr.msk.bf16.gmra.mrb[28].mxu0 %vm701_vm1, %v14458_v16 }
  0x4e   : > { %12174 = vmatprep.mubr.msk.bf16.mxu0 %vm21345_vm0, %v21242_v1 }
  0x4f   : > { %12345 = vmatmul.mubr.msk.bf16.gmra.mrb[28].mxu1 %vm701_vm1, %v14476_v19 }
  0x50   : > { %12348 = vmatprep.mubr.msk.bf16.mxu1 %vm21345_vm0, %v21242_v1 }
  0x55   : > { %12175 = vmatmul.mubr.msk.bf16.gmra.mrb[32].mxu0 %vm701_vm1, %v14459_v18  ;;  %v11115_v18 = vld [vmem:[%s21230_s1 + $0xd8] sm:$0xff] }
  0x56   : > { %12178 = vmatprep.mubr.msk.bf16.mxu0 %vm21345_vm0, %v21242_v1  ;;  %vm2536_vm13 = vcmp.gt.f32.partialorder %v11115_v18, 0.0  ;;  %v11100_v18 = vld [vmem:[%s21230_s1 + $0x60] sm:$0xff] }
  0x57   : > { %12349 = vmatmul.mubr.msk.bf16.gmra.mrb[32].mxu1 %vm701_vm1, %v14478_v21  ;;  %v2602_v19 = vsel %vm2536_vm13, 1, %v21240_v48  ;;  %vm2521_vm11 = vcmp.gt.f32.partialorder %v11100_v18, 0.0 }
  0x58   : > { %12352 = vmatprep.mubr.msk.bf16.mxu1 %vm21345_vm0, %v21242_v1  ;;  %2717 = vperm.xlu0 %13547, %v2602_v19  }
  0x5d   : > { %12179 = vmatmul.mubr.msk.bf16.gmra.mrb[36].mxu0 %vm701_vm1, %v14460_v20 }
  0x5e   : > { %12182 = vmatprep.mubr.msk.bf16.mxu0 %vm21345_vm0, %v21242_v1 }
  0x5f   : > { %12353 = vmatmul.mubr.msk.bf16.gmra.mrb[36].mxu1 %vm701_vm1, %v14480_v23  ;;  %v11117_v23 = vld [vmem:[%s21230_s1 + $0xe8] sm:$0xff] }
  0x60   : > { %12356 = vmatprep.mubr.msk.bf16.mxu1 %vm21345_vm0, %v21242_v1  ;;  %vm2538_vm14 = vcmp.gt.f32.partialorder %v11117_v23, 0.0  ;;  %v2587_v23 = vsel %vm2521_vm11, 1, %v21240_v48 }
  0x65   : > { %12183 = vmatmul.mubr.msk.bf16.gmra.mrb[40].mxu0 %vm701_vm1, %v14461_v22  ;;  %v14497_v22 = vld [vmem:[%s14732_s24 + $0xec] sm:$0xff]  }
  0x66   : > { %12186 = vmatprep.mubr.msk.bf16.mxu0 %vm21345_vm0, %v21242_v1 }
  0x67   : > { %12357 = vmatmul.mubr.msk.bf16.gmra.mrb[40].mxu1 %vm701_vm1, %v14482_v25 }
  0x68   : > { %12360 = vmatprep.mubr.msk.bf16.mxu1 %vm21345_vm0, %v21242_v1 }
  0x6d   : > { %12187 = vmatmul.mubr.msk.bf16.gmra.mrb[44].mxu0 %vm701_vm1, %v14463_v24 }
  0x6e   : > { %12190 = vmatprep.mubr.msk.bf16.mxu0 %vm21345_vm0, %v21242_v1 }
  0x6f   : > { %12361 = vmatmul.mubr.msk.bf16.gmra.mrb[44].mxu1 %vm701_vm1, %v14484_v27  ;;  %v2604_v27 = vsel %vm2538_vm14, 1, %v21240_v48 }
  0x70   : > { %12364 = vmatprep.mubr.msk.bf16.mxu1 %vm21345_vm0, %v21242_v1  ;;  %2723 = vperm.xlu0 %13547, %v2604_v27  }
  0x75   : > { %12191 = vmatmul.mubr.msk.bf16.gmra.mrb[48].mxu0 %vm701_vm1, %v14465_v26 }
  0x76   : > { %12194 = vmatprep.mubr.msk.bf16.mxu0 %vm21345_vm0, %v21242_v1 }
  0x77   : > { %12365 = vmatmul.mubr.msk.bf16.gmra.mrb[48].mxu1 %vm701_vm1, %v14486_v29 }
  0x78   : > { %12368 = vmatprep.mubr.msk.bf16.mxu1 %vm21345_vm0, %v21242_v1 }
  0x7d   : > { %12195 = vmatmul.mubr.msk.bf16.gmra.mrb[52].mxu0 %vm701_vm1, %v14467_v28 }
  0x7e   : > { %12198 = vmatprep.mubr.msk.bf16.mxu0 %vm21345_vm0, %v21242_v1 }
  0x7f   : > { %12369 = vmatmul.mubr.msk.bf16.gmra.mrb[52].mxu1 %vm701_vm1, %v14488_v31 }
  0x80   : > { %12372 = vmatprep.mubr.msk.bf16.mxu1 %vm21345_vm0, %v21242_v1 }
  0x85   : > { %12199 = vmatmul.mubr.msk.bf16.gmra.mrb[56].mxu0 %vm701_vm1, %v14469_v30  ;;  %v11119_v30 = vld [vmem:[%s21230_s1 + $0xf8] sm:$0xff] }
  0x86   : > { %12202 = vmatprep.mubr.msk.bf16.mxu0 %vm21345_vm0, %v21242_v1  ;;  %vm2540_vm15 = vcmp.gt.f32.partialorder %v11119_v30, 0.0 }
  0x87   : > { %12373 = vmatmul.mubr.msk.bf16.gmra.mrb[56].mxu1 %vm701_vm1, %v14490_v33 }
  0x88   : > { %12376 = vmatprep.mubr.msk.bf16.mxu1 %vm21345_vm0, %v21242_v1 }
  0x8d   : > { %12203 = vmatmul.mubr.msk.bf16.gmra.mrb[60].mxu0 %vm701_vm1, %v14471_v32  ;;  %v2606_v32 = vsel %vm2540_vm15, 1, %v21240_v48 }
  0x8e   : > { %12206 = vmatprep.mubr.msk.bf16.mxu0 %vm21345_vm0, %v21242_v1  ;;  %2729 = vperm.xlu0 %13547, %v2606_v32   ;;  %v11102_v32 = vld [vmem:[%s21230_s1 + $0x70] sm:$0xff] }
  0x8f   : > { %12377 = vmatmul.mubr.msk.bf16.gmra.mrb[60].mxu1 %vm701_vm1, %v14492_v35  ;;  %v14499_v35 = vld [vmem:[%s14732_s24 + $0xf4] sm:$0xff]   ;;  %vm2523_vm13 = vcmp.gt.f32.partialorder %v11102_v32, 0.0 }
  0x90   : > { %12380 = vmatprep.mubr.msk.bf16.mxu1 %vm21345_vm0, %v21242_v1 }
  0x95   : > { %12207 = vmatmul.mubr.msk.bf16.gmra.mrb[64].mxu0 %vm701_vm1, %v14473_v34 }
  0x96   : > { %12210 = vmatprep.mubr.msk.bf16.mxu0 %vm21345_vm0, %v21242_v1 }
  0x97   : > { %12381 = vmatmul.mubr.msk.bf16.gmra.mrb[64].mxu1 %vm701_vm1, %v14494_v37 }
  0x98   : > { %12384 = vmatprep.mubr.msk.bf16.mxu1 %vm21345_vm0, %v21242_v1 }
  0x9d   : > { %12211 = vmatmul.mubr.msk.bf16.gmra.mrb[68].mxu0 %vm701_vm1, %v14475_v36  ;;  %v11121_v36 = vld [vmem:[%s21230_s1 + $0x108] sm:$0xff] }
  0x9e   : > { %12214 = vmatprep.mubr.msk.bf16.mxu0 %vm21345_vm0, %v21242_v1  ;;  %vm2542_vm2 = vcmp.gt.f32.partialorder %v11121_v36, 0.0  ;;  %v2589_v36 = vsel %vm2523_vm13, 1, %v21240_v48 }
  0x9f   : > { %12385 = vmatmul.mubr.msk.bf16.gmra.mrb[68].mxu1 %vm701_vm1, %v14496_v39 }
  0xa0   : > { %12388 = vmatprep.mubr.msk.bf16.mxu1 %vm21345_vm0, %v21242_v1 }
  0xa5   : > { %12215 = vmatmul.mubr.msk.bf16.gmra.mrb[72].mxu0 %vm701_vm1, %v14477_v38 }
  0xa6   : > { %12218 = vmatprep.mubr.msk.bf16.mxu0 %vm21345_vm0, %v21242_v1 }
  0xa7   : > { %12389 = vmatmul.mubr.msk.bf16.gmra.mrb[72].mxu1 %vm701_vm1, %v14498_v41 }
  0xa8   : > { %12392 = vmatprep.mubr.msk.bf16.mxu1 %vm21345_vm0, %v21242_v1 }
  0xad   : > { %12219 = vmatmul.mubr.msk.bf16.gmra.mrb[76].mxu0 %vm701_vm1, %v14479_v40  ;;  %v2608_v40 = vsel %vm2542_vm2, 1, %v21240_v48 }
  0xae   : > { %12222 = vmatprep.mubr.msk.bf16.mxu0 %vm21345_vm0, %v21242_v1  ;;  %2735 = vperm.xlu0 %13547, %v2608_v40  }
  0xaf   : > { %12393 = vmatmul.mubr.msk.bf16.gmra.mrb[76].mxu1 %vm701_vm1, %v14500_v43  ;;  %v11123_v43 = vld [vmem:[%s21230_s1 + $0x118] sm:$0xff] }
  0xb0   : > { %12396 = vmatprep.mubr.msk.bf16.mxu1 %vm21345_vm0, %v21242_v1  ;;  %vm2544_vm3 = vcmp.gt.f32.partialorder %v11123_v43, 0.0  ;;  %v11104_v43 = vld [vmem:[%s21230_s1 + $0x80] sm:$0xff] }
  0xb1   : > { %vm2525_vm15 = vcmp.gt.f32.partialorder %v11104_v43, 0.0  ;;  %v11144_v43 = vld [vmem:[%s21230_s1 + $0x1c0] sm:$0xff] }
  0xb2   : > { %vm2565_vm10 = vcmp.gt.f32.partialorder %v11144_v43, 0.0 }
  0xb5   : > { %12223 = vmatmul.mubr.msk.bf16.gmra.mrb[80].mxu0 %vm701_vm1, %v14481_v42 }
  0xb6   : > { %12226 = vmatprep.mubr.msk.bf16.mxu0 %vm21345_vm0, %v21242_v1 }
  0xb7   : > { %12397 = vmatmul.mubr.msk.bf16.gmra.mrb[80].mxu1 %vm701_vm1, %v14502_v45  ;;  %v2610_v45 = vsel %vm2544_vm3, 1, %v21240_v48 }
  0xb8   : > { %12400 = vmatprep.mubr.msk.bf16.mxu1 %vm21345_vm0, %v21242_v1  ;;  %2741 = vperm.xlu0 %13547, %v2610_v45  }
  0xbd   : > { %12227 = vmatmul.mubr.msk.bf16.gmra.mrb[84].mxu0 %vm701_vm1, %v14483_v44 }
  0xbe   : > { %12230 = vmatprep.mubr.msk.bf16.mxu0 %vm21345_vm0, %v21242_v1 }
  0xbf   : > { %12401 = vmatmul.mubr.msk.bf16.gmra.mrb[84].mxu1 %vm701_vm1, %v14504_v50  ;;  %v11125_v50 = vld [vmem:[%s21230_s1 + $0x128] sm:$0xff] }
  0xc0   : > { %12404 = vmatprep.mubr.msk.bf16.mxu1 %vm21345_vm0, %v21242_v1  ;;  %vm2546_vm4 = vcmp.gt.f32.partialorder %v11125_v50, 0.0  ;;  %v11136_v50 = vld [vmem:[%s21230_s1 + $0x180] sm:$0xff] }
  0xc1   : > { %v2612_v54 = vsel %vm2546_vm4, 1, %v21240_v48  ;;  %vm2557_vm2 = vcmp.gt.f32.partialorder %v11136_v50, 0.0  ;;  %v2631_v50 = vsel %vm2565_vm10, 1, %v21240_v48 }
  0xc2   : > { %2747 = vperm.xlu0 %13547, %v2612_v54   ;;  %v14508_v54 = vld [vmem:[%s21231_s2 + $0x10] sm:$0xff]   ;;  %v2623_v58 = vsel %vm2557_vm2, 1, %v21240_v48 }
  0xc5   : > { %12231 = vmatmul.mubr.msk.bf16.gmra.mrb[88].mxu0 %vm701_vm1, %v14485_v46 }
  0xc6   : > { %12234 = vmatprep.mubr.msk.bf16.mxu0 %vm21345_vm0, %v21242_v1 }
  0xc7   : > { %12405 = vmatmul.mubr.msk.bf16.gmra.mrb[88].mxu1 %vm701_vm1, %v14506_v56 }
  0xcd   : > { %12235 = vmatmul.mubr.msk.bf16.gmra.mrb[92].mxu0 %vm701_vm1, %v14487_v53 }
  0xce   : > { %12238 = vmatprep.mubr.msk.bf16.mxu0 %vm21345_vm0, %v21242_v1 }
  0xd5   : > { %12239 = vmatmul.mubr.msk.bf16.gmra.mrb[96].mxu0 %vm701_vm1, %v14489_v59  ;;  %v11126_v59 = vld [vmem:[%s21230_s1 + $0x130] sm:$0xff] }
  0xd6   : > { %12242 = vmatprep.mubr.msk.bf16.mxu0 %vm21345_vm0, %v21242_v1  ;;  %vm2547_vm6 = vcmp.gt.f32.partialorder %v11126_v59, 0.0  ;;  %v11106_v59 = vld [vmem:[%s21230_s1 + $0x90] sm:$0xff] }
  0xd7   : > { %v2613_v61 = vsel %vm2547_vm6, 1, %v21240_v48  ;;  %vm2527_vm3 = vcmp.gt.f32.partialorder %v11106_v59, 0.0 }
  0xd8   : > { %2750 = vperm.xlu0 %13547, %v2613_v61   ;;  %v2593_v62 = vsel %vm2527_vm3, 1, %v21240_v48 }
  0xdc   : > { %2756 = vperm.xlu0 %13547, %v2615_v8  }
  0xdd   : > { %12243 = vmatmul.mubr.msk.bf16.gmra.mrb[100].mxu0 %vm701_vm1, %v14491_v0 }
  0xde   : > { %12246 = vmatprep.mubr.msk.bf16.mxu0 %vm21345_vm0, %v21242_v1 }
  0xe0   : > { %2762 = vperm.xlu0 %13547, %v2617_v17  }
  0xe5   : > { %12247 = vmatmul.mubr.msk.bf16.gmra.mrb[104].mxu0 %vm701_vm1, %v14493_v6 }
  0xe6   : > { %12250 = vmatprep.mubr.msk.bf16.mxu0 %vm21345_vm0, %v21242_v1 }
  0xe8   : > { %v14975_v11 = vpop.f32.mrb[0].mxu0 }
  0xe9   : > { %v12144_v12 = vpop.f32.mrb[1].mxu0 }
  0xea   : > { %v14981_v15 = vpop.f32.mrb[2].mxu0  ;;  %v14999_v26 = vpop.f32.mrb[0].mxu1 }
  0xeb   : > { %v12145_v16 = vpop.f32.mrb[3].mxu0  ;;  %v12318_v28 = vpop.f32.mrb[1].mxu1 }
  0xec   : > { %v15003_v29 = vpop.f32.mrb[2].mxu1 }
  0xed   : > { %12251 = vmatmul.mubr.msk.bf16.gmra.mrb[108].mxu0 %vm701_vm1, %v14495_v13  ;;  %v12319_v31 = vpop.f32.mrb[3].mxu1  ;;  %v2585_v13 = vsel %vm2519_vm9, 1, %v21240_v48 }
  0xee   : > { %12254 = vmatprep.mubr.msk.bf16.mxu0 %vm21345_vm0, %v21242_v1  ;;  %2666 = vperm.xlu1 %13548, %v2585_v13   ;;  %v11140_v13 = vld [vmem:[%s21230_s1 + $0x1a0] sm:$0xff] }
  0xef   : > { %vm2561_vm6 = vcmp.gt.f32.partialorder %v11140_v13, 0.0 }
  0xf0   : > { %v14991_v20 = vpop.f32.mrb[4].mxu0  ;;  %v2627_v18 = vsel %vm2561_vm6, 1, %v21240_v48 }
  0xf1   : > { %v12148_v21 = vpop.f32.mrb[5].mxu0 }
  0xf2   : > { %v14997_v24 = vpop.f32.mrb[6].mxu0  ;;  %v15019_v39 = vpop.f32.mrb[4].mxu1  ;;  %2672 = vperm.xlu1 %13548, %v2587_v23  }
  0xf3   : > { %v12149_v25 = vpop.f32.mrb[7].mxu0  ;;  %v12322_v41 = vpop.f32.mrb[5].mxu1 }
  0xf4   : > { %v15023_v42 = vpop.f32.mrb[6].mxu1  ;;  %v11132_v25 = vld [vmem:[%s21230_s1 + $0x160] sm:$0xff] }
  0xf5   : > { %12255 = vmatmul.mubr.msk.bf16.gmra.mrb[112].mxu0 %vm701_vm1, %v14497_v22  ;;  %v12323_v44 = vpop.f32.mrb[7].mxu1  ;;  %v14505_v22 = vld [vmem:[%s14732_s24 + $0x10c] sm:$0xff]   ;;  %vm2553_vm12 = vcmp.gt.f32.partialorder %v11132_v25, 0.0 }
  0xf6   : > { %12258 = vmatprep.mubr.msk.bf16.mxu0 %vm21345_vm0, %v21242_v1  ;;  %v2619_v31 = vsel %vm2553_vm12, 1, %v21240_v48  ;;  %2678 = vperm.xlu1 %13548, %v2589_v36  }
  0xf7   : > { %2768 = vperm.xlu0 %13547, %v2619_v31  }
  0xf8   : > { %v15011_v33 = vpop.f32.mrb[8].mxu0 }
  0xf9   : > { %v12152_v34 = vpop.f32.mrb[9].mxu0 }
  0xfa   : > { %v15017_v37 = vpop.f32.mrb[10].mxu0  ;;  %v15039_v53 = vpop.f32.mrb[8].mxu1 }
  0xfb   : > { %v12153_v38 = vpop.f32.mrb[11].mxu0  ;;  %v12326_v56 = vpop.f32.mrb[9].mxu1 }
  0xfc   : > { %v15046_v57 = vpop.f32.mrb[10].mxu1  ;;  %v11134_v38 = vld [vmem:[%s21230_s1 + $0x170] sm:$0xff] }
  0xfd   : > { %12259 = vmatmul.mubr.msk.bf16.gmra.mrb[116].mxu0 %vm701_vm1, %v14499_v35  ;;  %v12327_v60 = vpop.f32.mrb[11].mxu1  ;;  %vm2555_vm14 = vcmp.gt.f32.partialorder %v11134_v38, 0.0 }
  0xfe   : > { %12262 = vmatprep.mubr.msk.bf16.mxu0 %vm21345_vm0, %v21242_v1  ;;  %v2621_v41 = vsel %vm2555_vm14, 1, %v21240_v48 }
  0xff   : > { %2774 = vperm.xlu0 %13547, %v2621_v41  }
 0x100   : > { %v15031_v46 = vpop.f32.mrb[12].mxu0 }
 0x101   : > { %v12156_v47 = vpop.f32.mrb[13].mxu0 }
 0x102   : > { %v15037_v51 = vpop.f32.mrb[14].mxu0  ;;  %v15067_v7 = vpop.f32.mrb[12].mxu1  ;;  %v14507_v47 = vld [vmem:[%s14732_s24] sm:$0xff]  }
 0x103   : > { %v12157_v52 = vpop.f32.mrb[15].mxu0  ;;  %v12330_v10 = vpop.f32.mrb[13].mxu1  ;;  %2780 = vperm.xlu0 %13547, %v2623_v58  }
 0x104   : > { %v15074_v12 = vpop.f32.mrb[14].mxu1  ;;  %v2595_v10 = vsel %vm2529_vm5, 1, %v21240_v48 }
 0x105   : > { %12263 = vmatmul.mubr.msk.bf16.gmra.mrb[120].mxu0 %vm701_vm1, %v14501_v49  ;;  %v12331_v16 = vpop.f32.mrb[15].mxu1  ;;  %v2591_v49 = vsel %vm2525_vm15, 1, %v21240_v48 }
 0x106   : > { %12266 = vmatprep.mubr.msk.bf16.mxu0 %vm21345_vm0, %v21242_v1  ;;  %2684 = vperm.xlu1 %13548, %v2591_v49  }
 0x108   : > { %v15058_v63 = vpop.f32.mrb[16].mxu0 }
 0x109   : > { %v12160_v0 = vpop.f32.mrb[17].mxu0 }
 0x10a   : > { %v15065_v5 = vpop.f32.mrb[18].mxu0  ;;  %v15095_v30 = vpop.f32.mrb[16].mxu1  ;;  %v11138_v0 = vld [vmem:[%s21230_s1 + $0x190] sm:$0xff]  ;;  %2690 = vperm.xlu1 %13548, %v2593_v62  }
 0x10b   : > { %v12161_v6 = vpop.f32.mrb[19].mxu0  ;;  %v12334_v34 = vpop.f32.mrb[17].mxu1  ;;  %vm2559_vm4 = vcmp.gt.f32.partialorder %v11138_v0, 0.0 }
 0x10c   : > { %v15102_v35 = vpop.f32.mrb[18].mxu1  ;;  %v2625_v3 = vsel %vm2559_vm4, 1, %v21240_v48  ;;  %v11112_v34 = vld [vmem:[%s21230_s1 + $0xc0] sm:$0xff] }
 0x10d   : > { %12267 = vmatmul.mubr.msk.bf16.gmra.mrb[124].mxu0 %vm701_vm1, %v14503_v2  ;;  %v12335_v40 = vpop.f32.mrb[19].mxu1  ;;  %2786 = vperm.xlu0 %13547, %v2625_v3   ;;  %vm2533_vm9 = vcmp.gt.f32.partialorder %v11112_v34, 0.0 }
 0x10e   : > { %12270 = vmatprep.mubr.msk.bf16.mxu0 %vm21345_vm0, %v21242_v1  ;;  %2696 = vperm.xlu1 %13548, %v2595_v10   ;;  %v14510_v40 = vld [vmem:[%s14732_s24 + $0x10] sm:$0xff]   ;;  %v2599_v41 = vsel %vm2533_vm9, 1, %v21240_v48  ;;  %v11148_v10 = vld [vmem:[%s21230_s1 + $0x1e0] sm:$0xff] }
 0x10f   : > { %vm2569_vm14 = vcmp.gt.f32.partialorder %v11148_v10, 0.0 }
 0x110   : > { %v15086_v19 = vpop.f32.mrb[20].mxu0 }
 0x111   : > { %v12164_v21 = vpop.f32.mrb[21].mxu0  ;;  %2792 = vperm.xlu0 %13547, %v2627_v18  }
 0x112   : > { %v15093_v27 = vpop.f32.mrb[22].mxu0  ;;  %v15126_v56 = vpop.f32.mrb[20].mxu1  ;;  %v11110_v21 = vld [vmem:[%s21230_s1 + $0xb0] sm:$0xff] }
 0x113   : > { %v12165_v28 = vpop.f32.mrb[23].mxu0  ;;  %v12338_v60 = vpop.f32.mrb[21].mxu1  ;;  %vm2531_vm7 = vcmp.gt.f32.partialorder %v11110_v21, 0.0  ;;  %v2635_v21 = vsel %vm2569_vm14, 1, %v21240_v48 }
 0x114   : > { %v15133_v61 = vpop.f32.mrb[22].mxu1  ;;  %v2597_v25 = vsel %vm2531_vm7, 1, %v21240_v48  ;;  %v11142_v28 = vld [vmem:[%s21230_s1 + $0x1b0] sm:$0xff] }
 0x115   : > { %12271 = vmatmul.mubr.msk.bf16.gmra.mrb[128].mxu0 %vm701_vm1, %v14505_v22  ;;  %v12339_v2 = vpop.f32.mrb[23].mxu1  ;;  %vm2563_vm8 = vcmp.gt.f32.partialorder %v11142_v28, 0.0  ;;  %2702 = vperm.xlu1 %13548, %v2597_v25   ;;  %v11146_v60 = vld [vmem:[%s21230_s1 + $0x1d0] sm:$0xff] }
 0x116   : > { %12276 = vmatprep.mubr.msk.bf16.mxu0 %vm21345_vm0, %v21242_v1  ;;  %v2629_v32 = vsel %vm2563_vm8, 1, %v21240_v48  ;;  %vm2567_vm12 = vcmp.gt.f32.partialorder %v11146_v60, 0.0  ;;  %v11116_v2 = vld [vmem:[%s21230_s1 + $0xe0] sm:$0xff] }
 0x117   : > { %2798 = vperm.xlu0 %13547, %v2629_v32   ;;  %v2633_v0 = vsel %vm2567_vm12, 1, %v21240_v48  ;;  %vm2537_vm13 = vcmp.gt.f32.partialorder %v11116_v2, 0.0  ;;  %v11150_v32 = vld [vmem:[%s21230_s1 + $0x1f0] sm:$0xff] }
 0x118   : > { %v15114_v44 = vpop.f32.mrb[24].mxu0  ;;  %vm2571_vm2 = vcmp.gt.f32.partialorder %v11150_v32, 0.0  ;;  %v11122_v2 = vld [vmem:[%s21230_s1 + $0x110] sm:$0xff] }
 0x119   : > { %v12168_v45 = vpop.f32.mrb[25].mxu0  ;;  %2708 = vperm.xlu1 %13548, %v2599_v41   ;;  %vm2543_vm5 = vcmp.gt.f32.partialorder %v11122_v2, 0.0 }
 0x11a   : > { %v15121_v52 = vpop.f32.mrb[26].mxu0  ;;  %v15155_v17 = vpop.f32.mrb[24].mxu1 }
 0x11b   : > { %v12169_v55 = vpop.f32.mrb[27].mxu0  ;;  %v12342_v22 = vpop.f32.mrb[25].mxu1  ;;  %2804 = vperm.xlu0 %13547, %v2631_v50   ;;  %v14512_v50 = vld [vmem:[%s14732_s24 + $0x20] sm:$0xff]  }
 0x11c   : > { %v15162_v23 = vpop.f32.mrb[26].mxu1  ;;  %v11118_v22 = vld [vmem:[%s21230_s1 + $0xf0] sm:$0xff] }
 0x11d   : > { %12277 = vmatmul.mubr.msk.bf16.vlgmr.msra.gmra.mrb[132].mxu0 %vm701_vm1, %v14507_v47  ;;  %v12343_v31 = vpop.f32.mrb[27].mxu1  ;;  %vm2539_vm15 = vcmp.gt.f32.partialorder %v11118_v22, 0.0 }
 0x11e   : > { %12409 = vmatpush3.bf16.msra.mxu0 %v14508_v54  ;;  %12280 = vmatprep.mubr.msk.bf16.mxu0 %vm21345_vm0, %v21242_v1  ;;  %v11114_v54 = vld [vmem:[%s21230_s1 + $0xd0] sm:$0xff]  ;;  %v2605_v31 = vsel %vm2539_vm15, 1, %v21240_v48 }
 0x11f   : > { %12758 = vmatprep.subr.bf16.mxu0 %v21242_v1  ;;  %vm2535_vm11 = vcmp.gt.f32.partialorder %v11114_v54, 0.0  ;;  %2810 = vperm.xlu0 %13547, %v2633_v0  }
 0x120   : > { %v15146_v6 = vpop.f32.mrb[28].mxu0  ;;  %v2601_v59 = vsel %vm2535_vm11, 1, %v21240_v48 }
 0x121   : > { %v12172_v8 = vpop.f32.mrb[29].mxu0  ;;  %2714 = vperm.xlu1 %13548, %v2601_v59  }
 0x122   : > { %v15153_v14 = vpop.f32.mrb[30].mxu0  ;;  %v15183_v49 = vpop.f32.mrb[28].mxu1  ;;  %v14511_v8 = vld [vmem:[%s14732_s24 + $0x18] sm:$0xff]  }
 0x123   : > { %v12173_v16 = vpop.f32.mrb[31].mxu0  ;;  %v12346_v55 = vpop.f32.mrb[29].mxu1  ;;  %2816 = vperm.xlu0 %13547, %v2635_v21   ;;  %v11124_v21 = vld [vmem:[%s21230_s1 + $0x120] sm:$0xff] }
 0x124   : > { %v15190_v58 = vpop.f32.mrb[30].mxu1  ;;  %v11152_v55 = vld [vmem:[%s21230_s1 + $0x200] sm:$0xff]  ;;  %vm2545_vm7 = vcmp.gt.f32.partialorder %v11124_v21, 0.0 }
 0x125   : > { %12281 = vmatmul.mubr.msk.bf16.gmra.mrb[136].mxu0 %vm701_vm1, %v14509_v9  ;;  %v12347_v62 = vpop.f32.mrb[31].mxu1  ;;  %v2603_v9 = vsel %vm2537_vm13, 1, %v21240_v48  ;;  %vm2573_vm4 = vcmp.gt.f32.partialorder %v11152_v55, 0.0  ;;  %v2611_v32 = vsel %vm2545_vm7, 1, %v21240_v48 }
 0x126   : > { %12284 = vmatprep.mubr.msk.bf16.mxu0 %vm21345_vm0, %v21242_v1  ;;  %2720 = vperm.xlu1 %13548, %v2603_v9   ;;  %v11154_v9 = vld [vmem:[%s21230_s1 + $0x210] sm:$0xff] }
 0x127   : > { %vm2575_vm6 = vcmp.gt.f32.partialorder %v11154_v9, 0.0 }
 0x128   : > { %v15174_v36 = vpop.f32.mrb[32].mxu0 }
 0x129   : > { %v12176_v38 = vpop.f32.mrb[33].mxu0 }
 0x12a   : > { %v15181_v45 = vpop.f32.mrb[34].mxu0  ;;  %v15211_v18 = vpop.f32.mrb[32].mxu1  ;;  %2726 = vperm.xlu1 %13548, %v2605_v31   ;;  %v2637_v38 = vsel %vm2571_vm2, 1, %v21240_v48  ;;  %v14513_v31 = vld [vmem:[%s14732_s24 + $0x28] sm:$0xff]  }
 0x12b   : > { %v12177_v47 = vpop.f32.mrb[35].mxu0  ;;  %v12350_v25 = vpop.f32.mrb[33].mxu1  ;;  %2822 = vperm.xlu0 %13547, %v2637_v38  }
 0x12c   : > { %v15218_v28 = vpop.f32.mrb[34].mxu1 }
 0x12d   : > { %12285 = vmatmul.mubr.msk.bf16.gmra.mrb[140].mxu0 %vm701_vm1, %v14510_v40  ;;  %v12351_v34 = vpop.f32.mrb[35].mxu1  ;;  %v11120_v40 = vld [vmem:[%s21230_s1 + $0x100] sm:$0xff] }
 0x12e   : > { %12288 = vmatprep.mubr.msk.bf16.mxu0 %vm21345_vm0, %v21242_v1  ;;  %vm2541_vm3 = vcmp.gt.f32.partialorder %v11120_v40, 0.0  ;;  %v11091_v34 = vld [vmem:[%s21230_s1 + $0x18] sm:$0xff] }
 0x12f   : > { %v2607_v54 = vsel %vm2541_vm3, 1, %v21240_v48  ;;  %vm2512_vm8 = vcmp.gt.f32.partialorder %v11091_v34, 0.0  ;;  %v14515_v34 = vld [vmem:[%s14732_s24 + $0x38] sm:$0xff]  }
 0x130   : > { %v15202_v3 = vpop.f32.mrb[36].mxu0  ;;  %2732 = vperm.xlu1 %13548, %v2607_v54   ;;  %v11092_v54 = vld [vmem:[%s21230_s1 + $0x20] sm:$0xff] }
 0x131   : > { %v12180_v4 = vpop.f32.mrb[37].mxu0  ;;  %vm2513_vm9 = vcmp.gt.f32.partialorder %v11092_v54, 0.0 }
 0x132   : > { %v15209_v13 = vpop.f32.mrb[38].mxu0  ;;  %v15241_v0 = vpop.f32.mrb[36].mxu1 }
 0x133   : > { %v12181_v16 = vpop.f32.mrb[39].mxu0  ;;  %v12354_v4 = vpop.f32.mrb[37].mxu1 }
 0x134   : > { %v2641_v16 = vsel %vm2575_vm6, 1, %v21240_v48 }
 0x135   : > { %12289 = vmatmul.mubr.msk.bf16.gmra.mrb[144].mxu0 %vm701_vm1, %v14511_v8  ;;  %v15248_v8 = vpop.f32.mrb[38].mxu1 }
 0x136   : > { %12292 = vmatprep.mubr.msk.bf16.mxu0 %vm21345_vm0, %v21242_v1  ;;  %v12355_v10 = vpop.f32.mrb[39].mxu1 }
 0x138   : > { %v915_v41 = vpop.f32.mrb[40].mxu0 }
 0x139   : > { %v15231_v43 = vadd.f32 %v14999_v26, %v915_v41  ;;  %v12184_v47 = vpop.f32.mrb[41].mxu0  ;;  %v2639_v26 = vsel %vm2573_vm4, 1, %v21240_v48 }
 0x13a   : > { %v918_v59 = vpop.f32.mrb[42].mxu0  ;;  %2828 = vperm.xlu0 %13547, %v2639_v26   ;;  %v15268_v47 = vpop.f32.mrb[40].mxu1 }
 0x13b   : > { %v15239_v60 = vadd.f32 %v15003_v29, %v918_v59  ;;  %v12185_v62 = vpop.f32.mrb[43].mxu0  ;;  %v2609_v29 = vsel %vm2543_vm5, 1, %v21240_v48  ;;  %v12358_v59 = vpop.f32.mrb[41].mxu1 }
 0x13c   : > { %2738 = vperm.xlu1 %13548, %v2609_v29   ;;  %v2579_v62 = vsel %vm2513_vm9, 1, %v21240_v48  ;;  %v14514_v29 = vld [vmem:[%s14732_s24 + $0x30] sm:$0xff]  }
 0x13d   : > { %12293 = vmatmul.mubr.msk.bf16.gmra.mrb[148].mxu0 %vm701_vm1, %v14512_v50  ;;  %v2578_v50 = vsel %vm2512_vm8, 1, %v21240_v48 }
 0x13e   : > { %12296 = vmatprep.mubr.msk.bf16.mxu0 %vm21345_vm0, %v21242_v1  ;;  %2834 = vperm.xlu0 %13547, %v2641_v16  }
 0x140   : > { %v923_v22 = vpop.f32.mrb[44].mxu0  ;;  %2744 = vperm.xlu1 %13548, %v2611_v32  }
 0x141   : > { %v12188_v25 = vpop.f32.mrb[45].mxu0  ;;  %v15266_v38 = vadd.f32 %v15019_v39, %v923_v22  ;;  %v15278_v39 = vpop.f32.mrb[42].mxu1 }
 0x142   : > { %v926_v40 = vpop.f32.mrb[46].mxu0  ;;  %2645 = vperm.xlu0 %13547, %v2578_v50   ;;  %v12359_v26 = vpop.f32.mrb[43].mxu1 }
 0x143   : > { %v12189_v41 = vpop.f32.mrb[47].mxu0  ;;  %v15275_v55 = vadd.f32 %v15023_v42, %v926_v40  ;;  %v15287_v16 = vpop.f32.mrb[44].mxu1 }
 0x144   : > { %2648 = vperm.xlu1 %13548, %v2579_v62   ;;  %v12362_v22 = vpop.f32.mrb[45].mxu1 }
 0x145   : > { %12297 = vmatmul.mubr.msk.bf16.gmra.mrb[152].mxu0 %vm701_vm1, %v14513_v31  ;;  %v15293_v25 = vpop.f32.mrb[46].mxu1 }
 0x146   : > { %12300 = vmatprep.mubr.msk.bf16.mxu0 %vm21345_vm0, %v21242_v1  ;;  %v12363_v31 = vpop.f32.mrb[47].mxu1 }
 0x148   : > { %v931_v2 = vpop.f32.mrb[48].mxu0 }
 0x149   : > { %v12192_v4 = vpop.f32.mrb[49].mxu0  ;;  %v15285_v42 = vadd.f32 %v15039_v53, %v931_v2 }
 0x14a   : > { %v934_v9 = vpop.f32.mrb[50].mxu0  ;;  %v14516_v4 = vld [vmem:[%s14732_s24 + $0x40] sm:$0xff]  }
 0x14b   : > { %v12193_v10 = vpop.f32.mrb[51].mxu0  ;;  %v15290_v21 = vadd.f32 %v15046_v57, %v934_v9  ;;  %v15301_v57 = vpop.f32.mrb[48].mxu1 }
 0x14c   : > { %v12366_v59 = vpop.f32.mrb[49].mxu1 }
 0x14d   : > { %21394 = vst [vmem:[#allocation2_spill] sm:$0xff] %v15290_v21  ;;  %12301 = vmatmul.mubr.msk.bf16.gmra.mrb[156].mxu0 %vm701_vm1, %v14514_v29  ;;  %v15307_v62 = vpop.f32.mrb[50].mxu1 }
 0x14e   : > { %12304 = vmatprep.mubr.msk.bf16.mxu0 %vm21345_vm0, %v21242_v1  ;;  %v12367_v26 = vpop.f32.mrb[51].mxu1 }
 0x150   : > { %v939_v32 = vpop.f32.mrb[52].mxu0 }
 0x151   : > { %v12196_v53 = vpop.f32.mrb[53].mxu0  ;;  %v15299_v40 = vadd.f32 %v15067_v7, %v939_v32 }
 0x152   : > { %v942_v41 = vpop.f32.mrb[54].mxu0 }
 0x153   : > { %21395 = vst [vmem:[#allocation3_spill] sm:$0xff] %v15299_v40  ;;  %v12197_v50 = vpop.f32.mrb[55].mxu0  ;;  %v15304_v54 = vadd.f32 %v15074_v12, %v942_v41  ;;  %v15315_v12 = vpop.f32.mrb[52].mxu1  ;;  %v14517_v41 = vld [vmem:[%s14732_s24 + $0x48] sm:$0xff]  }
 0x154   : > { %v12370_v31 = vpop.f32.mrb[53].mxu1 }
 0x155   : > { %21396 = vst [vmem:[#allocation4_spill] sm:$0xff] %v15304_v54  ;;  %12305 = vmatmul.mubr.msk.bf16.gmra.mrb[160].mxu0 %vm701_vm1, %v14515_v34  ;;  %v15321_v32 = vpop.f32.mrb[54].mxu1  ;;  %v14518_v31 = vld [vmem:[%s14732_s24 + $0x18] sm:$0xff]  }
 0x156   : > { %12308 = vmatprep.mubr.msk.bf16.mxu0 %vm21345_vm0, %v21242_v1  ;;  %v12371_v53 = vpop.f32.mrb[55].mxu1 }
 0x158   : > { %v947_v2 = vpop.f32.mrb[56].mxu0 }
 0x159   : > { %v12200_v7 = vpop.f32.mrb[57].mxu0  ;;  %v15313_v29 = vadd.f32 %v15095_v30, %v947_v2 }
 0x15a   : > { %v950_v9 = vpop.f32.mrb[58].mxu0 }
 0x15b   : > { %21397 = vst [vmem:[#allocation5_spill] sm:$0xff] %v15313_v29  ;;  %v12201_v10 = vpop.f32.mrb[59].mxu0  ;;  %v15318_v22 = vadd.f32 %v15102_v35, %v950_v9  ;;  %v15329_v35 = vpop.f32.mrb[56].mxu1 }
 0x15c   : > { %v12374_v7 = vpop.f32.mrb[57].mxu1 }
 0x15d   : > { %21398 = vst [vmem:[#allocation6_spill] sm:$0xff] %v15318_v22  ;;  %12309 = vmatmul.mubr.msk.bf16.gmra.mrb[164].mxu0 %vm701_vm1, %v14516_v4  ;;  %v15335_v4 = vpop.f32.mrb[58].mxu1 }
 0x15e   : > { %12312 = vmatprep.mubr.msk.bf16.mxu0 %vm21345_vm0, %v21242_v1  ;;  %v12375_v9 = vpop.f32.mrb[59].mxu1 }
 0x160   : > { %v955_v34 = vpop.f32.mrb[60].mxu0 }
 0x161   : > { %v12204_v30 = vpop.f32.mrb[61].mxu0  ;;  %v15327_v50 = vadd.f32 %v15126_v56, %v955_v34 }
 0x162   : > { %v958_v59 = vpop.f32.mrb[62].mxu0 }
 0x163   : > { %21399 = vst [vmem:[#allocation7_spill] sm:$0xff] %v15327_v50  ;;  %v12205_v26 = vpop.f32.mrb[63].mxu0  ;;  %v15332_v2 = vadd.f32 %v15133_v61, %v958_v59  ;;  %v15343_v61 = vpop.f32.mrb[60].mxu1 }
 0x165   : > { %21400 = vst [vmem:[#allocation8_spill] sm:$0xff] %v15332_v2  ;;  %12313 = vmatmul.mubr.msk.bf16.gmra.mrb[168].mxu0 %vm701_vm1, %v14517_v41  ;;  %v12378_v41 = vpop.f32.mrb[61].mxu1 }
 0x166   : > { %12410 = vmatprep.mubr.msk.bf16.mxu0 %vm21345_vm0, %v21242_v1  ;;  %v15349_v26 = vpop.f32.mrb[62].mxu1 }
 0x167   : > { %v12379_v7 = vpop.f32.mrb[63].mxu1 }
 0x168   : > { %v963_v10 = vpop.f32.mrb[64].mxu0 }
 0x169   : > { %v12208_v56 = vpop.f32.mrb[65].mxu0  ;;  %v15341_v53 = vadd.f32 %v15155_v17, %v963_v10  ;;  %v14519_v10 = vld [vmem:[%s14732_s24 + $0x20] sm:$0xff]  }
 0x16a   : > { %v966_v34 = vpop.f32.mrb[66].mxu0 }
 0x16b   : > { %21401 = vst [vmem:[#allocation9_spill] sm:$0xff] %v15341_v53  ;;  %v12209_v30 = vpop.f32.mrb[67].mxu0  ;;  %v15346_v59 = vadd.f32 %v15162_v23, %v966_v34  ;;  %v15357_v23 = vpop.f32.mrb[64].mxu1 }
 0x16d   : > { %21402 = vst [vmem:[#allocation10_spill] sm:$0xff] %v15346_v59  ;;  %12411 = vmatmul.mubr.msk.bf16.vlgmr.msra.gmra.mrb[172].mxu0 %vm701_vm1, %v14518_v31  ;;  %v12382_v31 = vpop.f32.mrb[65].mxu1 }
 0x16e   : > { %12414 = vmatprep.mubr.msk.bf16.mxu0 %vm21345_vm0, %v21242_v1  ;;  %v15363_v41 = vpop.f32.mrb[66].mxu1 }
 0x16f   : > { %v12383_v7 = vpop.f32.mrb[67].mxu1 }
 0x170   : > { %v971_v9 = vpop.f32.mrb[68].mxu0 }
 0x171   : > { %v12212_v17 = vpop.f32.mrb[69].mxu0  ;;  %v15355_v56 = vadd.f32 %v15183_v49, %v971_v9  ;;  %v14520_v49 = vld [vmem:[%s14732_s24 + $0x28] sm:$0xff]  }
 0x172   : > { %v974_v30 = vpop.f32.mrb[70].mxu0 }
 0x173   : > { %21403 = vst [vmem:[#allocation11_spill] sm:$0xff] %v15355_v56  ;;  %v12213_v48 = vpop.f32.mrb[71].mxu0  ;;  %v15360_v34 = vadd.f32 %v15190_v58, %v974_v30  ;;  %v15371_v58 = vpop.f32.mrb[68].mxu1 }
 0x175   : > { %21404 = vst [vmem:[#allocation12_spill] sm:$0xff] %v15360_v34  ;;  %12415 = vmatmul.mubr.msk.bf16.gmra.mrb[176].mxu0 %vm701_vm1, %v14519_v10  ;;  %v12386_v10 = vpop.f32.mrb[69].mxu1 }
 0x176   : > { %12418 = vmatprep.mubr.msk.bf16.mxu0 %vm21345_vm0, %v21242_v1  ;;  %v15377_v31 = vpop.f32.mrb[70].mxu1 }
 0x177   : > { %v12387_v7 = vpop.f32.mrb[71].mxu1 }
 0x178   : > { %v979_v17 = vpop.f32.mrb[72].mxu0 }
 0x179   : > { %v12216_v59 = vpop.f32.mrb[73].mxu0  ;;  %v15369_v48 = vadd.f32 %v15211_v18, %v979_v17 }
 0x17a   : > { %v982_v9 = vpop.f32.mrb[74].mxu0  ;;  %v15381_v59 = vpop.permute.xlu0 %2651 }
 0x17b   : > { %21405 = vst [vmem:[#allocation13_spill] sm:$0xff] %v15369_v48  ;;  %v12217_v56 = vpop.f32.mrb[75].mxu0  ;;  %v15374_v30 = vadd.f32 %v15218_v28, %v982_v9  ;;  %v14521_v48 = vld [vmem:[%s14732_s24 + $0x30] sm:$0xff]   ;;  %v21408_v9 = vmov 0   ;;  %v15391_v34 = vpop.f32.mrb[72].mxu1 }
 0x17c   : > { %v11127_v56 = vld [vmem:[%s21230_s1 + $0x138] sm:$0xff]  ;;  %v12390_v53 = vpop.f32.mrb[73].mxu1 }
 0x17d   : > { %21406 = vst [vmem:[#allocation14_spill] sm:$0xff] %v15374_v30  ;;  %12419 = vmatmul.mubr.msk.bf16.gmra.mrb[180].mxu0 %vm701_vm1, %v14520_v49  ;;  %vm2548_vm10 = vcmp.gt.f32.partialorder %v11127_v56, 0.0  ;;  %v11129_v56 = vld [vmem:[%s21230_s1 + $0x148] sm:$0xff]  ;;  %v11131_v53 = vld [vmem:[%s21230_s1 + $0x158] sm:$0xff] }
 0x17e   : > { %12422 = vmatprep.mubr.msk.bf16.mxu0 %vm21345_vm0, %v21242_v1  ;;  %v2614_v10 = vsel %vm2548_vm10, 1, %v21408_v9  ;;  %v15396_v1 = vpop.permute.xlu0 %2654  ;;  %vm2550_vm11 = vcmp.gt.f32.partialorder %v11129_v56, 0.0  ;;  %vm2552_vm12 = vcmp.gt.f32.partialorder %v11131_v53, 0.0  ;;  %v11133_v53 = vld [vmem:[%s21230_s1 + $0x168] sm:$0xff] }
 0x17f   : > { %2753 = vperm.xlu1 %13548, %v2614_v10   ;;  %v14522_v10 = vld [vmem:[%s14732_s24 + $0x38] sm:$0xff]   ;;  %vm2554_vm13 = vcmp.gt.f32.partialorder %v11133_v53, 0.0 }
 0x180   : > { %v987_v18 = vpop.f32.mrb[76].mxu0 }
 0x181   : > { %v12220_v17 = vpop.f32.mrb[77].mxu0  ;;  %v15388_v28 = vadd.f32 %v15241_v0, %v987_v18  ;;  %v15402_v0 = vpop.f32.mrb[74].mxu1 }
 0x182   : > { %v990_v49 = vpop.f32.mrb[78].mxu0  ;;  %v12391_v18 = vpop.f32.mrb[75].mxu1  ;;  %v2616_v17 = vsel %vm2550_vm11, 1, %v21408_v9 }
 0x183   : > { %21407 = vst [vmem:[#allocation15_spill] sm:$0xff] %v15388_v28  ;;  %v12221_v30 = vpop.f32.mrb[79].mxu0  ;;  %v15394_v7 = vadd.f32 %v15248_v8, %v990_v49  ;;  %2759 = vperm.xlu1 %13548, %v2616_v17   ;;  %v15414_v56 = vpop.permute.xlu0 %2663  ;;  %v2618_v28 = vsel %vm2552_vm12, 1, %v21408_v9 }
 0x184   : > { %v21410_v30 = vmov 0.0   ;;  %v15417_v2 = vpop.f32.mrb[76].mxu1 }
 0x185   : > { %21409 = vst [vmem:[#allocation16_spill] sm:$0xff] %v15394_v7  ;;  %12423 = vmatmul.mubr.msk.bf16.gmra.mrb[184].mxu0 %vm701_vm1, %v14521_v48  ;;  %v12394_v50 = vpop.f32.mrb[77].mxu1 }
 0x186   : > { %12426 = vmatprep.mubr.msk.bf16.mxu0 %vm21345_vm0, %v21410_v30  ;;  %v11135_v50 = vld [vmem:[%s21230_s1 + $0x178] sm:$0xff] }
 0x187   : > { %2765 = vperm.xlu1 %13548, %v2618_v28   ;;  %vm2556_vm14 = vcmp.gt.f32.partialorder %v11135_v50, 0.0 }
 0x188   : > { %v995_v8 = vpop.f32.mrb[80].mxu0 }
 0x189   : > { %v12224_v49 = vpop.f32.mrb[81].mxu0  ;;  %v15412_v48 = vadd.f32 %v15268_v47, %v995_v8  ;;  %v15426_v47 = vpop.f32.mrb[78].mxu1 }
 0x18a   : > { %v998_v7 = vpop.f32.mrb[82].mxu0  ;;  %v12395_v8 = vpop.f32.mrb[79].mxu1  ;;  %v2620_v49 = vsel %vm2554_vm13, 1, %v21408_v9 }
 0x18b   : > { %21411 = vst [vmem:[#allocation17_spill] sm:$0xff] %v15412_v48  ;;  %v12225_v18 = vpop.f32.mrb[83].mxu0  ;;  %v15420_v17 = vadd.f32 %v15278_v39, %v998_v7  ;;  %2771 = vperm.xlu1 %13548, %v2620_v49   ;;  %v15431_v39 = vpop.permute.xlu0 %2669 }
 0x18c   : > { %v14523_v18 = vld [vmem:[%s14732_s24 + $0x40] sm:$0xff]   ;;  %v15441_v48 = vpop.f32.mrb[80].mxu1 }
 0x18d   : > { %21412 = vst [vmem:[#allocation18_spill] sm:$0xff] %v15420_v17  ;;  %12427 = vmatmul.mubr.msk.bf16.gmra.mrb[188].mxu0 %vm701_vm1, %v14522_v10  ;;  %v2622_v17 = vsel %vm2556_vm14, 1, %v21408_v9  ;;  %v12398_v22 = vpop.f32.mrb[81].mxu1  ;;  %vm2844_vm14 = vcmp.eq.s32.totalorder %v15381_v59, 1 }
 0x18e   : > { %12430 = vmatprep.mubr.msk.bf16.mxu0 %vm21345_vm0, %v21410_v30  ;;  %v11139_v22 = vld [vmem:[%s21230_s1 + $0x198] sm:$0xff] }
 0x18f   : > { %2777 = vperm.xlu1 %13548, %v2622_v17   ;;  %vm2560_vm2 = vcmp.gt.f32.partialorder %v11139_v22, 0.0  ;;  %v11141_v22 = vld [vmem:[%s21230_s1 + $0x1a8] sm:$0xff] }
 0x190   : > { %v1003_v28 = vpop.f32.mrb[84].mxu0  ;;  %vm2562_vm3 = vcmp.gt.f32.partialorder %v11141_v22, 0.0 }
 0x191   : > { %v12228_v7 = vpop.f32.mrb[85].mxu0  ;;  %v15438_v10 = vadd.f32 %v15287_v16, %v1003_v28  ;;  %v15450_v16 = vpop.f32.mrb[82].mxu1 }
 0x192   : > { %v1006_v53 = vpop.f32.mrb[86].mxu0  ;;  %v11137_v7 = vld [vmem:[%s21230_s1 + $0x188] sm:$0xff]  ;;  %v15454_v28 = vpop.permute.xlu0 %2675 }
 0x193   : > { %21413 = vst [vmem:[#allocation19_spill] sm:$0xff] %v15438_v10  ;;  %v12229_v8 = vpop.f32.mrb[87].mxu0  ;;  %v15444_v49 = vadd.f32 %v15293_v25, %v1006_v53  ;;  %vm2558_vm15 = vcmp.gt.f32.partialorder %v11137_v7, 0.0  ;;  %v12399_v50 = vpop.f32.mrb[83].mxu1 }
 0x194   : > { %v2624_v17 = vsel %vm2558_vm15, 1, %v21408_v9  ;;  %v14524_v8 = vld [vmem:[%s14732_s24 + $0x48] sm:$0xff]   ;;  %v15465_v29 = vpop.f32.mrb[84].mxu1  ;;  %vm2845_vm15 = vcmp.eq.s32.totalorder %v15396_v1, 1 }
 0x195   : > { %21414 = vst [vmem:[#allocation20_spill] sm:$0xff] %v15444_v49  ;;  %12431 = vmatmul.mubr.msk.bf16.gmra.mrb[192].mxu0 %vm701_vm1, %v14523_v18  ;;  %2783 = vperm.xlu1 %13548, %v2624_v17   ;;  %v2626_v49 = vsel %vm2560_vm2, 1, %v21408_v9  ;;  %v12402_v54 = vpop.f32.mrb[85].mxu1 }
 0x196   : > { %12434 = vmatprep.mubr.msk.bf16.mxu0 %vm21345_vm0, %v21410_v30  ;;  %v15470_v17 = vpop.permute.xlu0 %2681  ;;  %v11143_v54 = vld [vmem:[%s21230_s1 + $0x1b8] sm:$0xff] }
 0x197   : > { %vm2564_vm4 = vcmp.gt.f32.partialorder %v11143_v54, 0.0 }
 0x198   : > { %v1011_v25 = vpop.f32.mrb[88].mxu0 }
 0x199   : > { %v12232_v53 = vpop.f32.mrb[89].mxu0  ;;  %v15462_v18 = vadd.f32 %v15301_v57, %v1011_v25  ;;  %2789 = vperm.xlu1 %13548, %v2626_v49   ;;  %v15476_v57 = vpop.f32.mrb[86].mxu1  ;;  %v2628_v49 = vsel %vm2562_vm3, 1, %v21408_v9 }
 0x19a   : > { %v1014_v7 = vpop.f32.mrb[90].mxu0  ;;  %v15488_v22 = vpop.permute.xlu0 %2687 }
 0x19b   : > { %21415 = vst [vmem:[#allocation21_spill] sm:$0xff] %v15462_v18  ;;  %v12233_v10 = vpop.f32.mrb[91].mxu0  ;;  %v15468_v50 = vadd.f32 %v15307_v62, %v1014_v7 }
 0x19c   : > { %v12403_v10 = vpop.f32.mrb[87].mxu1 }
 0x19d   : > { %21416 = vst [vmem:[#allocation22_spill] sm:$0xff] %v15468_v50  ;;  %12435 = vmatmul.mubr.msk.bf16.gmra.mrb[196].mxu0 %vm701_vm1, %v14524_v8  ;;  %2795 = vperm.xlu1 %13548, %v2628_v49   ;;  %v14525_v8 = vld [vmem:[%s14732_s24 + $0x50] sm:$0xff]   ;;  %v2630_v50 = vsel %vm2564_vm4, 1, %v21408_v9  ;;  %v15494_v18 = vpop.f32.mrb[88].mxu1 }
 0x19e   : > { %12438 = vmatprep.mubr.msk.bf16.mxu0 %vm21345_vm0, %v21410_v30  ;;  %v12406_v40 = vpop.f32.mrb[89].mxu1 }
 0x19f   : > { %v11147_v40 = vld [vmem:[%s21230_s1 + $0x1d8] sm:$0xff] }
 0x1a0   : > { %v1019_v62 = vpop.f32.mrb[92].mxu0  ;;  %vm2568_vm6 = vcmp.gt.f32.partialorder %v11147_v40, 0.0 }
 0x1a1   : > { %v15485_v25 = vadd.f32 %v15315_v12, %v1019_v62  ;;  %v12236_v53 = vpop.f32.mrb[93].mxu0  ;;  %2801 = vperm.xlu1 %13548, %v2630_v50   ;;  %v11145_v12 = vld [vmem:[%s21230_s1 + $0x1c8] sm:$0xff]  ;;  %v15500_v62 = vpop.f32.mrb[90].mxu1 }
 0x1a2   : > { %v1022_v7 = vpop.f32.mrb[94].mxu0  ;;  %vm2566_vm5 = vcmp.gt.f32.partialorder %v11145_v12, 0.0  ;;  %v12407_v54 = vpop.f32.mrb[91].mxu1 }
 0x1a3   : > { %21417 = vst [vmem:[#allocation23_spill] sm:$0xff] %v15485_v25  ;;  %v15492_v10 = vadd.f32 %v15321_v32, %v1022_v7  ;;  %v12237_v49 = vpop.f32.mrb[95].mxu0  ;;  %v2632_v32 = vsel %vm2566_vm5, 1, %v21408_v9  ;;  %v11149_v25 = vld [vmem:[%s21230_s1 + $0x1e8] sm:$0xff]  ;;  %vm2848_vm5 = vcmp.eq.s32.totalorder %v15414_v56, 1 }
 0x1a4   : > { %v15512_v49 = vpop.permute.xlu0 %2693  ;;  %vm2570_vm7 = vcmp.gt.f32.partialorder %v11149_v25, 0.0 }
 0x1a5   : > { %21418 = vst [vmem:[#allocation24_spill] sm:$0xff] %v15492_v10  ;;  %12439 = vmatmul.mubr.msk.bf16.gmra.mrb[200].mxu0 %vm701_vm1, %v14525_v8  ;;  %2807 = vperm.xlu1 %13548, %v2632_v32   ;;  %v14526_v8 = vld [vmem:[%s14732_s24 + $0x58] sm:$0xff]   ;;  %v2634_v10 = vsel %vm2568_vm6, 1, %v21408_v9 }
 0x1a6   : > { %12442 = vmatprep.mubr.msk.bf16.mxu0 %vm21345_vm0, %v21410_v30 }
 0x1a8   : > { %v1027_v53 = vpop.f32.mrb[96].mxu0 }
 0x1a9   : > { %v15509_v50 = vadd.f32 %v15329_v35, %v1027_v53  ;;  %v12240_v7 = vpop.f32.mrb[97].mxu0  ;;  %2813 = vperm.xlu1 %13548, %v2634_v10   ;;  %v2636_v35 = vsel %vm2570_vm7, 1, %v21408_v9  ;;  %v15525_v53 = vpop.permute.xlu0 %2699  ;;  %vm2850_vm7 = vcmp.eq.s32.totalorder %v15431_v39, 1 }
 0x1aa   : > { %v1030_v12 = vpop.f32.mrb[98].mxu0 }
 0x1ab   : > { %21419 = vst [vmem:[#allocation25_spill] sm:$0xff] %v15509_v50  ;;  %v15516_v54 = vadd.f32 %v15335_v4, %v1030_v12  ;;  %v12241_v32 = vpop.f32.mrb[99].mxu0  ;;  %v11151_v4 = vld [vmem:[%s21230_s1 + $0x1f8] sm:$0xff]  ;;  %v14527_v12 = vld [vmem:[%s14732_s24 + $0x60] sm:$0xff]  }
 0x1ac   : > { %vm2572_vm8 = vcmp.gt.f32.partialorder %v11151_v4, 0.0 }
 0x1ad   : > { %21420 = vst [vmem:[#allocation26_spill] sm:$0xff] %v15516_v54  ;;  %12443 = vmatmul.mubr.msk.bf16.gmra.mrb[204].mxu0 %vm701_vm1, %v14526_v8  ;;  %2819 = vperm.xlu1 %13548, %v2636_v35   ;;  %v2638_v8 = vsel %vm2572_vm8, 1, %v21408_v9  ;;  %v11153_v35 = vld [vmem:[%s21230_s1 + $0x208] sm:$0xff] }
 0x1ae   : > { %12446 = vmatprep.mubr.msk.bf16.mxu0 %vm21345_vm0, %v21410_v30  ;;  %vm2574_vm9 = vcmp.gt.f32.partialorder %v11153_v35, 0.0 }
 0x1b0   : > { %v1035_v40 = vpop.f32.mrb[100].mxu0 }
 0x1b1   : > { %v15531_v10 = vadd.f32 %v15343_v61, %v1035_v40  ;;  %v12244_v7 = vpop.f32.mrb[101].mxu0  ;;  %2825 = vperm.xlu1 %13548, %v2638_v8   ;;  %v15542_v61 = vpop.permute.xlu0 %2705  ;;  %v2640_v40 = vsel %vm2574_vm9, 1, %v21408_v9  ;;  %vm2852_vm9 = vcmp.eq.s32.totalorder %v15454_v28, 1 }
 0x1b2   : > { %v1038_v25 = vpop.f32.mrb[102].mxu0 }
 0x1b3   : > { %21421 = vst [vmem:[#allocation27_spill] sm:$0xff] %v15531_v10  ;;  %v15536_v32 = vadd.f32 %v15349_v26, %v1038_v25  ;;  %v12245_v54 = vpop.f32.mrb[103].mxu0  ;;  %v11155_v26 = vld [vmem:[%s21230_s1 + $0x218] sm:$0xff]  ;;  %v14537_v10 = vld [vmem:[%s14732_s24 + $0xb0] sm:$0xff]  }
 0x1b4   : > { %vm2576_vm10 = vcmp.gt.f32.partialorder %v11155_v26, 0.0 }
 0x1b5   : > { %21422 = vst [vmem:[#allocation28_spill] sm:$0xff] %v15536_v32  ;;  %12447 = vmatmul.mubr.msk.bf16.gmra.mrb[208].mxu0 %vm701_vm1, %v14527_v12  ;;  %2831 = vperm.xlu1 %13548, %v2640_v40   ;;  %v14528_v12 = vld [vmem:[%s14732_s24 + $0x68] sm:$0xff]   ;;  %v2642_v8 = vsel %vm2576_vm10, 1, %v21408_v9  ;;  %v15558_v40 = vpop.permute.xlu0 %2711 }
 0x1b6   : > { %12450 = vmatprep.mubr.msk.bf16.mxu0 %vm21345_vm0, %v21410_v30 }
 0x1b8   : > { %v1043_v4 = vpop.f32.mrb[104].mxu0 }
 0x1b9   : > { %v15551_v54 = vadd.f32 %v15357_v23, %v1043_v4  ;;  %v12248_v7 = vpop.f32.mrb[105].mxu0  ;;  %2837 = vperm.xlu1 %13548, %v2642_v8   ;;  %v15567_v9 = vpop.permute.xlu0 %2717 }
 0x1ba   : > { %v1046_v25 = vpop.f32.mrb[106].mxu0  ;;  %v14529_v7 = vld [vmem:[%s14732_s24 + $0x70] sm:$0xff]  }
 0x1bb   : > { %21423 = vst [vmem:[#allocation29_spill] sm:$0xff] %v15551_v54  ;;  %v15556_v35 = vadd.f32 %v15363_v41, %v1046_v25  ;;  %v12249_v32 = vpop.f32.mrb[107].mxu0 }
 0x1bd   : > { %21424 = vst [vmem:[#allocation30_spill] sm:$0xff] %v15556_v35  ;;  %12451 = vmatmul.mubr.msk.bf16.gmra.mrb[212].mxu0 %vm701_vm1, %v14528_v12  ;;  %v15575_v12 = vpop.permute.xlu0 %2723 }
 0x1be   : > { %12454 = vmatprep.mubr.msk.bf16.mxu0 %vm21345_vm0, %v21410_v30  ;;  %21427 = vst [vmem:[#allocation33_spill] sm:$0xff] %v15575_v12 }
 0x1c0   : > { %v1051_v23 = vpop.f32.mrb[108].mxu0 }
 0x1c1   : > { %v15564_v4 = vadd.f32 %v15371_v58, %v1051_v23  ;;  %v12252_v26 = vpop.f32.mrb[109].mxu0 }
 0x1c2   : > { %v1054_v41 = vpop.f32.mrb[110].mxu0  ;;  %v14530_v26 = vld [vmem:[%s14732_s24 + $0x78] sm:$0xff]  }
 0x1c3   : > { %21425 = vst [vmem:[#allocation31_spill] sm:$0xff] %v15564_v4  ;;  %v15570_v32 = vadd.f32 %v15377_v31, %v1054_v41  ;;  %v12253_v25 = vpop.f32.mrb[111].mxu0 }
 0x1c5   : > { %21426 = vst [vmem:[#allocation32_spill] sm:$0xff] %v15570_v32  ;;  %12455 = vmatmul.mubr.msk.bf16.gmra.mrb[216].mxu0 %vm701_vm1, %v14529_v7  ;;  %v15585_v7 = vpop.permute.xlu0 %2729 }
 0x1c6   : > { %12458 = vmatprep.mubr.msk.bf16.mxu0 %vm21345_vm0, %v21410_v30  ;;  %21430 = vst [vmem:[#allocation36_spill] sm:$0xff] %v15585_v7 }
 0x1c8   : > { %v1059_v8 = vpop.f32.mrb[112].mxu0 }
 0x1c9   : > { %v15578_v58 = vadd.f32 %v15391_v34, %v1059_v8  ;;  %v12256_v23 = vpop.f32.mrb[113].mxu0  ;;  %v14531_v8 = vld [vmem:[%s14732_s24 + $0x80] sm:$0xff]  }
 0x1ca   : > { %v1062_v4 = vpop.f32.mrb[114].mxu0 }
 0x1cb   : > { %21428 = vst [vmem:[#allocation34_spill] sm:$0xff] %v15578_v58  ;;  %v15582_v35 = vadd.f32 %v15402_v0, %v1062_v4  ;;  %v12257_v31 = vpop.f32.mrb[115].mxu0  ;;  %v15596_v4 = vpop.permute.xlu0 %2735 }
 0x1cc   : > { %21433 = vst [vmem:[#allocation39_spill] sm:$0xff] %v15596_v4  ;;  %v14543_v4 = vld [vmem:[%s14732_s24 + $0xe0] sm:$0xff]  }
 0x1cd   : > { %21429 = vst [vmem:[#allocation35_spill] sm:$0xff] %v15582_v35  ;;  %12459 = vmatmul.mubr.msk.bf16.gmra.mrb[220].mxu0 %vm701_vm1, %v14530_v26  ;;  %v14536_v35 = vld [vmem:[%s14732_s24 + $0xa8] sm:$0xff]  }
 0x1ce   : > { %12462 = vmatprep.mubr.msk.bf16.mxu0 %vm21345_vm0, %v21410_v30 }
 0x1d0   : > { %v1067_v41 = vpop.f32.mrb[116].mxu0 }
 0x1d1   : > { %v15590_v25 = vadd.f32 %v15417_v2, %v1067_v41  ;;  %v12260_v34 = vpop.f32.mrb[117].mxu0  ;;  %v14532_v41 = vld [vmem:[%s14732_s24 + $0x88] sm:$0xff]  }
 0x1d2   : > { %v1070_v23 = vpop.f32.mrb[118].mxu0  ;;  %v15605_v34 = vpop.permute.xlu0 %2741 }
 0x1d3   : > { %21431 = vst [vmem:[#allocation37_spill] sm:$0xff] %v15590_v25  ;;  %v15594_v58 = vadd.f32 %v15426_v47, %v1070_v23  ;;  %v12261_v0 = vpop.f32.mrb[119].mxu0  ;;  %21435 = vst [vmem:[#allocation41_spill] sm:$0xff] %v15605_v34  ;;  %v14542_v34 = vld [vmem:[%s14732_s24 + $0xd8] sm:$0xff]  }
 0x1d5   : > { %21432 = vst [vmem:[#allocation38_spill] sm:$0xff] %v15594_v58  ;;  %12463 = vmatmul.mubr.msk.bf16.gmra.mrb[224].mxu0 %vm701_vm1, %v14531_v8 }
 0x1d6   : > { %12466 = vmatprep.mubr.msk.bf16.mxu0 %vm21345_vm0, %v21410_v30  ;;  %v15613_v8 = vpop.permute.xlu0 %2747 }
 0x1d7   : > { %21437 = vst [vmem:[#allocation43_spill] sm:$0xff] %v15613_v8 }
 0x1d8   : > { %v1075_v26 = vpop.f32.mrb[120].mxu0 }
 0x1d9   : > { %v15602_v31 = vadd.f32 %v15441_v48, %v1075_v26  ;;  %v12264_v2 = vpop.f32.mrb[121].mxu0 }
 0x1da   : > { %v1078_v25 = vpop.f32.mrb[122].mxu0  ;;  %v14533_v2 = vld [vmem:[%s14732_s24 + $0x90] sm:$0xff]  }
 0x1db   : > { %21434 = vst [vmem:[#allocation40_spill] sm:$0xff] %v15602_v31  ;;  %v15608_v47 = vadd.f32 %v15450_v16, %v1078_v25  ;;  %v12265_v23 = vpop.f32.mrb[123].mxu0  ;;  %v15619_v31 = vpop.permute.xlu1 %2657 }
 0x1dc   : > { %vm2846_vm3 = vcmp.eq.s32.totalorder %v15619_v31, 1 }
 0x1dd   : > { %21436 = vst [vmem:[#allocation42_spill] sm:$0xff] %v15608_v47  ;;  %12467 = vmatmul.mubr.msk.bf16.gmra.mrb[228].mxu0 %vm701_vm1, %v14532_v41  ;;  %v15625_v41 = vpop.permute.xlu0 %2750 }
 0x1de   : > { %12470 = vmatprep.mubr.msk.bf16.mxu0 %vm21345_vm0, %v21410_v30  ;;  %21440 = vst [vmem:[#allocation46_spill] sm:$0xff] %v15625_v41 }
 0x1df   : > { %v15629_v23 = vpop.permute.xlu1 %2660 }
 0x1e0   : > { %v1083_v0 = vpop.f32.mrb[124].mxu0  ;;  %vm2847_vm4 = vcmp.eq.s32.totalorder %v15629_v23, 1 }
 0x1e1   : > { %v15616_v48 = vadd.f32 %v15465_v29, %v1083_v0  ;;  %v12268_v26 = vpop.f32.mrb[125].mxu0 }
 0x1e2   : > { %v1086_v58 = vpop.f32.mrb[126].mxu0 }
 0x1e3   : > { %21438 = vst [vmem:[#allocation44_spill] sm:$0xff] %v15616_v48  ;;  %v15622_v16 = vadd.f32 %v15476_v57, %v1086_v58  ;;  %v12269_v25 = vpop.f32.mrb[127].mxu0  ;;  %v14534_v48 = vld [vmem:[%s14732_s24 + $0x98] sm:$0xff]  }
 0x1e4   : > { %v15641_v25 = vpop.permute.xlu1 %2666 }
 0x1e5   : > { %21439 = vst [vmem:[#allocation45_spill] sm:$0xff] %v15622_v16  ;;  %12471 = vmatmul.mubr.msk.bf16.gmra.mrb[232].mxu0 %vm701_vm1, %v14533_v2  ;;  %v15638_v2 = vpop.permute.xlu0 %2756  ;;  %vm2849_vm6 = vcmp.eq.s32.totalorder %v15641_v25, 1 }
 0x1e6   : > { %12474 = vmatprep.mubr.msk.bf16.mxu0 %vm21345_vm0, %v21410_v30  ;;  %21443 = vst [vmem:[#allocation49_spill] sm:$0xff] %v15638_v2  ;;  %v14540_v2 = vld [vmem:[%s14732_s24 + $0xc8] sm:$0xff]  }
 0x1e8   : > { %v1091_v29 = vpop.f32.mrb[128].mxu0 }
 0x1e9   : > { %v15632_v0 = vadd.f32 %v15494_v18, %v1091_v29  ;;  %v12272_v26 = vpop.f32.mrb[129].mxu0 }
 0x1ea   : > { %v1094_v47 = vpop.f32.mrb[130].mxu0  ;;  %v14535_v26 = vld [vmem:[%s14732_s24 + $0xa0] sm:$0xff]  }
 0x1eb   : > { %21441 = vst [vmem:[#allocation47_spill] sm:$0xff] %v15632_v0  ;;  %v15636_v57 = vadd.f32 %v15500_v62, %v1094_v47  ;;  %v12273_v58 = vpop.f32.mrb[131].mxu0  ;;  %v15649_v0 = vpop.permute.xlu0 %2762 }
 0x1ec   : > { %21444 = vst [vmem:[#allocation50_spill] sm:$0xff] %v15649_v0 }
 0x1ed   : > { %21442 = vst [vmem:[#allocation48_spill] sm:$0xff] %v15636_v57  ;;  %12475 = vmatmul.mubr.msk.bf16.gmra.mrb[236].mxu0 %vm701_vm1, %v14534_v48  ;;  %v15654_v48 = vpop.permute.xlu1 %2672 }
 0x1ee   : > { %12478 = vmatprep.mubr.msk.bf16.mxu0 %vm21345_vm0, %v21410_v30  ;;  %vm2851_vm8 = vcmp.eq.s32.totalorder %v15654_v48, 1 }
 0x1ef   : > { %v15659_v57 = vpop.permute.xlu0 %2768 }
 0x1f0   : > { %v1402_v16 = vpop.f32.mrb[132].mxu0  ;;  %21445 = vst [vmem:[#allocation51_spill] sm:$0xff] %v15659_v57 }
 0x1f1   : > { %v15646_v18 = vadd.f32 %v1402_v16, %v14975_v11  ;;  %v12278_v29 = vpop.f32.mrb[133].mxu0  ;;  %v15665_v32 = vpop.permute.xlu1 %2678 }
 0x1f2   : > { %v1405_v62 = vpop.f32.mrb[134].mxu0  ;;  %vm2853_vm10 = vcmp.eq.s32.totalorder %v15665_v32, 1 }
 0x1f3   : > { %v15652_v47 = vadd.f32 %v1405_v62, %v14981_v15  ;;  %v12279_v58 = vpop.f32.mrb[135].mxu0 }
 0x1f5   : > { %12479 = vmatmul.mubr.msk.bf16.gmra.mrb[240].mxu0 %vm701_vm1, %v14535_v26  ;;  %v15671_v26 = vpop.permute.xlu0 %2774  ;;  %v15675_v54 = vpop.permute.xlu1 %2684 }
 0x1f6   : > { %12482 = vmatprep.mubr.msk.bf16.mxu0 %vm21345_vm0, %v21410_v30  ;;  %21446 = vst [vmem:[#allocation52_spill] sm:$0xff] %v15671_v26 }
 0x1f8   : > { %v1410_v11 = vpop.f32.mrb[136].mxu0 }
 0x1f9   : > { %v15662_v16 = vadd.f32 %v1410_v11, %v14991_v20  ;;  %v12282_v29 = vpop.f32.mrb[137].mxu0 }
 0x1fa   : > { %v1413_v15 = vpop.f32.mrb[138].mxu0 }
 0x1fb   : > { %v15668_v62 = vadd.f32 %v1413_v15, %v14997_v24  ;;  %v12283_v58 = vpop.f32.mrb[139].mxu0 }
 0x1fc   : > { %v15687_v58 = vpop.permute.xlu1 %2690 }
 0x1fd   : > { %12483 = vmatmul.mubr.msk.bf16.gmra.mrb[244].mxu0 %vm701_vm1, %v14536_v35  ;;  %v15684_v35 = vpop.permute.xlu0 %2780 }
 0x1fe   : > { %12486 = vmatprep.mubr.msk.bf16.mxu0 %vm21345_vm0, %v21410_v30  ;;  %21447 = vst [vmem:[#allocation53_spill] sm:$0xff] %v15684_v35 }
 0x200   : > { %v1418_v20 = vpop.f32.mrb[140].mxu0 }
 0x201   : > { %v15678_v11 = vadd.f32 %v1418_v20, %v15011_v33  ;;  %v12286_v29 = vpop.f32.mrb[141].mxu0  ;;  %v15695_v57 = vpop.permute.xlu0 %2786 }
 0x202   : > { %v1421_v50 = vpop.f32.mrb[142].mxu0  ;;  %v14538_v29 = vld [vmem:[%s14732_s24 + $0xb8] sm:$0xff]   ;;  %21448 = vst [vmem:[#allocation54_spill] sm:$0xff] %v15695_v57  ;;  %v14539_v57 = vld [vmem:[%s14732_s24 + $0xc0] sm:$0xff]  }
 0x203   : > { %v15682_v24 = vadd.f32 %v1421_v50, %v15017_v37  ;;  %v12287_v15 = vpop.f32.mrb[143].mxu0 }
 0x205   : > { %12487 = vmatmul.mubr.msk.bf16.gmra.mrb[248].mxu0 %vm701_vm1, %v14537_v10  ;;  %v15700_v10 = vpop.permute.xlu1 %2696  ;;  %v15705_v35 = vpop.permute.xlu0 %2792 }
 0x206   : > { %12490 = vmatprep.mubr.msk.bf16.mxu0 %vm21345_vm0, %v21410_v30  ;;  %21449 = vst [vmem:[#allocation55_spill] sm:$0xff] %v15705_v35 }
 0x208   : > { %v1426_v26 = vpop.f32.mrb[144].mxu0 }
 0x209   : > { %v15692_v33 = vadd.f32 %v1426_v26, %v15031_v46  ;;  %v12290_v20 = vpop.f32.mrb[145].mxu0  ;;  %v15711_v0 = vpop.permute.xlu1 %2702 }
 0x20a   : > { %v1429_v37 = vpop.f32.mrb[146].mxu0 }
 0x20b   : > { %v15698_v50 = vadd.f32 %v1429_v37, %v15037_v51  ;;  %v12291_v15 = vpop.f32.mrb[147].mxu0 }
 0x20d   : > { %12491 = vmatmul.mubr.msk.bf16.gmra.mrb[252].mxu0 %vm701_vm1, %v14538_v29  ;;  %v15717_v29 = vpop.permute.xlu0 %2798  ;;  %v15721_v35 = vpop.permute.xlu1 %2708 }
 0x20e   : > { %12494 = vmatprep.mubr.msk.bf16.mxu0 %vm21345_vm0, %v21410_v30  ;;  %21450 = vst [vmem:[#allocation56_spill] sm:$0xff] %v15717_v29 }
 0x210   : > { %v1434_v46 = vpop.f32.mrb[148].mxu0 }
 0x211   : > { %v15708_v26 = vadd.f32 %v1434_v46, %v15058_v63  ;;  %v12294_v20 = vpop.f32.mrb[149].mxu0 }
 0x212   : > { %v1437_v51 = vpop.f32.mrb[150].mxu0 }
 0x213   : > { %v15714_v37 = vadd.f32 %v1437_v51, %v15065_v5  ;;  %v12295_v15 = vpop.f32.mrb[151].mxu0 }
 0x214   : > { %v15733_v15 = vpop.permute.xlu1 %2714 }
 0x215   : > { %12495 = vmatmul.mubr.msk.bf16.gmra.mrb[0].mxu0 %vm701_vm1, %v14539_v57  ;;  %v15730_v57 = vpop.permute.xlu0 %2804 }
 0x216   : > { %12498 = vmatprep.mubr.msk.bf16.mxu0 %vm21345_vm0, %v21410_v30  ;;  %21451 = vst [vmem:[#allocation57_spill] sm:$0xff] %v15730_v57 }
 0x218   : > { %v1442_v63 = vpop.f32.mrb[152].mxu0  ;;  %v15749_v8 = vpop.permute.xlu1 %2720 }
 0x219   : > { %v15724_v46 = vadd.f32 %v1442_v63, %v15086_v19  ;;  %v12298_v20 = vpop.f32.mrb[153].mxu0  ;;  %v14551_v19 = vld [vmem:[%s21233_s4 + $0x30] sm:$0xff]   ;;  %21453 = vst [vmem:[#allocation59_spill] sm:$0xff] %v15749_v8 }
 0x21a   : > { %v1445_v41 = vpop.f32.mrb[154].mxu0  ;;  %v15744_v20 = vpop.permute.xlu0 %2810  ;;  %12542 = vmatprep.subr.bf16.mxu1 %v14551_v19 }
 0x21b   : > { %v15728_v5 = vadd.f32 %v1445_v41, %v15093_v27  ;;  %v12299_v51 = vpop.f32.mrb[155].mxu0  ;;  %v14541_v41 = vld [vmem:[%s14732_s24 + $0xd0] sm:$0xff]   ;;  %21452 = vst [vmem:[#allocation58_spill] sm:$0xff] %v15744_v20  ;;  %12543 = vmatpush3.bf16.msra.mxu1 %v14551_v19 }
 0x21d   : > { %12499 = vmatmul.mubr.msk.bf16.gmra.mrb[4].mxu0 %vm701_vm1, %v14540_v2 }
 0x21e   : > { %12502 = vmatprep.mubr.msk.bf16.mxu0 %vm21345_vm0, %v21410_v30 }
 0x220   : > { %v1450_v29 = vpop.f32.mrb[156].mxu0 }
 0x221   : > { %v15741_v63 = vadd.f32 %v1450_v29, %v15114_v44  ;;  %v12302_v27 = vpop.f32.mrb[157].mxu0  ;;  %v15754_v44 = vpop.permute.xlu0 %2816 }
 0x222   : > { %v1453_v51 = vpop.f32.mrb[158].mxu0  ;;  %21454 = vst [vmem:[#allocation60_spill] sm:$0xff] %v15754_v44 }
 0x223   : > { %v15747_v2 = vadd.f32 %v1453_v51, %v15121_v52  ;;  %v12303_v57 = vpop.f32.mrb[159].mxu0  ;;  %v15760_v52 = vpop.permute.xlu1 %2726 }
 0x224   : > { %21455 = vst [vmem:[#allocation61_spill] sm:$0xff] %v15760_v52 }
 0x225   : > { %12503 = vmatmul.mubr.msk.bf16.gmra.mrb[8].mxu0 %vm701_vm1, %v14541_v41  ;;  %v15766_v41 = vpop.permute.xlu0 %2822 }
 0x226   : > { %12506 = vmatprep.mubr.msk.bf16.mxu0 %vm21345_vm0, %v21410_v30  ;;  %21456 = vst [vmem:[#allocation62_spill] sm:$0xff] %v15766_v41 }
 0x227   : > { %v15770_v44 = vpop.permute.xlu1 %2732 }
 0x228   : > { %v1458_v29 = vpop.f32.mrb[160].mxu0  ;;  %21457 = vst [vmem:[#allocation63_spill] sm:$0xff] %v15770_v44 }
 0x229   : > { %v15757_v27 = vadd.f32 %v1458_v29, %v15146_v6  ;;  %v12306_v20 = vpop.f32.mrb[161].mxu0 }
 0x22a   : > { %v1461_v57 = vpop.f32.mrb[162].mxu0 }
 0x22b   : > { %v15763_v51 = vadd.f32 %v1461_v57, %v15153_v14  ;;  %v12307_v19 = vpop.f32.mrb[163].mxu0 }
 0x22c   : > { %v15782_v19 = vpop.permute.xlu1 %2738 }
 0x22d   : > { %12507 = vmatmul.mubr.msk.bf16.gmra.mrb[12].mxu0 %vm701_vm1, %v14542_v34  ;;  %v15779_v34 = vpop.permute.xlu0 %2828  ;;  %21459 = vst [vmem:[#allocation65_spill] sm:$0xff] %v15782_v19 }
 0x22e   : > { %12510 = vmatprep.mubr.msk.bf16.mxu0 %vm21345_vm0, %v21410_v30  ;;  %21458 = vst [vmem:[#allocation64_spill] sm:$0xff] %v15779_v34 }
 0x230   : > { %v1466_v6 = vpop.f32.mrb[164].mxu0 }
 0x231   : > { %v15773_v20 = vadd.f32 %v1466_v6, %v15174_v36  ;;  %v12310_v29 = vpop.f32.mrb[165].mxu0  ;;  %v15790_v44 = vpop.permute.xlu0 %2834 }
 0x232   : > { %v1469_v7 = vpop.f32.mrb[166].mxu0  ;;  %v14544_v29 = vld [vmem:[%s14732_s24 + $0xe8] sm:$0xff]   ;;  %21460 = vst [vmem:[#allocation66_spill] sm:$0xff] %v15790_v44 }
 0x233   : > { %v15777_v14 = vadd.f32 %v1469_v7, %v15181_v45  ;;  %v12311_v57 = vpop.f32.mrb[167].mxu0 }
 0x235   : > { %12511 = vmatmul.mubr.msk.bf16.gmra.mrb[16].mxu0 %vm701_vm1, %v14543_v4  ;;  %v15795_v4 = vpop.permute.xlu1 %2744  ;;  %v2646_v34 = vpop.permute.xlu0 %2645 }
 0x236   : > { %12514 = vmatprep.mubr.msk.bf16.mxu0 %vm21345_vm0, %v21410_v30  ;;  %21461 = vst [vmem:[#allocation67_spill] sm:$0xff] %v15795_v4  ;;  %vm2842_vm11 = vcmp.eq.s32.totalorder %v2646_v34, 1  ;;  %v14547_v34 = vld [vmem:[%s14732_s24 + $0x100] sm:$0xff]  }
 0x238   : > { %v1474_v41 = vpop.f32.mrb[168].mxu0 }
 0x239   : > { %v15787_v36 = vadd.f32 %v1474_v41, %v15202_v3  ;;  %v12314_v6 = vpop.f32.mrb[169].mxu0  ;;  %v3040_v3 = vlaneseq  ;;  %v2649_v44 = vpop.permute.xlu1 %2648 }
 0x23a   : > { %v1477_v45 = vpop.f32.mrb[170].mxu0  ;;  %v15803_v6 = vld [vmem:[%s21232_s3] ss:$0 sm:$0xff]  ;;  %vm2843_vm12 = vcmp.eq.s32.totalorder %v2649_v44, 1 }
 0x23b   : > { %v15793_v7 = vadd.f32 %v1477_v45, %v15209_v13  ;;  %v12315_v57 = vpop.f32.mrb[171].mxu0  ;;  %v14552_v13 = vld [vmem:[%s21233_s4 + $0x38] sm:$0xff]   ;;  %v15812_v8 = vshrl.u32 %v3040_v3, 7 }
 0x23c   : > { %12544 = vmatprep.subr.bf16.mxu1 %v14552_v13  ;;  %v14546_v3 = vld [vmem:[%s14732_s24 + $0xf8] sm:$0xff]  }
 0x23d   : > { %12515 = vmatmul.mubr.msk.bf16.gmra.mrb[20].mxu0 %vm701_vm1, %v14544_v29  ;;  %v14545_v29 = vld [vmem:[%s14732_s24 + $0xf0] sm:$0xff]   ;;  %12545 = vmatpush3.bf16.msra.mxu1 %v14552_v13  ;;  %vm3042_vm13 = vcmp.lt.s32.totalorder %v15812_v8, 1  ;;  %vm3175_vm2 = vcmp.lt.s32.totalorder %v15812_v8, 7  ;;  %v21069_v8 = vld [vmem:[%s21238_s9] ss:$0 sm:$0xff] }
 0x23e   : > { %12518 = vmatprep.mubr.msk.bf16.mxu0 %vm21345_vm0, %v21410_v30 }
 0x240   : > { %v2043_v41 = vpop.f32.mrb[172].mxu0 }
 0x241   : > { %v2306_v45 = vadd.f32 %v2043_v41, %v15646_v18  ;;  %v12412_v57 = vpop.f32.mrb[173].mxu0 }
 0x242   : > { %v2046_v4 = vpop.f32.mrb[174].mxu0 }
 0x243   : > { %v2307_v19 = vadd.f32 %v2046_v4, %v15652_v47  ;;  %v2379_v52 = vadd.f32 %v15803_v6, %v2306_v45  ;;  %v12413_v12 = vpop.f32.mrb[175].mxu0 }
 0x245   : > { %v15814_v21 = vsel %vm2842_vm11, %v2379_v52, 0.0  ;;  %v2380_v18 = vadd.f32 %v15803_v6, %v2307_v19  ;;  %12519 = vmatmul.mubr.msk.bf16.gmra.mrb[24].mxu0 %vm701_vm1, %v14545_v29  ;;  %vm2855_vm11 = vcmp.eq.s32.totalorder %v15675_v54, 1 }
 0x246   : > { %21462 = vst [vmem:[#allocation68_spill] sm:$0xff] %v15814_v21  ;;  %12522 = vmatprep.mubr.msk.bf16.mxu0 %vm21345_vm0, %v21410_v30  ;;  %v21253_v12 = vrot.slane %v15814_v21, 7 }
 0x247   : > { %v15821_v47 = vsel %vm2843_vm12, %v2380_v18, 0.0  ;;  %vm2856_vm12 = vcmp.eq.s32.totalorder %v15488_v22, 1 }
 0x248   : > { %21463 = vst [vmem:[#allocation69_spill] sm:$0xff] %v15821_v47  ;;  %v2975_v44 = vrot.slane %v15821_v47, 7  ;;  %v2051_v52 = vpop.f32.mrb[176].mxu0 }
 0x249   : > { %v2308_v4 = vadd.f32 %v2051_v52, %v15662_v16  ;;  %v12416_v19 = vpop.f32.mrb[177].mxu0  ;;  %v3110_v16 = vrot.slane %v15821_v47, 1  ;;  %v21512_v47 = vld [vmem:[#allocation41_spill] sm:$0xff] }
 0x24a   : > { %v15834_v41 = vsel %vm3042_vm13, %v21253_v12, %v2975_v44  ;;  %v2054_v13 = vpop.f32.mrb[178].mxu0 }
 0x24b   : > { %21464 = vst [vmem:[#allocation70_spill] sm:$0xff] %v15834_v41  ;;  %v2381_v45 = vadd.f32 %v15803_v6, %v2308_v4  ;;  %v2309_v57 = vadd.f32 %v2054_v13, %v15668_v62  ;;  %v12417_v29 = vpop.f32.mrb[179].mxu0  ;;  %v21254_v62 = vrot.slane %v15814_v21, 1 }
 0x24d   : > { %v2382_v18 = vadd.f32 %v15803_v6, %v2309_v57  ;;  %12523 = vmatmul.mubr.msk.bf16.gmra.mrb[28].mxu0 %vm701_vm1, %v14546_v3  ;;  %v2910_v59 = vsel %vm2844_vm14, %v2381_v45, 0.0  ;;  %vm2857_vm14 = vcmp.eq.s32.totalorder %v15687_v58, 1 }
 0x24e   : > { %v2976_v52 = vrot.slane %v2910_v59, 7  ;;  %v3111_v19 = vrot.slane %v2910_v59, 1  ;;  %12526 = vmatprep.mubr.msk.bf16.mxu0 %vm21345_vm0, %v21410_v30 }
 0x24f   : > { %v2911_v4 = vsel %vm2845_vm15, %v2382_v18, 0.0  ;;  %v15860_v18 = vsel %vm3175_vm2, %v21254_v62, %v3110_v16  ;;  %vm2858_vm15 = vcmp.eq.s32.totalorder %v15512_v49, 1 }
 0x250   : > { %v2059_v13 = vpop.f32.mrb[180].mxu0  ;;  %v13549_v1 = vpack.i.bf16 %v2911_v4, %v2910_v59  ;;  %v2977_v29 = vrot.slane %v2911_v4, 7  ;;  %v3112_v12 = vrot.slane %v2911_v4, 1  ;;  %v15848_v57 = vsel %vm3042_vm13, %v2975_v44, %v2976_v52  ;;  %21466 = vst [vmem:[#allocation72_spill] sm:$0xff] %v15860_v18  ;;  %v14548_v4 = vld [vmem:[%s14732_s24 + $0x108] sm:$0xff]  }
 0x251   : > { %v2310_v3 = vadd.f32 %v2059_v13, %v15678_v11  ;;  %v12420_v45 = vpop.f32.mrb[181].mxu0  ;;  %v15854_v41 = vsel %vm3175_vm2, %v3110_v16, %v3111_v19 }
 0x252   : > { %21465 = vst [vmem:[#allocation71_spill] sm:$0xff] %v15854_v41  ;;  %13550 = vrot.lane.b32.xlu0 %v13549_v1, %s14638_s28  ;;  %v2062_v44 = vpop.f32.mrb[182].mxu0  ;;  %v3238_v11 = vsel %vm3175_vm2, %v3111_v19, %v3112_v12  ;;  %v15868_v59 = vsel %vm3042_vm13, %v2976_v52, %v2977_v29  ;;  %v14553_v52 = vld [vmem:[%s21233_s4 + $0x40] sm:$0xff]  }
 0x253   : > { %v2383_v13 = vadd.f32 %v15803_v6, %v2310_v3  ;;  %v2311_v16 = vadd.f32 %v2062_v44, %v15682_v24  ;;  %v12421_v45 = vpop.f32.mrb[183].mxu0  ;;  %12546 = vmatprep.subr.bf16.mxu1 %v14553_v52 }
 0x254   : > { %12547 = vmatpush3.bf16.msra.mxu1 %v14553_v52 }
 0x255   : > { %v2384_v31 = vadd.f32 %v15803_v6, %v2311_v16  ;;  %12527 = vmatmul.mubr.msk.bf16.gmra.mrb[32].mxu0 %vm701_vm1, %v14547_v34  ;;  %v2912_v19 = vsel %vm2846_vm3, %v2383_v13, 0.0  ;;  %vm2859_vm3 = vcmp.eq.s32.totalorder %v15700_v10, 1 }
 0x256   : > { %v2978_v1 = vrot.slane %v2912_v19, 7  ;;  %v3113_v62 = vrot.slane %v2912_v19, 1  ;;  %12530 = vmatprep.mubr.msk.bf16.mxu0 %vm21345_vm0, %v21410_v30 }
 0x257   : > { %v15882_v3 = vsel %vm2847_vm4, %v2384_v31, 0.0  ;;  %vm2860_vm4 = vcmp.eq.s32.totalorder %v15525_v53, 1 }
 0x258   : > { %v2067_v24 = vpop.f32.mrb[184].mxu0  ;;  %v13554_v23 = vpack.i.bf16 %v15882_v3, %v2912_v19  ;;  %v3114_v34 = vrot.slane %v15882_v3, 1  ;;  %v3237_v13 = vsel %vm3175_vm2, %v3112_v12, %v3113_v62  ;;  %v15893_v31 = vsel %vm3042_vm13, %v2977_v29, %v2978_v1  ;;  %v14554_v19 = vld [vmem:[%s21233_s4 + $0x48] sm:$0xff]  }
 0x259   : > { %v2312_v16 = vadd.f32 %v2067_v24, %v15692_v33  ;;  %v12424_v45 = vpop.f32.mrb[185].mxu0  ;;  %v13559_v18 = vpack.i.bf16 %v3237_v13, %v3238_v11  ;;  %v21467_v33 = vrot.slane %v15882_v3, 7  ;;  %12548 = vmatprep.subr.bf16.mxu1 %v14554_v19 }
 0x25a   : > { %13555 = vrot.lane.b32.xlu1 %v13554_v23, %s14638_s28  ;;  %v2070_v44 = vpop.f32.mrb[186].mxu0  ;;  %v3236_v12 = vsel %vm3175_vm2, %v3113_v62, %v3114_v34  ;;  %12549 = vmatpush3.bf16.msra.mxu1 %v14554_v19  ;;  %v14556_v19 = vld [vmem:[%s21233_s4 + $0x58] sm:$0xff]  }
 0x25b   : > { %v15906_v11 = vsel %vm3042_vm13, %v2978_v1, %v21467_v33  ;;  %v2385_v29 = vadd.f32 %v15803_v6, %v2312_v16  ;;  %v2313_v52 = vadd.f32 %v2070_v44, %v15698_v50  ;;  %v12425_v24 = vpop.f32.mrb[187].mxu0  ;;  %v14555_v1 = vld [vmem:[%s21233_s4 + $0x50] sm:$0xff]  }
 0x25c   : > { %12550 = vmatprep.subr.bf16.mxu1 %v14555_v1 }
 0x25d   : > { %v15911_v56 = vsel %vm2848_vm5, %v2385_v29, 0.0  ;;  %v2386_v62 = vadd.f32 %v15803_v6, %v2313_v52  ;;  %12531 = vmatmul.mubr.msk.bf16.gmra.mrb[36].mxu0 %vm701_vm1, %v14548_v4  ;;  %vm2861_vm5 = vcmp.eq.s32.totalorder %v15711_v0, 1 }
 0x25e   : > { %21468 = vst [vmem:[#allocation73_spill] sm:$0xff] %v15911_v56  ;;  %13560 = vrot.lane.b32.xlu1 %v13559_v18, %s14639_s19  ;;  %12534 = vmatprep.mubr.msk.bf16.mxu0 %vm21345_vm0, %v21410_v30  ;;  %v3115_v25 = vrot.slane %v15911_v56, 1  ;;  %v14549_v18 = vld [vmem:[%s14732_s24 + $0x110] sm:$0xff]  }
 0x25f   : > { %v15922_v50 = vsel %vm2849_vm6, %v2386_v62, 0.0  ;;  %12551 = vmatpush3.bf16.msra.mxu1 %v14555_v1  ;;  %vm2862_vm6 = vcmp.eq.s32.totalorder %v15542_v61, 1 }
 0x260   : > { %21469 = vst [vmem:[#allocation74_spill] sm:$0xff] %v15922_v50  ;;  %v2075_v23 = vpop.f32.mrb[188].mxu0  ;;  %v13564_v44 = vpack.i.bf16 %v15922_v50, %v15911_v56  ;;  %v3235_v4 = vsel %vm3175_vm2, %v3114_v34, %v3115_v25  ;;  %12552 = vmatprep.subr.bf16.mxu1 %v14556_v19 }
 0x261   : > { %v2314_v13 = vadd.f32 %v2075_v23, %v15708_v26  ;;  %v12428_v16 = vpop.f32.mrb[189].mxu0  ;;  %v13569_v45 = vpack.i.bf16 %v3235_v4, %v3236_v12  ;;  %v3116_v26 = vrot.slane %v15922_v50, 1 }
 0x262   : > { %13565 = vrot.lane.b32.xlu0 %v13564_v44, %s14638_s28  ;;  %v2078_v33 = vpop.f32.mrb[190].mxu0  ;;  %v14550_v16 = vld [vmem:[%s14732_s24 + $0x118] sm:$0xff]  }
 0x263   : > { %v2387_v29 = vadd.f32 %v15803_v6, %v2314_v13  ;;  %v2315_v52 = vadd.f32 %v2078_v33, %v15714_v37  ;;  %v12429_v34 = vpop.f32.mrb[191].mxu0  ;;  %12553 = vmatpush3.bf16.msra.mxu1 %v14556_v19  ;;  %v3234_v23 = vsel %vm3175_vm2, %v3115_v25, %v3116_v26 }
 0x265   : > { %v15939_v12 = vsel %vm2850_vm7, %v2387_v29, 0.0  ;;  %v2388_v24 = vadd.f32 %v15803_v6, %v2315_v52  ;;  %12535 = vmatmul.mubr.msk.bf16.gmra.mrb[40].mxu0 %vm701_vm1, %v14549_v18  ;;  %vm2863_vm7 = vcmp.eq.s32.totalorder %v15721_v35, 1 }
 0x266   : > { %21470 = vst [vmem:[#allocation75_spill] sm:$0xff] %v15939_v12  ;;  %13570 = vrot.lane.b32.xlu0 %v13569_v45, %s14639_s19  ;;  %v3117_v39 = vrot.slane %v15939_v12, 1  ;;  %12538 = vmatprep.mubr.msk.bf16.mxu0 %vm21345_vm0, %v21410_v30 }
 0x267   : > { %v15947_v37 = vsel %vm2851_vm8, %v2388_v24, 0.0  ;;  %vm2864_vm8 = vcmp.eq.s32.totalorder %v15558_v40, 1 }
 0x268   : > { %21471 = vst [vmem:[#allocation76_spill] sm:$0xff] %v15947_v37  ;;  %v2083_v48 = vpop.f32.mrb[192].mxu0  ;;  %v13574_v62 = vpack.i.bf16 %v15947_v37, %v15939_v12  ;;  %v3233_v1 = vsel %vm3175_vm2, %v3116_v26, %v3117_v39  ;;  %v3118_v25 = vrot.slane %v15947_v37, 1 }
 0x269   : > { %v2316_v44 = vadd.f32 %v2083_v48, %v15724_v46  ;;  %v12432_v4 = vpop.f32.mrb[193].mxu0  ;;  %v13579_v13 = vpack.i.bf16 %v3233_v1, %v3234_v23 }
 0x26a   : > { %13575 = vrot.lane.b32.xlu0 %v13574_v62, %s14638_s28  ;;  %v2086_v18 = vpop.f32.mrb[194].mxu0  ;;  %v3232_v26 = vsel %vm3175_vm2, %v3117_v39, %v3118_v25 }
 0x26b   : > { %v2389_v45 = vadd.f32 %v15803_v6, %v2316_v44  ;;  %v2317_v19 = vadd.f32 %v2086_v18, %v15728_v5  ;;  %13580 = vrot.lane.b32.xlu1 %v13579_v13, %s14639_s19  ;;  %v12433_v33 = vpop.f32.mrb[195].mxu0  ;;  %v15987_v13 = vpop.permute.xlu1 %2753 }
 0x26d   : > { %v15964_v46 = vsel %vm2852_vm9, %v2389_v45, 0.0  ;;  %v2390_v29 = vadd.f32 %v15803_v6, %v2317_v19  ;;  %12539 = vmatmul.mubr.msk.bf16.gmra.mrb[44].mxu0 %vm701_vm1, %v14550_v16  ;;  %vm2854_vm1 = vcmp.eq.s32.totalorder %v15470_v17, 1  ;;  %vm2865_vm9 = vcmp.eq.s32.totalorder %v15733_v15, 1 }
 0x26e   : > { %21472 = vst [vmem:[#allocation77_spill] sm:$0xff] %v15964_v46  ;;  %v3119_v28 = vrot.slane %v15964_v46, 1  ;;  %12770 = vmatprep.mubr.msk.bf16.mxu0 %vm21345_vm0, %v21410_v30 }
 0x26f   : > { %v15971_v52 = vsel %vm2853_vm10, %v2390_v29, 0.0  ;;  %vm2866_vm10 = vcmp.eq.s32.totalorder %v15567_v9, 1 }
 0x270   : > { %21473 = vst [vmem:[#allocation78_spill] sm:$0xff] %v15971_v52  ;;  %v2091_v5 = vpop.f32.mrb[196].mxu0  ;;  %v13584_v34 = vpack.i.bf16 %v15971_v52, %v15964_v46  ;;  %v3231_v32 = vsel %vm3175_vm2, %v3118_v25, %v3119_v28  ;;  %v3120_v39 = vrot.slane %v15971_v52, 1 }
 0x271   : > { %v2318_v24 = vadd.f32 %v2091_v5, %v15741_v63  ;;  %v12436_v48 = vpop.f32.mrb[197].mxu0  ;;  %v13589_v62 = vpack.i.bf16 %v3231_v32, %v3232_v26 }
 0x272   : > { %13585 = vrot.lane.b32.xlu1 %v13584_v34, %s14638_s28  ;;  %v2094_v1 = vpop.f32.mrb[198].mxu0  ;;  %v3230_v54 = vsel %vm3175_vm2, %v3119_v28, %v3120_v39  ;;  %v16004_v34 = vpop.permute.xlu1 %2759 }
 0x273   : > { %v2391_v23 = vadd.f32 %v15803_v6, %v2318_v24  ;;  %v2319_v44 = vadd.f32 %v2094_v1, %v15747_v2  ;;  %13590 = vrot.lane.b32.xlu0 %v13589_v62, %s14639_s19  ;;  %v12437_v4 = vpop.f32.mrb[199].mxu0 }
 0x275   : > { %v15989_v63 = vsel %vm2854_vm1, %v2391_v23, 0.0  ;;  %v2392_v17 = vadd.f32 %v15803_v6, %v2319_v44 }
 0x276   : > { %21474 = vst [vmem:[#allocation79_spill] sm:$0xff] %v15989_v63  ;;  %v3121_v16 = vrot.slane %v15989_v63, 1  ;;  %v16023_v44 = vpop.permute.xlu1 %2765 }
 0x277   : > { %v15993_v18 = vsel %vm2855_vm11, %v2392_v17, 0.0 }
 0x278   : > { %21475 = vst [vmem:[#allocation80_spill] sm:$0xff] %v15993_v18  ;;  %v2099_v45 = vpop.f32.mrb[200].mxu0  ;;  %v13594_v2 = vpack.i.bf16 %v15993_v18, %v15989_v63  ;;  %v3229_v19 = vsel %vm3175_vm2, %v3120_v39, %v3121_v16 }
 0x279   : > { %v2320_v33 = vadd.f32 %v2099_v45, %v15757_v27  ;;  %v12440_v25 = vpop.f32.mrb[201].mxu0  ;;  %v13599_v29 = vpack.i.bf16 %v3229_v19, %v3230_v54  ;;  %v3122_v27 = vrot.slane %v15993_v18, 1 }
 0x27a   : > { %13595 = vrot.lane.b32.xlu0 %v13594_v2, %s14638_s28  ;;  %v2102_v5 = vpop.f32.mrb[202].mxu0  ;;  %v16037_v25 = vpop.permute.xlu1 %2771 }
 0x27b   : > { %v2393_v32 = vadd.f32 %v15803_v6, %v2320_v33  ;;  %v2321_v26 = vadd.f32 %v2102_v5, %v15763_v51  ;;  %13600 = vrot.lane.b32.xlu1 %v13599_v29, %s14639_s19  ;;  %v12441_v24 = vpop.f32.mrb[203].mxu0  ;;  %v3228_v58 = vsel %vm3175_vm2, %v3121_v16, %v3122_v27 }
 0x27d   : > { %v16011_v28 = vsel %vm2856_vm12, %v2393_v32, 0.0  ;;  %v2394_v22 = vadd.f32 %v15803_v6, %v2321_v26 }
 0x27e   : > { %21476 = vst [vmem:[#allocation81_spill] sm:$0xff] %v16011_v28  ;;  %v3123_v48 = vrot.slane %v16011_v28, 1 }
 0x27f   : > { %v16015_v62 = vsel %vm2857_vm14, %v2394_v22, 0.0 }
 0x280   : > { %21477 = vst [vmem:[#allocation82_spill] sm:$0xff] %v16015_v62  ;;  %v2107_v1 = vpop.f32.mrb[204].mxu0  ;;  %v13604_v23 = vpack.i.bf16 %v16015_v62, %v16011_v28  ;;  %v3227_v51 = vsel %vm3175_vm2, %v3122_v27, %v3123_v48  ;;  %v3124_v16 = vrot.slane %v16015_v62, 1 }
 0x281   : > { %v2322_v4 = vadd.f32 %v2107_v1, %v15773_v20  ;;  %v12444_v39 = vpop.f32.mrb[205].mxu0  ;;  %v13609_v17 = vpack.i.bf16 %v3227_v51, %v3228_v58  ;;  %v16054_v58 = vpop.permute.xlu1 %2777 }
 0x282   : > { %13605 = vrot.lane.b32.xlu1 %v13604_v23, %s14638_s28  ;;  %v2110_v45 = vpop.f32.mrb[206].mxu0  ;;  %v3226_v10 = vsel %vm3175_vm2, %v3123_v48, %v3124_v16 }
 0x283   : > { %v2395_v2 = vadd.f32 %v15803_v6, %v2322_v4  ;;  %v2323_v19 = vadd.f32 %v2110_v45, %v15777_v14  ;;  %13610 = vrot.lane.b32.xlu0 %v13609_v17, %s14639_s19  ;;  %v12445_v54 = vpop.f32.mrb[207].mxu0 }
 0x285   : > { %v16033_v33 = vsel %vm2858_vm15, %v2395_v2, 0.0  ;;  %v2396_v20 = vadd.f32 %v15803_v6, %v2323_v19 }
 0x286   : > { %21478 = vst [vmem:[#allocation83_spill] sm:$0xff] %v16033_v33  ;;  %v3125_v49 = vrot.slane %v16033_v33, 1 }
 0x287   : > { %v16039_v29 = vsel %vm2859_vm3, %v2396_v20, 0.0  ;;  %v16072_v20 = vpop.permute.xlu1 %2783 }
 0x288   : > { %21479 = vst [vmem:[#allocation84_spill] sm:$0xff] %v16039_v29  ;;  %v2115_v5 = vpop.f32.mrb[208].mxu0  ;;  %v13614_v14 = vpack.i.bf16 %v16039_v29, %v16033_v33  ;;  %v3225_v32 = vsel %vm3175_vm2, %v3124_v16, %v3125_v49 }
 0x289   : > { %v2324_v26 = vadd.f32 %v2115_v5, %v15787_v36  ;;  %v12448_v24 = vpop.f32.mrb[209].mxu0  ;;  %v13619_v27 = vpack.i.bf16 %v3225_v32, %v3226_v10  ;;  %v3126_v36 = vrot.slane %v16039_v29, 1 }
 0x28a   : > { %13615 = vrot.lane.b32.xlu0 %v13614_v14, %s14638_s28  ;;  %v2118_v22 = vpop.f32.mrb[210].mxu0 }
 0x28b   : > { %v2397_v1 = vadd.f32 %v15803_v6, %v2324_v26  ;;  %v2325_v23 = vadd.f32 %v2118_v22, %v15793_v7  ;;  %13620 = vrot.lane.b32.xlu1 %v13619_v27, %s14639_s19  ;;  %v12449_v51 = vpop.f32.mrb[211].mxu0  ;;  %v3224_v0 = vsel %vm3175_vm2, %v3125_v49, %v3126_v36  ;;  %v16085_v27 = vpop.permute.xlu1 %2789 }
 0x28d   : > { %v16057_v48 = vsel %vm2860_vm4, %v2397_v1, 0.0  ;;  %v2398_v53 = vadd.f32 %v15803_v6, %v2325_v23 }
 0x28e   : > { %21480 = vst [vmem:[#allocation85_spill] sm:$0xff] %v16057_v48  ;;  %v3127_v4 = vrot.slane %v16057_v48, 1 }
 0x28f   : > { %v16061_v39 = vsel %vm2861_vm5, %v2398_v53, 0.0  ;;  %vm2874_vm5 = vcmp.eq.s32.totalorder %v21512_v47, 1 }
 0x290   : > { %21481 = vst [vmem:[#allocation86_spill] sm:$0xff] %v16061_v39  ;;  %v2123_v17 = vpop.f32.mrb[212].mxu0  ;;  %v13624_v7 = vpack.i.bf16 %v16061_v39, %v16057_v48  ;;  %v3223_v45 = vsel %vm3175_vm2, %v3126_v36, %v3127_v4 }
 0x291   : > { %v2326_v2 = vadd.f32 %v2123_v17, %v15231_v43  ;;  %v12452_v19 = vpop.f32.mrb[213].mxu0  ;;  %v13629_v54 = vpack.i.bf16 %v3223_v45, %v3224_v0  ;;  %v3128_v43 = vrot.slane %v16061_v39, 1  ;;  %v16104_v0 = vpop.permute.xlu1 %2795 }
 0x292   : > { %13625 = vrot.lane.b32.xlu1 %v13624_v7, %s14638_s28  ;;  %v2126_v16 = vpop.f32.mrb[214].mxu0 }
 0x293   : > { %v2399_v5 = vadd.f32 %v15803_v6, %v2326_v2  ;;  %v2327_v14 = vadd.f32 %v2126_v16, %v15239_v60  ;;  %13630 = vrot.lane.b32.xlu0 %v13629_v54, %s14639_s19  ;;  %v12453_v32 = vpop.f32.mrb[215].mxu0  ;;  %v3222_v35 = vsel %vm3175_vm2, %v3127_v4, %v3128_v43 }
 0x295   : > { %v16079_v49 = vsel %vm2862_vm6, %v2399_v5, 0.0  ;;  %v2400_v61 = vadd.f32 %v15803_v6, %v2327_v14 }
 0x296   : > { %21482 = vst [vmem:[#allocation87_spill] sm:$0xff] %v16079_v49  ;;  %v3129_v10 = vrot.slane %v16079_v49, 1 }
 0x297   : > { %v16083_v26 = vsel %vm2863_vm7, %v2400_v61, 0.0  ;;  %v21486_v61 = vld [vmem:[#allocation2_spill] sm:$0xff] }
 0x298   : > { %21483 = vst [vmem:[#allocation88_spill] sm:$0xff] %v16083_v26  ;;  %v2131_v24 = vpop.f32.mrb[216].mxu0  ;;  %v13634_v60 = vpack.i.bf16 %v16083_v26, %v16079_v49  ;;  %v3221_v22 = vsel %vm3175_vm2, %v3128_v43, %v3129_v10  ;;  %v3130_v4 = vrot.slane %v16083_v26, 1 }
 0x299   : > { %v2328_v1 = vadd.f32 %v2131_v24, %v15266_v38  ;;  %v12456_v23 = vpop.f32.mrb[217].mxu0  ;;  %v13639_v51 = vpack.i.bf16 %v3221_v22, %v3222_v35  ;;  %v21487_v22 = vld [vmem:[#allocation59_spill] sm:$0xff]  ;;  %v16122_v35 = vpop.permute.xlu1 %2801 }
 0x29a   : > { %13635 = vrot.lane.b32.xlu0 %v13634_v60, %s14638_s28  ;;  %v2134_v36 = vpop.f32.mrb[218].mxu0  ;;  %v3220_v15 = vsel %vm3175_vm2, %v3129_v10, %v3130_v4  ;;  %vm2867_vm1 = vcmp.eq.s32.totalorder %v21487_v22, 1 }
 0x29b   : > { %v2401_v53 = vadd.f32 %v15803_v6, %v2328_v1  ;;  %v2329_v17 = vadd.f32 %v2134_v36, %v15275_v55  ;;  %13640 = vrot.lane.b32.xlu1 %v13639_v51, %s14639_s19  ;;  %v12457_v7 = vpop.f32.mrb[219].mxu0 }
 0x29c   : > { %v21490_v7 = vld [vmem:[#allocation3_spill] sm:$0xff] }
 0x29d   : > { %v16101_v45 = vsel %vm2864_vm8, %v2401_v53, 0.0  ;;  %v2402_v38 = vadd.f32 %v15803_v6, %v2329_v17 }
 0x29e   : > { %21484 = vst [vmem:[#allocation89_spill] sm:$0xff] %v16101_v45  ;;  %v3131_v40 = vrot.slane %v16101_v45, 1 }
 0x29f   : > { %v16107_v2 = vsel %vm2865_vm9, %v2402_v38, 0.0  ;;  %vm3770_vm9 = vcmask 261120  }
 0x2a0   : > { %21485 = vst [vmem:[#allocation90_spill] sm:$0xff] %v16107_v2  ;;  %v2139_v19 = vpop.f32.mrb[220].mxu0  ;;  %v13644_v55 = vpack.i.bf16 %v16107_v2, %v16101_v45  ;;  %v3219_v54 = vsel %vm3175_vm2, %v3130_v4, %v3131_v40 }
 0x2a1   : > { %v2330_v16 = vadd.f32 %v2139_v19, %v15285_v42  ;;  %v12460_v5 = vpop.f32.mrb[221].mxu0  ;;  %v13649_v14 = vpack.i.bf16 %v3219_v54, %v3220_v15  ;;  %v3132_v42 = vrot.slane %v16107_v2, 1  ;;  %v16139_v54 = vpop.permute.xlu1 %2807 }
 0x2a2   : > { %13645 = vrot.lane.b32.xlu1 %v13644_v55, %s14638_s28  ;;  %v2142_v32 = vpop.f32.mrb[222].mxu0  ;;  %v21491_v55 = vld [vmem:[#allocation33_spill] sm:$0xff]  ;;  %v21492_v5 = vld [vmem:[#allocation4_spill] sm:$0xff] }
 0x2a3   : > { %v2403_v43 = vadd.f32 %v15803_v6, %v2330_v16  ;;  %v2331_v24 = vadd.f32 %v2142_v32, %v21486_v61  ;;  %13650 = vrot.lane.b32.xlu0 %v13649_v14, %s14639_s19  ;;  %v12461_v60 = vpop.f32.mrb[223].mxu0  ;;  %v3218_v17 = vsel %vm3175_vm2, %v3131_v40, %v3132_v42  ;;  %vm2868_vm11 = vcmp.eq.s32.totalorder %v21491_v55, 1 }
 0x2a5   : > { %v16125_v10 = vsel %vm2866_vm10, %v2403_v43, 0.0  ;;  %v2404_v9 = vadd.f32 %v15803_v6, %v2331_v24  ;;  %v21493_v43 = vld [vmem:[#allocation61_spill] sm:$0xff]  ;;  %vm3837_vm10 = vcmask 523264  }
 0x2a6   : > { %21488 = vst [vmem:[#allocation2_spill] sm:$0xff] %v16125_v10  ;;  %v3133_v1 = vrot.slane %v16125_v10, 1  ;;  %vm2869_vm12 = vcmp.eq.s32.totalorder %v21493_v43, 1 }
 0x2a7   : > { %v16129_v23 = vsel %vm2867_vm1, %v2404_v9, 0.0  ;;  %vm2878_vm1 = vcmp.eq.s32.totalorder %v15987_v13, 1 }
 0x2a8   : > { %21489 = vst [vmem:[#allocation59_spill] sm:$0xff] %v16129_v23  ;;  %v2147_v51 = vpop.f32.mrb[224].mxu0  ;;  %v13654_v36 = vpack.i.bf16 %v16129_v23, %v16125_v10  ;;  %v3217_v53 = vsel %vm3175_vm2, %v3132_v42, %v3133_v1  ;;  %v3134_v40 = vrot.slane %v16129_v23, 1  ;;  %v16153_v42 = vpop.permute.xlu1 %2813 }
 0x2a9   : > { %v2332_v4 = vadd.f32 %v2147_v51, %v21490_v7  ;;  %v12464_v38 = vpop.f32.mrb[225].mxu0  ;;  %v13659_v19 = vpack.i.bf16 %v3217_v53, %v3218_v17  ;;  %v21496_v17 = vld [vmem:[#allocation5_spill] sm:$0xff] }
 0x2aa   : > { %13655 = vrot.lane.b32.xlu0 %v13654_v36, %s14638_s28  ;;  %v2150_v15 = vpop.f32.mrb[226].mxu0  ;;  %v3216_v53 = vsel %vm3175_vm2, %v3133_v1, %v3134_v40 }
 0x2ab   : > { %v2405_v16 = vadd.f32 %v15803_v6, %v2332_v4  ;;  %v2333_v14 = vadd.f32 %v2150_v15, %v21492_v5  ;;  %13660 = vrot.lane.b32.xlu1 %v13659_v19, %s14639_s19  ;;  %v12465_v32 = vpop.f32.mrb[227].mxu0  ;;  %v21497_v19 = vld [vmem:[#allocation36_spill] sm:$0xff] }
 0x2ac   : > { %vm2870_vm14 = vcmp.eq.s32.totalorder %v21497_v19, 1  ;;  %v21499_v32 = vld [vmem:[#allocation63_spill] sm:$0xff] }
 0x2ad   : > { %v16147_v61 = vsel %vm2868_vm11, %v2405_v16, 0.0  ;;  %v2406_v24 = vadd.f32 %v15803_v6, %v2333_v14  ;;  %v21498_v16 = vld [vmem:[#allocation6_spill] sm:$0xff]  ;;  %vm2871_vm15 = vcmp.eq.s32.totalorder %v21499_v32, 1 }
 0x2ae   : > { %21494 = vst [vmem:[#allocation3_spill] sm:$0xff] %v16147_v61  ;;  %v3135_v60 = vrot.slane %v16147_v61, 1 }
 0x2af   : > { %v16151_v22 = vsel %vm2869_vm12, %v2406_v24, 0.0  ;;  %v16172_v24 = vpop.permute.xlu1 %2819 }
 0x2b0   : > { %21495 = vst [vmem:[#allocation33_spill] sm:$0xff] %v16151_v22  ;;  %v2155_v9 = vpop.f32.mrb[228].mxu0  ;;  %v13664_v51 = vpack.i.bf16 %v16151_v22, %v16147_v61  ;;  %v3215_v36 = vsel %vm3175_vm2, %v3134_v40, %v3135_v60  ;;  %v3136_v1 = vrot.slane %v16151_v22, 1 }
 0x2b1   : > { %v2334_v7 = vadd.f32 %v2155_v9, %v21496_v17  ;;  %v12468_v4 = vpop.f32.mrb[229].mxu0  ;;  %v13669_v38 = vpack.i.bf16 %v3215_v36, %v3216_v53 }
 0x2b2   : > { %13665 = vrot.lane.b32.xlu1 %v13664_v51, %s14638_s28  ;;  %v2158_v55 = vpop.f32.mrb[230].mxu0  ;;  %v21502_v4 = vld [vmem:[#allocation7_spill] sm:$0xff] }
 0x2b3   : > { %v2407_v15 = vadd.f32 %v15803_v6, %v2334_v7  ;;  %v2335_v5 = vadd.f32 %v2158_v55, %v21498_v16  ;;  %13670 = vrot.lane.b32.xlu0 %v13669_v38, %s14639_s19  ;;  %v12469_v14 = vpop.f32.mrb[231].mxu0  ;;  %v3214_v7 = vsel %vm3175_vm2, %v3135_v60, %v3136_v1  ;;  %v16189_v30 = vpop.permute.xlu1 %2825 }
 0x2b4   : > { %21505 = vst [vmem:[#allocation5_spill] sm:$0xff] %v16189_v30 }
 0x2b5   : > { %v16169_v43 = vsel %vm2870_vm14, %v2407_v15, 0.0  ;;  %v2408_v40 = vadd.f32 %v15803_v6, %v2335_v5  ;;  %v21503_v5 = vld [vmem:[#allocation8_spill] sm:$0xff]  ;;  %vm2880_vm14 = vcmp.eq.s32.totalorder %v16004_v34, 1 }
 0x2b6   : > { %21500 = vst [vmem:[#allocation4_spill] sm:$0xff] %v16169_v43  ;;  %v3137_v9 = vrot.slane %v16169_v43, 1 }
 0x2b7   : > { %v16175_v51 = vsel %vm2871_vm15, %v2408_v40, 0.0  ;;  %v21504_v40 = vld [vmem:[#allocation39_spill] sm:$0xff]  ;;  %vm3993_vm15 = vcmask 1043456  }
 0x2b8   : > { %21501 = vst [vmem:[#allocation61_spill] sm:$0xff] %v16175_v51  ;;  %v2163_v36 = vpop.f32.mrb[232].mxu0  ;;  %v13674_v53 = vpack.i.bf16 %v16175_v51, %v16169_v43  ;;  %v3213_v17 = vsel %vm3175_vm2, %v3136_v1, %v3137_v9  ;;  %vm2872_vm3 = vcmp.eq.s32.totalorder %v21504_v40, 1  ;;  %v3138_v60 = vrot.slane %v16175_v51, 1 }
 0x2b9   : > { %v2336_v38 = vadd.f32 %v2163_v36, %v21502_v4  ;;  %v12472_v19 = vpop.f32.mrb[233].mxu0  ;;  %v13679_v55 = vpack.i.bf16 %v3213_v17, %v3214_v7  ;;  %v21507_v17 = vld [vmem:[#allocation65_spill] sm:$0xff] }
 0x2ba   : > { %13675 = vrot.lane.b32.xlu0 %v13674_v53, %s14638_s28  ;;  %v2166_v15 = vpop.f32.mrb[234].mxu0  ;;  %vm2873_vm4 = vcmp.eq.s32.totalorder %v21507_v17, 1  ;;  %v21511_v17 = vld [vmem:[#allocation10_spill] sm:$0xff] }
 0x2bb   : > { %v2409_v16 = vadd.f32 %v15803_v6, %v2336_v38  ;;  %v2337_v14 = vadd.f32 %v2166_v15, %v21503_v5  ;;  %13680 = vrot.lane.b32.xlu1 %v13679_v55, %s14639_s19  ;;  %v12473_v32 = vpop.f32.mrb[235].mxu0  ;;  %v3212_v55 = vsel %vm3175_vm2, %v3137_v9, %v3138_v60  ;;  %v21509_v15 = vld [vmem:[#allocation9_spill] sm:$0xff] }
 0x2bc   : > { %v16206_v32 = vpop.permute.xlu1 %2831 }
 0x2bd   : > { %v16192_v1 = vsel %vm2872_vm3, %v2409_v16, 0.0  ;;  %v2410_v36 = vadd.f32 %v15803_v6, %v2337_v14  ;;  %21510 = vst [vmem:[#allocation63_spill] sm:$0xff] %v16206_v32  ;;  %v21519_v32 = vld [vmem:[#allocation43_spill] sm:$0xff]  ;;  %vm4091_vm3 = vcmask 785408  }
 0x2be   : > { %21506 = vst [vmem:[#allocation36_spill] sm:$0xff] %v16192_v1  ;;  %v3139_v53 = vrot.slane %v16192_v1, 1  ;;  %vm2876_vm7 = vcmp.eq.s32.totalorder %v21519_v32, 1 }
 0x2bf   : > { %v16197_v7 = vsel %vm2873_vm4, %v2410_v36, 0.0 }
 0x2c0   : > { %21508 = vst [vmem:[#allocation6_spill] sm:$0xff] %v16197_v7  ;;  %v2171_v4 = vpop.f32.mrb[236].mxu0  ;;  %v13684_v38 = vpack.i.bf16 %v16197_v7, %v16192_v1  ;;  %v3211_v19 = vsel %vm3175_vm2, %v3138_v60, %v3139_v53  ;;  %v21514_v60 = vld [vmem:[#allocation67_spill] sm:$0xff] }
 0x2c1   : > { %v2338_v16 = vadd.f32 %v2171_v4, %v21509_v15  ;;  %v12476_v5 = vpop.f32.mrb[237].mxu0  ;;  %v13689_v14 = vpack.i.bf16 %v3211_v19, %v3212_v55  ;;  %vm2875_vm6 = vcmp.eq.s32.totalorder %v21514_v60, 1  ;;  %v16221_v55 = vpop.permute.xlu1 %2837 }
 0x2c2   : > { %13685 = vrot.lane.b32.xlu1 %v13684_v38, %s14638_s28  ;;  %v2174_v40 = vpop.f32.mrb[238].mxu0  ;;  %v3140_v38 = vrot.slane %v16197_v7, 1  ;;  %21516 = vst [vmem:[#allocation39_spill] sm:$0xff] %v16221_v55  ;;  %v21521_v7 = vld [vmem:[#allocation46_spill] sm:$0xff] }
 0x2c3   : > { %v2411_v36 = vadd.f32 %v15803_v6, %v2338_v16  ;;  %v2339_v41 = vadd.f32 %v2174_v40, %v21511_v17  ;;  %13690 = vrot.lane.b32.xlu0 %v13689_v14, %s14639_s19  ;;  %v12477_v21 = vpop.f32.mrb[239].mxu0  ;;  %v21517_v16 = vld [vmem:[#allocation11_spill] sm:$0xff]  ;;  %v21518_v17 = vld [vmem:[#allocation12_spill] sm:$0xff]  ;;  %vm2877_vm8 = vcmp.eq.s32.totalorder %v21521_v7, 1 }
 0x2c4   : > { %v13551_v40 = vpop.permute.xlu0 %13550  ;;  %v3210_v55 = vsel %vm3175_vm2, %v3139_v53, %v3140_v38 }
 0x2c5   : > { %v16213_v1 = vsel %vm2874_vm5, %v2411_v36, 0.0  ;;  %v2412_v9 = vadd.f32 %v15803_v6, %v2339_v41  ;;  %v13553_v30 = vunpack.i.h.bf16 %v13551_v40  ;;  %vm2882_vm5 = vcmp.eq.s32.totalorder %v16023_v44, 1 }
 0x2c6   : > { %21513 = vst [vmem:[#allocation7_spill] sm:$0xff] %v16213_v1  ;;  %v3141_v4 = vrot.slane %v16213_v1, 1 }
 0x2c7   : > { %v16218_v19 = vsel %vm2875_vm6, %v2412_v9, 0.0 }
 0x2c8   : > { %21515 = vst [vmem:[#allocation8_spill] sm:$0xff] %v16218_v19  ;;  %v2179_v15 = vpop.f32.mrb[240].mxu0  ;;  %v13694_v21 = vpack.i.bf16 %v16218_v19, %v16213_v1  ;;  %v3209_v41 = vsel %vm3175_vm2, %v3140_v38, %v3141_v4 }
 0x2c9   : > { %v2340_v47 = vadd.f32 %v2179_v15, %v21517_v16  ;;  %v12480_v5 = vpop.f32.mrb[241].mxu0  ;;  %v13699_v15 = vpack.i.bf16 %v3209_v41, %v3210_v55  ;;  %v3142_v16 = vrot.slane %v16218_v19, 1  ;;  %v3774_v19 = vsel %vm3770_vm9, %v15868_v59, %v13553_v30 }
 0x2ca   : > { %13695 = vrot.lane.b32.xlu1 %v13694_v21, %s14638_s28  ;;  %v2182_v14 = vpop.f32.mrb[242].mxu0 }
 0x2cb   : > { %v2413_v36 = vadd.f32 %v15803_v6, %v2340_v47  ;;  %v2341_v9 = vadd.f32 %v2182_v14, %v21518_v17  ;;  %v12481_v60 = vpop.f32.mrb[243].mxu0  ;;  %v13552_v47 = vunpack.i.l.bf16 %v13551_v40  ;;  %v3208_v7 = vsel %vm3175_vm2, %v3141_v4, %v3142_v16  ;;  %v21523_v17 = vld [vmem:[#allocation13_spill] sm:$0xff] }
 0x2cc   : > { %v13556_v1 = vpop.permute.xlu1 %13555 }
 0x2cd   : > { %v16235_v5 = vsel %vm2876_vm7, %v2413_v36, 0.0  ;;  %v2414_v21 = vadd.f32 %v15803_v6, %v2341_v9  ;;  %vm2884_vm7 = vcmp.eq.s32.totalorder %v16037_v25, 1 }
 0x2ce   : > { %21520 = vst [vmem:[#allocation65_spill] sm:$0xff] %v16235_v5  ;;  %13700 = vrot.lane.b32.xlu1 %v13699_v15, %s14639_s19  ;;  %v3143_v14 = vrot.slane %v16235_v5, 1 }
 0x2cf   : > { %v16241_v53 = vsel %vm2877_vm8, %v2414_v21, 0.0  ;;  %v3773_v21 = vsel %vm3770_vm9, %v15848_v57, %v13552_v47 }
 0x2d0   : > { %21522 = vst [vmem:[#allocation9_spill] sm:$0xff] %v16241_v53  ;;  %v13561_v32 = vpop.permute.xlu1 %13560  ;;  %v2187_v38 = vpop.f32.mrb[244].mxu0  ;;  %v13704_v55 = vpack.i.bf16 %v16241_v53, %v16235_v5  ;;  %v3207_v41 = vsel %vm3175_vm2, %v3142_v16, %v3143_v14  ;;  %v21524_v16 = vld [vmem:[#allocation14_spill] sm:$0xff]  ;;  %v3144_v57 = vrot.slane %v16241_v53, 1 }
 0x2d1   : > { %v13563_v40 = vunpack.i.h.bf16 %v13561_v32  ;;  %v13562_v36 = vunpack.i.l.bf16 %v13561_v32  ;;  %v2342_v9 = vadd.f32 %v2187_v38, %v21523_v17  ;;  %v12484_v60 = vpop.f32.mrb[245].mxu0  ;;  %v13709_v15 = vpack.i.bf16 %v3207_v41, %v3208_v7 }
 0x2d2   : > { %13705 = vrot.lane.b32.xlu0 %v13704_v55, %s14638_s28  ;;  %v2190_v5 = vpop.f32.mrb[246].mxu0  ;;  %v21526_v55 = vld [vmem:[#allocation49_spill] sm:$0xff]  ;;  %v13558_v41 = vunpack.i.h.bf16 %v13556_v1  ;;  %v13557_v7 = vunpack.i.l.bf16 %v13556_v1  ;;  %v3206_v60 = vsel %vm3175_vm2, %v3143_v14, %v3144_v57 }
 0x2d3   : > { %v3841_v51 = vsel %vm3837_vm10, %v3774_v19, %v13563_v40  ;;  %v3840_v43 = vsel %vm3837_vm10, %v3773_v21, %v13562_v36  ;;  %v2415_v4 = vadd.f32 %v15803_v6, %v2342_v9  ;;  %v2343_v32 = vadd.f32 %v2190_v5, %v21524_v16  ;;  %13710 = vrot.lane.b32.xlu1 %v13709_v15, %s14639_s19  ;;  %v12485_v38 = vpop.f32.mrb[247].mxu0  ;;  %v21527_v40 = vld [vmem:[#allocation50_spill] sm:$0xff] }
 0x2d4   : > { %v16262_v47 = vpack.c.bf16 %v3841_v51, %v3840_v43  ;;  %v13566_v30 = vpop.permute.xlu0 %13565  ;;  %vm2879_vm11 = vcmp.eq.s32.totalorder %v21526_v55, 1  ;;  %vm2881_vm12 = vcmp.eq.s32.totalorder %v21527_v40, 1  ;;  %v2980_v36 = vrot.slane %v15911_v56, 7 }
 0x2d5   : > { %v16264_v59 = vsel %vm2878_vm1, %v2415_v4, 0.0  ;;  %v2416_v19 = vadd.f32 %v15803_v6, %v2343_v32  ;;  %v21529_v4 = vld [vmem:[#allocation15_spill] sm:$0xff]  ;;  %v3776_v55 = vsel %vm3770_vm9, %v15906_v11, %v13558_v41  ;;  %v13568_v43 = vunpack.i.h.bf16 %v13566_v30 }
 0x2d6   : > { %21525 = vst [vmem:[#allocation10_spill] sm:$0xff] %v16264_v59  ;;  %v21277_v5 = vrot.slane %v16264_v59, 1  ;;  %v13567_v56 = vunpack.i.l.bf16 %v13566_v30  ;;  %v21531_v11 = vrot.slane %v15882_v3, 7  ;;  %v21532_v41 = vrot.slane %v15922_v50, 7 }
 0x2d7   : > { %v16272_v13 = vsel %vm2879_vm11, %v2416_v19, 0.0  ;;  %v3775_v19 = vsel %vm3770_vm9, %v15893_v31, %v13557_v7  ;;  %v16297_v31 = vld [vmem:[%s21233_s4] sm:$0xff]   ;;  %v3994_v3 = vrot.slane %v16262_v47, 4  ;;  %vm2886_vm1 = vcmp.eq.s32.totalorder %v16054_v58, 1 }
 0x2d8   : > { %21528 = vst [vmem:[#allocation41_spill] sm:$0xff] %v16272_v13  ;;  %v13571_v51 = vpop.permute.xlu0 %13570  ;;  %v2195_v17 = vpop.f32.mrb[248].mxu0  ;;  %v13714_v9 = vpack.i.bf16 %v16272_v13, %v16264_v59  ;;  %v3205_v1 = vsel %vm3175_vm2, %v3144_v57, %v21277_v5  ;;  %v3102_v30 = vsel %vm3042_vm13, %v21531_v11, %v2980_v36  ;;  %v3101_v7 = vsel %vm3042_vm13, %v2980_v36, %v21532_v41 }
 0x2d9   : > { %v13573_v15 = vunpack.i.h.bf16 %v13571_v51  ;;  %v13572_v21 = vunpack.i.l.bf16 %v13571_v51  ;;  %v2344_v16 = vadd.f32 %v2195_v17, %v21529_v4  ;;  %v12488_v32 = vpop.f32.mrb[249].mxu0  ;;  %v13719_v38 = vpack.i.bf16 %v3205_v1, %v3206_v60  ;;  %v21530_v51 = vld [vmem:[#allocation16_spill] sm:$0xff]  ;;  %12614 = vmatprep.subr.bf16.mxu1 %v16297_v31 }
 0x2da   : > { %13715 = vrot.lane.b32.xlu1 %v13714_v9, %s14638_s28  ;;  %v2198_v5 = vpop.f32.mrb[250].mxu0  ;;  %v3778_v34 = vsel %vm3770_vm9, %v3101_v7, %v13568_v43  ;;  %v2988_v58 = vrot.slane %v16011_v28, 7 }
 0x2db   : > { %v3843_v53 = vsel %vm3837_vm10, %v3776_v55, %v13573_v15  ;;  %v3842_v14 = vsel %vm3837_vm10, %v3775_v19, %v13572_v21  ;;  %v2417_v57 = vadd.f32 %v15803_v6, %v2344_v16  ;;  %v2345_v17 = vadd.f32 %v2198_v5, %v21530_v51  ;;  %13720 = vrot.lane.b32.xlu0 %v13719_v38, %s14639_s19  ;;  %v12489_v1 = vpop.f32.mrb[251].mxu0 }
 0x2dc   : > { %v16307_v9 = vpack.c.bf16 %v3843_v53, %v3842_v14  ;;  %v3146_v21 = vrot.slane %v16272_v13, 1  ;;  %v3777_v16 = vsel %vm3770_vm9, %v3102_v30, %v13567_v56  ;;  %v13576_v38 = vpop.permute.xlu0 %13575  ;;  %v2982_v55 = vrot.slane %v15939_v12, 7  ;;  %v21535_v56 = vld [vmem:[#allocation17_spill] sm:$0xff] }
 0x2dd   : > { %v16311_v5 = vsel %vm2880_vm14, %v2417_v57, 0.0  ;;  %v2418_v60 = vadd.f32 %v15803_v6, %v2345_v17  ;;  %v13581_v15 = vpop.permute.xlu1 %13580  ;;  %v21280_v14 = vrot.slane %v15947_v37, 7  ;;  %v13578_v41 = vunpack.i.h.bf16 %v13576_v38 }
 0x2de   : > { %21533 = vst [vmem:[#allocation67_spill] sm:$0xff] %v16311_v5  ;;  %v3147_v4 = vrot.slane %v16311_v5, 1  ;;  %v13583_v36 = vunpack.i.h.bf16 %v13581_v15  ;;  %v13582_v53 = vunpack.i.l.bf16 %v13581_v15  ;;  %v3995_v19 = vrot.slane %v16307_v9, 4 }
 0x2df   : > { %v16322_v32 = vsel %vm2881_vm12, %v2418_v60, 0.0  ;;  %v13577_v7 = vunpack.i.l.bf16 %v13576_v38  ;;  %vm2888_vm12 = vcmp.eq.s32.totalorder %v16072_v20, 1  ;;  %v2990_v20 = vrot.slane %v16033_v33, 7 }
 0x2e0   : > { %21534 = vst [vmem:[#allocation11_spill] sm:$0xff] %v16322_v32  ;;  %v3845_v57 = vsel %vm3837_vm10, %v3778_v34, %v13583_v36  ;;  %v3844_v51 = vsel %vm3837_vm10, %v3777_v16, %v13582_v53  ;;  %v2203_v17 = vpop.f32.mrb[252].mxu0  ;;  %v3996_v40 = vsel %vm3993_vm15, %v3994_v3, %v3995_v19  ;;  %v13724_v30 = vpack.i.bf16 %v16322_v32, %v16311_v5  ;;  %v21537_v3 = vld [vmem:[#allocation18_spill] sm:$0xff] }
 0x2e1   : > { %v16329_v1 = vpack.c.bf16 %v3845_v57, %v3844_v51  ;;  %v2346_v43 = vadd.f32 %v2203_v17, %v21535_v56  ;;  %v12492_v11 = vpop.f32.mrb[253].mxu0  ;;  %12554 = vmatprep.mubr.msk.bf16.mxu1 %vm4091_vm3, %v3996_v40  ;;  %v3203_v15 = vsel %vm3175_vm2, %v3146_v21, %v3147_v4  ;;  %v21536_v36 = vrot.slane %v16264_v59, 1  ;;  %v21538_v17 = vld [vmem:[#allocation51_spill] sm:$0xff]  ;;  %v16362_v40 = vld [vmem:[%s21232_s3] ss:$0 sm:$0xff] }
 0x2e2   : > { %v2206_v60 = vpop.f32.mrb[254].mxu0  ;;  %13725 = vrot.lane.b32.xlu0 %v13724_v30, %s14638_s28  ;;  %vm2883_vm4 = vcmp.eq.s32.totalorder %v21538_v17, 1  ;;  %v3148_v56 = vrot.slane %v16322_v32, 1  ;;  %v21539_v11 = vrot.slane %v15922_v50, 7  ;;  %v21542_v17 = vld [vmem:[#allocation19_spill] sm:$0xff] }
 0x2e3   : > { %v3204_v53 = vsel %vm3175_vm2, %v21536_v36, %v3146_v21  ;;  %v2419_v16 = vadd.f32 %v15803_v6, %v2346_v43  ;;  %v2347_v34 = vadd.f32 %v2206_v60, %v21537_v3  ;;  %v12493_v51 = vpop.f32.mrb[255].mxu0  ;;  %v3997_v38 = vrot.slane %v16329_v1, 4 }
 0x2e4   : > { %v13729_v57 = vpack.i.bf16 %v3203_v15, %v3204_v53  ;;  %v3100_v21 = vsel %vm3042_vm13, %v21539_v11, %v2982_v55  ;;  %v3099_v6 = vsel %vm3042_vm13, %v2982_v55, %v21280_v14  ;;  %v2984_v60 = vrot.slane %v15964_v46, 7  ;;  %v13586_v51 = vpop.permute.xlu1 %13585 }
 0x2e5   : > { %v16357_v43 = vsel %vm2882_vm5, %v2419_v16, 0.0  ;;  %v2420_v44 = vadd.f32 %v16362_v40, %v2347_v34  ;;  %v13591_v30 = vpop.permute.xlu0 %13590  ;;  %v3779_v55 = vsel %vm3770_vm9, %v3100_v21, %v13577_v7  ;;  %v3780_v16 = vsel %vm3770_vm9, %v3099_v6, %v13578_v41 }
 0x2e6   : > { %21540 = vst [vmem:[#allocation12_spill] sm:$0xff] %v16357_v43  ;;  %13730 = vrot.lane.b32.xlu1 %v13729_v57, %s14639_s19  ;;  %v3149_v15 = vrot.slane %v16357_v43, 1  ;;  %v13593_v36 = vunpack.i.h.bf16 %v13591_v30  ;;  %v13592_v53 = vunpack.i.l.bf16 %v13591_v30  ;;  %v3998_v34 = vsel %vm3993_vm15, %v3995_v19, %v3997_v38 }
 0x2e7   : > { %v16372_v3 = vsel %vm2883_vm4, %v2420_v44, 0.0  ;;  %v21282_v57 = vrot.slane %v15971_v52, 7  ;;  %12555 = vmatmul.mubr.msk.bf16.vlgmr.msra.gmra.mrb[92].mxu1 %vm4091_vm3, %v3998_v34  ;;  %v3202_v7 = vsel %vm3175_vm2, %v3147_v4, %v3148_v56  ;;  %v14558_v4 = vld [vmem:[%s21233_s4 + $0x8] sm:$0xff]   ;;  %v21543_v34 = vld [vmem:[#allocation20_spill] sm:$0xff]  ;;  %vm2890_vm4 = vcmp.eq.s32.totalorder %v16085_v27, 1 }
 0x2e8   : > { %21541 = vst [vmem:[#allocation43_spill] sm:$0xff] %v16372_v3  ;;  %v3847_v11 = vsel %vm3837_vm10, %v3780_v16, %v13593_v36  ;;  %v3846_v14 = vsel %vm3837_vm10, %v3779_v55, %v13592_v53  ;;  %v2211_v30 = vpop.f32.mrb[0].mxu0  ;;  %v13734_v19 = vpack.i.bf16 %v16372_v3, %v16357_v43  ;;  %v3201_v44 = vsel %vm3175_vm2, %v3148_v56, %v3149_v15  ;;  %v21544_v56 = vld [vmem:[#allocation52_spill] sm:$0xff] }
 0x2e9   : > { %v16381_v41 = vpack.c.bf16 %v3847_v11, %v3846_v14  ;;  %v2348_v21 = vadd.f32 %v2211_v30, %v21542_v17  ;;  %v12496_v6 = vpop.f32.mrb[1].mxu0  ;;  %12615 = vmatpush3.bf16.msra.mxu1 %v16297_v31  ;;  %v13588_v36 = vunpack.i.h.bf16 %v13586_v51  ;;  %v13739_v55 = vpack.i.bf16 %v3201_v44, %v3202_v7 }
 0x2ea   : > { %v2214_v53 = vpop.f32.mrb[2].mxu0  ;;  %v13587_v14 = vunpack.i.l.bf16 %v13586_v51  ;;  %13735 = vrot.lane.b32.xlu1 %v13734_v19, %s14638_s28  ;;  %vm2885_vm6 = vcmp.eq.s32.totalorder %v21544_v56, 1  ;;  %v3150_v31 = vrot.slane %v16372_v3, 1  ;;  %12616 = vmatprep.subr.bf16.mxu1 %v14558_v4  ;;  %v21545_v51 = vrot.slane %v15947_v37, 7  ;;  %v21548_v56 = vld [vmem:[#allocation21_spill] sm:$0xff] }
 0x2eb   : > { %v2421_v16 = vadd.f32 %v16362_v40, %v2348_v21  ;;  %v2349_v11 = vadd.f32 %v2214_v53, %v21543_v34  ;;  %v12497_v30 = vpop.f32.mrb[3].mxu0  ;;  %v3999_v17 = vrot.slane %v16381_v41, 4  ;;  %13740 = vrot.lane.b32.xlu0 %v13739_v55, %s14639_s19  ;;  %v3097_v21 = vsel %vm3042_vm13, %v2984_v60, %v21282_v57 }
 0x2ec   : > { %v3098_v7 = vsel %vm3042_vm13, %v21545_v51, %v2984_v60  ;;  %v2986_v44 = vrot.slane %v15989_v63, 7  ;;  %v3782_v51 = vsel %vm3770_vm9, %v3097_v21, %v13588_v36  ;;  %v13596_v60 = vpop.permute.xlu0 %13595 }
 0x2ed   : > { %v16408_v6 = vsel %vm2884_vm7, %v2421_v16, 0.0  ;;  %v2422_v19 = vadd.f32 %v16362_v40, %v2349_v11  ;;  %v13601_v25 = vpop.permute.xlu1 %13600  ;;  %12617 = vmatpush3.bf16.msra.mxu1 %v14558_v4  ;;  %v3781_v30 = vsel %vm3770_vm9, %v3098_v7, %v13587_v14  ;;  %v4000_v16 = vsel %vm3993_vm15, %v3997_v38, %v3999_v17 }
 0x2ee   : > { %21546 = vst [vmem:[#allocation46_spill] sm:$0xff] %v16408_v6  ;;  %v3151_v53 = vrot.slane %v16408_v6, 1  ;;  %v13603_v55 = vunpack.i.h.bf16 %v13601_v25  ;;  %v13602_v34 = vunpack.i.l.bf16 %v13601_v25  ;;  %v21284_v11 = vrot.slane %v15993_v18, 7  ;;  %12558 = vmatprep.mubr.msk.bf16.mxu1 %vm4091_vm3, %v4000_v16 }
 0x2ef   : > { %v16417_v46 = vsel %vm2885_vm6, %v2422_v19, 0.0  ;;  %v3200_v14 = vsel %vm3175_vm2, %v3149_v15, %v3150_v31  ;;  %v21549_v15 = vld [vmem:[#allocation22_spill] sm:$0xff]  ;;  %vm2892_vm6 = vcmp.eq.s32.totalorder %v16104_v0, 1  ;;  %v2994_v0 = vrot.slane %v16079_v49, 7 }
 0x2f0   : > { %21547 = vst [vmem:[#allocation13_spill] sm:$0xff] %v16417_v46  ;;  %v3849_v4 = vsel %vm3837_vm10, %v3782_v51, %v13603_v55  ;;  %v3848_v57 = vsel %vm3837_vm10, %v3781_v30, %v13602_v34  ;;  %v2219_v25 = vpop.f32.mrb[4].mxu0  ;;  %v13744_v38 = vpack.i.bf16 %v16417_v46, %v16408_v6  ;;  %v3199_v19 = vsel %vm3175_vm2, %v3150_v31, %v3151_v53 }
 0x2f1   : > { %v16426_v36 = vpack.c.bf16 %v3849_v4, %v3848_v57  ;;  %v2350_v7 = vadd.f32 %v2219_v25, %v21548_v56  ;;  %v12500_v21 = vpop.f32.mrb[5].mxu0  ;;  %v13598_v55 = vunpack.i.h.bf16 %v13596_v60  ;;  %v13749_v34 = vpack.i.bf16 %v3199_v19, %v3200_v14  ;;  %v21550_v56 = vld [vmem:[#allocation53_spill] sm:$0xff] }
 0x2f2   : > { %v2222_v51 = vpop.f32.mrb[6].mxu0  ;;  %v13597_v30 = vunpack.i.l.bf16 %v13596_v60  ;;  %13745 = vrot.lane.b32.xlu0 %v13744_v38, %s14638_s28  ;;  %vm2887_vm8 = vcmp.eq.s32.totalorder %v21550_v56, 1  ;;  %v3152_v21 = vrot.slane %v16417_v46, 1  ;;  %v21551_v31 = vrot.slane %v15971_v52, 7 }
 0x2f3   : > { %v2423_v16 = vadd.f32 %v16362_v40, %v2350_v7  ;;  %v2351_v57 = vadd.f32 %v2222_v51, %v21549_v15  ;;  %v12501_v4 = vpop.f32.mrb[7].mxu0  ;;  %v4001_v25 = vrot.slane %v16426_v36, 4  ;;  %13750 = vrot.lane.b32.xlu1 %v13749_v34, %s14639_s19  ;;  %v3095_v14 = vsel %vm3042_vm13, %v2986_v44, %v21284_v11 }
 0x2f4   : > { %v3096_v60 = vsel %vm3042_vm13, %v21551_v31, %v2986_v44  ;;  %v3784_v56 = vsel %vm3770_vm9, %v3095_v14, %v13598_v55  ;;  %v13606_v63 = vpop.permute.xlu1 %13605  ;;  %v21555_v55 = vld [vmem:[#allocation23_spill] sm:$0xff] }
 0x2f5   : > { %v16449_v7 = vsel %vm2886_vm1, %v2423_v16, 0.0  ;;  %v2424_v38 = vadd.f32 %v16362_v40, %v2351_v57  ;;  %v13611_v19 = vpop.permute.xlu0 %13610  ;;  %v3783_v4 = vsel %vm3770_vm9, %v3096_v60, %v13597_v30  ;;  %v4002_v44 = vsel %vm3993_vm15, %v3999_v17, %v4001_v25 }
 0x2f6   : > { %21552 = vst [vmem:[#allocation14_spill] sm:$0xff] %v16449_v7  ;;  %v3153_v51 = vrot.slane %v16449_v7, 1  ;;  %v13613_v34 = vunpack.i.h.bf16 %v13611_v19  ;;  %v13612_v15 = vunpack.i.l.bf16 %v13611_v19  ;;  %v21287_v16 = vrot.slane %v16015_v62, 7  ;;  %12559 = vmatmul.mubr.msk.bf16.gmra.mrb[96].mxu1 %vm4091_vm3, %v4002_v44 }
 0x2f7   : > { %v16456_v31 = vsel %vm2887_vm8, %v2424_v38, 0.0  ;;  %v3198_v19 = vsel %vm3175_vm2, %v3151_v53, %v3152_v21  ;;  %v21556_v53 = vld [vmem:[#allocation24_spill] sm:$0xff]  ;;  %vm2894_vm8 = vcmp.eq.s32.totalorder %v16122_v35, 1 }
 0x2f8   : > { %21553 = vst [vmem:[#allocation49_spill] sm:$0xff] %v16456_v31  ;;  %v3851_v57 = vsel %vm3837_vm10, %v3784_v56, %v13613_v34  ;;  %v3850_v11 = vsel %vm3837_vm10, %v3783_v4, %v13612_v15  ;;  %v2227_v28 = vpop.f32.mrb[8].mxu0  ;;  %v13754_v17 = vpack.i.bf16 %v16456_v31, %v16449_v7  ;;  %v3197_v38 = vsel %vm3175_vm2, %v3152_v21, %v3153_v51 }
 0x2f9   : > { %v16465_v30 = vpack.c.bf16 %v3851_v57, %v3850_v11  ;;  %v2352_v60 = vadd.f32 %v2227_v28, %v21555_v55  ;;  %v12504_v14 = vpop.f32.mrb[9].mxu0  ;;  %v13608_v34 = vunpack.i.h.bf16 %v13606_v63  ;;  %v13759_v15 = vpack.i.bf16 %v3197_v38, %v3198_v19  ;;  %v21557_v55 = vld [vmem:[#allocation54_spill] sm:$0xff] }
 0x2fa   : > { %v2230_v56 = vpop.f32.mrb[10].mxu0  ;;  %v13607_v4 = vunpack.i.l.bf16 %v13606_v63  ;;  %13755 = vrot.lane.b32.xlu1 %v13754_v17, %s14638_s28  ;;  %vm2889_vm11 = vcmp.eq.s32.totalorder %v21557_v55, 1  ;;  %v3154_v14 = vrot.slane %v16456_v31, 1  ;;  %v21558_v21 = vrot.slane %v15993_v18, 7 }
 0x2fb   : > { %21554 = vst [vmem:[#allocation50_spill] sm:$0xff] %v16465_v30  ;;  %v2425_v44 = vadd.f32 %v16362_v40, %v2352_v60  ;;  %v2353_v11 = vadd.f32 %v2230_v56, %v21556_v53  ;;  %v12505_v57 = vpop.f32.mrb[11].mxu0  ;;  %v4003_v28 = vrot.slane %v16465_v30, 4  ;;  %13760 = vrot.lane.b32.xlu0 %v13759_v15, %s14639_s19  ;;  %v3093_v19 = vsel %vm3042_vm13, %v2988_v58, %v21287_v16 }
 0x2fc   : > { %v3094_v63 = vsel %vm3042_vm13, %v21558_v21, %v2988_v58  ;;  %v3786_v55 = vsel %vm3770_vm9, %v3093_v19, %v13608_v34  ;;  %v13616_v18 = vpop.permute.xlu0 %13615  ;;  %v21562_v34 = vld [vmem:[#allocation25_spill] sm:$0xff] }
 0x2fd   : > { %v16488_v60 = vsel %vm2888_vm12, %v2425_v44, 0.0  ;;  %v2426_v17 = vadd.f32 %v16362_v40, %v2353_v11  ;;  %v13621_v38 = vpop.permute.xlu1 %13620  ;;  %v3785_v57 = vsel %vm3770_vm9, %v3094_v63, %v13607_v4  ;;  %v4004_v58 = vsel %vm3993_vm15, %v4001_v25, %v4003_v28 }
 0x2fe   : > { %21559 = vst [vmem:[#allocation15_spill] sm:$0xff] %v16488_v60  ;;  %v3155_v56 = vrot.slane %v16488_v60, 1  ;;  %v13623_v15 = vunpack.i.h.bf16 %v13621_v38  ;;  %v13622_v53 = vunpack.i.l.bf16 %v13621_v38  ;;  %v21291_v44 = vrot.slane %v16039_v29, 7  ;;  %12562 = vmatprep.mubr.msk.bf16.mxu1 %vm4091_vm3, %v4004_v58 }
 0x2ff   : > { %v16495_v21 = vsel %vm2889_vm11, %v2426_v17, 0.0  ;;  %v3196_v38 = vsel %vm3175_vm2, %v3153_v51, %v3154_v14  ;;  %v13617_v58 = vunpack.i.l.bf16 %v13616_v18  ;;  %vm2896_vm11 = vcmp.eq.s32.totalorder %v16139_v54, 1 }
 0x300   : > { %21560 = vst [vmem:[#allocation16_spill] sm:$0xff] %v16495_v21  ;;  %v3853_v11 = vsel %vm3837_vm10, %v3786_v55, %v13623_v15  ;;  %v3852_v16 = vsel %vm3837_vm10, %v3785_v57, %v13622_v53  ;;  %v2235_v33 = vpop.f32.mrb[12].mxu0  ;;  %v13764_v25 = vpack.i.bf16 %v16495_v21, %v16488_v60  ;;  %v3195_v17 = vsel %vm3175_vm2, %v3154_v14, %v3155_v56  ;;  %v14559_v57 = vld [vmem:[%s21233_s4 + $0x10] sm:$0xff]  }
 0x301   : > { %v16504_v4 = vpack.c.bf16 %v3853_v11, %v3852_v16  ;;  %v2354_v63 = vadd.f32 %v2235_v33, %v21562_v34  ;;  %v12508_v19 = vpop.f32.mrb[13].mxu0  ;;  %v13618_v15 = vunpack.i.h.bf16 %v13616_v18  ;;  %v13769_v53 = vpack.i.bf16 %v3195_v17, %v3196_v38  ;;  %v21563_v33 = vld [vmem:[#allocation26_spill] sm:$0xff]  ;;  %12618 = vmatprep.subr.bf16.mxu1 %v14559_v57 }
 0x302   : > { %v2238_v55 = vpop.f32.mrb[14].mxu0  ;;  %13765 = vrot.lane.b32.xlu0 %v13764_v25, %s14638_s28  ;;  %v21564_v19 = vld [vmem:[#allocation55_spill] sm:$0xff]  ;;  %v3156_v14 = vrot.slane %v16495_v21, 1  ;;  %v21565_v18 = vrot.slane %v16015_v62, 7  ;;  %12619 = vmatpush3.bf16.msra.mxu1 %v14559_v57  ;;  %v2998_v54 = vrot.slane %v16125_v10, 7 }
 0x303   : > { %21561 = vst [vmem:[#allocation17_spill] sm:$0xff] %v16504_v4  ;;  %v2427_v51 = vadd.f32 %v16362_v40, %v2354_v63  ;;  %v2355_v16 = vadd.f32 %v2238_v55, %v21563_v33  ;;  %v12509_v11 = vpop.f32.mrb[15].mxu0  ;;  %v4005_v34 = vrot.slane %v16504_v4, 4  ;;  %vm2891_vm14 = vcmp.eq.s32.totalorder %v21564_v19, 1  ;;  %13770 = vrot.lane.b32.xlu1 %v13769_v53, %s14639_s19  ;;  %v21569_v19 = vld [vmem:[#allocation27_spill] sm:$0xff] }
 0x304   : > { %v3092_v38 = vsel %vm3042_vm13, %v21565_v18, %v2990_v20  ;;  %v3091_v63 = vsel %vm3042_vm13, %v2990_v20, %v21291_v44  ;;  %v2992_v55 = vrot.slane %v16057_v48, 7  ;;  %v13626_v20 = vpop.permute.xlu1 %13625 }
 0x305   : > { %v16530_v25 = vsel %vm2890_vm4, %v2427_v51, 0.0  ;;  %v2428_v17 = vadd.f32 %v16362_v40, %v2355_v16  ;;  %v13631_v27 = vpop.permute.xlu0 %13630  ;;  %v3787_v62 = vsel %vm3770_vm9, %v3092_v38, %v13617_v58  ;;  %v3788_v18 = vsel %vm3770_vm9, %v3091_v63, %v13618_v15 }
 0x306   : > { %21566 = vst [vmem:[#allocation18_spill] sm:$0xff] %v16530_v25  ;;  %v3157_v53 = vrot.slane %v16530_v25, 1  ;;  %v13633_v33 = vunpack.i.h.bf16 %v13631_v27  ;;  %v13632_v11 = vunpack.i.l.bf16 %v13631_v27  ;;  %v4006_v51 = vsel %vm3993_vm15, %v4003_v28, %v4005_v34 }
 0x307   : > { %v16539_v52 = vsel %vm2891_vm14, %v2428_v17, 0.0  ;;  %v21293_v16 = vrot.slane %v16061_v39, 7  ;;  %12563 = vmatmul.mubr.msk.bf16.gmra.mrb[100].mxu1 %vm4091_vm3, %v4006_v51  ;;  %v3194_v58 = vsel %vm3175_vm2, %v3155_v56, %v3156_v14  ;;  %v21570_v56 = vld [vmem:[#allocation28_spill] sm:$0xff]  ;;  %vm2898_vm14 = vcmp.eq.s32.totalorder %v16153_v42, 1 }
 0x308   : > { %21567 = vst [vmem:[#allocation51_spill] sm:$0xff] %v16539_v52  ;;  %v3855_v57 = vsel %vm3837_vm10, %v3788_v18, %v13633_v33  ;;  %v3854_v44 = vsel %vm3837_vm10, %v3787_v62, %v13632_v11  ;;  %v2243_v27 = vpop.f32.mrb[16].mxu0  ;;  %v13774_v28 = vpack.i.bf16 %v16539_v52, %v16530_v25  ;;  %v3193_v17 = vsel %vm3175_vm2, %v3156_v14, %v3157_v53 }
 0x309   : > { %v16548_v15 = vpack.c.bf16 %v3855_v57, %v3854_v44  ;;  %v2356_v38 = vadd.f32 %v2243_v27, %v21569_v19  ;;  %v12512_v63 = vpop.f32.mrb[17].mxu0  ;;  %v13628_v33 = vunpack.i.h.bf16 %v13626_v20  ;;  %v13779_v62 = vpack.i.bf16 %v3193_v17, %v3194_v58  ;;  %v21571_v19 = vld [vmem:[#allocation56_spill] sm:$0xff] }
 0x30a   : > { %v2246_v18 = vpop.f32.mrb[18].mxu0  ;;  %v13627_v11 = vunpack.i.l.bf16 %v13626_v20  ;;  %13775 = vrot.lane.b32.xlu1 %v13774_v28, %s14638_s28  ;;  %vm2893_vm5 = vcmp.eq.s32.totalorder %v21571_v19, 1  ;;  %v3158_v63 = vrot.slane %v16539_v52, 1  ;;  %v21572_v14 = vrot.slane %v16039_v29, 7 }
 0x30b   : > { %21568 = vst [vmem:[#allocation19_spill] sm:$0xff] %v16548_v15  ;;  %v2429_v51 = vadd.f32 %v16362_v40, %v2356_v38  ;;  %v2357_v44 = vadd.f32 %v2246_v18, %v21570_v56  ;;  %v12513_v57 = vpop.f32.mrb[19].mxu0  ;;  %v4007_v27 = vrot.slane %v16548_v15, 4  ;;  %13780 = vrot.lane.b32.xlu0 %v13779_v62, %s14639_s19  ;;  %v3089_v58 = vsel %vm3042_vm13, %v2992_v55, %v21293_v16 }
 0x30c   : > { %v3090_v20 = vsel %vm3042_vm13, %v21572_v14, %v2992_v55  ;;  %v3790_v19 = vsel %vm3770_vm9, %v3089_v58, %v13628_v33  ;;  %v13636_v48 = vpop.permute.xlu0 %13635  ;;  %v21576_v33 = vld [vmem:[#allocation29_spill] sm:$0xff]  ;;  %v3000_v42 = vrot.slane %v16147_v61, 7 }
 0x30d   : > { %v16571_v38 = vsel %vm2892_vm6, %v2429_v51, 0.0  ;;  %v2430_v28 = vadd.f32 %v16362_v40, %v2357_v44  ;;  %v13641_v17 = vpop.permute.xlu1 %13640  ;;  %v3789_v57 = vsel %vm3770_vm9, %v3090_v20, %v13627_v11  ;;  %v4008_v55 = vsel %vm3993_vm15, %v4005_v34, %v4007_v27 }
 0x30e   : > { %21573 = vst [vmem:[#allocation20_spill] sm:$0xff] %v16571_v38  ;;  %v3159_v18 = vrot.slane %v16571_v38, 1  ;;  %v13643_v62 = vunpack.i.h.bf16 %v13641_v17  ;;  %v13642_v56 = vunpack.i.l.bf16 %v13641_v17  ;;  %v21297_v51 = vrot.slane %v16083_v26, 7  ;;  %12566 = vmatprep.mubr.msk.bf16.mxu1 %vm4091_vm3, %v4008_v55 }
 0x30f   : > { %v16578_v14 = vsel %vm2893_vm5, %v2430_v28, 0.0  ;;  %v3192_v17 = vsel %vm3175_vm2, %v3157_v53, %v3158_v63  ;;  %v13637_v55 = vunpack.i.l.bf16 %v13636_v48  ;;  %vm2900_vm5 = vcmp.eq.s32.totalorder %v16172_v24, 1 }
 0x310   : > { %21574 = vst [vmem:[#allocation52_spill] sm:$0xff] %v16578_v14  ;;  %v3857_v44 = vsel %vm3837_vm10, %v3790_v19, %v13643_v62  ;;  %v3856_v16 = vsel %vm3837_vm10, %v3789_v57, %v13642_v56  ;;  %v2251_v49 = vpop.f32.mrb[20].mxu0  ;;  %v13784_v34 = vpack.i.bf16 %v16578_v14, %v16571_v38  ;;  %v3191_v28 = vsel %vm3175_vm2, %v3158_v63, %v3159_v18  ;;  %v14560_v57 = vld [vmem:[%s21233_s4 + $0x18] sm:$0xff]  }
 0x311   : > { %v16587_v11 = vpack.c.bf16 %v3857_v44, %v3856_v16  ;;  %v2358_v20 = vadd.f32 %v2251_v49, %v21576_v33  ;;  %v12516_v58 = vpop.f32.mrb[21].mxu0  ;;  %v13638_v62 = vunpack.i.h.bf16 %v13636_v48  ;;  %v13789_v56 = vpack.i.bf16 %v3191_v28, %v3192_v17  ;;  %v21577_v49 = vld [vmem:[#allocation30_spill] sm:$0xff]  ;;  %12620 = vmatprep.subr.bf16.mxu1 %v14560_v57 }
 0x312   : > { %v2254_v19 = vpop.f32.mrb[22].mxu0  ;;  %13785 = vrot.lane.b32.xlu0 %v13784_v34, %s14638_s28  ;;  %v21578_v58 = vld [vmem:[#allocation57_spill] sm:$0xff]  ;;  %v3160_v63 = vrot.slane %v16578_v14, 1  ;;  %v21579_v48 = vrot.slane %v16061_v39, 7  ;;  %12621 = vmatpush3.bf16.msra.mxu1 %v14560_v57 }
 0x313   : > { %21575 = vst [vmem:[#allocation21_spill] sm:$0xff] %v16587_v11  ;;  %v2431_v53 = vadd.f32 %v16362_v40, %v2358_v20  ;;  %v2359_v16 = vadd.f32 %v2254_v19, %v21577_v49  ;;  %v12517_v44 = vpop.f32.mrb[23].mxu0  ;;  %v4009_v33 = vrot.slane %v16587_v11, 4  ;;  %vm2895_vm7 = vcmp.eq.s32.totalorder %v21578_v58, 1  ;;  %13790 = vrot.lane.b32.xlu1 %v13789_v56, %s14639_s19  ;;  %v21583_v58 = vld [vmem:[#allocation31_spill] sm:$0xff] }
 0x314   : > { %v3088_v17 = vsel %vm3042_vm13, %v21579_v48, %v2994_v0  ;;  %v3087_v20 = vsel %vm3042_vm13, %v2994_v0, %v21297_v51  ;;  %v2996_v19 = vrot.slane %v16101_v45, 7  ;;  %v13646_v0 = vpop.permute.xlu1 %13645 }
 0x315   : > { %v16613_v34 = vsel %vm2894_vm8, %v2431_v53, 0.0  ;;  %v2432_v28 = vadd.f32 %v16362_v40, %v2359_v16  ;;  %v13651_v35 = vpop.permute.xlu0 %13650  ;;  %v3791_v39 = vsel %vm3770_vm9, %v3088_v17, %v13637_v55  ;;  %v3792_v48 = vsel %vm3770_vm9, %v3087_v20, %v13638_v62 }
 0x316   : > { %21580 = vst [vmem:[#allocation22_spill] sm:$0xff] %v16613_v34  ;;  %v3161_v56 = vrot.slane %v16613_v34, 1  ;;  %v13653_v49 = vunpack.i.h.bf16 %v13651_v35  ;;  %v13652_v44 = vunpack.i.l.bf16 %v13651_v35  ;;  %v4010_v53 = vsel %vm3993_vm15, %v4007_v27, %v4009_v33 }
 0x317   : > { %v16622_v29 = vsel %vm2895_vm7, %v2432_v28, 0.0  ;;  %v21299_v16 = vrot.slane %v16107_v2, 7  ;;  %12567 = vmatmul.mubr.msk.bf16.gmra.mrb[104].mxu1 %vm4091_vm3, %v4010_v53  ;;  %v3190_v55 = vsel %vm3175_vm2, %v3159_v18, %v3160_v63  ;;  %v21584_v18 = vld [vmem:[#allocation32_spill] sm:$0xff] }
 0x318   : > { %21581 = vst [vmem:[#allocation53_spill] sm:$0xff] %v16622_v29  ;;  %v3859_v57 = vsel %vm3837_vm10, %v3792_v48, %v13653_v49  ;;  %v3858_v51 = vsel %vm3837_vm10, %v3791_v39, %v13652_v44  ;;  %v2259_v35 = vpop.f32.mrb[24].mxu0  ;;  %v13794_v27 = vpack.i.bf16 %v16622_v29, %v16613_v34  ;;  %v3189_v28 = vsel %vm3175_vm2, %v3160_v63, %v3161_v56 }
 0x319   : > { %v16631_v62 = vpack.c.bf16 %v3859_v57, %v3858_v51  ;;  %v2360_v17 = vadd.f32 %v2259_v35, %v21583_v58  ;;  %v12520_v20 = vpop.f32.mrb[25].mxu0  ;;  %v13648_v49 = vunpack.i.h.bf16 %v13646_v0  ;;  %v13799_v39 = vpack.i.bf16 %v3189_v28, %v3190_v55  ;;  %v21585_v58 = vld [vmem:[#allocation58_spill] sm:$0xff] }
 0x31a   : > { %v2262_v48 = vpop.f32.mrb[26].mxu0  ;;  %v13647_v44 = vunpack.i.l.bf16 %v13646_v0  ;;  %13795 = vrot.lane.b32.xlu1 %v13794_v27, %s14638_s28  ;;  %vm2897_vm1 = vcmp.eq.s32.totalorder %v21585_v58, 1  ;;  %v3162_v20 = vrot.slane %v16622_v29, 1  ;;  %v21586_v63 = vrot.slane %v16083_v26, 7 }
 0x31b   : > { %21582 = vst [vmem:[#allocation23_spill] sm:$0xff] %v16631_v62  ;;  %v2433_v53 = vadd.f32 %v16362_v40, %v2360_v17  ;;  %v2361_v51 = vadd.f32 %v2262_v48, %v21584_v18  ;;  %v12521_v57 = vpop.f32.mrb[27].mxu0  ;;  %v4011_v35 = vrot.slane %v16631_v62, 4  ;;  %13800 = vrot.lane.b32.xlu0 %v13799_v39, %s14639_s19  ;;  %v3085_v55 = vsel %vm3042_vm13, %v2996_v19, %v21299_v16 }
 0x31c   : > { %v3086_v0 = vsel %vm3042_vm13, %v21586_v63, %v2996_v19  ;;  %v3794_v58 = vsel %vm3770_vm9, %v3085_v55, %v13648_v49  ;;  %v13656_v45 = vpop.permute.xlu0 %13655  ;;  %v21590_v49 = vld [vmem:[#allocation34_spill] sm:$0xff] }
 0x31d   : > { %v16654_v17 = vsel %vm2896_vm11, %v2433_v53, 0.0  ;;  %v2434_v27 = vadd.f32 %v16362_v40, %v2361_v51  ;;  %v13661_v28 = vpop.permute.xlu1 %13660  ;;  %v3793_v57 = vsel %vm3770_vm9, %v3086_v0, %v13647_v44  ;;  %v4012_v19 = vsel %vm3993_vm15, %v4009_v33, %v4011_v35 }
 0x31e   : > { %21587 = vst [vmem:[#allocation24_spill] sm:$0xff] %v16654_v17  ;;  %v3163_v48 = vrot.slane %v16654_v17, 1  ;;  %v13663_v39 = vunpack.i.h.bf16 %v13661_v28  ;;  %v13662_v18 = vunpack.i.l.bf16 %v13661_v28  ;;  %v21302_v53 = vrot.slane %v16129_v23, 7  ;;  %12570 = vmatprep.mubr.msk.bf16.mxu1 %vm4091_vm3, %v4012_v19 }
 0x31f   : > { %v16661_v63 = vsel %vm2897_vm1, %v2434_v27, 0.0  ;;  %v3188_v28 = vsel %vm3175_vm2, %v3161_v56, %v3162_v20  ;;  %v21591_v56 = vld [vmem:[#allocation35_spill] sm:$0xff] }
 0x320   : > { %21588 = vst [vmem:[#allocation54_spill] sm:$0xff] %v16661_v63  ;;  %v3861_v51 = vsel %vm3837_vm10, %v3794_v58, %v13663_v39  ;;  %v3860_v16 = vsel %vm3837_vm10, %v3793_v57, %v13662_v18  ;;  %v2267_v10 = vpop.f32.mrb[28].mxu0  ;;  %v13804_v33 = vpack.i.bf16 %v16661_v63, %v16654_v17  ;;  %v3187_v27 = vsel %vm3175_vm2, %v3162_v20, %v3163_v48 }
 0x321   : > { %v16670_v44 = vpack.c.bf16 %v3861_v51, %v3860_v16  ;;  %v2362_v0 = vadd.f32 %v2267_v10, %v21590_v49  ;;  %v12524_v55 = vpop.f32.mrb[29].mxu0  ;;  %v13658_v39 = vunpack.i.h.bf16 %v13656_v45  ;;  %v13809_v18 = vpack.i.bf16 %v3187_v27, %v3188_v28  ;;  %v21592_v49 = vld [vmem:[#allocation60_spill] sm:$0xff] }
 0x322   : > { %v2270_v58 = vpop.f32.mrb[30].mxu0  ;;  %v13657_v57 = vunpack.i.l.bf16 %v13656_v45  ;;  %13805 = vrot.lane.b32.xlu0 %v13804_v33, %s14638_s28  ;;  %vm2899_vm12 = vcmp.eq.s32.totalorder %v21592_v49, 1  ;;  %v3164_v55 = vrot.slane %v16661_v63, 1  ;;  %v21593_v20 = vrot.slane %v16107_v2, 7 }
 0x323   : > { %21589 = vst [vmem:[#allocation25_spill] sm:$0xff] %v16670_v44  ;;  %v2435_v19 = vadd.f32 %v16362_v40, %v2362_v0  ;;  %v2363_v16 = vadd.f32 %v2270_v58, %v21591_v56  ;;  %v12525_v51 = vpop.f32.mrb[31].mxu0  ;;  %v4013_v10 = vrot.slane %v16670_v44, 4  ;;  %13810 = vrot.lane.b32.xlu1 %v13809_v18, %s14639_s19  ;;  %v3083_v28 = vsel %vm3042_vm13, %v2998_v54, %v21302_v53 }
 0x324   : > { %v3084_v45 = vsel %vm3042_vm13, %v21593_v20, %v2998_v54  ;;  %v3796_v49 = vsel %vm3770_vm9, %v3083_v28, %v13658_v39  ;;  %v13666_v2 = vpop.permute.xlu1 %13665  ;;  %v21597_v39 = vld [vmem:[#allocation37_spill] sm:$0xff] }
 0x325   : > { %v16693_v0 = vsel %vm2898_vm14, %v2435_v19, 0.0  ;;  %v2436_v33 = vadd.f32 %v16362_v40, %v2363_v16  ;;  %v13671_v27 = vpop.permute.xlu0 %13670  ;;  %v3795_v51 = vsel %vm3770_vm9, %v3084_v45, %v13657_v57  ;;  %v4014_v54 = vsel %vm3993_vm15, %v4011_v35, %v4013_v10 }
 0x326   : > { %21594 = vst [vmem:[#allocation26_spill] sm:$0xff] %v16693_v0  ;;  %v3165_v58 = vrot.slane %v16693_v0, 1  ;;  %v13673_v18 = vunpack.i.h.bf16 %v13671_v27  ;;  %v13672_v56 = vunpack.i.l.bf16 %v13671_v27  ;;  %v21306_v19 = vrot.slane %v16151_v22, 7  ;;  %12571 = vmatmul.mubr.msk.bf16.gmra.mrb[108].mxu1 %vm4091_vm3, %v4014_v54 }
 0x327   : > { %v16700_v20 = vsel %vm2899_vm12, %v2436_v33, 0.0  ;;  %v3186_v27 = vsel %vm3175_vm2, %v3163_v48, %v3164_v55  ;;  %v13667_v54 = vunpack.i.l.bf16 %v13666_v2 }
 0x328   : > { %21595 = vst [vmem:[#allocation55_spill] sm:$0xff] %v16700_v20  ;;  %v3863_v16 = vsel %vm3837_vm10, %v3796_v49, %v13673_v18  ;;  %v3862_v53 = vsel %vm3837_vm10, %v3795_v51, %v13672_v56  ;;  %v2275_v61 = vpop.f32.mrb[32].mxu0  ;;  %v13814_v35 = vpack.i.bf16 %v16700_v20, %v16693_v0  ;;  %v3185_v33 = vsel %vm3175_vm2, %v3164_v55, %v3165_v58  ;;  %v14561_v51 = vld [vmem:[%s21233_s4 + $0x20] sm:$0xff]  }
 0x329   : > { %v16709_v57 = vpack.c.bf16 %v3863_v16, %v3862_v53  ;;  %v2364_v45 = vadd.f32 %v2275_v61, %v21597_v39  ;;  %v12528_v28 = vpop.f32.mrb[33].mxu0  ;;  %v13668_v18 = vunpack.i.h.bf16 %v13666_v2  ;;  %v13819_v56 = vpack.i.bf16 %v3185_v33, %v3186_v27  ;;  %v21598_v61 = vld [vmem:[#allocation38_spill] sm:$0xff]  ;;  %12622 = vmatprep.subr.bf16.mxu1 %v14561_v51 }
 0x32a   : > { %v2278_v49 = vpop.f32.mrb[34].mxu0  ;;  %13815 = vrot.lane.b32.xlu1 %v13814_v35, %s14638_s28  ;;  %v11156_v55 = vld [vmem:[%s21230_s1 + $0x220] sm:$0xff]  ;;  %v3166_v27 = vrot.slane %v16700_v20, 1  ;;  %v21600_v2 = vrot.slane %v16129_v23, 7  ;;  %v21601_v35 = vld [vmem:[#allocation4_spill] sm:$0xff]  ;;  %12623 = vmatpush3.bf16.msra.mxu1 %v14561_v51 }
 0x32b   : > { %21596 = vst [vmem:[#allocation27_spill] sm:$0xff] %v16709_v57  ;;  %v2437_v48 = vadd.f32 %v16362_v40, %v2364_v45  ;;  %v2365_v53 = vadd.f32 %v2278_v49, %v21598_v61  ;;  %v12529_v16 = vpop.f32.mrb[35].mxu0  ;;  %v21599_v28 = vld [vmem:[#allocation62_spill] sm:$0xff]  ;;  %13820 = vrot.lane.b32.xlu0 %v13819_v56, %s14639_s19  ;;  %v3002_v33 = vrot.slane %v21601_v35, 7  ;;  %v3081_v49 = vsel %vm3042_vm13, %v3000_v42, %v21306_v19  ;;  %v21605_v19 = vld [vmem:[#allocation61_spill] sm:$0xff] }
 0x32c   : > { %vm2901_vm4 = vcmp.eq.s32.totalorder %v21599_v28, 1  ;;  %v3082_v45 = vsel %vm3042_vm13, %v21600_v2, %v3000_v42  ;;  %vm2577_vm6 = vcmp.gt.f32.partialorder %v11156_v55, 0.0  ;;  %v3798_v35 = vsel %vm3770_vm9, %v3081_v49, %v13668_v18  ;;  %v13676_v42 = vpop.permute.xlu0 %13675 }
 0x32d   : > { %v16739_v61 = vsel %vm2900_vm5, %v2437_v48, 0.0  ;;  %v2438_v24 = vadd.f32 %v16362_v40, %v2365_v53  ;;  %v13681_v16 = vpop.permute.xlu1 %13680  ;;  %v3797_v56 = vsel %vm3770_vm9, %v3082_v45, %v13667_v54  ;;  %v21604_v48 = vrot.slane %v16709_v57, 4  ;;  %v21607_v45 = vld [vmem:[#allocation40_spill] sm:$0xff] }
 0x32e   : > { %21602 = vst [vmem:[#allocation28_spill] sm:$0xff] %v16739_v61  ;;  %v3167_v39 = vrot.slane %v16739_v61, 1  ;;  %v13683_v23 = vunpack.i.h.bf16 %v13681_v16  ;;  %v13682_v2 = vunpack.i.l.bf16 %v13681_v16  ;;  %v3184_v18 = vsel %vm3175_vm2, %v3165_v58, %v3166_v27  ;;  %v21610_v58 = vld [vmem:[#allocation42_spill] sm:$0xff] }
 0x32f   : > { %v16747_v26 = vsel %vm2901_vm4, %v2438_v24, 0.0  ;;  %v4016_v53 = vsel %vm3993_vm15, %v4013_v10, %v21604_v48  ;;  %v13678_v51 = vunpack.i.h.bf16 %v13676_v42  ;;  %v21613_v44 = vrot.slane %v21605_v19, 7 }
 0x330   : > { %21603 = vst [vmem:[#allocation56_spill] sm:$0xff] %v16747_v26  ;;  %v3865_v37 = vsel %vm3837_vm10, %v3798_v35, %v13683_v23  ;;  %v3864_v16 = vsel %vm3837_vm10, %v3797_v56, %v13682_v2  ;;  %12574 = vmatprep.mubr.msk.bf16.mxu1 %vm4091_vm3, %v4016_v53  ;;  %v2283_v54 = vpop.f32.mrb[36].mxu0  ;;  %v13824_v10 = vpack.i.bf16 %v16747_v26, %v16739_v61  ;;  %v21608_v23 = vld [vmem:[#allocation64_spill] sm:$0xff]  ;;  %v21609_v35 = vld [vmem:[#allocation5_spill] sm:$0xff]  ;;  %v13677_v2 = vunpack.i.l.bf16 %v13676_v42 }
 0x331   : > { %v16758_v28 = vpack.c.bf16 %v3865_v37, %v3864_v16  ;;  %v2366_v49 = vadd.f32 %v2283_v54, %v21607_v45  ;;  %v12532_v24 = vpop.f32.mrb[37].mxu0  ;;  %v3183_v48 = vsel %vm3175_vm2, %v3166_v27, %v3167_v39  ;;  %vm2903_vm7 = vcmp.eq.s32.totalorder %v21608_v23, 1 }
 0x332   : > { %vm2902_vm8 = vcmp.eq.s32.totalorder %v21609_v35, 1  ;;  %v2286_v56 = vpop.f32.mrb[38].mxu0  ;;  %v13829_v53 = vpack.i.bf16 %v3183_v48, %v3184_v18  ;;  %13825 = vrot.lane.b32.xlu0 %v13824_v10, %s14638_s28  ;;  %v21611_v24 = vld [vmem:[#allocation36_spill] sm:$0xff]  ;;  %v21612_v27 = vrot.slane %v16151_v22, 7  ;;  %v3079_v42 = vsel %vm3042_vm13, %v3002_v33, %v21613_v44  ;;  %v21615_v10 = vld [vmem:[#allocation6_spill] sm:$0xff] }
 0x333   : > { %21606 = vst [vmem:[#allocation29_spill] sm:$0xff] %v16758_v28  ;;  %v2439_v37 = vadd.f32 %v16362_v40, %v2366_v49  ;;  %v2367_v16 = vadd.f32 %v2286_v56, %v21610_v58  ;;  %v12533_v54 = vpop.f32.mrb[39].mxu0  ;;  %v4017_v45 = vrot.slane %v16758_v28, 4  ;;  %v3004_v12 = vrot.slane %v21611_v24, 7 }
 0x334   : > { %v3080_v50 = vsel %vm3042_vm13, %v21612_v27, %v3002_v33  ;;  %13830 = vrot.lane.b32.xlu1 %v13829_v53, %s14639_s19  ;;  %v21614_v18 = vmov 0   ;;  %v3168_v56 = vrot.slane %v16747_v26, 1  ;;  %v3800_v55 = vsel %vm3770_vm9, %v3079_v42, %v13678_v51 }
 0x335   : > { %v2643_v49 = vsel %vm2577_vm6, 1, %v21614_v18  ;;  %v16787_v58 = vsel %vm2902_vm8, %v2439_v37, 0.0  ;;  %v2440_v54 = vadd.f32 %v16362_v40, %v2367_v16  ;;  %v13691_v27 = vpop.permute.xlu0 %13690  ;;  %v3799_v24 = vsel %vm3770_vm9, %v3080_v50, %v13677_v2 }
 0x336   : > { %v3169_v44 = vrot.slane %v16787_v58, 1  ;;  %v13693_v33 = vunpack.i.h.bf16 %v13691_v27  ;;  %v13692_v53 = vunpack.i.l.bf16 %v13691_v27  ;;  %v21616_v35 = vrot.slane %v16709_v57, 4  ;;  %v13686_v27 = vpop.permute.xlu1 %13685 }
 0x337   : > { %v16796_v48 = vsel %vm2903_vm7, %v2440_v54, 0.0  ;;  %v21617_v54 = vld [vmem:[#allocation44_spill] sm:$0xff]  ;;  %v3182_v57 = vsel %vm3175_vm2, %v3167_v39, %v3168_v56 }
 0x338   : > { %v4018_v37 = vsel %vm3993_vm15, %v21616_v35, %v4017_v45  ;;  %v13839_v16 = vpack.i.bf16 %v16796_v48, %v16787_v58  ;;  %v3035_v50 = vrot.slane %v16796_v48, 7  ;;  %v3170_v2 = vrot.slane %v16796_v48, 1  ;;  %2840 = vperm.xlu1 %13548, %v2643_v49   ;;  %v2291_v23 = vpop.f32.mrb[40].mxu0 }
 0x339   : > { %v3867_v51 = vsel %vm3837_vm10, %v3800_v55, %v13693_v33  ;;  %12575 = vmatmul.mubr.msk.bf16.gmra.mrb[112].mxu1 %vm4091_vm3, %v4018_v37  ;;  %v3866_v42 = vsel %vm3837_vm10, %v3799_v24, %v13692_v53  ;;  %v2368_v22 = vadd.f32 %v2291_v23, %v21617_v54  ;;  %v12536_v28 = vpop.f32.mrb[41].mxu0  ;;  %v3181_v35 = vsel %vm3175_vm2, %v3168_v56, %v3169_v44  ;;  %v21620_v37 = vld [vmem:[#allocation45_spill] sm:$0xff]  ;;  %v21621_v56 = vld [vmem:[#allocation66_spill] sm:$0xff] }
 0x33a   : > { %v16813_v62 = vpack.c.bf16 %v3867_v51, %v3866_v42  ;;  %v2294_v48 = vpop.f32.mrb[42].mxu0  ;;  %v13834_v11 = vpack.i.bf16 %v3181_v35, %v3182_v57  ;;  %v3180_v33 = vsel %vm3175_vm2, %v3169_v44, %v3170_v2  ;;  %v21619_v49 = vrot.slane %v16787_v58, 7  ;;  %v21622_v51 = vld [vmem:[#allocation63_spill] sm:$0xff] }
 0x33b   : > { %v13688_v28 = vunpack.i.h.bf16 %v13686_v27  ;;  %v13687_v53 = vunpack.i.l.bf16 %v13686_v27  ;;  %v2441_v55 = vadd.f32 %v16362_v40, %v2368_v22  ;;  %v2369_v23 = vadd.f32 %v2294_v48, %v21620_v37  ;;  %v12537_v39 = vpop.f32.mrb[43].mxu0  ;;  %v21624_v27 = vld [vmem:[#allocation7_spill] sm:$0xff] }
 0x33c   : > { %21618 = vst [vmem:[#allocation30_spill] sm:$0xff] %v16813_v62  ;;  %v16821_v24 = vsel %vm3042_vm13, %v21619_v49, %v3035_v50  ;;  %vm2905_vm1 = vcmp.eq.s32.totalorder %v21621_v56, 1  ;;  %vm2904_vm11 = vcmp.eq.s32.totalorder %v21622_v51, 1  ;;  %v21623_v57 = vrot.slane %v21605_v19, 7  ;;  %13835 = vrot.lane.b32.xlu0 %v13834_v11, %s14639_s19  ;;  %v13696_v42 = vpop.permute.xlu1 %13695  ;;  %v14562_v39 = vld [vmem:[%s21233_s4 + $0x28] sm:$0xff]   ;;  %v21626_v51 = vld [vmem:[#allocation8_spill] sm:$0xff] }
 0x33d   : > { %v4019_v54 = vrot.slane %v16813_v62, 4  ;;  %v3006_v35 = vrot.slane %v21624_v27, 7  ;;  %v21625_v22 = vrot.slane %v21615_v10, 7  ;;  %v2970_v49 = vsel %vm2904_vm11, %v2441_v55, 0.0  ;;  %12624 = vmatprep.subr.bf16.mxu1 %v14562_v39 }
 0x33e   : > { %v3078_v44 = vsel %vm3042_vm13, %v21623_v57, %v3004_v12  ;;  %v2442_v37 = vadd.f32 %v16362_v40, %v2369_v23  ;;  %v3036_v11 = vrot.slane %v2970_v49, 7  ;;  %v3171_v19 = vrot.slane %v2970_v49, 1  ;;  %12625 = vmatpush3.bf16.msra.mxu1 %v14562_v39 }
 0x33f   : > { %v3077_v48 = vsel %vm3042_vm13, %v3004_v12, %v21625_v22  ;;  %v4020_v62 = vsel %vm3993_vm15, %v4017_v45, %v4019_v54  ;;  %v3801_v27 = vsel %vm3770_vm9, %v3078_v44, %v13687_v53  ;;  %v13698_v55 = vunpack.i.h.bf16 %v13696_v42 }
 0x340   : > { %v3802_v15 = vsel %vm3770_vm9, %v3077_v48, %v13688_v28  ;;  %v16848_v12 = vsel %vm2905_vm1, %v2442_v37, 0.0  ;;  %12578 = vmatprep.mubr.msk.bf16.mxu1 %vm4091_vm3, %v4020_v62  ;;  %13840 = vrot.lane.b32.xlu0 %v13839_v16, %s14638_s28  ;;  %v13701_v45 = vpop.permute.xlu1 %13700  ;;  %v2299_v53 = vpop.f32.mrb[44].mxu0  ;;  %v3179_v28 = vsel %vm3175_vm2, %v3170_v2, %v3171_v19  ;;  %v21627_v48 = vld [vmem:[#allocation47_spill] sm:$0xff]  ;;  %v13697_v30 = vunpack.i.l.bf16 %v13696_v42 }
 0x341   : > { %v13844_v23 = vpack.i.bf16 %v16848_v12, %v2970_v49  ;;  %v3172_v57 = vrot.slane %v16848_v12, 1  ;;  %v13703_v56 = vunpack.i.h.bf16 %v13701_v45  ;;  %v13702_v44 = vunpack.i.l.bf16 %v13701_v45  ;;  %v12540_v62 = vpop.f32.mrb[45].mxu0 }
 0x342   : > { %v2370_v37 = vadd.f32 %v2299_v53, %v21627_v48  ;;  %v13849_v4 = vpack.i.bf16 %v3179_v28, %v3180_v33  ;;  %v2302_v49 = vpop.f32.mrb[46].mxu0  ;;  %v16863_v16 = vsel %vm3042_vm13, %v3035_v50, %v3036_v11  ;;  %v21628_v2 = vrot.slane %v16848_v12, 7  ;;  %v21630_v28 = vld [vmem:[#allocation39_spill] sm:$0xff] }
 0x343   : > { %13845 = vrot.lane.b32.xlu1 %v13844_v23, %s14638_s28  ;;  %v3178_v22 = vsel %vm3175_vm2, %v3171_v19, %v3172_v57  ;;  %v3869_v45 = vsel %vm3837_vm10, %v3802_v15, %v13703_v56  ;;  %v3868_v33 = vsel %vm3837_vm10, %v3801_v27, %v13702_v44  ;;  %v21629_v23 = vld [vmem:[#allocation48_spill] sm:$0xff]  ;;  %v12541_v19 = vpop.f32.mrb[47].mxu0  ;;  %vm2906_vm12 = vcmp.eq.s32.totalorder %v21630_v28, 1 }
 0x344   : > { %v16869_v39 = vsel %vm3042_vm13, %v3036_v11, %v21628_v2  ;;  %v2443_v42 = vadd.f32 %v16362_v40, %v2370_v37  ;;  %v16875_v53 = vadd.f32 %v2302_v49, %v21629_v23  ;;  %v16878_v50 = vpack.c.bf16 %v3869_v45, %v3868_v33  ;;  %13850 = vrot.lane.b32.xlu0 %v13849_v4, %s14639_s19  ;;  %v13706_v45 = vpop.permute.xlu0 %13705  ;;  %v21633_v23 = vld [vmem:[#allocation69_spill] sm:$0xff]  ;;  %v21634_v19 = vld [vmem:[#allocation68_spill] sm:$0xff] }
 0x345   : > { %v21631_v48 = vrot.slane %v21615_v10, 7  ;;  %v13711_v27 = vpop.permute.xlu1 %13710  ;;  %v21632_v40 = vrot.slane %v21626_v51, 7  ;;  %v21635_v28 = vpack.i.bf16 %v21633_v23, %v21634_v19 }
 0x346   : > { %v16885_v15 = vsel %vm2906_vm12, %v2443_v42, 0.0  ;;  %v13713_v37 = vunpack.i.h.bf16 %v13711_v27  ;;  %v13712_v62 = vunpack.i.l.bf16 %v13711_v27  ;;  %v4021_v2 = vrot.slane %v16878_v50, 4 }
 0x347   : > { %v3076_v11 = vsel %vm3042_vm13, %v21631_v48, %v3006_v35  ;;  %v3075_v56 = vsel %vm3042_vm13, %v3006_v35, %v21632_v40  ;;  %v21330_v44 = vrot.slane %v16885_v15, 1  ;;  %v21637_v40 = vld [vmem:[#allocation9_spill] sm:$0xff] }
 0x348   : > { %v3803_v49 = vsel %vm3770_vm9, %v3076_v11, %v13697_v30  ;;  %v3804_v4 = vsel %vm3770_vm9, %v3075_v56, %v13698_v55  ;;  %13860 = vrot.lane.b32.xlu0 %v21635_v28, %s14638_s28  ;;  %v4022_v55 = vsel %vm3993_vm15, %v4019_v54, %v4021_v2  ;;  %v21636_v11 = vld [vmem:[#allocation65_spill] sm:$0xff]  ;;  %v3009_v56 = vrot.slane %v21637_v40, 7  ;;  %v16917_v54 = vld [vmem:[%s21233_s4 + $0x60] sm:$0xff]  }
 0x349   : > { %v3871_v33 = vsel %vm3837_vm10, %v3804_v4, %v13713_v37  ;;  %v3870_v42 = vsel %vm3837_vm10, %v3803_v49, %v13712_v62  ;;  %v3177_v35 = vsel %vm3175_vm2, %v3172_v57, %v21330_v44  ;;  %v3008_v27 = vrot.slane %v21636_v11, 7  ;;  %12579 = vmatmul.mubr.msk.bf16.gmra.mrb[116].mxu1 %vm4091_vm3, %v4022_v55  ;;  %v21640_v55 = vld [vmem:[#allocation72_spill] sm:$0xff]  ;;  %12686 = vmatprep.subr.bf16.mxu1 %v16917_v54 }
 0x34a   : > { %v16905_v30 = vpack.c.bf16 %v3871_v33, %v3870_v42  ;;  %v13854_v48 = vpack.i.bf16 %v3177_v35, %v3178_v22  ;;  %v13708_v37 = vunpack.i.h.bf16 %v13706_v45  ;;  %v13707_v62 = vunpack.i.l.bf16 %v13706_v45  ;;  %v21639_v35 = vld [vmem:[#allocation71_spill] sm:$0xff] }
 0x34b   : > { %v21638_v22 = vrot.slane %v21626_v51, 7  ;;  %v3073_v45 = vsel %vm3042_vm13, %v3008_v27, %v3009_v56 }
 0x34c   : > { %13855 = vrot.lane.b32.xlu1 %v13854_v48, %s14639_s19  ;;  %v4023_v49 = vrot.slane %v16905_v30, 4  ;;  %v21641_v48 = vpack.i.bf16 %v21639_v35, %v21640_v55 }
 0x34d   : > { %v13721_v4 = vpop.permute.xlu0 %13720  ;;  %v3074_v33 = vsel %vm3042_vm13, %v21638_v22, %v3008_v27 }
 0x34e   : > { %v4024_v57 = vsel %vm3993_vm15, %v4021_v2, %v4023_v49  ;;  %v13723_v42 = vunpack.i.h.bf16 %v13721_v4  ;;  %v13722_v23 = vunpack.i.l.bf16 %v13721_v4  ;;  %v3805_v28 = vsel %vm3770_vm9, %v3074_v33, %v13707_v62  ;;  %v13716_v4 = vpop.permute.xlu1 %13715 }
 0x34f   : > { %12582 = vmatprep.mubr.msk.bf16.mxu1 %vm4091_vm3, %v4024_v57  ;;  %v3806_v2 = vsel %vm3770_vm9, %v3073_v45, %v13708_v37  ;;  %v3010_v62 = vrot.slane %v16264_v59, 7  ;;  %v3011_v37 = vrot.slane %v16272_v13, 7  ;;  %v13718_v33 = vunpack.i.h.bf16 %v13716_v4 }
 0x350   : > { %13865 = vrot.lane.b32.xlu1 %v21641_v48, %s14639_s19  ;;  %v3873_v22 = vsel %vm3837_vm10, %v3806_v2, %v13723_v42  ;;  %v3872_v44 = vsel %vm3837_vm10, %v3805_v28, %v13722_v23  ;;  %v13717_v45 = vunpack.i.l.bf16 %v13716_v4  ;;  %v3012_v4 = vrot.slane %v16311_v5, 7 }
 0x351   : > { %v16935_v27 = vpack.c.bf16 %v3873_v22, %v3872_v44  ;;  %v3072_v42 = vsel %vm3042_vm13, %v3009_v56, %v3010_v62  ;;  %v3071_v44 = vsel %vm3042_vm13, %v3010_v62, %v3011_v37  ;;  %v3013_v13 = vrot.slane %v16322_v32, 7 }
 0x352   : > { %v3807_v2 = vsel %vm3770_vm9, %v3072_v42, %v13717_v45  ;;  %v3808_v48 = vsel %vm3770_vm9, %v3071_v44, %v13718_v33  ;;  %v3070_v45 = vsel %vm3042_vm13, %v3011_v37, %v3012_v4 }
 0x353   : > { %v4025_v57 = vrot.slane %v16935_v27, 4  ;;  %v3069_v33 = vsel %vm3042_vm13, %v3012_v4, %v3013_v13  ;;  %v3015_v4 = vrot.slane %v16372_v3, 7 }
 0x354   : > { %v13726_v22 = vpop.permute.xlu0 %13725 }
 0x355   : > { %v4026_v35 = vsel %vm3993_vm15, %v4023_v49, %v4025_v57  ;;  %v13728_v56 = vunpack.i.h.bf16 %v13726_v22  ;;  %v13727_v40 = vunpack.i.l.bf16 %v13726_v22 }
 0x356   : > { %12583 = vmatmul.mubr.msk.bf16.gmra.mrb[120].mxu1 %vm4091_vm3, %v4026_v35 }
 0x358   : > { %v13731_v55 = vpop.permute.xlu1 %13730 }
 0x359   : > { %v13733_v23 = vunpack.i.h.bf16 %v13731_v55  ;;  %v13732_v28 = vunpack.i.l.bf16 %v13731_v55 }
 0x35b   : > { %v3875_v49 = vsel %vm3837_vm10, %v3808_v48, %v13733_v23  ;;  %v3874_v35 = vsel %vm3837_vm10, %v3807_v2, %v13732_v28  ;;  %v3809_v28 = vsel %vm3770_vm9, %v3070_v45, %v13727_v40  ;;  %v3810_v2 = vsel %vm3770_vm9, %v3069_v33, %v13728_v56 }
 0x35c   : > { %v16952_v59 = vpack.c.bf16 %v3875_v49, %v3874_v35  ;;  %v13736_v48 = vpop.permute.xlu1 %13735  ;;  %v3014_v35 = vrot.slane %v16357_v43, 7 }
 0x35d   : > { %v13741_v55 = vpop.permute.xlu0 %13740  ;;  %v13737_v32 = vunpack.i.l.bf16 %v13736_v48 }
 0x35e   : > { %v4027_v62 = vrot.slane %v16952_v59, 4  ;;  %v13743_v42 = vunpack.i.h.bf16 %v13741_v55  ;;  %v13742_v44 = vunpack.i.l.bf16 %v13741_v55  ;;  %v13738_v55 = vunpack.i.h.bf16 %v13736_v48 }
 0x35f   : > { %v3068_v45 = vsel %vm3042_vm13, %v3013_v13, %v3014_v35  ;;  %v3067_v33 = vsel %vm3042_vm13, %v3014_v35, %v3015_v4  ;;  %v3016_v13 = vrot.slane %v16408_v6, 7 }
 0x360   : > { %v4028_v23 = vsel %vm3993_vm15, %v4025_v57, %v4027_v62  ;;  %v3877_v22 = vsel %vm3837_vm10, %v3810_v2, %v13743_v42  ;;  %v3876_v49 = vsel %vm3837_vm10, %v3809_v28, %v13742_v44  ;;  %v3812_v28 = vsel %vm3770_vm9, %v3067_v33, %v13738_v55 }
 0x361   : > { %12586 = vmatprep.mubr.msk.bf16.mxu1 %vm4091_vm3, %v4028_v23  ;;  %v16965_v37 = vpack.c.bf16 %v3877_v22, %v3876_v49  ;;  %v3811_v23 = vsel %vm3770_vm9, %v3068_v45, %v13737_v32  ;;  %v3017_v49 = vrot.slane %v16417_v46, 7  ;;  %v3066_v55 = vsel %vm3042_vm13, %v3015_v4, %v3016_v13 }
 0x362   : > { %v3018_v4 = vrot.slane %v16449_v7, 7 }
 0x363   : > { %v4029_v57 = vrot.slane %v16965_v37, 4  ;;  %v3065_v45 = vsel %vm3042_vm13, %v3016_v13, %v3017_v49 }
 0x364   : > { %v13746_v2 = vpop.permute.xlu0 %13745 }
 0x365   : > { %v13751_v40 = vpop.permute.xlu1 %13750  ;;  %v4030_v56 = vsel %vm3993_vm15, %v4027_v62, %v4029_v57  ;;  %v13748_v35 = vunpack.i.h.bf16 %v13746_v2  ;;  %v13747_v3 = vunpack.i.l.bf16 %v13746_v2 }
 0x366   : > { %v13753_v42 = vunpack.i.h.bf16 %v13751_v40  ;;  %v13752_v44 = vunpack.i.l.bf16 %v13751_v40  ;;  %12587 = vmatmul.mubr.msk.bf16.gmra.mrb[124].mxu1 %vm4091_vm3, %v4030_v56 }
 0x368   : > { %v3879_v48 = vsel %vm3837_vm10, %v3812_v28, %v13753_v42  ;;  %v3878_v22 = vsel %vm3837_vm10, %v3811_v23, %v13752_v44  ;;  %v3813_v44 = vsel %vm3770_vm9, %v3066_v55, %v13747_v3  ;;  %v3814_v23 = vsel %vm3770_vm9, %v3065_v45, %v13748_v35 }
 0x369   : > { %v16980_v62 = vpack.c.bf16 %v3879_v48, %v3878_v22  ;;  %v3019_v22 = vrot.slane %v16456_v31, 7  ;;  %v3064_v35 = vsel %vm3042_vm13, %v3017_v49, %v3018_v4  ;;  %v3020_v49 = vrot.slane %v16488_v60, 7  ;;  %v11320_v60 = vld [vmem:[%s21230_s1 + $0x120] sm:$0xff] }
 0x36b   : > { %v4031_v40 = vrot.slane %v16980_v62, 4  ;;  %v3063_v55 = vsel %vm3042_vm13, %v3018_v4, %v3019_v22 }
 0x36c   : > { %v13756_v28 = vpop.permute.xlu1 %13755 }
 0x36d   : > { %v13761_v56 = vpop.permute.xlu0 %13760  ;;  %v4032_v32 = vsel %vm3993_vm15, %v4029_v57, %v4031_v40  ;;  %v13758_v13 = vunpack.i.h.bf16 %v13756_v28  ;;  %v13757_v46 = vunpack.i.l.bf16 %v13756_v28 }
 0x36e   : > { %v13763_v33 = vunpack.i.h.bf16 %v13761_v56  ;;  %v13762_v42 = vunpack.i.l.bf16 %v13761_v56  ;;  %12590 = vmatprep.mubr.msk.bf16.mxu1 %vm4091_vm3, %v4032_v32 }
 0x370   : > { %v3881_v2 = vsel %vm3837_vm10, %v3814_v23, %v13763_v33  ;;  %v3880_v48 = vsel %vm3837_vm10, %v3813_v44, %v13762_v42  ;;  %v3815_v42 = vsel %vm3770_vm9, %v3064_v35, %v13757_v46  ;;  %v3816_v44 = vsel %vm3770_vm9, %v3063_v55, %v13758_v13 }
 0x371   : > { %v16995_v57 = vpack.c.bf16 %v3881_v2, %v3880_v48  ;;  %v3021_v48 = vrot.slane %v16495_v21, 7  ;;  %v3062_v13 = vsel %vm3042_vm13, %v3019_v22, %v3020_v49  ;;  %v3022_v22 = vrot.slane %v16530_v25, 7 }
 0x373   : > { %v4033_v56 = vrot.slane %v16995_v57, 4  ;;  %v3061_v35 = vsel %vm3042_vm13, %v3020_v49, %v3021_v48 }
 0x374   : > { %v13766_v23 = vpop.permute.xlu0 %13765 }
 0x375   : > { %v13771_v32 = vpop.permute.xlu1 %13770  ;;  %v4034_v3 = vsel %vm3993_vm15, %v4031_v40, %v4033_v56  ;;  %v13768_v4 = vunpack.i.h.bf16 %v13766_v23  ;;  %v13767_v31 = vunpack.i.l.bf16 %v13766_v23 }
 0x376   : > { %v13773_v45 = vunpack.i.h.bf16 %v13771_v32  ;;  %v13772_v33 = vunpack.i.l.bf16 %v13771_v32  ;;  %12591 = vmatmul.mubr.msk.bf16.gmra.mrb[128].mxu1 %vm4091_vm3, %v4034_v3 }
 0x378   : > { %v3883_v28 = vsel %vm3837_vm10, %v3816_v44, %v13773_v45  ;;  %v3882_v2 = vsel %vm3837_vm10, %v3815_v42, %v13772_v33  ;;  %v3817_v33 = vsel %vm3770_vm9, %v3062_v13, %v13767_v31  ;;  %v3818_v42 = vsel %vm3770_vm9, %v3061_v35, %v13768_v4 }
 0x379   : > { %v17010_v40 = vpack.c.bf16 %v3883_v28, %v3882_v2  ;;  %v3023_v2 = vrot.slane %v16539_v52, 7  ;;  %v3060_v4 = vsel %vm3042_vm13, %v3021_v48, %v3022_v22  ;;  %v3024_v48 = vrot.slane %v16571_v38, 7 }
 0x37b   : > { %v4035_v32 = vrot.slane %v17010_v40, 4  ;;  %v3059_v13 = vsel %vm3042_vm13, %v3022_v22, %v3023_v2 }
 0x37c   : > { %v13776_v44 = vpop.permute.xlu1 %13775 }
 0x37d   : > { %v13781_v3 = vpop.permute.xlu0 %13780  ;;  %v4036_v46 = vsel %vm3993_vm15, %v4033_v56, %v4035_v32  ;;  %v13778_v49 = vunpack.i.h.bf16 %v13776_v44  ;;  %v13777_v21 = vunpack.i.l.bf16 %v13776_v44 }
 0x37e   : > { %v13783_v55 = vunpack.i.h.bf16 %v13781_v3  ;;  %v13782_v45 = vunpack.i.l.bf16 %v13781_v3  ;;  %12594 = vmatprep.mubr.msk.bf16.mxu1 %vm4091_vm3, %v4036_v46 }
 0x380   : > { %v3885_v23 = vsel %vm3837_vm10, %v3818_v42, %v13783_v55  ;;  %v3884_v28 = vsel %vm3837_vm10, %v3817_v33, %v13782_v45  ;;  %v3819_v45 = vsel %vm3770_vm9, %v3060_v4, %v13777_v21  ;;  %v3820_v33 = vsel %vm3770_vm9, %v3059_v13, %v13778_v49 }
 0x381   : > { %v17025_v56 = vpack.c.bf16 %v3885_v23, %v3884_v28  ;;  %v3025_v28 = vrot.slane %v16578_v14, 7  ;;  %v3058_v49 = vsel %vm3042_vm13, %v3023_v2, %v3024_v48  ;;  %v3026_v2 = vrot.slane %v16613_v34, 7 }
 0x383   : > { %v4037_v3 = vrot.slane %v17025_v56, 4  ;;  %v3057_v4 = vsel %vm3042_vm13, %v3024_v48, %v3025_v28 }
 0x384   : > { %v13786_v42 = vpop.permute.xlu0 %13785 }
 0x385   : > { %v13791_v46 = vpop.permute.xlu1 %13790  ;;  %v4038_v31 = vsel %vm3993_vm15, %v4035_v32, %v4037_v3  ;;  %v13788_v22 = vunpack.i.h.bf16 %v13786_v42  ;;  %v13787_v52 = vunpack.i.l.bf16 %v13786_v42 }
 0x386   : > { %v13793_v35 = vunpack.i.h.bf16 %v13791_v46  ;;  %v13792_v55 = vunpack.i.l.bf16 %v13791_v46  ;;  %12595 = vmatmul.mubr.msk.bf16.gmra.mrb[132].mxu1 %vm4091_vm3, %v4038_v31 }
 0x388   : > { %v3887_v44 = vsel %vm3837_vm10, %v3820_v33, %v13793_v35  ;;  %v3886_v23 = vsel %vm3837_vm10, %v3819_v45, %v13792_v55  ;;  %v3821_v55 = vsel %vm3770_vm9, %v3058_v49, %v13787_v52  ;;  %v3822_v45 = vsel %vm3770_vm9, %v3057_v4, %v13788_v22 }
 0x389   : > { %v17040_v32 = vpack.c.bf16 %v3887_v44, %v3886_v23  ;;  %v3027_v23 = vrot.slane %v16622_v29, 7  ;;  %v3056_v22 = vsel %vm3042_vm13, %v3025_v28, %v3026_v2  ;;  %v3028_v28 = vrot.slane %v16654_v17, 7 }
 0x38b   : > { %v4039_v46 = vrot.slane %v17040_v32, 4  ;;  %v3055_v49 = vsel %vm3042_vm13, %v3026_v2, %v3027_v23 }
 0x38c   : > { %v13796_v33 = vpop.permute.xlu1 %13795 }
 0x38d   : > { %v13801_v31 = vpop.permute.xlu0 %13800  ;;  %v4040_v21 = vsel %vm3993_vm15, %v4037_v3, %v4039_v46  ;;  %v13798_v48 = vunpack.i.h.bf16 %v13796_v33  ;;  %v13797_v14 = vunpack.i.l.bf16 %v13796_v33 }
 0x38e   : > { %v13803_v13 = vunpack.i.h.bf16 %v13801_v31  ;;  %v13802_v35 = vunpack.i.l.bf16 %v13801_v31  ;;  %12598 = vmatprep.mubr.msk.bf16.mxu1 %vm4091_vm3, %v4040_v21 }
 0x390   : > { %v3889_v42 = vsel %vm3837_vm10, %v3822_v45, %v13803_v13  ;;  %v3888_v44 = vsel %vm3837_vm10, %v3821_v55, %v13802_v35  ;;  %v3823_v35 = vsel %vm3770_vm9, %v3056_v22, %v13797_v14  ;;  %v3824_v55 = vsel %vm3770_vm9, %v3055_v49, %v13798_v48 }
 0x391   : > { %v17055_v3 = vpack.c.bf16 %v3889_v42, %v3888_v44  ;;  %v3029_v44 = vrot.slane %v16661_v63, 7  ;;  %v3054_v48 = vsel %vm3042_vm13, %v3027_v23, %v3028_v28  ;;  %v3030_v23 = vrot.slane %v16693_v0, 7 }
 0x393   : > { %v4041_v31 = vrot.slane %v17055_v3, 4  ;;  %v3053_v22 = vsel %vm3042_vm13, %v3028_v28, %v3029_v44 }
 0x394   : > { %v13806_v45 = vpop.permute.xlu0 %13805 }
 0x395   : > { %v13811_v21 = vpop.permute.xlu1 %13810  ;;  %v4042_v52 = vsel %vm3993_vm15, %v4039_v46, %v4041_v31  ;;  %v13808_v2 = vunpack.i.h.bf16 %v13806_v45  ;;  %v13807_v29 = vunpack.i.l.bf16 %v13806_v45 }
 0x396   : > { %v13813_v4 = vunpack.i.h.bf16 %v13811_v21  ;;  %v13812_v13 = vunpack.i.l.bf16 %v13811_v21  ;;  %12599 = vmatmul.mubr.msk.bf16.gmra.mrb[136].mxu1 %vm4091_vm3, %v4042_v52 }
 0x398   : > { %v3891_v33 = vsel %vm3837_vm10, %v3824_v55, %v13813_v4  ;;  %v3890_v42 = vsel %vm3837_vm10, %v3823_v35, %v13812_v13  ;;  %v3825_v13 = vsel %vm3770_vm9, %v3054_v48, %v13807_v29  ;;  %v3826_v35 = vsel %vm3770_vm9, %v3053_v22, %v13808_v2 }
 0x399   : > { %v17070_v46 = vpack.c.bf16 %v3891_v33, %v3890_v42  ;;  %v3031_v42 = vrot.slane %v16700_v20, 7  ;;  %v3052_v2 = vsel %vm3042_vm13, %v3029_v44, %v3030_v23  ;;  %v3032_v44 = vrot.slane %v16739_v61, 7 }
 0x39b   : > { %v4043_v21 = vrot.slane %v17070_v46, 4  ;;  %v3051_v48 = vsel %vm3042_vm13, %v3030_v23, %v3031_v42 }
 0x39c   : > { %v13816_v55 = vpop.permute.xlu1 %13815 }
 0x39d   : > { %v13821_v52 = vpop.permute.xlu0 %13820  ;;  %v4044_v14 = vsel %vm3993_vm15, %v4041_v31, %v4043_v21  ;;  %v13818_v28 = vunpack.i.h.bf16 %v13816_v55  ;;  %v13817_v63 = vunpack.i.l.bf16 %v13816_v55 }
 0x39e   : > { %v13823_v49 = vunpack.i.h.bf16 %v13821_v52  ;;  %v13822_v4 = vunpack.i.l.bf16 %v13821_v52  ;;  %12602 = vmatprep.mubr.msk.bf16.mxu1 %vm4091_vm3, %v4044_v14 }
 0x3a0   : > { %v3893_v45 = vsel %vm3837_vm10, %v3826_v35, %v13823_v49  ;;  %v3892_v33 = vsel %vm3837_vm10, %v3825_v13, %v13822_v4  ;;  %v3827_v4 = vsel %vm3770_vm9, %v3052_v2, %v13817_v63  ;;  %v3828_v13 = vsel %vm3770_vm9, %v3051_v48, %v13818_v28 }
 0x3a1   : > { %v17085_v31 = vpack.c.bf16 %v3893_v45, %v3892_v33  ;;  %v3033_v33 = vrot.slane %v16747_v26, 7  ;;  %v3050_v28 = vsel %vm3042_vm13, %v3031_v42, %v3032_v44 }
 0x3a3   : > { %v4045_v52 = vrot.slane %v17085_v31, 4  ;;  %v3049_v2 = vsel %vm3042_vm13, %v3032_v44, %v3033_v33 }
 0x3a4   : > { %v13826_v35 = vpop.permute.xlu0 %13825 }
 0x3a5   : > { %v4046_v29 = vsel %vm3993_vm15, %v4043_v21, %v4045_v52  ;;  %v13828_v23 = vunpack.i.h.bf16 %v13826_v35  ;;  %v13827_v20 = vunpack.i.l.bf16 %v13826_v35 }
 0x3a6   : > { %v13831_v14 = vpop.permute.xlu1 %13830  ;;  %12603 = vmatmul.mubr.msk.bf16.gmra.mrb[140].mxu1 %vm4091_vm3, %v4046_v29 }
 0x3a7   : > { %v13833_v22 = vunpack.i.h.bf16 %v13831_v14  ;;  %v13832_v49 = vunpack.i.l.bf16 %v13831_v14 }
 0x3a9   : > { %v3895_v55 = vsel %vm3837_vm10, %v3828_v13, %v13833_v22  ;;  %v3894_v45 = vsel %vm3837_vm10, %v3827_v4, %v13832_v49  ;;  %v3829_v49 = vsel %vm3770_vm9, %v3050_v28, %v13827_v20  ;;  %v3830_v4 = vsel %vm3770_vm9, %v3049_v2, %v13828_v23  ;;  %v11292_v20 = vld [vmem:[%s21230_s1 + $0x40] sm:$0xff] }
 0x3aa   : > { %v17100_v21 = vpack.c.bf16 %v3895_v55, %v3894_v45  ;;  %v14606_v23 = vld [vmem:[%s21232_s3] ss:$0 sm:$0xff]  ;;  %v21642_v28 = vrot.slane %v16787_v58, 7  ;;  %vm5435_vm4 = vcmp.gt.f32.partialorder %v11292_v20, 0.0  ;;  %v11294_v58 = vld [vmem:[%s21230_s1 + $0x50] sm:$0xff] }
 0x3ab   : > { %v5495_v20 = vsel %vm5435_vm4, 1, %v21614_v18  ;;  %vm5437_vm5 = vcmp.gt.f32.partialorder %v11294_v58, 0.0 }
 0x3ac   : > { %v4047_v14 = vrot.slane %v17100_v21, 4  ;;  %v3048_v2 = vsel %vm3042_vm13, %v3033_v33, %v21642_v28 }
 0x3ae   : > { %v13836_v29 = vpop.permute.xlu0 %13835  ;;  %v4048_v63 = vsel %vm3993_vm15, %v4045_v52, %v4047_v14 }
 0x3af   : > { %v13838_v48 = vunpack.i.h.bf16 %v13836_v29  ;;  %v13837_v22 = vunpack.i.l.bf16 %v13836_v29  ;;  %12606 = vmatprep.mubr.msk.bf16.mxu1 %vm4091_vm3, %v4048_v63  ;;  %v2444_v63 = vadd.f32 %v14606_v23, %v16875_v53  ;;  %v11293_v23 = vld [vmem:[%s21230_s1 + $0x48] sm:$0xff] }
 0x3b0   : > { %vm5436_vm6 = vcmp.gt.f32.partialorder %v11293_v23, 0.0 }
 0x3b1   : > { %v3897_v13 = vsel %vm3837_vm10, %v3830_v4, %v13838_v48  ;;  %v3896_v35 = vsel %vm3837_vm10, %v3829_v49, %v13837_v22  ;;  %v5496_v58 = vsel %vm5436_vm6, 1, %v21614_v18 }
 0x3b2   : > { %v17115_v55 = vpack.c.bf16 %v3897_v13, %v3896_v35  ;;  %v13841_v52 = vpop.permute.xlu0 %13840 }
 0x3b3   : > { %v13843_v45 = vunpack.i.h.bf16 %v13841_v52  ;;  %v13842_v42 = vunpack.i.l.bf16 %v13841_v52 }
 0x3b4   : > { %v4049_v26 = vrot.slane %v17115_v55, 4 }
 0x3b5   : > { %v3832_v4 = vsel %vm3770_vm9, %v16821_v24, %v13843_v45 }
 0x3b6   : > { %v13851_v44 = vpop.permute.xlu0 %13850  ;;  %v4050_v29 = vsel %vm3993_vm15, %v4047_v14, %v4049_v26  ;;  %v3831_v14 = vsel %vm3770_vm9, %v3048_v2, %v13842_v42 }
 0x3b7   : > { %v13853_v48 = vunpack.i.h.bf16 %v13851_v44  ;;  %v13852_v22 = vunpack.i.l.bf16 %v13851_v44  ;;  %v2841_v49 = vpop.permute.xlu1 %2840  ;;  %12607 = vmatmul.mubr.msk.bf16.gmra.mrb[144].mxu1 %vm4091_vm3, %v4050_v29  ;;  %v21643_v44 = vrot.slane %v21634_v19, 7 }
 0x3b8   : > { %vm2907_vm14 = vcmp.eq.s32.totalorder %v2841_v49, 1 }
 0x3b9   : > { %v3899_v13 = vsel %vm3837_vm10, %v3832_v4, %v13853_v48  ;;  %v3898_v53 = vsel %vm3837_vm10, %v3831_v14, %v13852_v22  ;;  %v17136_v35 = vsel %vm2907_vm14, %v2444_v63, 0.0  ;;  %v21644_v48 = vrot.slane %v16885_v15, 1 }
 0x3ba   : > { %v17141_v33 = vpack.c.bf16 %v3899_v13, %v3898_v53  ;;  %v13869_v52 = vpack.i.bf16 %v17136_v35, %v16885_v15  ;;  %v21344_v42 = vrot.slane %v17136_v35, 7  ;;  %v3174_v24 = vrot.slane %v17136_v35, 1  ;;  %v13861_v49 = vpop.permute.xlu0 %13860 }
 0x3bb   : > { %v13846_v45 = vpop.permute.xlu1 %13845  ;;  %v21645_v14 = vrot.slane %v21634_v19, 1  ;;  %v5497_v19 = vsel %vm5437_vm5, 1, %v21614_v18 }
 0x3bc   : > { %v3108_v29 = vsel %vm3042_vm13, %v21344_v42, %v21643_v44  ;;  %13870 = vrot.lane.b32.xlu0 %v13869_v52, %s14638_s28  ;;  %v13848_v63 = vunpack.i.h.bf16 %v13846_v45  ;;  %v13847_v28 = vunpack.i.l.bf16 %v13846_v45  ;;  %v4051_v2 = vrot.slane %v17141_v33, 4  ;;  %v11296_v45 = vld [vmem:[%s21230_s1 + $0x60] sm:$0xff] }
 0x3bd   : > { %v3176_v22 = vsel %vm3175_vm2, %v21644_v48, %v3174_v24  ;;  %v3241_v4 = vsel %vm3175_vm2, %v3174_v24, %v21645_v14  ;;  %v11295_v24 = vld [vmem:[%s21230_s1 + $0x58] sm:$0xff]  ;;  %v13862_v48 = vunpack.i.l.bf16 %v13861_v49  ;;  %vm5439_vm7 = vcmp.gt.f32.partialorder %v11296_v45, 0.0 }
 0x3be   : > { %v4052_v13 = vsel %vm3993_vm15, %v4049_v26, %v4051_v2  ;;  %v13874_v52 = vpack.i.bf16 %v3241_v4, %v3176_v22  ;;  %v13863_v26 = vunpack.i.h.bf16 %v13861_v49  ;;  %v3833_v23 = vsel %vm3770_vm9, %v16863_v16, %v13847_v28  ;;  %v11298_v16 = vld [vmem:[%s21230_s1 + $0x70] sm:$0xff] }
 0x3bf   : > { %v13856_v53 = vpop.permute.xlu1 %13855  ;;  %12610 = vmatprep.mubr.msk.bf16.mxu1 %vm4091_vm3, %v4052_v13  ;;  %v3834_v22 = vsel %vm3770_vm9, %v16869_v39, %v13848_v63  ;;  %vm5438_vm8 = vcmp.gt.f32.partialorder %v11295_v24, 0.0  ;;  %v11297_v39 = vld [vmem:[%s21230_s1 + $0x68] sm:$0xff]  ;;  %v21646_v63 = vld [vmem:[#allocation70_spill] sm:$0xff]  ;;  %v5499_v45 = vsel %vm5439_vm7, 1, %v21614_v18  ;;  %vm5441_vm1 = vcmp.gt.f32.partialorder %v11298_v16, 0.0 }
 0x3c0   : > { %v13858_v44 = vunpack.i.h.bf16 %v13856_v53  ;;  %v13857_v42 = vunpack.i.l.bf16 %v13856_v53  ;;  %5560 = vperm.xlu0 %13547, %v5495_v20   ;;  %13875 = vrot.lane.b32.xlu1 %v13874_v52, %s14639_s19  ;;  %v3771_v53 = vsel %vm3770_vm9, %v3108_v29, %v13862_v48  ;;  %vm5440_vm11 = vcmp.gt.f32.partialorder %v11297_v39, 0.0  ;;  %v11300_v29 = vld [vmem:[%s21230_s1 + $0x80] sm:$0xff]  ;;  %v14564_v16 = vld [vmem:[%s21233_s4 + $0x68] sm:$0xff]  }
 0x3c1   : > { %v5501_v48 = vsel %vm5441_vm1, 1, %v21614_v18  ;;  %vm5443_vm12 = vcmp.gt.f32.partialorder %v11300_v29, 0.0  ;;  %v11309_v29 = vld [vmem:[%s21230_s1 + $0xc8] sm:$0xff] }
 0x3c2   : > { %v3901_v14 = vsel %vm3837_vm10, %v3834_v22, %v13858_v44  ;;  %v3900_v20 = vsel %vm3837_vm10, %v3833_v23, %v13857_v42  ;;  %v3772_v42 = vsel %vm3770_vm9, %v21646_v63, %v13863_v26  ;;  %v11299_v26 = vld [vmem:[%s21230_s1 + $0x78] sm:$0xff] }
 0x3c3   : > { %v17185_v4 = vpack.c.bf16 %v3901_v14, %v3900_v20  ;;  %v13866_v13 = vpop.permute.xlu1 %13865  ;;  %vm5442_vm14 = vcmp.gt.f32.partialorder %v11299_v26, 0.0  ;;  %v11302_v14 = vld [vmem:[%s21230_s1 + $0x90] sm:$0xff]  ;;  %v11301_v20 = vld [vmem:[%s21230_s1 + $0x88] sm:$0xff] }
 0x3c4   : > { %v13868_v28 = vunpack.i.h.bf16 %v13866_v13  ;;  %v13867_v49 = vunpack.i.l.bf16 %v13866_v13  ;;  %5566 = vperm.xlu0 %13547, %v5497_v19   ;;  %5563 = vperm.xlu1 %13548, %v5496_v58   ;;  %v5498_v19 = vsel %vm5438_vm8, 1, %v21614_v18  ;;  %v5503_v58 = vsel %vm5443_vm12, 1, %v21614_v18 }
 0x3c5   : > { %v4053_v52 = vrot.slane %v17185_v4, 4  ;;  %v5502_v13 = vsel %vm5442_vm14, 1, %v21614_v18  ;;  %vm5445_vm4 = vcmp.gt.f32.partialorder %v11302_v14, 0.0  ;;  %vm5444_vm5 = vcmp.gt.f32.partialorder %v11301_v20, 0.0  ;;  %v14568_v14 = vld [vmem:[%s21233_s4 + $0x88] sm:$0xff]   ;;  %v11291_v20 = vld [vmem:[%s21230_s1 + $0x38] sm:$0xff] }
 0x3c6   : > { %v3839_v44 = vsel %vm3837_vm10, %v3772_v42, %v13868_v28  ;;  %v3838_v24 = vsel %vm3837_vm10, %v3771_v53, %v13867_v49  ;;  %v11304_v28 = vld [vmem:[%s21230_s1 + $0xa0] sm:$0xff]  ;;  %v11303_v49 = vld [vmem:[%s21230_s1 + $0x98] sm:$0xff]  ;;  %v5505_v39 = vsel %vm5445_vm4, 1, %v21614_v18  ;;  %v5504_v63 = vsel %vm5444_vm5, 1, %v21614_v18  ;;  %v11306_v42 = vld [vmem:[%s21230_s1 + $0xb0] sm:$0xff] }
 0x3c7   : > { %v4054_v23 = vsel %vm3993_vm15, %v4051_v2, %v4053_v52  ;;  %v3904_v22 = vpack.c.bf16 %v3839_v44, %v3838_v24  ;;  %v5500_v2 = vsel %vm5440_vm11, 1, %v21614_v18  ;;  %vm5447_vm6 = vcmp.gt.f32.partialorder %v11304_v28, 0.0  ;;  %v11308_v52 = vld [vmem:[%s21230_s1 + $0xc0] sm:$0xff]  ;;  %v11307_v44 = vld [vmem:[%s21230_s1 + $0xb8] sm:$0xff] }
 0x3c8   : > { %12611 = vmatmul.mubr.msk.bf16.gmra.mrb[148].mxu1 %vm4091_vm3, %v4054_v23  ;;  %5572 = vperm.xlu0 %13547, %v5499_v45   ;;  %vm5446_vm7 = vcmp.gt.f32.partialorder %v11303_v49, 0.0  ;;  %vm5449_vm8 = vcmp.gt.f32.partialorder %v11306_v42, 0.0  ;;  %v14566_v45 = vld [vmem:[%s21233_s4 + $0x78] sm:$0xff]   ;;  %vm5451_vm11 = vcmp.gt.f32.partialorder %v11308_v52, 0.0  ;;  %vm5450_vm12 = vcmp.gt.f32.partialorder %v11307_v44, 0.0  ;;  %v11310_v23 = vld [vmem:[%s21230_s1 + $0xd0] sm:$0xff] }
 0x3c9   : > { %5569 = vperm.xlu1 %13548, %v5498_v19   ;;  %12626 = vmatprep.mubr.msk.bf16.mxu1 %vm4091_vm3, %v3904_v22  ;;  %v5506_v53 = vsel %vm5446_vm7, 1, %v21614_v18  ;;  %v5509_v24 = vsel %vm5449_vm8, 1, %v21614_v18  ;;  %v14567_v22 = vld [vmem:[%s21233_s4 + $0x80] sm:$0xff]   ;;  %v5511_v26 = vsel %vm5451_vm11, 1, %v21614_v18  ;;  %vm5453_vm14 = vcmp.gt.f32.partialorder %v11310_v23, 0.0  ;;  %v21650_v42 = vld [vmem:[#allocation19_spill] sm:$0xff] }
 0x3ca   : > { %vm5452_vm4 = vcmp.gt.f32.partialorder %v11309_v29, 0.0  ;;  %v11312_v28 = vld [vmem:[%s21230_s1 + $0xe0] sm:$0xff]  ;;  %v21653_v52 = vld [vmem:[#allocation25_spill] sm:$0xff]  ;;  %v3038_v23 = vrot.slane %v16885_v15, 7 }
 0x3cb   : > { %vm5455_vm7 = vcmp.gt.f32.partialorder %v11312_v28, 0.0  ;;  %v21655_v44 = vld [vmem:[#allocation29_spill] sm:$0xff] }
 0x3cc   : > { %5578 = vperm.xlu0 %13547, %v5501_v48   ;;  %v5510_v48 = vsel %vm5450_vm12, 1, %v21614_v18 }
 0x3cd   : > { %5575 = vperm.xlu1 %13548, %v5500_v2   ;;  %v11311_v2 = vld [vmem:[%s21230_s1 + $0xd8] sm:$0xff] }
 0x3ce   : > { %vm5454_vm5 = vcmp.gt.f32.partialorder %v11311_v2, 0.0 }
 0x3cf   : > { %v5514_v49 = vsel %vm5454_vm5, 1, %v21614_v18 }
 0x3d0   : > { %5584 = vperm.xlu0 %13547, %v5503_v58   ;;  %12627 = vmatmul.mubr.msk.bf16.vlgmr.msra.gmra.mrb[92].mxu1 %vm4091_vm3, %v16262_v47  ;;  %v14565_v47 = vld [vmem:[%s21233_s4 + $0x70] sm:$0xff]   ;;  %v21647_v58 = vld [vmem:[#allocation50_spill] sm:$0xff] }
 0x3d1   : > { %5581 = vperm.xlu1 %13548, %v5502_v13   ;;  %12687 = vmatpush3.bf16.msra.mxu1 %v16917_v54  ;;  %v11305_v54 = vld [vmem:[%s21230_s1 + $0xa8] sm:$0xff]  ;;  %v5513_v13 = vsel %vm5453_vm14, 1, %v21614_v18 }
 0x3d2   : > { %12630 = vmatprep.mubr.msk.bf16.mxu1 %vm4091_vm3, %v16307_v9  ;;  %12688 = vmatprep.subr.bf16.mxu1 %v14564_v16  ;;  %v5507_v9 = vsel %vm5447_vm6, 1, %v21614_v18  ;;  %vm5448_vm1 = vcmp.gt.f32.partialorder %v11305_v54, 0.0  ;;  %vm5434_vm6 = vcmp.gt.f32.partialorder %v11291_v20, 0.0  ;;  %v5515_v54 = vsel %vm5455_vm7, 1, %v21614_v18 }
 0x3d3   : > { %v5508_v19 = vsel %vm5448_vm1, 1, %v21614_v18 }
 0x3d4   : > { %5590 = vperm.xlu0 %13547, %v5505_v39   ;;  %v5494_v39 = vsel %vm5434_vm6, 1, %v21614_v18 }
 0x3d5   : > { %5587 = vperm.xlu1 %13548, %v5504_v63   ;;  %12689 = vmatpush3.bf16.msra.mxu1 %v14564_v16  ;;  %v5512_v16 = vsel %vm5452_vm4, 1, %v21614_v18  ;;  %v21648_v63 = vmov 0.0  }
 0x3d6   : > { %12690 = vmatprep.subr.bf16.mxu1 %v14565_v47 }
 0x3d8   : > { %5596 = vperm.xlu0 %13547, %v5507_v9   ;;  %12631 = vmatmul.mubr.msk.bf16.gmra.mrb[96].mxu1 %vm4091_vm3, %v16329_v1  ;;  %v21651_v9 = vld [vmem:[#allocation21_spill] sm:$0xff] }
 0x3d9   : > { %5593 = vperm.xlu1 %13548, %v5506_v53   ;;  %12634 = vmatprep.mubr.msk.bf16.mxu1 %vm4091_vm3, %v16381_v41  ;;  %v21652_v53 = vld [vmem:[#allocation23_spill] sm:$0xff] }
 0x3da   : > { %12691 = vmatpush3.bf16.msra.mxu1 %v14565_v47  ;;  %v21649_v47 = vld [vmem:[#allocation17_spill] sm:$0xff] }
 0x3db   : > { %12692 = vmatprep.subr.bf16.mxu1 %v14566_v45 }
 0x3dc   : > { %5602 = vperm.xlu0 %13547, %v5509_v24   ;;  %v21656_v24 = vld [vmem:[#allocation30_spill] sm:$0xff] }
 0x3dd   : > { %5599 = vperm.xlu1 %13548, %v5508_v19  }
 0x3de   : > { %12693 = vmatpush3.bf16.msra.mxu1 %v14566_v45  ;;  %v21654_v45 = vld [vmem:[#allocation27_spill] sm:$0xff] }
 0x3df   : > { %12694 = vmatprep.subr.bf16.mxu1 %v14567_v22 }
 0x3e0   : > { %5608 = vperm.xlu0 %13547, %v5511_v26   ;;  %12635 = vmatmul.mubr.msk.bf16.gmra.mrb[100].mxu1 %vm4091_vm3, %v16426_v36 }
 0x3e1   : > { %5605 = vperm.xlu1 %13548, %v5510_v48   ;;  %12638 = vmatprep.mubr.msk.bf16.mxu1 %vm4091_vm3, %v21647_v58  ;;  %v21657_v48 = vrot.slane %v17136_v35, 7 }
 0x3e2   : > { %12695 = vmatpush3.bf16.msra.mxu1 %v14567_v22 }
 0x3e3   : > { %12696 = vmatprep.subr.bf16.mxu1 %v14568_v14  ;;  %v3043_v2 = vsel %vm3042_vm13, %v3038_v23, %v21657_v48 }
 0x3e4   : > { %5614 = vperm.xlu0 %13547, %v5513_v13  }
 0x3e5   : > { %5611 = vperm.xlu1 %13548, %v5512_v16  }
 0x3e6   : > { %12697 = vmatpush3.bf16.msra.mxu1 %v14568_v14  ;;  %v21658_v14 = vrot.slane %v16848_v12, 7 }
 0x3e7   : > { %12878 = vmatprep.subr.bf16.mxu1 %v21648_v63 }
 0x3e8   : > { %5617 = vperm.xlu0 %13547, %v5514_v49   ;;  %12639 = vmatmul.mubr.msk.bf16.gmra.mrb[104].mxu1 %vm4091_vm3, %v21649_v47  ;;  %v3044_v20 = vsel %vm3042_vm13, %v21658_v14, %v3038_v23 }
 0x3e9   : > { %5557 = vperm.xlu1 %13548, %v5494_v39   ;;  %12642 = vmatprep.mubr.msk.bf16.mxu1 %vm4091_vm3, %v21650_v42 }
 0x3ed   : > { %5620 = vperm.xlu1 %13548, %v5515_v54  }
 0x3f0   : > { %12643 = vmatmul.mubr.msk.bf16.gmra.mrb[108].mxu1 %vm4091_vm3, %v21651_v9 }
 0x3f1   : > { %12646 = vmatprep.mubr.msk.bf16.mxu1 %vm4091_vm3, %v21652_v53 }
 0x3f8   : > { %12647 = vmatmul.mubr.msk.bf16.gmra.mrb[112].mxu1 %vm4091_vm3, %v21653_v52 }
 0x3f9   : > { %12650 = vmatprep.mubr.msk.bf16.mxu1 %vm4091_vm3, %v21654_v45 }
 0x400   : > { %12651 = vmatmul.mubr.msk.bf16.gmra.mrb[116].mxu1 %vm4091_vm3, %v21655_v44 }
 0x401   : > { %12654 = vmatprep.mubr.msk.bf16.mxu1 %vm4091_vm3, %v21656_v24 }
 0x408   : > { %12655 = vmatmul.mubr.msk.bf16.gmra.mrb[120].mxu1 %vm4091_vm3, %v16878_v50 }
 0x409   : > { %12658 = vmatprep.mubr.msk.bf16.mxu1 %vm4091_vm3, %v16905_v30 }
 0x410   : > { %12659 = vmatmul.mubr.msk.bf16.gmra.mrb[124].mxu1 %vm4091_vm3, %v16935_v27 }
 0x411   : > { %12662 = vmatprep.mubr.msk.bf16.mxu1 %vm4091_vm3, %v16952_v59 }
 0x418   : > { %12663 = vmatmul.mubr.msk.bf16.gmra.mrb[128].mxu1 %vm4091_vm3, %v16965_v37 }
 0x419   : > { %12666 = vmatprep.mubr.msk.bf16.mxu1 %vm4091_vm3, %v16980_v62 }
 0x420   : > { %12667 = vmatmul.mubr.msk.bf16.gmra.mrb[132].mxu1 %vm4091_vm3, %v16995_v57 }
 0x421   : > { %12670 = vmatprep.mubr.msk.bf16.mxu1 %vm4091_vm3, %v17010_v40 }
 0x428   : > { %12671 = vmatmul.mubr.msk.bf16.gmra.mrb[136].mxu1 %vm4091_vm3, %v17025_v56 }
 0x429   : > { %12674 = vmatprep.mubr.msk.bf16.mxu1 %vm4091_vm3, %v17040_v32 }
 0x42e   : > { %v13871_v19 = vpop.permute.xlu0 %13870 }
 0x42f   : > { %v13873_v22 = vunpack.i.h.bf16 %v13871_v19  ;;  %v13872_v29 = vunpack.i.l.bf16 %v13871_v19 }
 0x430   : > { %12675 = vmatmul.mubr.msk.bf16.gmra.mrb[140].mxu1 %vm4091_vm3, %v17055_v3 }
 0x431   : > { %12678 = vmatprep.mubr.msk.bf16.mxu1 %vm4091_vm3, %v17070_v46  ;;  %v3835_v16 = vsel %vm3770_vm9, %v3044_v20, %v13872_v29  ;;  %v3836_v28 = vsel %vm3770_vm9, %v3043_v2, %v13873_v22 }
 0x432   : > { %v13876_v26 = vpop.permute.xlu1 %13875 }
 0x433   : > { %v13878_v15 = vunpack.i.h.bf16 %v13876_v26  ;;  %v13877_v13 = vunpack.i.l.bf16 %v13876_v26 }
 0x435   : > { %v3902_v49 = vsel %vm3837_vm10, %v3835_v16, %v13877_v13  ;;  %v3903_v39 = vsel %vm3837_vm10, %v3836_v28, %v13878_v15  ;;  %v17500_v13 = vld [vmem:[%s21230_s1 + $0x100] sm:$0xff]  ;;  %v17505_v16 = vld [vmem:[%s21230_s1 + $0x108] sm:$0xff] }
 0x436   : > { %v3936_v54 = vpack.c.bf16 %v3903_v39, %v3902_v49  ;;  %v14572_v28 = vld [vmem:[%s21235_s6 + $0x48] sm:$0xff]  }
 0x438   : > { %12679 = vmatmul.mubr.msk.bf16.gmra.mrb[144].mxu1 %vm4091_vm3, %v17085_v31 }
 0x439   : > { %12682 = vmatprep.mubr.msk.bf16.mxu1 %vm4091_vm3, %v17100_v21 }
 0x440   : > { %12683 = vmatmul.mubr.msk.bf16.gmra.mrb[148].mxu1 %vm4091_vm3, %v17115_v55 }
 0x441   : > { %12698 = vmatprep.mubr.msk.bf16.mxu1 %vm4091_vm3, %v16329_v1  ;;  %v5561_v1 = vpop.permute.xlu0 %5560 }
 0x442   : > { %vm5735_vm8 = vcmp.eq.s32.totalorder %v5561_v1, 1  ;;  %v17519_v1 = vld [vmem:[%s21230_s1 + $0x110] sm:$0xff] }
 0x448   : > { %12699 = vmatmul.mubr.msk.bf16.vlgmr.msra.gmra.mrb[92].mxu1 %vm4091_vm3, %v16381_v41  ;;  %v5564_v41 = vpop.permute.xlu1 %5563 }
 0x449   : > { %12702 = vmatprep.mubr.msk.bf16.mxu1 %vm4091_vm3, %v16426_v36  ;;  %v17419_v36 = vpop.permute.xlu0 %5566  ;;  %vm5736_vm1 = vcmp.eq.s32.totalorder %v5564_v41, 1 }
 0x44a   : > { %vm5737_vm11 = vcmp.eq.s32.totalorder %v17419_v36, 1 }
 0x44c   : > { %v17421_v12 = vpop.permute.xlu1 %5569 }
 0x44d   : > { %vm5738_vm6 = vcmp.eq.s32.totalorder %v17421_v12, 1 }
 0x450   : > { %12703 = vmatmul.mubr.msk.bf16.gmra.mrb[96].mxu1 %vm4091_vm3, %v21647_v58 }
 0x451   : > { %12706 = vmatprep.mubr.msk.bf16.mxu1 %vm4091_vm3, %v21649_v47 }
 0x458   : > { %12707 = vmatmul.mubr.msk.bf16.gmra.mrb[100].mxu1 %vm4091_vm3, %v21650_v42  ;;  %v11314_v42 = vld [vmem:[%s21230_s1 + $0xf0] sm:$0xff] }
 0x459   : > { %12710 = vmatprep.mubr.msk.bf16.mxu1 %vm4091_vm3, %v21651_v9  ;;  %v11315_v9 = vld [vmem:[%s21230_s1 + $0xf8] sm:$0xff]  ;;  %vm5457_vm4 = vcmp.gt.f32.partialorder %v11314_v42, 0.0 }
 0x45a   : > { %vm5458_vm5 = vcmp.gt.f32.partialorder %v11315_v9, 0.0 }
 0x460   : > { %12711 = vmatmul.mubr.msk.bf16.gmra.mrb[104].mxu1 %vm4091_vm3, %v21652_v53 }
 0x461   : > { %12714 = vmatprep.mubr.msk.bf16.mxu1 %vm4091_vm3, %v21653_v52 }
 0x468   : > { %12715 = vmatmul.mubr.msk.bf16.gmra.mrb[108].mxu1 %vm4091_vm3, %v21654_v45 }
 0x469   : > { %12718 = vmatprep.mubr.msk.bf16.mxu1 %vm4091_vm3, %v21655_v44 }
 0x470   : > { %12719 = vmatmul.mubr.msk.bf16.gmra.mrb[112].mxu1 %vm4091_vm3, %v21656_v24 }
 0x471   : > { %12722 = vmatprep.mubr.msk.bf16.mxu1 %vm4091_vm3, %v16878_v50  ;;  %v17423_v50 = vpop.permute.xlu0 %5572 }
 0x472   : > { %vm5739_vm14 = vcmp.eq.s32.totalorder %v17423_v50, 1  ;;  %v14573_v50 = vld [vmem:[%s21235_s6 + $0x50] sm:$0xff]  }
 0x478   : > { %12723 = vmatmul.mubr.msk.bf16.gmra.mrb[116].mxu1 %vm4091_vm3, %v16905_v30  ;;  %v14570_v30 = vld [vmem:[%s21235_s6 + $0x38] sm:$0xff]  }
 0x479   : > { %12726 = vmatprep.mubr.msk.bf16.mxu1 %vm4091_vm3, %v16935_v27  ;;  %v17428_v27 = vpop.permute.xlu1 %5575 }
 0x47a   : > { %vm5740_vm7 = vcmp.eq.s32.totalorder %v17428_v27, 1 }
 0x480   : > { %12727 = vmatmul.mubr.msk.bf16.gmra.mrb[120].mxu1 %vm4091_vm3, %v16952_v59  ;;  %v14569_v59 = vld [vmem:[%s21235_s6 + $0x30] sm:$0xff]  }
 0x481   : > { %12730 = vmatprep.mubr.msk.bf16.mxu1 %vm4091_vm3, %v16965_v37  ;;  %12759 = vmatpush3.bf16.msra.mxu0 %v14569_v59  ;;  %v17431_v37 = vpop.permute.xlu0 %5578 }
 0x482   : > { %12760 = vmatprep.subr.bf16.mxu0 %v21648_v63 }
 0x485   : > { %12761 = vmatpush3.bf16.msra.mxu0 %v14570_v30 }
 0x486   : > { %12762 = vmatprep.subr.bf16.mxu0 %v21648_v63 }
 0x488   : > { %12731 = vmatmul.mubr.msk.bf16.gmra.mrb[124].mxu1 %vm4091_vm3, %v16980_v62  ;;  %v17433_v62 = vpop.permute.xlu1 %5581 }
 0x489   : > { %12734 = vmatprep.mubr.msk.bf16.mxu1 %vm4091_vm3, %v16995_v57  ;;  %v17438_v57 = vld [vmem:[%s21234_s5] ss:$0 sm:$0xff] }
 0x490   : > { %12735 = vmatmul.mubr.msk.bf16.gmra.mrb[128].mxu1 %vm4091_vm3, %v17010_v40  ;;  %v14571_v40 = vld [vmem:[%s21235_s6 + $0x40] sm:$0xff]  }
 0x491   : > { %12738 = vmatprep.mubr.msk.bf16.mxu1 %vm4091_vm3, %v17025_v56  ;;  %12763 = vmatpush3.bf16.msra.mxu0 %v14571_v40  ;;  %v17524_v40 = vsel %vm5457_vm4, 1, %v21614_v18  ;;  %vm5460_vm4 = vcmp.gt.f32.partialorder %v17505_v16, 0.0 }
 0x492   : > { %12764 = vmatprep.subr.bf16.mxu0 %v21648_v63 }
 0x495   : > { %12765 = vmatpush3.bf16.msra.mxu0 %v14572_v28 }
 0x496   : > { %12766 = vmatprep.subr.bf16.mxu0 %v21648_v63 }
 0x498   : > { %12739 = vmatmul.mubr.msk.bf16.gmra.mrb[132].mxu1 %vm4091_vm3, %v17040_v32  ;;  %v17443_v32 = vpop.permute.xlu0 %5584 }
 0x499   : > { %12742 = vmatprep.mubr.msk.bf16.mxu1 %vm4091_vm3, %v17055_v3  ;;  %12767 = vmatpush3.bf16.msra.mxu0 %v14573_v50 }
 0x49a   : > { %12768 = vmatprep.subr.bf16.mxu0 %v21648_v63 }
 0x49c   : > { %v17466_v53 = vpop.permute.xlu0 %5590 }
 0x4a0   : > { %12743 = vmatmul.mubr.msk.bf16.gmra.mrb[136].mxu1 %vm4091_vm3, %v17070_v46 }
 0x4a1   : > { %12746 = vmatprep.mubr.msk.bf16.mxu1 %vm4091_vm3, %v17085_v31 }
 0x4a8   : > { %12747 = vmatmul.mubr.msk.bf16.gmra.mrb[140].mxu1 %vm4091_vm3, %v17100_v21  ;;  %v17449_v21 = vpop.permute.xlu1 %5587 }
 0x4a9   : > { %12750 = vmatprep.mubr.msk.bf16.mxu1 %vm4091_vm3, %v17115_v55 }
 0x4ac   : > { %v17477_v29 = vpop.permute.xlu1 %5593 }
 0x4b0   : > { %12751 = vmatmul.mubr.msk.bf16.gmra.mrb[144].mxu1 %vm4091_vm3, %v17141_v33  ;;  %v17550_v42 = vpop.permute.xlu1 %5599 }
 0x4b1   : > { %12754 = vmatprep.mubr.msk.bf16.mxu1 %vm4091_vm3, %v17185_v4  ;;  %v11313_v4 = vld [vmem:[%s21230_s1 + $0xe8] sm:$0xff] }
 0x4b2   : > { %vm5456_vm12 = vcmp.gt.f32.partialorder %v11313_v4, 0.0 }
 0x4b3   : > { %v17514_v59 = vsel %vm5456_vm12, 1, %v21614_v18  ;;  %vm5459_vm12 = vcmp.gt.f32.partialorder %v17500_v13, 0.0 }
 0x4b8   : > { %12755 = vmatmul.mubr.msk.bf16.gmra.mrb[148].mxu1 %vm4091_vm3, %v3936_v54 }
 0x4b9   : > { %12890 = vmatprep.mubr.msk.bf16.mxu1 %vm21345_vm0, %v21648_v63  ;;  %vm5744_vm0 = vcmp.eq.s32.totalorder %v17449_v21, 1 }
 0x51b   : > { %v12700_v56 = vpop.f32.mrb[92].mxu1 }
 0x51c   : > { %v5254_v3 = vadd.f32 %v12700_v56, %v17438_v57  ;;  %v17446_v46 = vpop.f32.mrb[93].mxu1  ;;  %v17528_v56 = vsel %vm5458_vm5, 1, %v21614_v18  ;;  %vm5461_vm5 = vcmp.gt.f32.partialorder %v17519_v1, 0.0 }
 0x51d   : > { %21659 = vst [vmem:[#allocation57_spill] sm:$0xff] %v17446_v46  ;;  %v12701_v31 = vpop.f32.mrb[94].mxu1 }
 0x51e   : > { %v5314_v55 = vmax.f32 %v5254_v3, 0.0  ;;  %v5255_v35 = vadd.f32 %v12701_v31, %v17438_v57  ;;  %v17452_v33 = vpop.f32.mrb[95].mxu1  ;;  %v17532_v3 = vpop.permute.xlu0 %5596 }
 0x520   : > { %v17457_v58 = vsel %vm5735_vm8, %v5314_v55, 0.0  ;;  %v5315_v47 = vmax.f32 %v5255_v35, 0.0  ;;  %vm5741_vm8 = vcmp.eq.s32.totalorder %v17431_v37, 1 }
 0x521   : > { %21660 = vst [vmem:[#allocation31_spill] sm:$0xff] %v17457_v58  ;;  %v21348_v52 = vrot.slane %v17457_v58, 7  ;;  %v21347_v44 = vrot.slane %v17457_v58, 1 }
 0x522   : > { %v17469_v45 = vsel %vm5736_vm1, %v5315_v47, 0.0  ;;  %vm5743_vm1 = vcmp.eq.s32.totalorder %v17443_v32, 1  ;;  %v17581_v50 = vpop.permute.xlu0 %5602  ;;  %v17635_v32 = vsel %vm5461_vm5, 1, %v21614_v18 }
 0x523   : > { %v13879_v24 = vpack.i.bf16 %v17469_v45, %v17457_v58  ;;  %v5856_v19 = vrot.slane %v17469_v45, 7  ;;  %v5976_v23 = vrot.slane %v17469_v45, 1  ;;  %v12704_v22 = vpop.f32.mrb[96].mxu1 }
 0x524   : > { %v5258_v26 = vadd.f32 %v12704_v22, %v17438_v57  ;;  %v4962_v48 = vpop.f32.mrb[97].mxu1 }
 0x525   : > { %v17485_v2 = vsel %vm3042_vm13, %v21348_v52, %v5856_v19  ;;  %v5256_v14 = vadd.f32 %v17438_v57, %v4962_v48  ;;  %13880 = vrot.lane.b32.xlu0 %v13879_v24, %s14638_s28  ;;  %v12705_v20 = vpop.f32.mrb[98].mxu1  ;;  %v17495_v15 = vsel %vm3175_vm2, %v21347_v44, %v5976_v23 }
 0x526   : > { %v5318_v49 = vmax.f32 %v5258_v26, 0.0  ;;  %v5259_v39 = vadd.f32 %v12705_v20, %v17438_v57  ;;  %v4965_v54 = vpop.f32.mrb[99].mxu1  ;;  %v17649_v1 = vpop.permute.xlu0 %5608 }
 0x527   : > { %v5316_v41 = vmax.f32 %v5256_v14, 0.0  ;;  %v5257_v30 = vadd.f32 %v17438_v57, %v4965_v54 }
 0x528   : > { %v17536_v31 = vsel %vm5739_vm14, %v5318_v49, 0.0  ;;  %v5319_v55 = vmax.f32 %v5259_v39, 0.0  ;;  %vm5742_vm14 = vcmp.eq.s32.totalorder %v17433_v62, 1 }
 0x529   : > { %v5859_v35 = vrot.slane %v17536_v31, 7  ;;  %v5797_v4 = vsel %vm5737_vm11, %v5316_v41, 0.0  ;;  %v5317_v47 = vmax.f32 %v5257_v30, 0.0  ;;  %v5979_v9 = vrot.slane %v17536_v31, 1 }
 0x52a   : > { %v5857_v24 = vrot.slane %v5797_v4, 7  ;;  %v5977_v22 = vrot.slane %v5797_v4, 1  ;;  %v17555_v36 = vsel %vm5740_vm7, %v5319_v55, 0.0  ;;  %vm5747_vm11 = vcmp.eq.s32.totalorder %v17532_v3, 1 }
 0x52b   : > { %v5860_v48 = vrot.slane %v17555_v36, 7  ;;  %v5798_v20 = vsel %vm5738_vm6, %v5317_v47, 0.0  ;;  %v12708_v28 = vpop.f32.mrb[100].mxu1  ;;  %vm5745_vm6 = vcmp.eq.s32.totalorder %v17466_v53, 1  ;;  %vm5748_vm7 = vcmp.eq.s32.totalorder %v17550_v42, 1 }
 0x52c   : > { %v17565_v49 = vsel %vm3042_vm13, %v5856_v19, %v5857_v24  ;;  %v13884_v39 = vpack.i.bf16 %v5798_v20, %v5797_v4  ;;  %v5858_v27 = vrot.slane %v5798_v20, 7  ;;  %v5978_v54 = vrot.slane %v5798_v20, 1  ;;  %v4978_v41 = vpop.f32.mrb[101].mxu1  ;;  %v14574_v4 = vld [vmem:[%s21235_s6 + $0x58] sm:$0xff]  }
 0x52d   : > { %v17570_v30 = vsel %vm3042_vm13, %v5859_v35, %v5860_v48  ;;  %v5262_v55 = vadd.f32 %v12708_v28, %v17438_v57  ;;  %v5260_v12 = vadd.f32 %v17438_v57, %v4978_v41  ;;  %v12709_v47 = vpop.f32.mrb[102].mxu1  ;;  %v6088_v19 = vsel %vm3175_vm2, %v5976_v23, %v5977_v22  ;;  %12769 = vmatpush3.bf16.msra.mxu0 %v14574_v4 }
 0x52e   : > { %v17585_v20 = vsel %vm3042_vm13, %v5858_v27, %v5859_v35  ;;  %v17589_v28 = vsel %vm3042_vm13, %v5857_v24, %v5858_v27  ;;  %v5263_v41 = vadd.f32 %v12709_v47, %v17438_v57  ;;  %13885 = vrot.lane.b32.xlu1 %v13884_v39, %s14638_s28  ;;  %v4981_v45 = vpop.f32.mrb[103].mxu1  ;;  %v13889_v23 = vpack.i.bf16 %v6088_v19, %v17495_v15  ;;  %v17598_v35 = vpop.permute.xlu1 %5605 }
 0x52f   : > { %v5322_v44 = vmax.f32 %v5262_v55, 0.0  ;;  %v5320_v52 = vmax.f32 %v5260_v12, 0.0  ;;  %v5261_v26 = vadd.f32 %v17438_v57, %v4981_v45  ;;  %v6086_v14 = vsel %vm3175_vm2, %v5978_v54, %v5979_v9  ;;  %12998 = vmatprep.subr.bf16.mxu0 %v21648_v63 }
 0x530   : > { %v5323_v24 = vmax.f32 %v5263_v41, 0.0  ;;  %13890 = vrot.lane.b32.xlu0 %v13889_v23, %s14639_s19  ;;  %v6087_v39 = vsel %vm3175_vm2, %v5977_v22, %v5978_v54  ;;  %v21661_v15 = vrot.slane %v17555_v36, 1  ;;  %v17612_v55 = vsel %vm5459_vm12, 1, %v21614_v18 }
 0x531   : > { %v17619_v22 = vsel %vm5743_vm1, %v5322_v44, 0.0  ;;  %v17623_v54 = vsel %vm5741_vm8, %v5320_v52, 0.0  ;;  %v13894_v12 = vpack.i.bf16 %v6086_v14, %v6087_v39  ;;  %v17630_v19 = vsel %vm5460_vm4, 1, %v21614_v18 }
 0x532   : > { %v17607_v27 = vsel %vm3175_vm2, %v5979_v9, %v21661_v15  ;;  %v5321_v9 = vmax.f32 %v5261_v26, 0.0  ;;  %v5861_v13 = vrot.slane %v17623_v54, 7  ;;  %v5981_v47 = vrot.slane %v17623_v54, 1  ;;  %v17665_v15 = vpop.permute.xlu1 %5611 }
 0x533   : > { %vm5746_vm1 = vcmp.eq.s32.totalorder %v17477_v29, 1  ;;  %v5863_v37 = vrot.slane %v17619_v22, 7  ;;  %v5983_v52 = vrot.slane %v17619_v22, 1  ;;  %v17642_v44 = vsel %vm5744_vm0, %v5323_v24, 0.0  ;;  %13895 = vrot.lane.b32.xlu1 %v13894_v12, %s14639_s19  ;;  %v12712_v26 = vpop.f32.mrb[104].mxu1 }
 0x534   : > { %v17646_v16 = vsel %vm5742_vm14, %v5321_v9, 0.0  ;;  %v17653_v14 = vsel %vm3042_vm13, %v5860_v48, %v5861_v13  ;;  %v5864_v21 = vrot.slane %v17642_v44, 7  ;;  %5623 = vperm.xlu0 %13547, %v17514_v59   ;;  %v4994_v62 = vpop.f32.mrb[105].mxu1  ;;  %v5266_v48 = vadd.f32 %v12712_v26, %v17438_v57 }
 0x535   : > { %v5862_v23 = vrot.slane %v17646_v16, 7  ;;  %v5982_v24 = vrot.slane %v17646_v16, 1  ;;  %v12713_v39 = vpop.f32.mrb[106].mxu1  ;;  %v5264_v12 = vadd.f32 %v17438_v57, %v4994_v62  ;;  %v21662_v45 = vrot.slane %v17555_v36, 1 }
 0x536   : > { %v17669_v9 = vsel %vm3042_vm13, %v5863_v37, %v5864_v21  ;;  %v5267_v59 = vadd.f32 %v12713_v39, %v17438_v57  ;;  %v4997_v4 = vpop.f32.mrb[107].mxu1  ;;  %vm5751_vm0 = vcmp.eq.s32.totalorder %v17649_v1, 1  ;;  %v5326_v0 = vmax.f32 %v5266_v48, 0.0 }
 0x537   : > { %v6084_v41 = vsel %vm3175_vm2, %v21662_v45, %v5981_v47  ;;  %v17680_v26 = vsel %vm3042_vm13, %v5862_v23, %v5863_v37  ;;  %v17684_v61 = vsel %vm3042_vm13, %v5861_v13, %v5862_v23  ;;  %5626 = vperm.xlu1 %13548, %v17524_v40   ;;  %v5265_v62 = vadd.f32 %v17438_v57, %v4997_v4 }
 0x538   : > { %v5324_v39 = vmax.f32 %v5264_v12, 0.0  ;;  %v5327_v17 = vmax.f32 %v5267_v59, 0.0  ;;  %v21663_v45 = vpack.i.bf16 %v17555_v36, %v17536_v31  ;;  %v13904_v34 = vpack.i.bf16 %v6084_v41, %v17607_v27 }
 0x539   : > { %v6082_v37 = vsel %vm3175_vm2, %v5982_v24, %v5983_v52  ;;  %vm5749_vm8 = vcmp.eq.s32.totalorder %v17581_v50, 1  ;;  %vm5752_vm12 = vcmp.eq.s32.totalorder %v17665_v15, 1  ;;  %v17699_v40 = vsel %vm5747_vm11, %v5326_v0, 0.0 }
 0x53a   : > { %13900 = vrot.lane.b32.xlu0 %v21663_v45, %s14638_s28  ;;  %v5325_v13 = vmax.f32 %v5265_v62, 0.0  ;;  %v6083_v4 = vsel %vm3175_vm2, %v5981_v47, %v5982_v24  ;;  %v21664_v31 = vrot.slane %v17642_v44, 1  ;;  %v5867_v27 = vrot.slane %v17699_v40, 7 }
 0x53b   : > { %v5987_v41 = vrot.slane %v17699_v40, 1  ;;  %v17713_v23 = vsel %vm5745_vm6, %v5324_v39, 0.0  ;;  %v17717_v0 = vsel %vm5748_vm7, %v5327_v17, 0.0  ;;  %vm5750_vm4 = vcmp.eq.s32.totalorder %v17598_v35, 1  ;;  %13905 = vrot.lane.b32.xlu1 %v13904_v34, %s14639_s19  ;;  %v12716_v53 = vpop.f32.mrb[108].mxu1 }
 0x53c   : > { %v17707_v36 = vsel %vm3175_vm2, %v5983_v52, %v21664_v31  ;;  %v5865_v3 = vrot.slane %v17713_v23, 7  ;;  %v5985_v47 = vrot.slane %v17713_v23, 1  ;;  %v5868_v24 = vrot.slane %v17717_v0, 7  ;;  %v5010_v12 = vpop.f32.mrb[109].mxu1  ;;  %v17752_v52 = vpop.permute.xlu1 %5557 }
 0x53d   : > { %v17729_v17 = vsel %vm5746_vm1, %v5325_v13, 0.0  ;;  %v5270_v42 = vadd.f32 %v12716_v53, %v17438_v57  ;;  %v13914_v59 = vpack.i.bf16 %v6082_v37, %v6083_v4  ;;  %v12717_v45 = vpop.f32.mrb[110].mxu1  ;;  %v17744_v13 = vpop.permute.xlu0 %5614  ;;  %v5268_v37 = vadd.f32 %v17438_v57, %v5010_v12  ;;  %v11319_v53 = vld [vmem:[%s21230_s1 + $0x118] sm:$0xff] }
 0x53e   : > { %5629 = vperm.xlu0 %13547, %v17528_v56   ;;  %v17735_v62 = vsel %vm3042_vm13, %v5864_v21, %v5865_v3  ;;  %v17739_v34 = vsel %vm3042_vm13, %v5867_v27, %v5868_v24  ;;  %v5866_v29 = vrot.slane %v17729_v17, 7  ;;  %v5986_v56 = vrot.slane %v17729_v17, 1  ;;  %v5013_v4 = vpop.f32.mrb[111].mxu1 }
 0x53f   : > { %v5330_v31 = vmax.f32 %v5270_v42, 0.0  ;;  %v5271_v21 = vadd.f32 %v12717_v45, %v17438_v57  ;;  %5632 = vperm.xlu1 %13548, %v17612_v55   ;;  %v5269_v42 = vadd.f32 %v17438_v57, %v5013_v4  ;;  %v21665_v12 = vrot.slane %v17642_v44, 1 }
 0x540   : > { %v17756_v39 = vsel %vm3042_vm13, %v5866_v29, %v5867_v27  ;;  %v17760_v48 = vsel %vm3042_vm13, %v5865_v3, %v5866_v29  ;;  %v5328_v25 = vmax.f32 %v5268_v37, 0.0  ;;  %v21666_v3 = vpack.i.bf16 %v17646_v16, %v17623_v54 }
 0x541   : > { %v6080_v45 = vsel %vm3175_vm2, %v21665_v12, %v5985_v47  ;;  %v17770_v38 = vsel %vm5751_vm0, %v5330_v31, 0.0  ;;  %v5331_v27 = vmax.f32 %v5271_v21, 0.0  ;;  %vm5753_vm5 = vcmp.eq.s32.totalorder %v17744_v13, 1 }
 0x542   : > { %13910 = vrot.lane.b32.xlu0 %v21666_v3, %s14638_s28  ;;  %v13924_v55 = vpack.i.bf16 %v6080_v45, %v17707_v36  ;;  %v5871_v29 = vrot.slane %v17770_v38, 7  ;;  %v5329_v4 = vmax.f32 %v5269_v42, 0.0  ;;  %vm5462_vm14 = vcmp.gt.f32.partialorder %v11319_v53, 0.0  ;;  %v5621_v3 = vpop.permute.xlu1 %5620 }
 0x543   : > { %v17781_v1 = vsel %vm3175_vm2, %v5986_v56, %v5987_v41  ;;  %v17785_v31 = vsel %vm5749_vm8, %v5328_v25, 0.0  ;;  %v17789_v54 = vsel %vm5752_vm12, %v5331_v27, 0.0  ;;  %v17793_v16 = vsel %vm3175_vm2, %v5985_v47, %v5986_v56  ;;  %13915 = vrot.lane.b32.xlu1 %v13914_v59, %s14639_s19  ;;  %v12720_v42 = vpop.f32.mrb[112].mxu1  ;;  %v5618_v47 = vpop.permute.xlu0 %5617 }
 0x544   : > { %v21667_v36 = vrot.slane %v17717_v0, 1  ;;  %v5869_v21 = vrot.slane %v17785_v31, 7  ;;  %v5989_v50 = vrot.slane %v17785_v31, 1  ;;  %v5872_v15 = vrot.slane %v17789_v54, 7  ;;  %v5026_v45 = vpop.f32.mrb[113].mxu1 }
 0x545   : > { %v5991_v56 = vrot.slane %v17770_v38, 1  ;;  %v17810_v12 = vsel %vm5750_vm4, %v5329_v4, 0.0  ;;  %v13934_v27 = vpack.i.bf16 %v17781_v1, %v17793_v16  ;;  %v17827_v4 = vpop.f32.mrb[114].mxu1  ;;  %v5272_v25 = vadd.f32 %v17438_v57, %v5026_v45 }
 0x546   : > { %v17799_v37 = vsel %vm3175_vm2, %v5987_v41, %v21667_v36  ;;  %5635 = vperm.xlu0 %13547, %v17630_v19   ;;  %v5274_v41 = vadd.f32 %v12720_v42, %v17438_v57  ;;  %v17818_v59 = vsel %vm3042_vm13, %v5868_v24, %v5869_v21  ;;  %v17822_v36 = vsel %vm3042_vm13, %v5871_v29, %v5872_v15  ;;  %v5029_v24 = vpop.f32.mrb[115].mxu1 }
 0x547   : > { %v5870_v19 = vrot.slane %v17810_v12, 7  ;;  %v5992_v42 = vrot.slane %v17789_v54, 1  ;;  %v5990_v1 = vrot.slane %v17810_v12, 1  ;;  %5638 = vperm.xlu1 %13548, %v17635_v32   ;;  %v5273_v6 = vadd.f32 %v17438_v57, %v5029_v24 }
 0x548   : > { %v5334_v16 = vmax.f32 %v5274_v41, 0.0  ;;  %v21668_v41 = vrot.slane %v17717_v0, 1  ;;  %vm5754_vm11 = vcmp.eq.s32.totalorder %v5618_v47, 1  ;;  %vm5755_vm6 = vcmp.eq.s32.totalorder %v5621_v3, 1 }
 0x549   : > { %v17837_v7 = vsel %vm3042_vm13, %v5870_v19, %v5871_v29  ;;  %v17841_v35 = vsel %vm3042_vm13, %v5869_v21, %v5870_v19  ;;  %v5332_v43 = vmax.f32 %v5272_v25, 0.0  ;;  %v21669_v29 = vpack.i.bf16 %v17642_v44, %v17619_v22 }
 0x54a   : > { %v6076_v45 = vsel %vm3175_vm2, %v21668_v41, %v5989_v50  ;;  %v5333_v19 = vmax.f32 %v5273_v6, 0.0  ;;  %v5522_v32 = vsel %vm5462_vm14, 1, %v21614_v18  ;;  %vm5463_vm7 = vcmp.gt.f32.partialorder %v11320_v60, 0.0  ;;  %v11322_v60 = vld [vmem:[%s21230_s1 + $0x130] sm:$0xff] }
 0x54b   : > { %13920 = vrot.lane.b32.xlu0 %v21669_v29, %s14638_s28  ;;  %v13944_v21 = vpack.i.bf16 %v6076_v45, %v17799_v37  ;;  %v6074_v24 = vsel %vm3175_vm2, %v5990_v1, %v5991_v56  ;;  %v17858_v5 = vsel %vm5755_vm6, %v5334_v16, 0.0  ;;  %v17862_v25 = vsel %vm5753_vm5, %v5332_v43, 0.0  ;;  %13925 = vrot.lane.b32.xlu1 %v13924_v55, %s14639_s19  ;;  %v17875_v47 = vpop.f32.mrb[116].mxu1  ;;  %v11321_v43 = vld [vmem:[%s21230_s1 + $0x128] sm:$0xff] }
 0x54c   : > { %v6075_v22 = vsel %vm3175_vm2, %v5989_v50, %v5990_v1  ;;  %v17868_v44 = vsel %vm3175_vm2, %v5991_v56, %v5992_v42  ;;  %v5873_v6 = vrot.slane %v17862_v25, 7  ;;  %v5993_v53 = vrot.slane %v17862_v25, 1  ;;  %v17884_v1 = vpop.f32.mrb[117].mxu1 }
 0x54d   : > { %v17872_v37 = vsel %vm5754_vm11, %v5333_v19, 0.0  ;;  %v13954_v13 = vpack.i.bf16 %v6074_v24, %v6075_v22  ;;  %v5523_v55 = vsel %vm5463_vm7, 1, %v21614_v18  ;;  %v21361_v16 = vrot.slane %v17858_v5, 1  ;;  %v17893_v45 = vpop.f32.mrb[118].mxu1 }
 0x54e   : > { %v13969_v50 = vpack.i.bf16 %v17872_v37, %v17862_v25  ;;  %v21360_v56 = vrot.slane %v17872_v37, 7  ;;  %v5994_v3 = vrot.slane %v17872_v37, 1  ;;  %v17891_v41 = vsel %vm3042_vm13, %v5872_v15, %v5873_v6 }
 0x54f   : > { %5641 = vperm.xlu0 %13547, %v5522_v32   ;;  %v6072_v29 = vsel %vm3175_vm2, %v5992_v42, %v5993_v53  ;;  %v17903_v32 = vpop.f32.mrb[119].mxu1  ;;  %vm5464_vm1 = vcmp.gt.f32.partialorder %v11321_v43, 0.0  ;;  %5644 = vperm.xlu1 %13548, %v5523_v55   ;;  %v21670_v24 = vpack.i.bf16 %v17729_v17, %v17713_v23  ;;  %vm5465_vm0 = vcmp.gt.f32.partialorder %v11322_v60, 0.0  ;;  %v11323_v55 = vld [vmem:[%s21230_s1 + $0x138] sm:$0xff] }
 0x550   : > { %v17901_v19 = vsel %vm3042_vm13, %v5873_v6, %v21360_v56  ;;  %v13964_v15 = vpack.i.bf16 %v6072_v29, %v17868_v44  ;;  %v6070_v42 = vsel %vm3175_vm2, %v5994_v3, %v21361_v16  ;;  %v6071_v22 = vsel %vm3175_vm2, %v5993_v53, %v5994_v3 }
 0x551   : > { %v5524_v6 = vsel %vm5464_vm1, 1, %v21614_v18  ;;  %v13974_v43 = vpack.i.bf16 %v6070_v42, %v6071_v22  ;;  %v5525_v23 = vsel %vm5465_vm0, 1, %v21614_v18  ;;  %vm5466_vm8 = vcmp.gt.f32.partialorder %v11323_v55, 0.0 }
 0x552   : > { %v21671_v3 = vpack.i.bf16 %v17717_v0, %v17699_v40  ;;  %v5526_v60 = vsel %vm5466_vm8, 1, %v21614_v18  ;;  %v11326_v0 = vld [vmem:[%s21230_s1 + $0x150] sm:$0xff]  ;;  %vm5734_vm1 = vcmp.eq.s32.totalorder %v17752_v52, 1  ;;  %vm21696_vm0 = vmmov 0  }
 0x553   : > { %13930 = vrot.lane.b32.xlu0 %v21670_v24, %s14638_s28  ;;  %13935 = vrot.lane.b32.xlu1 %v13934_v27, %s14639_s19  ;;  %v17921_v44 = vpop.f32.mrb[120].mxu1  ;;  %v11324_v27 = vld [vmem:[%s21230_s1 + $0x140] sm:$0xff]  ;;  %v11325_v24 = vld [vmem:[%s21230_s1 + $0x148] sm:$0xff]  ;;  %vm5469_vm5 = vcmp.gt.f32.partialorder %v11326_v0, 0.0 }
 0x554   : > { %v17926_v29 = vpop.f32.mrb[121].mxu1  ;;  %vm5467_vm12 = vcmp.gt.f32.partialorder %v11324_v27, 0.0  ;;  %vm5468_vm4 = vcmp.gt.f32.partialorder %v11325_v24, 0.0  ;;  %v5529_v24 = vsel %vm5469_vm5, 1, %v21614_v18 }
 0x555   : > { %v17929_v17 = vpop.f32.mrb[122].mxu1 }
 0x556   : > { %v17931_v53 = vpop.f32.mrb[123].mxu1 }
 0x557   : > { %5647 = vperm.xlu0 %13547, %v5524_v6   ;;  %5650 = vperm.xlu1 %13548, %v5525_v23   ;;  %v5527_v6 = vsel %vm5467_vm12, 1, %v21614_v18  ;;  %v5528_v23 = vsel %vm5468_vm4, 1, %v21614_v18 }
 0x55b   : > { %13940 = vrot.lane.b32.xlu0 %v21671_v3, %s14638_s28  ;;  %13945 = vrot.lane.b32.xlu1 %v13944_v21, %s14639_s19  ;;  %v17942_v42 = vpop.f32.mrb[124].mxu1  ;;  %v21672_v21 = vpack.i.bf16 %v17810_v12, %v17785_v31  ;;  %v11327_v3 = vld [vmem:[%s21230_s1 + $0x158] sm:$0xff]  ;;  %v11328_v12 = vld [vmem:[%s21230_s1 + $0x160] sm:$0xff] }
 0x55c   : > { %v17947_v22 = vpop.f32.mrb[125].mxu1  ;;  %vm5470_vm14 = vcmp.gt.f32.partialorder %v11327_v3, 0.0  ;;  %vm5471_vm11 = vcmp.gt.f32.partialorder %v11328_v12, 0.0 }
 0x55d   : > { %v17950_v55 = vpop.f32.mrb[126].mxu1  ;;  %v5530_v0 = vsel %vm5470_vm14, 1, %v21614_v18 }
 0x55e   : > { %v17952_v40 = vpop.f32.mrb[127].mxu1 }
 0x55f   : > { %5653 = vperm.xlu0 %13547, %v5526_v60   ;;  %5656 = vperm.xlu1 %13548, %v5527_v6  }
 0x563   : > { %13950 = vrot.lane.b32.xlu0 %v21672_v21, %s14638_s28  ;;  %13955 = vrot.lane.b32.xlu1 %v13954_v13, %s14639_s19  ;;  %v17963_v27 = vpop.f32.mrb[128].mxu1  ;;  %v21673_v13 = vpack.i.bf16 %v17789_v54, %v17770_v38  ;;  %v11330_v54 = vld [vmem:[%s21230_s1 + $0x170] sm:$0xff] }
 0x564   : > { %v17968_v60 = vpop.f32.mrb[129].mxu1  ;;  %vm5473_vm7 = vcmp.gt.f32.partialorder %v11330_v54, 0.0 }
 0x565   : > { %v17971_v6 = vpop.f32.mrb[130].mxu1 }
 0x566   : > { %v17973_v31 = vpop.f32.mrb[131].mxu1 }
 0x567   : > { %5659 = vperm.xlu0 %13547, %v5528_v23   ;;  %5662 = vperm.xlu1 %13548, %v5529_v24   ;;  %v11329_v23 = vld [vmem:[%s21230_s1 + $0x168] sm:$0xff]  ;;  %v5531_v24 = vsel %vm5471_vm11, 1, %v21614_v18 }
 0x568   : > { %vm5472_vm6 = vcmp.gt.f32.partialorder %v11329_v23, 0.0 }
 0x56b   : > { %13960 = vrot.lane.b32.xlu0 %v21673_v13, %s14638_s28  ;;  %13965 = vrot.lane.b32.xlu1 %v13964_v15, %s14639_s19  ;;  %v17984_v21 = vpop.f32.mrb[132].mxu1  ;;  %v5532_v15 = vsel %vm5472_vm6, 1, %v21614_v18 }
 0x56c   : > { %21674 = vst [vmem:[#allocation32_spill] sm:$0xff] %v17984_v21  ;;  %v17989_v3 = vpop.f32.mrb[133].mxu1 }
 0x56d   : > { %v17992_v56 = vpop.f32.mrb[134].mxu1 }
 0x56e   : > { %21675 = vst [vmem:[#allocation58_spill] sm:$0xff] %v17992_v56  ;;  %v17994_v38 = vpop.f32.mrb[135].mxu1 }
 0x56f   : > { %5665 = vperm.xlu0 %13547, %v5530_v0   ;;  %21676 = vst [vmem:[#allocation34_spill] sm:$0xff] %v17994_v38  ;;  %5668 = vperm.xlu1 %13548, %v5531_v24   ;;  %v5533_v0 = vsel %vm5473_vm7, 1, %v21614_v18 }
 0x573   : > { %13970 = vrot.lane.b32.xlu0 %v13969_v50, %s14638_s28  ;;  %13975 = vrot.lane.b32.xlu1 %v13974_v43, %s14639_s19  ;;  %v18005_v12 = vpop.f32.mrb[136].mxu1 }
 0x574   : > { %21677 = vst [vmem:[#allocation35_spill] sm:$0xff] %v18005_v12  ;;  %v18007_v13 = vpop.f32.mrb[137].mxu1 }
 0x575   : > { %21678 = vst [vmem:[#allocation60_spill] sm:$0xff] %v18007_v13  ;;  %v18010_v23 = vpop.f32.mrb[138].mxu1 }
 0x576   : > { %21679 = vst [vmem:[#allocation37_spill] sm:$0xff] %v18010_v23  ;;  %v18012_v24 = vpop.f32.mrb[139].mxu1 }
 0x577   : > { %5671 = vperm.xlu0 %13547, %v5532_v15   ;;  %21680 = vst [vmem:[#allocation38_spill] sm:$0xff] %v18012_v24  ;;  %5674 = vperm.xlu1 %13548, %v5533_v0  }
 0x57b   : > { %v18014_v16 = vpop.f32.mrb[140].mxu1 }
 0x57c   : > { %21681 = vst [vmem:[#allocation62_spill] sm:$0xff] %v18014_v16  ;;  %v18016_v25 = vpop.f32.mrb[141].mxu1 }
 0x57d   : > { %21682 = vst [vmem:[#allocation40_spill] sm:$0xff] %v18016_v25  ;;  %v18018_v50 = vpop.f32.mrb[142].mxu1 }
 0x57e   : > { %21683 = vst [vmem:[#allocation64_spill] sm:$0xff] %v18018_v50  ;;  %v18020_v54 = vpop.f32.mrb[143].mxu1  ;;  %v5253_v50 = vadd.f32 %v17438_v57, %v17452_v33 }
 0x57f   : > { %21684 = vst [vmem:[#allocation5_spill] sm:$0xff] %v18020_v54 }
 0x580   : > { %v5313_v54 = vmax.f32 %v5253_v50, 0.0 }
 0x583   : > { %v18022_v43 = vpop.f32.mrb[144].mxu1 }
 0x584   : > { %21685 = vst [vmem:[#allocation42_spill] sm:$0xff] %v18022_v43  ;;  %v18024_v15 = vpop.f32.mrb[145].mxu1  ;;  %v18041_v43 = vsel %vm5734_vm1, %v5313_v54, 0.0 }
 0x585   : > { %21686 = vst [vmem:[#allocation44_spill] sm:$0xff] %v18024_v15  ;;  %v18026_v11 = vpop.f32.mrb[146].mxu1  ;;  %21693 = vst [vmem:[#allocation69_spill] sm:$0xff] %v18041_v43 }
 0x586   : > { %21687 = vst [vmem:[#allocation45_spill] sm:$0xff] %v18026_v11  ;;  %v18028_v51 = vpop.f32.mrb[147].mxu1  ;;  %v21367_v11 = vrot.slane %v18041_v43, 7 }
 0x587   : > { %21688 = vst [vmem:[#allocation66_spill] sm:$0xff] %v18028_v51 }
 0x58b   : > { %v18030_v10 = vpop.f32.mrb[148].mxu1 }
 0x58c   : > { %21689 = vst [vmem:[#allocation63_spill] sm:$0xff] %v18030_v10  ;;  %v18032_v46 = vpop.f32.mrb[149].mxu1 }
 0x58d   : > { %21690 = vst [vmem:[#allocation47_spill] sm:$0xff] %v18032_v46  ;;  %v18034_v0 = vpop.f32.mrb[150].mxu1  ;;  %v21694_v46 = vrot.slane %v17457_v58, 7 }
 0x58e   : > { %21691 = vst [vmem:[#allocation48_spill] sm:$0xff] %v18034_v0  ;;  %v18036_v16 = vpop.f32.mrb[151].mxu1 }
 0x58f   : > { %21692 = vst [vmem:[#allocation39_spill] sm:$0xff] %v18036_v16  ;;  %v5970_v0 = vsel %vm3042_vm13, %v21367_v11, %v21694_v46 }
 0x597   : > { %v13881_v15 = vpop.permute.xlu0 %13880 }
 0x598   : > { %v13883_v51 = vunpack.i.h.bf16 %v13881_v15  ;;  %v13882_v25 = vunpack.i.l.bf16 %v13881_v15 }
 0x59a   : > { %v6575_v54 = vsel %vm3770_vm9, %v5970_v0, %v13882_v25  ;;  %v6576_v12 = vsel %vm3770_vm9, %v17485_v2, %v13883_v51  ;;  %v11332_v0 = vld [vmem:[%s21230_s1 + $0x180] sm:$0xff] }
 0x59b   : > { %vm5475_vm4 = vcmp.gt.f32.partialorder %v11332_v0, 0.0 }
 0x5a0   : > { %v13886_v10 = vpop.permute.xlu1 %13885 }
 0x5a1   : > { %v13888_v33 = vunpack.i.h.bf16 %v13886_v10  ;;  %v13887_v50 = vunpack.i.l.bf16 %v13886_v10 }
 0x5a2   : > { %v13891_v16 = vpop.permute.xlu0 %13890 }
 0x5a3   : > { %v13893_v23 = vunpack.i.h.bf16 %v13891_v16  ;;  %v13892_v52 = vunpack.i.l.bf16 %v13891_v16  ;;  %v6577_v46 = vsel %vm3770_vm9, %v17565_v49, %v13887_v50  ;;  %v6578_v10 = vsel %vm3770_vm9, %v17589_v28, %v13888_v33  ;;  %v11331_v28 = vld [vmem:[%s21230_s1 + $0x178] sm:$0xff] }
 0x5a4   : > { %v5275_v49 = vadd.f32 %v17827_v4, %v17438_v57  ;;  %vm5474_vm8 = vcmp.gt.f32.partialorder %v11331_v28, 0.0  ;;  %v5277_v33 = vadd.f32 %v17438_v57, %v17903_v32 }
 0x5a5   : > { %v6636_v15 = vsel %vm3837_vm10, %v6576_v12, %v13893_v23  ;;  %v6635_v24 = vsel %vm3837_vm10, %v6575_v54, %v13892_v52  ;;  %v13896_v58 = vpop.permute.xlu1 %13895  ;;  %v5276_v23 = vadd.f32 %v17438_v57, %v17884_v1  ;;  %v11334_v1 = vld [vmem:[%s21230_s1 + $0x190] sm:$0xff]  ;;  %v5534_v52 = vsel %vm5474_vm8, 1, %v21614_v18 }
 0x5a6   : > { %v18055_v13 = vpack.c.bf16 %v6636_v15, %v6635_v24  ;;  %v13898_v43 = vunpack.i.h.bf16 %v13896_v58  ;;  %v13897_v56 = vunpack.i.l.bf16 %v13896_v58  ;;  %v5335_v24 = vmax.f32 %v5275_v49, 0.0 }
 0x5a7   : > { %v5336_v54 = vmax.f32 %v5276_v23, 0.0  ;;  %vm5477_vm11 = vcmp.gt.f32.partialorder %v11334_v1, 0.0 }
 0x5a8   : > { %21695 = vst [vmem:[#allocation68_spill] sm:$0xff] %v18055_v13  ;;  %v6637_v16 = vsel %vm3837_vm10, %v6577_v46, %v13897_v56  ;;  %v6638_v25 = vsel %vm3837_vm10, %v6578_v10, %v13898_v43  ;;  %v6776_v2 = vrot.slane %v18055_v13, 4  ;;  %v18080_v56 = vadd.f32 %v17875_v47, %v17438_v57  ;;  %v11333_v47 = vld [vmem:[%s21230_s1 + $0x188] sm:$0xff] }
 0x5a9   : > { %v18063_v51 = vpack.c.bf16 %v6638_v25, %v6637_v16  ;;  %v18086_v43 = vadd.f32 %v17893_v45, %v17438_v57  ;;  %vm5476_vm14 = vcmp.gt.f32.partialorder %v11333_v47, 0.0  ;;  %v11335_v25 = vld [vmem:[%s21230_s1 + $0x198] sm:$0xff]  ;;  %v21697_v47 = vrot.slane %v17858_v5, 1 }
 0x5aa   : > { %v5338_v45 = vmax.f32 %v18080_v56, 0.0  ;;  %vm5478_vm6 = vcmp.gt.f32.partialorder %v11335_v25, 0.0 }
 0x5ab   : > { %v21368_v12 = vrot.slane %v18063_v51, 4 }
 0x5ad   : > { %v6778_v58 = vsel %vm3993_vm15, %v6776_v2, %v21368_v12  ;;  %v5337_v2 = vmax.f32 %v5277_v33, 0.0  ;;  %v18119_v33 = vsel %vm5477_vm11, 1, %v21614_v18 }
 0x5ae   : > { %12771 = vmatmul.mubr.msk.bf16.vlgmr.msra.gmra.mrb[48].mxu0 %vm4091_vm3, %v6778_v58 }
 0x5af   : > { %12774 = vmatprep.mubr.msk.bf16.mxu0 %vm21696_vm0, %v21648_v63 }
 0x5b3   : > { %v5624_v4 = vpop.permute.xlu0 %5623 }
 0x5b4   : > { %vm5756_vm12 = vcmp.eq.s32.totalorder %v5624_v4, 1  ;;  %v5535_v4 = vsel %vm5475_vm4, 1, %v21614_v18 }
 0x5b5   : > { %v18100_v50 = vsel %vm5756_vm12, %v5335_v24, 0.0 }
 0x5b6   : > { %v13979_v15 = vpack.i.bf16 %v18100_v50, %v17858_v5  ;;  %v5996_v32 = vrot.slane %v18100_v50, 1  ;;  %v5627_v46 = vpop.permute.xlu1 %5626  ;;  %v21370_v56 = vrot.slane %v18100_v50, 7 }
 0x5b7   : > { %vm5757_vm5 = vcmp.eq.s32.totalorder %v5627_v46, 1  ;;  %v13901_v16 = vpop.permute.xlu0 %13900  ;;  %v5536_v46 = vsel %vm5476_vm14, 1, %v21614_v18 }
 0x5b8   : > { %v5817_v58 = vsel %vm5757_vm5, %v5336_v54, 0.0  ;;  %v13903_v49 = vunpack.i.h.bf16 %v13901_v16  ;;  %v13902_v28 = vunpack.i.l.bf16 %v13901_v16  ;;  %13980 = vrot.lane.b32.xlu0 %v13979_v15, %s14638_s28  ;;  %v6069_v1 = vsel %vm3175_vm2, %v21697_v47, %v5996_v32 }
 0x5b9   : > { %v5877_v23 = vrot.slane %v5817_v58, 7  ;;  %v5997_v24 = vrot.slane %v5817_v58, 1 }
 0x5ba   : > { %v13906_v0 = vpop.permute.xlu1 %13905  ;;  %v6579_v47 = vsel %vm3770_vm9, %v17585_v20, %v13902_v28  ;;  %v6580_v12 = vsel %vm3770_vm9, %v17570_v30, %v13903_v49 }
 0x5bb   : > { %v18125_v54 = vsel %vm3042_vm13, %v21370_v56, %v5877_v23  ;;  %v13908_v15 = vunpack.i.h.bf16 %v13906_v0  ;;  %v13907_v16 = vunpack.i.l.bf16 %v13906_v0  ;;  %v6068_v10 = vsel %vm3175_vm2, %v5996_v32, %v5997_v24  ;;  %v11336_v56 = vld [vmem:[%s21230_s1 + $0x1a0] sm:$0xff] }
 0x5bc   : > { %21698 = vst [vmem:[#allocation71_spill] sm:$0xff] %v18125_v54  ;;  %5677 = vperm.xlu0 %13547, %v5534_v52   ;;  %v13984_v13 = vpack.i.bf16 %v6068_v10, %v6069_v1  ;;  %v5280_v0 = vadd.f32 %v17438_v57, %v17926_v29  ;;  %v18145_v52 = vadd.f32 %v17921_v44, %v17438_v57  ;;  %v18149_v29 = vsel %vm5478_vm6, 1, %v21614_v18 }
 0x5bd   : > { %v5630_v11 = vpop.permute.xlu0 %5629  ;;  %v6640_v54 = vsel %vm3837_vm10, %v6580_v12, %v13908_v15  ;;  %v6639_v32 = vsel %vm3837_vm10, %v6579_v47, %v13907_v16  ;;  %vm5479_vm8 = vcmp.gt.f32.partialorder %v11336_v56, 0.0  ;;  %v11337_v12 = vld [vmem:[%s21230_s1 + $0x1a8] sm:$0xff]  ;;  %v21699_v15 = vrot.slane %v18063_v51, 4 }
 0x5be   : > { %vm5758_vm7 = vcmp.eq.s32.totalorder %v5630_v11, 1  ;;  %v18140_v38 = vpack.c.bf16 %v6640_v54, %v6639_v32  ;;  %v5633_v11 = vpop.permute.xlu1 %5632  ;;  %13985 = vrot.lane.b32.xlu1 %v13984_v13, %s14639_s19  ;;  %v5340_v1 = vmax.f32 %v5280_v0, 0.0  ;;  %vm5480_vm12 = vcmp.gt.f32.partialorder %v11337_v12, 0.0 }
 0x5bf   : > { %v5818_v21 = vsel %vm5758_vm7, %v5337_v2, 0.0  ;;  %vm5759_vm1 = vcmp.eq.s32.totalorder %v5633_v11, 1 }
 0x5c0   : > { %v13989_v20 = vpack.i.bf16 %v5818_v21, %v5817_v58  ;;  %v5878_v28 = vrot.slane %v5818_v21, 7  ;;  %v5998_v30 = vrot.slane %v5818_v21, 1  ;;  %v6779_v21 = vrot.slane %v18140_v38, 4 }
 0x5c1   : > { %v13911_v10 = vpop.permute.xlu0 %13910  ;;  %v5819_v2 = vsel %vm5759_vm1, %v5338_v45, 0.0  ;;  %v5281_v45 = vadd.f32 %v17438_v57, %v17931_v53 }
 0x5c2   : > { %v18157_v13 = vsel %vm3042_vm13, %v5877_v23, %v5878_v28  ;;  %v13913_v44 = vunpack.i.h.bf16 %v13911_v10  ;;  %13990 = vrot.lane.b32.xlu0 %v13989_v20, %s14638_s28  ;;  %v5879_v58 = vrot.slane %v5819_v2, 7  ;;  %v5999_v49 = vrot.slane %v5819_v2, 1  ;;  %v13916_v54 = vpop.permute.xlu1 %13915  ;;  %5680 = vperm.xlu1 %13548, %v5535_v4  }
 0x5c3   : > { %v13912_v25 = vunpack.i.l.bf16 %v13911_v10  ;;  %v6067_v56 = vsel %vm3175_vm2, %v5997_v24, %v5998_v30  ;;  %v6780_v16 = vsel %vm3993_vm15, %v21699_v15, %v6779_v21  ;;  %v18166_v23 = vsel %vm5479_vm8, 1, %v21614_v18 }
 0x5c4   : > { %v18172_v47 = vsel %vm3042_vm13, %v5878_v28, %v5879_v58  ;;  %v13918_v32 = vunpack.i.h.bf16 %v13916_v54  ;;  %v13917_v24 = vunpack.i.l.bf16 %v13916_v54  ;;  %12775 = vmatmul.mubr.msk.bf16.gmra.mrb[52].mxu0 %vm4091_vm3, %v6780_v16  ;;  %v6582_v20 = vsel %vm3770_vm9, %v17684_v61, %v13913_v44 }
 0x5c5   : > { %v5636_v4 = vpop.permute.xlu0 %5635  ;;  %v6581_v0 = vsel %vm3770_vm9, %v17653_v14, %v13912_v25  ;;  %v6066_v53 = vsel %vm3175_vm2, %v5998_v30, %v5999_v49  ;;  %12778 = vmatprep.mubr.msk.bf16.mxu0 %vm21696_vm0, %v21648_v63  ;;  %v21700_v10 = vmax.f32 %v18086_v43, 0.0  ;;  %v5342_v16 = vmax.f32 %v18145_v52, 0.0 }
 0x5c6   : > { %vm5760_vm4 = vcmp.eq.s32.totalorder %v5636_v4, 1  ;;  %5683 = vperm.xlu0 %13547, %v5536_v46   ;;  %v6641_v28 = vsel %vm3837_vm10, %v6581_v0, %v13917_v24  ;;  %v6642_v11 = vsel %vm3837_vm10, %v6582_v20, %v13918_v32  ;;  %v13994_v15 = vpack.i.bf16 %v6066_v53, %v6067_v56  ;;  %v5639_v46 = vpop.permute.xlu1 %5638  ;;  %v18213_v53 = vld [vmem:[%s21234_s5] ss:$0 sm:$0xff] }
 0x5c7   : > { %v5820_v54 = vsel %vm5760_vm4, %v21700_v10, 0.0  ;;  %v18187_v14 = vpack.c.bf16 %v6642_v11, %v6641_v28  ;;  %v18192_v30 = vadd.f32 %v17929_v17, %v17438_v57  ;;  %vm5761_vm5 = vcmp.eq.s32.totalorder %v5639_v46, 1 }
 0x5c8   : > { %v13999_v25 = vpack.i.bf16 %v5820_v54, %v5819_v2  ;;  %v5880_v61 = vrot.slane %v5820_v54, 7  ;;  %v6000_v44 = vrot.slane %v5820_v54, 1  ;;  %13995 = vrot.lane.b32.xlu1 %v13994_v15, %s14639_s19  ;;  %v18197_v43 = vsel %vm5480_vm12, 1, %v21614_v18  ;;  %v11338_v2 = vld [vmem:[%s21230_s1 + $0x1b0] sm:$0xff] }
 0x5c9   : > { %v13921_v32 = vpop.permute.xlu0 %13920  ;;  %v6781_v56 = vrot.slane %v18187_v14, 4  ;;  %v5821_v57 = vsel %vm5761_vm5, %v5340_v1, 0.0  ;;  %v5341_v20 = vmax.f32 %v5281_v45, 0.0  ;;  %vm5481_vm14 = vcmp.gt.f32.partialorder %v11338_v2, 0.0 }
 0x5ca   : > { %v18205_v52 = vsel %vm3042_vm13, %v5879_v58, %v5880_v61  ;;  %v13923_v17 = vunpack.i.h.bf16 %v13921_v32  ;;  %14000 = vrot.lane.b32.xlu0 %v13999_v25, %s14638_s28  ;;  %v5881_v24 = vrot.slane %v5821_v57, 7  ;;  %v6001_v4 = vrot.slane %v5821_v57, 1  ;;  %v13926_v1 = vpop.permute.xlu1 %13925 }
 0x5cb   : > { %v13922_v0 = vunpack.i.l.bf16 %v13921_v32  ;;  %v6065_v12 = vsel %vm3175_vm2, %v5999_v49, %v6000_v44  ;;  %v18217_v58 = vadd.f32 %v18213_v53, %v17942_v42  ;;  %v6782_v28 = vsel %vm3993_vm15, %v6779_v21, %v6781_v56 }
 0x5cc   : > { %v18222_v11 = vadd.f32 %v18213_v53, %v17947_v22  ;;  %v18226_v49 = vsel %vm3042_vm13, %v5880_v61, %v5881_v24  ;;  %v13928_v45 = vunpack.i.h.bf16 %v13926_v1  ;;  %v13927_v10 = vunpack.i.l.bf16 %v13926_v1  ;;  %5686 = vperm.xlu1 %13548, %v18119_v33   ;;  %12779 = vmatmul.mubr.msk.bf16.gmra.mrb[56].mxu0 %vm4091_vm3, %v6782_v28 }
 0x5cd   : > { %v6584_v42 = vsel %vm3770_vm9, %v17669_v9, %v13923_v17  ;;  %v6583_v21 = vsel %vm3770_vm9, %v17680_v26, %v13922_v0  ;;  %v6064_v22 = vsel %vm3175_vm2, %v6000_v44, %v6001_v4  ;;  %12782 = vmatprep.mubr.msk.bf16.mxu0 %vm21696_vm0, %v21648_v63  ;;  %v5346_v0 = vmax.f32 %v18217_v58, 0.0 }
 0x5ce   : > { %v5642_v54 = vpop.permute.xlu0 %5641  ;;  %5689 = vperm.xlu0 %13547, %v18149_v29   ;;  %v6644_v33 = vsel %vm3837_vm10, %v6584_v42, %v13928_v45  ;;  %v6643_v15 = vsel %vm3837_vm10, %v6583_v21, %v13927_v10  ;;  %v14004_v61 = vpack.i.bf16 %v6064_v22, %v6065_v12  ;;  %v5645_v17 = vpop.permute.xlu1 %5644  ;;  %v5343_v29 = vmax.f32 %v18192_v30, 0.0  ;;  %v11339_v12 = vld [vmem:[%s21230_s1 + $0x1b8] sm:$0xff] }
 0x5cf   : > { %vm5762_vm11 = vcmp.eq.s32.totalorder %v5642_v54, 1  ;;  %v18241_v46 = vpack.c.bf16 %v6644_v33, %v6643_v15  ;;  %vm5763_vm6 = vcmp.eq.s32.totalorder %v5645_v17, 1  ;;  %v5541_v1 = vsel %vm5481_vm14, 1, %v21614_v18 }
 0x5d0   : > { %v5822_v25 = vsel %vm5762_vm11, %v5341_v20, 0.0  ;;  %14005 = vrot.lane.b32.xlu1 %v14004_v61, %s14639_s19  ;;  %v5823_v30 = vsel %vm5763_vm6, %v5342_v16, 0.0  ;;  %v5344_v42 = vmax.f32 %v18222_v11, 0.0  ;;  %v18262_v21 = vadd.f32 %v18213_v53, %v17950_v55 }
 0x5d1   : > { %v14009_v9 = vpack.i.bf16 %v5822_v25, %v5821_v57  ;;  %v5882_v32 = vrot.slane %v5822_v25, 7  ;;  %v6002_v26 = vrot.slane %v5822_v25, 1  ;;  %v6783_v57 = vrot.slane %v18241_v46, 4 }
 0x5d2   : > { %v13931_v44 = vpop.permute.xlu0 %13930  ;;  %v5883_v45 = vrot.slane %v5823_v30, 7  ;;  %v6003_v10 = vrot.slane %v5823_v30, 1  ;;  %v13936_v22 = vpop.permute.xlu1 %13935  ;;  %vm5482_vm7 = vcmp.gt.f32.partialorder %v11339_v12, 0.0  ;;  %v5285_v16 = vadd.f32 %v18213_v53, %v17952_v40 }
 0x5d3   : > { %v18254_v20 = vsel %vm3042_vm13, %v5881_v24, %v5882_v32  ;;  %v13933_v28 = vunpack.i.h.bf16 %v13931_v44  ;;  %14010 = vrot.lane.b32.xlu0 %v14009_v9, %s14638_s28  ;;  %v13932_v54 = vunpack.i.l.bf16 %v13931_v44  ;;  %v6063_v2 = vsel %vm3175_vm2, %v6001_v4, %v6002_v26 }
 0x5d4   : > { %v6784_v24 = vsel %vm3993_vm15, %v6781_v56, %v6783_v57  ;;  %v18269_v33 = vsel %vm3042_vm13, %v5882_v32, %v5883_v45  ;;  %v13938_v15 = vunpack.i.h.bf16 %v13936_v22  ;;  %v13937_v25 = vunpack.i.l.bf16 %v13936_v22  ;;  %5692 = vperm.xlu1 %13548, %v18166_v23  }
 0x5d5   : > { %12783 = vmatmul.mubr.msk.bf16.gmra.mrb[60].mxu0 %vm4091_vm3, %v6784_v24  ;;  %v6585_v55 = vsel %vm3770_vm9, %v17735_v62, %v13932_v54  ;;  %v6586_v56 = vsel %vm3770_vm9, %v17760_v48, %v13933_v28  ;;  %v6062_v40 = vsel %vm3175_vm2, %v6002_v26, %v6003_v10  ;;  %v5345_v28 = vmax.f32 %v5285_v16, 0.0  ;;  %v11341_v16 = vld [vmem:[%s21230_s1 + $0x1c8] sm:$0xff] }
 0x5d6   : > { %v5648_v4 = vpop.permute.xlu0 %5647  ;;  %12786 = vmatprep.mubr.msk.bf16.mxu0 %vm21696_vm0, %v21648_v63  ;;  %v6645_v23 = vsel %vm3837_vm10, %v6585_v55, %v13937_v25  ;;  %v6646_v11 = vsel %vm3837_vm10, %v6586_v56, %v13938_v15  ;;  %v14014_v9 = vpack.i.bf16 %v6062_v40, %v6063_v2  ;;  %v5651_v44 = vpop.permute.xlu1 %5650  ;;  %v5542_v54 = vsel %vm5482_vm7, 1, %v21614_v18 }
 0x5d7   : > { %vm5764_vm1 = vcmp.eq.s32.totalorder %v5648_v4, 1  ;;  %5695 = vperm.xlu0 %13547, %v18197_v43   ;;  %v18284_v32 = vpack.c.bf16 %v6646_v11, %v6645_v23  ;;  %v5347_v43 = vmax.f32 %v18262_v21, 0.0  ;;  %vm5765_vm8 = vcmp.eq.s32.totalorder %v5651_v44, 1 }
 0x5d8   : > { %v5824_v61 = vsel %vm5764_vm1, %v5343_v29, 0.0  ;;  %14015 = vrot.lane.b32.xlu1 %v14014_v9, %s14639_s19  ;;  %v11340_v29 = vld [vmem:[%s21230_s1 + $0x1c0] sm:$0xff]  ;;  %v5825_v22 = vsel %vm5765_vm8, %v5344_v42, 0.0  ;;  %v18306_v55 = vadd.f32 %v18213_v53, %v17963_v27  ;;  %vm5484_vm4 = vcmp.gt.f32.partialorder %v11341_v16, 0.0 }
 0x5d9   : > { %v14019_v62 = vpack.i.bf16 %v5824_v61, %v5823_v30  ;;  %v5884_v17 = vrot.slane %v5824_v61, 7  ;;  %v6004_v48 = vrot.slane %v5824_v61, 1  ;;  %v6785_v2 = vrot.slane %v18284_v32, 4 }
 0x5da   : > { %v13941_v26 = vpop.permute.xlu0 %13940  ;;  %v5885_v12 = vrot.slane %v5825_v22, 7  ;;  %v6005_v15 = vrot.slane %v5825_v22, 1  ;;  %v13946_v42 = vpop.permute.xlu1 %13945  ;;  %vm5483_vm12 = vcmp.gt.f32.partialorder %v11340_v29, 0.0  ;;  %v11343_v29 = vld [vmem:[%s21230_s1 + $0x1d8] sm:$0xff] }
 0x5db   : > { %v18296_v30 = vsel %vm3042_vm13, %v5883_v45, %v5884_v17  ;;  %v13943_v24 = vunpack.i.h.bf16 %v13941_v26  ;;  %14020 = vrot.lane.b32.xlu0 %v14019_v62, %s14638_s28  ;;  %v13942_v25 = vunpack.i.l.bf16 %v13941_v26  ;;  %v6061_v4 = vsel %vm3175_vm2, %v6003_v10, %v6004_v48 }
 0x5dc   : > { %v18310_v45 = vadd.f32 %v18213_v53, %v17968_v60  ;;  %v6786_v56 = vsel %vm3993_vm15, %v6783_v57, %v6785_v2  ;;  %v18315_v40 = vsel %vm3042_vm13, %v5884_v17, %v5885_v12  ;;  %v13948_v23 = vunpack.i.h.bf16 %v13946_v42  ;;  %5698 = vperm.xlu1 %13548, %v5541_v1  }
 0x5dd   : > { %v13947_v11 = vunpack.i.l.bf16 %v13946_v42  ;;  %12787 = vmatmul.mubr.msk.bf16.gmra.mrb[64].mxu0 %vm4091_vm3, %v6786_v56  ;;  %v6588_v27 = vsel %vm3770_vm9, %v17739_v34, %v13943_v24  ;;  %v6587_v60 = vsel %vm3770_vm9, %v17756_v39, %v13942_v25  ;;  %v6060_v57 = vsel %vm3175_vm2, %v6004_v48, %v6005_v15 }
 0x5de   : > { %v5654_v10 = vpop.permute.xlu0 %5653  ;;  %12790 = vmatprep.mubr.msk.bf16.mxu0 %vm21696_vm0, %v21648_v63  ;;  %v6648_v1 = vsel %vm3837_vm10, %v6588_v27, %v13948_v23  ;;  %v14024_v62 = vpack.i.bf16 %v6060_v57, %v6061_v4  ;;  %v5657_v39 = vpop.permute.xlu1 %5656  ;;  %v5543_v24 = vsel %vm5483_vm12, 1, %v21614_v18  ;;  %v5544_v25 = vsel %vm5484_vm4, 1, %v21614_v18 }
 0x5df   : > { %vm5766_vm5 = vcmp.eq.s32.totalorder %v5654_v10, 1  ;;  %5701 = vperm.xlu0 %13547, %v5542_v54   ;;  %v6647_v61 = vsel %vm3837_vm10, %v6587_v60, %v13947_v11  ;;  %v5350_v54 = vmax.f32 %v18306_v55, 0.0  ;;  %vm5767_vm14 = vcmp.eq.s32.totalorder %v5657_v39, 1 }
 0x5e0   : > { %v5826_v9 = vsel %vm5766_vm5, %v5345_v28, 0.0  ;;  %v18328_v17 = vpack.c.bf16 %v6648_v1, %v6647_v61  ;;  %14025 = vrot.lane.b32.xlu1 %v14024_v62, %s14639_s19  ;;  %v11342_v28 = vld [vmem:[%s21230_s1 + $0x1d0] sm:$0xff]  ;;  %v5827_v42 = vsel %vm5767_vm14, %v5346_v0, 0.0  ;;  %v5348_v27 = vmax.f32 %v18310_v45, 0.0 }
 0x5e1   : > { %v14029_v34 = vpack.i.bf16 %v5826_v9, %v5825_v22  ;;  %v5886_v44 = vrot.slane %v5826_v9, 7  ;;  %v6006_v26 = vrot.slane %v5826_v9, 1  ;;  %v5887_v16 = vrot.slane %v5827_v42, 7 }
 0x5e2   : > { %v13951_v48 = vpop.permute.xlu0 %13950  ;;  %v6787_v22 = vrot.slane %v18328_v17, 4  ;;  %v6007_v23 = vrot.slane %v5827_v42, 1  ;;  %v13956_v58 = vpop.permute.xlu1 %13955  ;;  %vm5485_vm11 = vcmp.gt.f32.partialorder %v11342_v28, 0.0  ;;  %vm5486_vm6 = vcmp.gt.f32.partialorder %v11343_v29, 0.0  ;;  %v11345_v28 = vld [vmem:[%s21230_s1 + $0x1e8] sm:$0xff] }
 0x5e3   : > { %v18342_v4 = vsel %vm3042_vm13, %v5885_v12, %v5886_v44  ;;  %v13953_v56 = vunpack.i.h.bf16 %v13951_v48  ;;  %14030 = vrot.lane.b32.xlu0 %v14029_v34, %s14638_s28  ;;  %v13952_v11 = vunpack.i.l.bf16 %v13951_v48  ;;  %v6059_v10 = vsel %vm3175_vm2, %v6005_v15, %v6006_v26 }
 0x5e4   : > { %v18355_v12 = vadd.f32 %v18213_v53, %v17973_v31  ;;  %v6788_v0 = vsel %vm3993_vm15, %v6785_v2, %v6787_v22  ;;  %v18360_v60 = vsel %vm3042_vm13, %v5886_v44, %v5887_v16  ;;  %v13958_v57 = vunpack.i.h.bf16 %v13956_v58  ;;  %5704 = vperm.xlu1 %13548, %v5543_v24  }
 0x5e5   : > { %v13957_v1 = vunpack.i.l.bf16 %v13956_v58  ;;  %12791 = vmatmul.mubr.msk.bf16.gmra.mrb[68].mxu0 %vm4091_vm3, %v6788_v0  ;;  %v6589_v45 = vsel %vm3770_vm9, %v17818_v59, %v13952_v11  ;;  %v6590_v31 = vsel %vm3770_vm9, %v17841_v35, %v13953_v56  ;;  %v6058_v2 = vsel %vm3175_vm2, %v6006_v26, %v6007_v23 }
 0x5e6   : > { %v5660_v15 = vpop.permute.xlu0 %5659  ;;  %12794 = vmatprep.mubr.msk.bf16.mxu0 %vm21696_vm0, %v21648_v63  ;;  %v6650_v9 = vsel %vm3837_vm10, %v6590_v31, %v13958_v57  ;;  %v14034_v34 = vpack.i.bf16 %v6058_v2, %v6059_v10  ;;  %v5663_v48 = vpop.permute.xlu1 %5662  ;;  %v18379_v26 = vadd.f32 %v18213_v53, %v17971_v6  ;;  %v5546_v21 = vsel %vm5486_vm6, 1, %v21614_v18 }
 0x5e7   : > { %vm5768_vm7 = vcmp.eq.s32.totalorder %v5660_v15, 1  ;;  %5707 = vperm.xlu0 %13547, %v5544_v25   ;;  %v6649_v61 = vsel %vm3837_vm10, %v6589_v45, %v13957_v1  ;;  %vm5769_vm1 = vcmp.eq.s32.totalorder %v5663_v48, 1  ;;  %v5545_v25 = vsel %vm5485_vm11, 1, %v21614_v18 }
 0x5e8   : > { %v5828_v62 = vsel %vm5768_vm7, %v5347_v43, 0.0  ;;  %v18375_v59 = vpack.c.bf16 %v6650_v9, %v6649_v61  ;;  %14035 = vrot.lane.b32.xlu1 %v14034_v34, %s14639_s19  ;;  %v11344_v43 = vld [vmem:[%s21230_s1 + $0x1e0] sm:$0xff]  ;;  %v5829_v56 = vsel %vm5769_vm1, %v5348_v27, 0.0  ;;  %v5349_v57 = vmax.f32 %v18355_v12, 0.0 }
 0x5e9   : > { %v14039_v44 = vpack.i.bf16 %v5828_v62, %v5827_v42  ;;  %v5888_v35 = vrot.slane %v5828_v62, 7  ;;  %v6008_v39 = vrot.slane %v5828_v62, 1  ;;  %v5889_v29 = vrot.slane %v5829_v56, 7 }
 0x5ea   : > { %v13961_v24 = vpop.permute.xlu0 %13960  ;;  %v6789_v42 = vrot.slane %v18375_v59, 4  ;;  %v6009_v10 = vrot.slane %v5829_v56, 1  ;;  %v13966_v27 = vpop.permute.xlu1 %13965  ;;  %vm5487_vm8 = vcmp.gt.f32.partialorder %v11344_v43, 0.0  ;;  %vm5488_vm12 = vcmp.gt.f32.partialorder %v11345_v28, 0.0  ;;  %v11347_v43 = vld [vmem:[%s21230_s1 + $0x1f8] sm:$0xff]  ;;  %v14575_v28 = vld [vmem:[%s21235_s6 + $0x60] sm:$0xff]  }
 0x5eb   : > { %v18392_v6 = vsel %vm3042_vm13, %v5887_v16, %v5888_v35  ;;  %v13963_v11 = vunpack.i.h.bf16 %v13961_v24  ;;  %14040 = vrot.lane.b32.xlu0 %v14039_v44, %s14638_s28  ;;  %v13962_v58 = vunpack.i.l.bf16 %v13961_v24  ;;  %v6057_v0 = vsel %vm3175_vm2, %v6007_v23, %v6008_v39  ;;  %12999 = vmatpush3.bf16.msra.mxu0 %v14575_v28 }
 0x5ec   : > { %v18403_v16 = vadd.f32 %v18213_v53, %v17989_v3  ;;  %v6790_v1 = vsel %vm3993_vm15, %v6787_v22, %v6789_v42  ;;  %v18408_v15 = vsel %vm3042_vm13, %v5888_v35, %v5889_v29  ;;  %v13968_v45 = vunpack.i.h.bf16 %v13966_v27  ;;  %5710 = vperm.xlu1 %13548, %v5545_v25   ;;  %v11346_v25 = vld [vmem:[%s21230_s1 + $0x1f0] sm:$0xff]  ;;  %13000 = vmatprep.subr.bf16.mxu0 %v21648_v63 }
 0x5ed   : > { %v13967_v31 = vunpack.i.l.bf16 %v13966_v27  ;;  %12795 = vmatmul.mubr.msk.bf16.gmra.mrb[72].mxu0 %vm4091_vm3, %v6790_v1  ;;  %v6592_v23 = vsel %vm3770_vm9, %v17822_v36, %v13963_v11  ;;  %v6591_v3 = vsel %vm3770_vm9, %v17837_v7, %v13962_v58  ;;  %v6056_v22 = vsel %vm3175_vm2, %v6008_v39, %v6009_v10 }
 0x5ee   : > { %v5666_v2 = vpop.permute.xlu0 %5665  ;;  %12798 = vmatprep.mubr.msk.bf16.mxu0 %vm21696_vm0, %v21648_v63  ;;  %v6652_v12 = vsel %vm3837_vm10, %v6592_v23, %v13968_v45  ;;  %v14044_v62 = vpack.i.bf16 %v6056_v22, %v6057_v0  ;;  %v5669_v7 = vpop.permute.xlu1 %5668  ;;  %v5547_v39 = vsel %vm5487_vm8, 1, %v21614_v18  ;;  %v5548_v24 = vsel %vm5488_vm12, 1, %v21614_v18 }
 0x5ef   : > { %vm5770_vm4 = vcmp.eq.s32.totalorder %v5666_v2, 1  ;;  %5713 = vperm.xlu0 %13547, %v5546_v21   ;;  %v6651_v61 = vsel %vm3837_vm10, %v6591_v3, %v13967_v31  ;;  %vm5771_vm5 = vcmp.eq.s32.totalorder %v5669_v7, 1  ;;  %v5351_v55 = vmax.f32 %v18379_v26, 0.0 }
 0x5f0   : > { %v5830_v9 = vsel %vm5770_vm4, %v5349_v57, 0.0  ;;  %v18421_v34 = vpack.c.bf16 %v6652_v12, %v6651_v61  ;;  %14045 = vrot.lane.b32.xlu1 %v14044_v62, %s14639_s19  ;;  %v5831_v11 = vsel %vm5771_vm5, %v5350_v54, 0.0  ;;  %v5352_v54 = vmax.f32 %v18403_v16, 0.0 }
 0x5f1   : > { %v14049_v36 = vpack.i.bf16 %v5830_v9, %v5829_v56  ;;  %v5890_v44 = vrot.slane %v5830_v9, 7  ;;  %v6010_v35 = vrot.slane %v5830_v9, 1  ;;  %v5891_v0 = vrot.slane %v5831_v11, 7 }
 0x5f2   : > { %v13971_v48 = vpop.permute.xlu0 %13970  ;;  %v6791_v21 = vrot.slane %v18421_v34, 4  ;;  %v6011_v57 = vrot.slane %v5831_v11, 1  ;;  %v13976_v1 = vpop.permute.xlu1 %13975  ;;  %vm5489_vm14 = vcmp.gt.f32.partialorder %v11346_v25, 0.0  ;;  %vm5490_vm11 = vcmp.gt.f32.partialorder %v11347_v43, 0.0  ;;  %v14576_v43 = vld [vmem:[%s21235_s6 + $0x68] sm:$0xff]  }
 0x5f3   : > { %v18434_v56 = vsel %vm3042_vm13, %v5889_v29, %v5890_v44  ;;  %v13973_v58 = vunpack.i.h.bf16 %v13971_v48  ;;  %14050 = vrot.lane.b32.xlu0 %v14049_v36, %s14638_s28  ;;  %v13972_v27 = vunpack.i.l.bf16 %v13971_v48  ;;  %v6055_v29 = vsel %vm3175_vm2, %v6009_v10, %v6010_v35  ;;  %13001 = vmatpush3.bf16.msra.mxu0 %v14576_v43 }
 0x5f4   : > { %v6792_v45 = vsel %vm3993_vm15, %v6789_v42, %v6791_v21  ;;  %v18452_v31 = vsel %vm3042_vm13, %v5890_v44, %v5891_v0  ;;  %v13978_v2 = vunpack.i.h.bf16 %v13976_v1  ;;  %v13977_v23 = vunpack.i.l.bf16 %v13976_v1  ;;  %5716 = vperm.xlu1 %13548, %v5547_v39   ;;  %13002 = vmatprep.subr.bf16.mxu0 %v21648_v63 }
 0x5f5   : > { %12799 = vmatmul.mubr.msk.bf16.gmra.mrb[76].mxu0 %vm4091_vm3, %v6792_v45  ;;  %v6593_v26 = vsel %vm3770_vm9, %v17891_v41, %v13972_v27  ;;  %v6594_v10 = vsel %vm3770_vm9, %v17901_v19, %v13973_v58  ;;  %v6054_v42 = vsel %vm3175_vm2, %v6010_v35, %v6011_v57  ;;  %v5549_v44 = vsel %vm5489_vm14, 1, %v21614_v18  ;;  %v11348_v58 = vld [vmem:[%s21230_s1 + $0x200] sm:$0xff] }
 0x5f6   : > { %v5672_v3 = vpop.permute.xlu0 %5671  ;;  %12802 = vmatprep.mubr.msk.bf16.mxu0 %vm21696_vm0, %v21648_v63  ;;  %v6653_v16 = vsel %vm3837_vm10, %v6593_v26, %v13977_v23  ;;  %v6654_v22 = vsel %vm3837_vm10, %v6594_v10, %v13978_v2  ;;  %v14054_v61 = vpack.i.bf16 %v6054_v42, %v6055_v29  ;;  %v5675_v36 = vpop.permute.xlu1 %5674  ;;  %v5550_v25 = vsel %vm5490_vm11, 1, %v21614_v18 }
 0x5f7   : > { %vm5772_vm6 = vcmp.eq.s32.totalorder %v5672_v3, 1  ;;  %5719 = vperm.xlu0 %13547, %v5548_v24   ;;  %v18468_v41 = vpack.c.bf16 %v6654_v22, %v6653_v16  ;;  %vm5773_vm7 = vcmp.eq.s32.totalorder %v5675_v36, 1  ;;  %vm5491_vm1 = vcmp.gt.f32.partialorder %v11348_v58, 0.0 }
 0x5f8   : > { %v18465_v12 = vsel %vm5772_vm6, %v5351_v55, 0.0  ;;  %14055 = vrot.lane.b32.xlu1 %v14054_v61, %s14639_s19  ;;  %v18483_v48 = vsel %vm5773_vm7, %v5352_v54, 0.0  ;;  %v5875_v55 = vrot.slane %v17858_v5, 7  ;;  %v21701_v1 = vrot.slane %v17872_v37, 7  ;;  %v14577_v37 = vld [vmem:[%s21235_s6 + $0x70] sm:$0xff]   ;;  %v21703_v61 = vld [vmem:[#allocation34_spill] sm:$0xff] }
 0x5f9   : > { %v14059_v19 = vpack.i.bf16 %v18465_v12, %v5831_v11  ;;  %v21372_v9 = vrot.slane %v18465_v12, 7  ;;  %v6012_v62 = vrot.slane %v18465_v12, 1  ;;  %v6793_v35 = vrot.slane %v18468_v41, 4  ;;  %13003 = vmatpush3.bf16.msra.mxu0 %v14577_v37 }
 0x5fa   : > { %v6013_v24 = vrot.slane %v18483_v48, 1  ;;  %v5950_v45 = vsel %vm3042_vm13, %v21701_v1, %v5875_v55  ;;  %v21702_v2 = vrot.slane %v18100_v50, 7  ;;  %13004 = vmatprep.subr.bf16.mxu0 %v21648_v63 }
 0x5fb   : > { %v18481_v7 = vsel %vm3042_vm13, %v5891_v0, %v21372_v9  ;;  %14060 = vrot.lane.b32.xlu0 %v14059_v19, %s14638_s28  ;;  %v6053_v39 = vsel %vm3175_vm2, %v6011_v57, %v6012_v62  ;;  %v6794_v11 = vsel %vm3993_vm15, %v6791_v21, %v6793_v35  ;;  %v5551_v21 = vsel %vm5491_vm1, 1, %v21614_v18 }
 0x5fc   : > { %5722 = vperm.xlu1 %13548, %v5549_v44   ;;  %v6052_v28 = vsel %vm3175_vm2, %v6012_v62, %v6013_v24  ;;  %v5949_v23 = vsel %vm3042_vm13, %v5875_v55, %v21702_v2  ;;  %v5293_v19 = vadd.f32 %v18213_v53, %v21703_v61 }
 0x5fd   : > { %12803 = vmatmul.mubr.msk.bf16.gmra.mrb[80].mxu0 %vm4091_vm3, %v6794_v11  ;;  %v14064_v0 = vpack.i.bf16 %v6052_v28, %v6053_v39  ;;  %v11290_v39 = vld [vmem:[%s21230_s1 + $0x30] sm:$0xff] }
 0x5fe   : > { %12806 = vmatprep.mubr.msk.bf16.mxu0 %vm21696_vm0, %v21648_v63  ;;  %v5353_v36 = vmax.f32 %v5293_v19, 0.0  ;;  %vm5433_vm12 = vcmp.gt.f32.partialorder %v11290_v39, 0.0 }
 0x5ff   : > { %5725 = vperm.xlu0 %13547, %v5550_v25   ;;  %v21704_v25 = vld [vmem:[#allocation32_spill] sm:$0xff] }
 0x600   : > { %14065 = vrot.lane.b32.xlu1 %v14064_v0, %s14639_s19  ;;  %v5294_v11 = vadd.f32 %v18213_v53, %v21704_v25 }
 0x602   : > { %v5354_v43 = vmax.f32 %v5294_v11, 0.0 }
 0x604   : > { %5728 = vperm.xlu1 %13548, %v5551_v21  }
 0x62a   : > { %v13981_v57 = vpop.permute.xlu0 %13980 }
 0x62b   : > { %v13983_v27 = vunpack.i.h.bf16 %v13981_v57  ;;  %v13982_v29 = vunpack.i.l.bf16 %v13981_v57 }
 0x62d   : > { %v6596_v10 = vsel %vm3770_vm9, %v5949_v23, %v13983_v27  ;;  %v6595_v42 = vsel %vm3770_vm9, %v5950_v45, %v13982_v29  ;;  %v5493_v27 = vsel %vm5433_vm12, 1, %v21614_v18 }
 0x630   : > { %v13986_v54 = vpop.permute.xlu1 %13985 }
 0x631   : > { %v13988_v3 = vunpack.i.h.bf16 %v13986_v54  ;;  %v13987_v26 = vunpack.i.l.bf16 %v13986_v54 }
 0x633   : > { %v6656_v16 = vsel %vm3837_vm10, %v6596_v10, %v13988_v3  ;;  %v6655_v5 = vsel %vm3837_vm10, %v6595_v42, %v13987_v26  ;;  %v21706_v10 = vld [vmem:[#allocation60_spill] sm:$0xff] }
 0x634   : > { %v18521_v22 = vpack.c.bf16 %v6656_v16, %v6655_v5  ;;  %v5296_v42 = vadd.f32 %v18213_v53, %v21706_v10  ;;  %v21707_v16 = vld [vmem:[#allocation38_spill] sm:$0xff] }
 0x635   : > { %v5297_v5 = vadd.f32 %v18213_v53, %v21707_v16 }
 0x636   : > { %v6795_v50 = vrot.slane %v18521_v22, 4 }
 0x638   : > { %v6796_v62 = vsel %vm3993_vm15, %v6793_v35, %v6795_v50  ;;  %v21705_v35 = vld [vmem:[#allocation58_spill] sm:$0xff] }
 0x639   : > { %12807 = vmatmul.mubr.msk.bf16.gmra.mrb[84].mxu0 %vm4091_vm3, %v6796_v62  ;;  %v5295_v28 = vadd.f32 %v18213_v53, %v21705_v35 }
 0x63a   : > { %12810 = vmatprep.mubr.msk.bf16.mxu0 %vm21696_vm0, %v21648_v63 }
 0x63b   : > { %v5678_v44 = vpop.permute.xlu0 %5677  ;;  %v5355_v29 = vmax.f32 %v5295_v28, 0.0 }
 0x63c   : > { %vm5774_vm8 = vcmp.eq.s32.totalorder %v5678_v44, 1 }
 0x63d   : > { %v18541_v58 = vsel %vm5774_vm8, %v5353_v36, 0.0 }
 0x63e   : > { %v14069_v0 = vpack.i.bf16 %v18541_v58, %v18483_v48  ;;  %v21371_v55 = vrot.slane %v18541_v58, 7  ;;  %v6014_v54 = vrot.slane %v18541_v58, 1 }
 0x63f   : > { %v13991_v21 = vpop.permute.xlu0 %13990 }
 0x640   : > { %14070 = vrot.lane.b32.xlu0 %v14069_v0, %s14638_s28  ;;  %v13993_v1 = vunpack.i.h.bf16 %v13991_v21  ;;  %v13992_v23 = vunpack.i.l.bf16 %v13991_v21  ;;  %v6051_v28 = vsel %vm3175_vm2, %v6013_v24, %v6014_v54  ;;  %v21708_v0 = vld [vmem:[#allocation71_spill] sm:$0xff]  ;;  %v5356_v24 = vmax.f32 %v5296_v42, 0.0 }
 0x641   : > { %v5681_v57 = vpop.permute.xlu1 %5680 }
 0x642   : > { %vm5775_vm4 = vcmp.eq.s32.totalorder %v5681_v57, 1  ;;  %v6597_v21 = vsel %vm3770_vm9, %v21708_v0, %v13992_v23 }
 0x643   : > { %v5835_v45 = vsel %vm5775_vm4, %v5354_v43, 0.0  ;;  %v6598_v43 = vsel %vm3770_vm9, %v18157_v13, %v13993_v1  ;;  %v21709_v13 = vld [vmem:[#allocation35_spill] sm:$0xff] }
 0x644   : > { %v5895_v3 = vrot.slane %v5835_v45, 7  ;;  %v6015_v26 = vrot.slane %v5835_v45, 1  ;;  %5554 = vperm.xlu0 %13547, %v5493_v27   ;;  %v5298_v1 = vadd.f32 %v18213_v53, %v21709_v13 }
 0x645   : > { %v5684_v2 = vpop.permute.xlu0 %5683  ;;  %v13996_v61 = vpop.permute.xlu1 %13995 }
 0x646   : > { %vm5776_vm5 = vcmp.eq.s32.totalorder %v5684_v2, 1  ;;  %v18559_v19 = vsel %vm3042_vm13, %v21371_v55, %v5895_v3  ;;  %v13998_v39 = vunpack.i.h.bf16 %v13996_v61  ;;  %v13997_v25 = vunpack.i.l.bf16 %v13996_v61 }
 0x647   : > { %v5836_v37 = vsel %vm5776_vm5, %v5355_v29, 0.0  ;;  %v6050_v35 = vsel %vm3175_vm2, %v6014_v54, %v6015_v26 }
 0x648   : > { %v14079_v62 = vpack.i.bf16 %v5836_v37, %v5835_v45  ;;  %v5896_v36 = vrot.slane %v5836_v37, 7  ;;  %v6016_v44 = vrot.slane %v5836_v37, 1  ;;  %v14074_v27 = vpack.i.bf16 %v6050_v35, %v6051_v28 }
 0x649   : > { %v14001_v11 = vpop.permute.xlu0 %14000  ;;  %v6657_v29 = vsel %vm3837_vm10, %v6597_v21, %v13997_v25  ;;  %v6658_v45 = vsel %vm3837_vm10, %v6598_v43, %v13998_v39  ;;  %v5357_v37 = vmax.f32 %v5297_v5, 0.0  ;;  %v14578_v21 = vld [vmem:[%s21235_s6] sm:$0xff]  }
 0x64a   : > { %v18573_v57 = vsel %vm3042_vm13, %v5895_v3, %v5896_v36  ;;  %v14003_v2 = vunpack.i.h.bf16 %v14001_v11  ;;  %v6049_v10 = vsel %vm3175_vm2, %v6015_v26, %v6016_v44  ;;  %v18579_v54 = vpack.c.bf16 %v6658_v45, %v6657_v29  ;;  %14075 = vrot.lane.b32.xlu1 %v14074_v27, %s14639_s19  ;;  %v21710_v3 = vld [vmem:[#allocation37_spill] sm:$0xff]  ;;  %12879 = vmatpush3.bf16.msra.mxu1 %v14578_v21 }
 0x64b   : > { %v5687_v23 = vpop.permute.xlu1 %5686  ;;  %v5299_v16 = vadd.f32 %v18213_v53, %v21710_v3  ;;  %v14002_v25 = vunpack.i.l.bf16 %v14001_v11  ;;  %12880 = vmatprep.subr.bf16.mxu1 %v21648_v63 }
 0x64c   : > { %vm5777_vm14 = vcmp.eq.s32.totalorder %v5687_v23, 1  ;;  %v6797_v39 = vrot.slane %v18579_v54, 4  ;;  %v6600_v26 = vsel %vm3770_vm9, %v18205_v52, %v14003_v2 }
 0x64d   : > { %v5690_v61 = vpop.permute.xlu0 %5689  ;;  %v5837_v35 = vsel %vm5777_vm14, %v5356_v24, 0.0 }
 0x64e   : > { %vm5778_vm11 = vcmp.eq.s32.totalorder %v5690_v61, 1  ;;  %v5897_v42 = vrot.slane %v5837_v35, 7  ;;  %v6017_v28 = vrot.slane %v5837_v35, 1  ;;  %14080 = vrot.lane.b32.xlu1 %v14079_v62, %s14638_s28  ;;  %v6798_v11 = vsel %vm3993_vm15, %v6795_v50, %v6797_v39 }
 0x64f   : > { %v5838_v0 = vsel %vm5778_vm11, %v5357_v37, 0.0  ;;  %v14006_v29 = vpop.permute.xlu1 %14005  ;;  %12811 = vmatmul.mubr.msk.bf16.gmra.mrb[88].mxu0 %vm4091_vm3, %v6798_v11  ;;  %v6599_v62 = vsel %vm3770_vm9, %v18172_v47, %v14002_v25  ;;  %v5358_v61 = vmax.f32 %v5298_v1, 0.0 }
 0x650   : > { %v14089_v43 = vpack.i.bf16 %v5838_v0, %v5837_v35  ;;  %v5898_v27 = vrot.slane %v5838_v0, 7  ;;  %v6018_v5 = vrot.slane %v5838_v0, 1  ;;  %v18598_v52 = vsel %vm3042_vm13, %v5896_v36, %v5897_v42  ;;  %12814 = vmatprep.mubr.msk.bf16.mxu0 %vm21696_vm0, %v21648_v63  ;;  %v21711_v35 = vld [vmem:[#allocation40_spill] sm:$0xff]  ;;  %v21712_v0 = vld [vmem:[#allocation5_spill] sm:$0xff] }
 0x651   : > { %v14008_v45 = vunpack.i.h.bf16 %v14006_v29  ;;  %v14007_v2 = vunpack.i.l.bf16 %v14006_v29  ;;  %v14011_v24 = vpop.permute.xlu0 %14010  ;;  %v6048_v23 = vsel %vm3175_vm2, %v6016_v44, %v6017_v28 }
 0x652   : > { %v18607_v13 = vsel %vm3042_vm13, %v5897_v42, %v5898_v27  ;;  %v14084_v50 = vpack.i.bf16 %v6048_v23, %v6049_v10  ;;  %v14012_v37 = vunpack.i.l.bf16 %v14011_v24  ;;  %v6047_v44 = vsel %vm3175_vm2, %v6017_v28, %v6018_v5  ;;  %14090 = vrot.lane.b32.xlu1 %v14089_v43, %s14638_s28 }
 0x653   : > { %v6660_v36 = vsel %vm3837_vm10, %v6600_v26, %v14008_v45  ;;  %v6659_v3 = vsel %vm3837_vm10, %v6599_v62, %v14007_v2  ;;  %v5693_v25 = vpop.permute.xlu1 %5692  ;;  %v5359_v10 = vmax.f32 %v5299_v16, 0.0  ;;  %v5300_v42 = vadd.f32 %v18213_v53, %v21711_v35 }
 0x654   : > { %v18616_v47 = vpack.c.bf16 %v6660_v36, %v6659_v3  ;;  %14085 = vrot.lane.b32.xlu0 %v14084_v50, %s14639_s19  ;;  %v5301_v26 = vadd.f32 %v18213_v53, %v21712_v0  ;;  %vm5779_vm6 = vcmp.eq.s32.totalorder %v5693_v25, 1  ;;  %v14013_v28 = vunpack.i.h.bf16 %v14011_v24 }
 0x655   : > { %v5839_v1 = vsel %vm5779_vm6, %v5358_v61, 0.0  ;;  %v6601_v11 = vsel %vm3770_vm9, %v18226_v49, %v14012_v37 }
 0x656   : > { %v5696_v21 = vpop.permute.xlu0 %5695  ;;  %v6799_v29 = vrot.slane %v18616_v47, 4  ;;  %v5899_v45 = vrot.slane %v5839_v1, 7  ;;  %v6019_v2 = vrot.slane %v5839_v1, 1  ;;  %v6602_v37 = vsel %vm3770_vm9, %v18254_v20, %v14013_v28 }
 0x657   : > { %vm5780_vm7 = vcmp.eq.s32.totalorder %v5696_v21, 1  ;;  %v14016_v50 = vpop.permute.xlu1 %14015  ;;  %v5360_v21 = vmax.f32 %v5300_v42, 0.0 }
 0x658   : > { %v5840_v43 = vsel %vm5780_vm7, %v5359_v10, 0.0  ;;  %v6800_v36 = vsel %vm3993_vm15, %v6797_v39, %v6799_v29  ;;  %v18630_v3 = vsel %vm3042_vm13, %v5898_v27, %v5899_v45  ;;  %v14018_v25 = vunpack.i.h.bf16 %v14016_v50 }
 0x659   : > { %v14099_v16 = vpack.i.bf16 %v5840_v43, %v5839_v1  ;;  %v5900_v23 = vrot.slane %v5840_v43, 7  ;;  %v6020_v62 = vrot.slane %v5840_v43, 1  ;;  %v14017_v24 = vunpack.i.l.bf16 %v14016_v50  ;;  %12815 = vmatmul.mubr.msk.bf16.gmra.mrb[92].mxu0 %vm4091_vm3, %v6800_v36  ;;  %v21713_v1 = vld [vmem:[#allocation62_spill] sm:$0xff] }
 0x65a   : > { %v14021_v61 = vpop.permute.xlu0 %14020  ;;  %v6046_v49 = vsel %vm3175_vm2, %v6018_v5, %v6019_v2  ;;  %12818 = vmatprep.mubr.msk.bf16.mxu0 %vm21696_vm0, %v21648_v63  ;;  %v6662_v35 = vsel %vm3837_vm10, %v6602_v37, %v14018_v25 }
 0x65b   : > { %v18639_v10 = vsel %vm3042_vm13, %v5899_v45, %v5900_v23  ;;  %14100 = vrot.lane.b32.xlu1 %v14099_v16, %s14638_s28  ;;  %v14094_v39 = vpack.i.bf16 %v6046_v49, %v6047_v44  ;;  %v6661_v27 = vsel %vm3837_vm10, %v6601_v11, %v14017_v24  ;;  %v14023_v0 = vunpack.i.h.bf16 %v14021_v61  ;;  %v5699_v28 = vpop.permute.xlu1 %5698  ;;  %v14579_v44 = vld [vmem:[%s21235_s6 + $0x78] sm:$0xff]   ;;  %v21714_v11 = vld [vmem:[#allocation64_spill] sm:$0xff] }
 0x65c   : > { %v6045_v5 = vsel %vm3175_vm2, %v6019_v2, %v6020_v62  ;;  %v18648_v20 = vpack.c.bf16 %v6662_v35, %v6661_v27  ;;  %v5302_v45 = vadd.f32 %v18213_v53, %v21713_v1  ;;  %v5303_v43 = vadd.f32 %v18213_v53, %v21714_v11  ;;  %13005 = vmatpush3.bf16.msra.mxu0 %v14579_v44 }
 0x65d   : > { %14095 = vrot.lane.b32.xlu0 %v14094_v39, %s14639_s19  ;;  %v5361_v16 = vmax.f32 %v5301_v26, 0.0  ;;  %vm5781_vm1 = vcmp.eq.s32.totalorder %v5699_v28, 1  ;;  %v14022_v2 = vunpack.i.l.bf16 %v14021_v61  ;;  %v6604_v25 = vsel %vm3770_vm9, %v18296_v30, %v14023_v0  ;;  %13006 = vmatprep.subr.bf16.mxu0 %v21648_v63 }
 0x65e   : > { %v5702_v50 = vpop.permute.xlu0 %5701  ;;  %v6801_v42 = vrot.slane %v18648_v20, 4  ;;  %v5841_v36 = vsel %vm5781_vm1, %v5360_v21, 0.0 }
 0x65f   : > { %vm5782_vm8 = vcmp.eq.s32.totalorder %v5702_v50, 1  ;;  %v5901_v24 = vrot.slane %v5841_v36, 7  ;;  %v6021_v49 = vrot.slane %v5841_v36, 1  ;;  %v14026_v26 = vpop.permute.xlu1 %14025  ;;  %v6603_v1 = vsel %vm3770_vm9, %v18269_v33, %v14022_v2 }
 0x660   : > { %v5842_v37 = vsel %vm5782_vm8, %v5361_v16, 0.0  ;;  %v6802_v28 = vsel %vm3993_vm15, %v6799_v29, %v6801_v42  ;;  %v14028_v21 = vunpack.i.h.bf16 %v14026_v26  ;;  %v14027_v44 = vunpack.i.l.bf16 %v14026_v26 }
 0x661   : > { %v14109_v39 = vpack.i.bf16 %v5842_v37, %v5841_v36  ;;  %v5902_v27 = vrot.slane %v5842_v37, 7  ;;  %v6022_v35 = vrot.slane %v5842_v37, 1  ;;  %v18665_v61 = vsel %vm3042_vm13, %v5900_v23, %v5901_v24  ;;  %12819 = vmatmul.mubr.msk.bf16.gmra.mrb[96].mxu0 %vm4091_vm3, %v6802_v28  ;;  %v21715_v37 = vld [vmem:[#allocation44_spill] sm:$0xff] }
 0x662   : > { %v14031_v30 = vpop.permute.xlu0 %14030  ;;  %v6044_v0 = vsel %vm3175_vm2, %v6020_v62, %v6021_v49  ;;  %12822 = vmatprep.mubr.msk.bf16.mxu0 %vm21696_vm0, %v21648_v63  ;;  %v6664_v23 = vsel %vm3837_vm10, %v6604_v25, %v14028_v21  ;;  %v6663_v16 = vsel %vm3837_vm10, %v6603_v1, %v14027_v44  ;;  %v5362_v36 = vmax.f32 %v5302_v45, 0.0 }
 0x663   : > { %v18674_v11 = vsel %vm3042_vm13, %v5901_v24, %v5902_v27  ;;  %14110 = vrot.lane.b32.xlu1 %v14109_v39, %s14638_s28  ;;  %v14104_v29 = vpack.i.bf16 %v6044_v0, %v6045_v5  ;;  %v14032_v50 = vunpack.i.l.bf16 %v14031_v30  ;;  %v6043_v62 = vsel %vm3175_vm2, %v6021_v49, %v6022_v35  ;;  %v5705_v2 = vpop.permute.xlu1 %5704  ;;  %v14580_v5 = vld [vmem:[%s21235_s6 + $0x8] sm:$0xff]   ;;  %v21716_v39 = vld [vmem:[#allocation66_spill] sm:$0xff] }
 0x664   : > { %v18683_v33 = vpack.c.bf16 %v6664_v23, %v6663_v16  ;;  %v5363_v24 = vmax.f32 %v5303_v43, 0.0  ;;  %v5304_v25 = vadd.f32 %v18213_v53, %v21715_v37  ;;  %v5305_v26 = vadd.f32 %v18213_v53, %v21716_v39  ;;  %12881 = vmatpush3.bf16.msra.mxu1 %v14580_v5 }
 0x665   : > { %14105 = vrot.lane.b32.xlu0 %v14104_v29, %s14639_s19  ;;  %vm5783_vm12 = vcmp.eq.s32.totalorder %v5705_v2, 1  ;;  %v14033_v49 = vunpack.i.h.bf16 %v14031_v30  ;;  %v6605_v44 = vsel %vm3770_vm9, %v18315_v40, %v14032_v50  ;;  %12882 = vmatprep.subr.bf16.mxu1 %v21648_v63 }
 0x666   : > { %v5708_v28 = vpop.permute.xlu0 %5707  ;;  %v6803_v45 = vrot.slane %v18683_v33, 4  ;;  %v5843_v21 = vsel %vm5783_vm12, %v5362_v36, 0.0 }
 0x667   : > { %vm5784_vm4 = vcmp.eq.s32.totalorder %v5708_v28, 1  ;;  %v5903_v0 = vrot.slane %v5843_v21, 7  ;;  %v6023_v1 = vrot.slane %v5843_v21, 1  ;;  %v14036_v37 = vpop.permute.xlu1 %14035 }
 0x668   : > { %v5844_v43 = vsel %vm5784_vm4, %v5363_v24, 0.0  ;;  %v6804_v2 = vsel %vm3993_vm15, %v6801_v42, %v6803_v45  ;;  %v14038_v36 = vunpack.i.h.bf16 %v14036_v37  ;;  %v14037_v5 = vunpack.i.l.bf16 %v14036_v37 }
 0x669   : > { %v14119_v29 = vpack.i.bf16 %v5844_v43, %v5843_v21  ;;  %v5904_v23 = vrot.slane %v5844_v43, 7  ;;  %v6024_v16 = vrot.slane %v5844_v43, 1  ;;  %v18700_v30 = vsel %vm3042_vm13, %v5902_v27, %v5903_v0  ;;  %12823 = vmatmul.mubr.msk.bf16.gmra.mrb[100].mxu0 %vm4091_vm3, %v6804_v2 }
 0x66a   : > { %v14041_v40 = vpop.permute.xlu0 %14040  ;;  %v6042_v50 = vsel %vm3175_vm2, %v6022_v35, %v6023_v1  ;;  %v6606_v24 = vsel %vm3770_vm9, %v18342_v4, %v14033_v49  ;;  %12826 = vmatprep.mubr.msk.bf16.mxu0 %vm21696_vm0, %v21648_v63  ;;  %v6665_v27 = vsel %vm3837_vm10, %v6605_v44, %v14037_v5  ;;  %v5364_v43 = vmax.f32 %v5304_v25, 0.0 }
 0x66b   : > { %v18709_v39 = vsel %vm3042_vm13, %v5903_v0, %v5904_v23  ;;  %14120 = vrot.lane.b32.xlu1 %v14119_v29, %s14638_s28  ;;  %v14114_v42 = vpack.i.bf16 %v6042_v50, %v6043_v62  ;;  %v6666_v28 = vsel %vm3837_vm10, %v6606_v24, %v14038_v36  ;;  %v14043_v21 = vunpack.i.h.bf16 %v14041_v40  ;;  %v5711_v49 = vpop.permute.xlu1 %5710  ;;  %v21717_v0 = vld [vmem:[#allocation42_spill] sm:$0xff]  ;;  %v21718_v29 = vld [vmem:[#allocation45_spill] sm:$0xff] }
 0x66c   : > { %v6041_v35 = vsel %vm3175_vm2, %v6023_v1, %v6024_v16  ;;  %v18718_v4 = vpack.c.bf16 %v6666_v28, %v6665_v27  ;;  %v5306_v62 = vadd.f32 %v18213_v53, %v21717_v0  ;;  %v5307_v37 = vadd.f32 %v18213_v53, %v21718_v29 }
 0x66d   : > { %14115 = vrot.lane.b32.xlu0 %v14114_v42, %s14639_s19  ;;  %v5365_v2 = vmax.f32 %v5305_v26, 0.0  ;;  %vm5785_vm5 = vcmp.eq.s32.totalorder %v5711_v49, 1  ;;  %v14042_v5 = vunpack.i.l.bf16 %v14041_v40  ;;  %v6608_v25 = vsel %vm3770_vm9, %v18392_v6, %v14043_v21 }
 0x66e   : > { %v5714_v44 = vpop.permute.xlu0 %5713  ;;  %v6805_v36 = vrot.slane %v18718_v4, 4  ;;  %v5845_v50 = vsel %vm5785_vm5, %v5364_v43, 0.0 }
 0x66f   : > { %vm5786_vm14 = vcmp.eq.s32.totalorder %v5714_v44, 1  ;;  %v5905_v1 = vrot.slane %v5845_v50, 7  ;;  %v6025_v24 = vrot.slane %v5845_v50, 1  ;;  %v14046_v55 = vpop.permute.xlu1 %14045  ;;  %v6607_v21 = vsel %vm3770_vm9, %v18360_v60, %v14042_v5 }
 0x670   : > { %v5846_v42 = vsel %vm5786_vm14, %v5365_v2, 0.0  ;;  %v6806_v53 = vsel %vm3993_vm15, %v6803_v45, %v6805_v36  ;;  %v14048_v49 = vunpack.i.h.bf16 %v14046_v55  ;;  %v14047_v40 = vunpack.i.l.bf16 %v14046_v55  ;;  %v11349_v55 = vld [vmem:[%s21230_s1 + $0x208] sm:$0xff] }
 0x671   : > { %v14129_v27 = vpack.i.bf16 %v5846_v42, %v5845_v50  ;;  %v5906_v28 = vrot.slane %v5846_v42, 7  ;;  %v6026_v0 = vrot.slane %v5846_v42, 1  ;;  %v18731_v26 = vsel %vm3042_vm13, %v5904_v23, %v5905_v1  ;;  %12827 = vmatmul.mubr.msk.bf16.gmra.mrb[104].mxu0 %vm4091_vm3, %v6806_v53  ;;  %v21719_v42 = vld [vmem:[#allocation47_spill] sm:$0xff] }
 0x672   : > { %v14051_v43 = vpop.permute.xlu0 %14050  ;;  %v6040_v6 = vsel %vm3175_vm2, %v6024_v16, %v6025_v24  ;;  %12830 = vmatprep.mubr.msk.bf16.mxu0 %vm21696_vm0, %v21648_v63  ;;  %v6668_v23 = vsel %vm3837_vm10, %v6608_v25, %v14048_v49  ;;  %v6667_v16 = vsel %vm3837_vm10, %v6607_v21, %v14047_v40  ;;  %v5366_v44 = vmax.f32 %v5306_v62, 0.0  ;;  %v18761_v25 = vld [vmem:[%s21234_s5] ss:$0 sm:$0xff] }
 0x673   : > { %v18740_v29 = vsel %vm3042_vm13, %v5905_v1, %v5906_v28  ;;  %14130 = vrot.lane.b32.xlu1 %v14129_v27, %s14638_s28  ;;  %v14124_v45 = vpack.i.bf16 %v6040_v6, %v6041_v35  ;;  %v14052_v2 = vunpack.i.l.bf16 %v14051_v43  ;;  %v6039_v60 = vsel %vm3175_vm2, %v6025_v24, %v6026_v0  ;;  %v5717_v35 = vpop.permute.xlu1 %5716  ;;  %v14581_v1 = vld [vmem:[%s21235_s6 + $0x10] sm:$0xff]   ;;  %v21720_v24 = vld [vmem:[#allocation39_spill] sm:$0xff] }
 0x674   : > { %v5367_v5 = vmax.f32 %v5307_v37, 0.0  ;;  %v18752_v50 = vpack.c.bf16 %v6668_v23, %v6667_v16  ;;  %v5308_v27 = vadd.f32 %v18761_v25, %v21719_v42  ;;  %v5309_v62 = vadd.f32 %v18761_v25, %v21720_v24  ;;  %12883 = vmatpush3.bf16.msra.mxu1 %v14581_v1 }
 0x675   : > { %14125 = vrot.lane.b32.xlu0 %v14124_v45, %s14639_s19  ;;  %vm5787_vm11 = vcmp.eq.s32.totalorder %v5717_v35, 1  ;;  %vm5492_vm6 = vcmp.gt.f32.partialorder %v11349_v55, 0.0  ;;  %v14053_v49 = vunpack.i.h.bf16 %v14051_v43  ;;  %v6609_v6 = vsel %vm3770_vm9, %v18408_v15, %v14052_v2  ;;  %12884 = vmatprep.subr.bf16.mxu1 %v21648_v63 }
 0x676   : > { %v5720_v37 = vpop.permute.xlu0 %5719  ;;  %v6807_v53 = vrot.slane %v18752_v50, 4  ;;  %v5847_v40 = vsel %vm5787_vm11, %v5366_v44, 0.0 }
 0x677   : > { %vm5788_vm7 = vcmp.eq.s32.totalorder %v5720_v37, 1  ;;  %v5907_v21 = vrot.slane %v5847_v40, 7  ;;  %v6027_v45 = vrot.slane %v5847_v40, 1  ;;  %v14056_v35 = vpop.permute.xlu1 %14055 }
 0x678   : > { %v5848_v23 = vsel %vm5788_vm7, %v5367_v5, 0.0  ;;  %v6808_v9 = vsel %vm3993_vm15, %v6805_v36, %v6807_v53  ;;  %v14058_v44 = vunpack.i.h.bf16 %v14056_v35  ;;  %v14057_v1 = vunpack.i.l.bf16 %v14056_v35 }
 0x679   : > { %v14139_v16 = vpack.i.bf16 %v5848_v23, %v5847_v40  ;;  %v5908_v42 = vrot.slane %v5848_v23, 7  ;;  %v6028_v24 = vrot.slane %v5848_v23, 1  ;;  %v18774_v43 = vsel %vm3042_vm13, %v5906_v28, %v5907_v21  ;;  %12831 = vmatmul.mubr.msk.bf16.gmra.mrb[108].mxu0 %vm4091_vm3, %v6808_v9 }
 0x67a   : > { %v14061_v15 = vpop.permute.xlu0 %14060  ;;  %v6038_v2 = vsel %vm3175_vm2, %v6026_v0, %v6027_v45  ;;  %v6610_v5 = vsel %vm3770_vm9, %v18434_v56, %v14053_v49  ;;  %v5552_v28 = vsel %vm5492_vm6, 1, %v21614_v18  ;;  %12834 = vmatprep.mubr.msk.bf16.mxu0 %vm21696_vm0, %v21648_v63  ;;  %v6669_v9 = vsel %vm3837_vm10, %v6609_v6, %v14057_v1 }
 0x67b   : > { %v18783_v37 = vsel %vm3042_vm13, %v5907_v21, %v5908_v42  ;;  %14140 = vrot.lane.b32.xlu1 %v14139_v16, %s14638_s28  ;;  %v14134_v36 = vpack.i.bf16 %v6038_v2, %v6039_v60  ;;  %v6670_v0 = vsel %vm3837_vm10, %v6610_v5, %v14058_v44  ;;  %v14063_v40 = vunpack.i.h.bf16 %v14061_v15  ;;  %v5723_v23 = vpop.permute.xlu1 %5722  ;;  %v21721_v60 = vld [vmem:[#allocation63_spill] sm:$0xff] }
 0x67c   : > { %v6037_v56 = vsel %vm3175_vm2, %v6027_v45, %v6028_v24  ;;  %v5368_v49 = vmax.f32 %v5308_v27, 0.0  ;;  %v18794_v21 = vpack.c.bf16 %v6670_v0, %v6669_v9  ;;  %v5310_v55 = vadd.f32 %v18761_v25, %v21721_v60 }
 0x67d   : > { %14135 = vrot.lane.b32.xlu0 %v14134_v36, %s14639_s19  ;;  %v5369_v16 = vmax.f32 %v5309_v62, 0.0  ;;  %vm5789_vm1 = vcmp.eq.s32.totalorder %v5723_v23, 1  ;;  %v14062_v1 = vunpack.i.l.bf16 %v14061_v15  ;;  %v6612_v27 = vsel %vm3770_vm9, %v18481_v7, %v14063_v40 }
 0x67e   : > { %v5726_v35 = vpop.permute.xlu0 %5725  ;;  %v6809_v6 = vrot.slane %v18794_v21, 4  ;;  %v5849_v44 = vsel %vm5789_vm1, %v5368_v49, 0.0 }
 0x67f   : > { %vm5790_vm8 = vcmp.eq.s32.totalorder %v5726_v35, 1  ;;  %5731 = vperm.xlu1 %13548, %v5552_v28   ;;  %v5909_v45 = vrot.slane %v5849_v44, 7  ;;  %v6029_v2 = vrot.slane %v5849_v44, 1  ;;  %v14066_v0 = vpop.permute.xlu1 %14065  ;;  %v6611_v40 = vsel %vm3770_vm9, %v18452_v31, %v14062_v1 }
 0x680   : > { %v18802_v5 = vsel %vm5790_vm8, %v5369_v16, 0.0  ;;  %v6810_v23 = vsel %vm3993_vm15, %v6807_v53, %v6809_v6  ;;  %v14068_v28 = vunpack.i.h.bf16 %v14066_v0  ;;  %v14067_v49 = vunpack.i.l.bf16 %v14066_v0 }
 0x681   : > { %v14149_v36 = vpack.i.bf16 %v18802_v5, %v5849_v44  ;;  %v21373_v9 = vrot.slane %v18802_v5, 7  ;;  %v6030_v62 = vrot.slane %v18802_v5, 1  ;;  %v18810_v15 = vsel %vm3042_vm13, %v5908_v42, %v5909_v45  ;;  %12835 = vmatmul.mubr.msk.bf16.gmra.mrb[112].mxu0 %vm4091_vm3, %v6810_v23  ;;  %v18832_v35 = vpop.f32.mrb[48].mxu0 }
 0x682   : > { %v6036_v7 = vsel %vm3175_vm2, %v6028_v24, %v6029_v2  ;;  %12838 = vmatprep.mubr.msk.bf16.mxu0 %vm21696_vm0, %v21648_v63  ;;  %v14582_v24 = vld [vmem:[%s21235_s6 + $0x80] sm:$0xff]   ;;  %v6672_v16 = vsel %vm3837_vm10, %v6612_v27, %v14068_v28  ;;  %v6671_v31 = vsel %vm3837_vm10, %v6611_v40, %v14067_v49  ;;  %v5370_v1 = vmax.f32 %v5310_v55, 0.0  ;;  %v14583_v55 = vld [vmem:[%s21235_s6 + $0x18] sm:$0xff]  }
 0x683   : > { %v18821_v60 = vsel %vm3042_vm13, %v5909_v45, %v21373_v9  ;;  %v14144_v53 = vpack.i.bf16 %v6036_v7, %v6037_v56  ;;  %v6035_v42 = vsel %vm3175_vm2, %v6029_v2, %v6030_v62  ;;  %v18834_v44 = vpack.c.bf16 %v6672_v16, %v6671_v31  ;;  %v5729_v56 = vpop.permute.xlu1 %5728  ;;  %v12772_v45 = vpop.f32.mrb[49].mxu0  ;;  %13007 = vmatpush3.bf16.msra.mxu0 %v14582_v24 }
 0x684   : > { %vm5791_vm12 = vcmp.eq.s32.totalorder %v5729_v56, 1  ;;  %v18837_v2 = vpop.f32.mrb[50].mxu0  ;;  %13008 = vmatprep.subr.bf16.mxu0 %v21648_v63  ;;  %12885 = vmatpush3.bf16.msra.mxu1 %v14583_v55 }
 0x685   : > { %14145 = vrot.lane.b32.xlu0 %v14144_v53, %s14639_s19  ;;  %21722 = vst [vmem:[#allocation72_spill] sm:$0xff] %v18837_v2  ;;  %v21375_v0 = vrot.slane %v18834_v44, 4  ;;  %v18841_v27 = vsel %vm5791_vm12, %v5370_v1, 0.0  ;;  %v12773_v23 = vpop.f32.mrb[51].mxu0  ;;  %12886 = vmatprep.subr.bf16.mxu1 %v21648_v63 }
 0x686   : > { %v21374_v28 = vrot.slane %v18841_v27, 1 }
 0x687   : > { %v6812_v49 = vsel %vm3993_vm15, %v6809_v6, %v21375_v0  ;;  %v14584_v6 = vld [vmem:[%s21235_s6 + $0x88] sm:$0xff]  }
 0x688   : > { %v6034_v7 = vsel %vm3175_vm2, %v6030_v62, %v21374_v28  ;;  %13009 = vmatpush3.bf16.msra.mxu0 %v14584_v6 }
 0x689   : > { %14150 = vrot.lane.b32.xlu0 %v14149_v36, %s14638_s28  ;;  %12839 = vmatmul.mubr.msk.bf16.gmra.mrb[116].mxu0 %vm4091_vm3, %v6812_v49  ;;  %v14154_v40 = vpack.i.bf16 %v6034_v7, %v6035_v42  ;;  %v14585_v42 = vld [vmem:[%s21235_s6 + $0x20] sm:$0xff]   ;;  %v14586_v7 = vld [vmem:[%s21235_s6 + $0x28] sm:$0xff]  }
 0x68a   : > { %12842 = vmatprep.mubr.msk.bf16.mxu0 %vm21696_vm0, %v21648_v63  ;;  %12887 = vmatpush3.bf16.msra.mxu1 %v14585_v42 }
 0x68b   : > { %14155 = vrot.lane.b32.xlu1 %v14154_v40, %s14639_s19  ;;  %12888 = vmatprep.subr.bf16.mxu1 %v21648_v63 }
 0x68e   : > { %12889 = vmatpush3.bf16.msra.mxu1 %v14586_v7 }
 0x697   : > { %v18863_v36 = vpop.f32.mrb[52].mxu0 }
 0x698   : > { %21723 = vst [vmem:[#allocation70_spill] sm:$0xff] %v18863_v36  ;;  %v12776_v53 = vpop.f32.mrb[53].mxu0 }
 0x699   : > { %v18865_v24 = vpop.f32.mrb[54].mxu0 }
 0x69a   : > { %21724 = vst [vmem:[#allocation50_spill] sm:$0xff] %v18865_v24  ;;  %v12777_v62 = vpop.f32.mrb[55].mxu0 }
 0x69f   : > { %v18871_v16 = vpop.f32.mrb[56].mxu0 }
 0x6a0   : > { %21725 = vst [vmem:[#allocation17_spill] sm:$0xff] %v18871_v16  ;;  %v12780_v31 = vpop.f32.mrb[57].mxu0 }
 0x6a1   : > { %v18873_v1 = vpop.f32.mrb[58].mxu0 }
 0x6a2   : > { %21726 = vst [vmem:[#allocation19_spill] sm:$0xff] %v18873_v1  ;;  %v12781_v56 = vpop.f32.mrb[59].mxu0 }
 0x6a8   : > { %v18875_v45 = vpop.f32.mrb[60].mxu0 }
 0x6a9   : > { %21727 = vst [vmem:[#allocation21_spill] sm:$0xff] %v18875_v45  ;;  %v12784_v23 = vpop.f32.mrb[61].mxu0  ;;  %v21733_v45 = vrot.slane %v18465_v12, 7 }
 0x6aa   : > { %v18877_v55 = vpop.f32.mrb[62].mxu0  ;;  %v5893_v23 = vrot.slane %v18483_v48, 7 }
 0x6ab   : > { %21728 = vst [vmem:[#allocation23_spill] sm:$0xff] %v18877_v55  ;;  %v12785_v49 = vpop.f32.mrb[63].mxu0 }
 0x6ac   : > { %v5932_v7 = vsel %vm3042_vm13, %v21733_v45, %v5893_v23 }
 0x6b0   : > { %v18882_v40 = vpop.f32.mrb[64].mxu0 }
 0x6b1   : > { %21729 = vst [vmem:[#allocation25_spill] sm:$0xff] %v18882_v40  ;;  %v12788_v6 = vpop.f32.mrb[65].mxu0 }
 0x6b2   : > { %v18884_v53 = vpop.f32.mrb[66].mxu0  ;;  %v14071_v31 = vpop.permute.xlu0 %14070  ;;  %v21734_v6 = vrot.slane %v18541_v58, 7 }
 0x6b3   : > { %21730 = vst [vmem:[#allocation27_spill] sm:$0xff] %v18884_v53  ;;  %v12789_v62 = vpop.f32.mrb[67].mxu0  ;;  %v14073_v28 = vunpack.i.h.bf16 %v14071_v31  ;;  %v14072_v0 = vunpack.i.l.bf16 %v14071_v31  ;;  %v21736_v31 = vld [vmem:[#allocation57_spill] sm:$0xff] }
 0x6b4   : > { %v5931_v62 = vsel %vm3042_vm13, %v5893_v23, %v21734_v6  ;;  %v5252_v53 = vadd.f32 %v18761_v25, %v21736_v31  ;;  %v21738_v6 = vld [vmem:[#allocation69_spill] sm:$0xff]  ;;  %v21739_v31 = vrot.slane %v18834_v44, 4 }
 0x6b5   : > { %v6614_v48 = vsel %vm3770_vm9, %v5931_v62, %v14073_v28  ;;  %v5974_v62 = vrot.slane %v21738_v6, 1 }
 0x6b8   : > { %v18886_v42 = vpop.f32.mrb[68].mxu0 }
 0x6b9   : > { %21731 = vst [vmem:[#allocation29_spill] sm:$0xff] %v18886_v42  ;;  %v12792_v56 = vpop.f32.mrb[69].mxu0 }
 0x6ba   : > { %v18888_v9 = vpop.f32.mrb[70].mxu0 }
 0x6bb   : > { %21732 = vst [vmem:[#allocation30_spill] sm:$0xff] %v18888_v9  ;;  %v12793_v49 = vpop.f32.mrb[71].mxu0  ;;  %v6613_v9 = vsel %vm3770_vm9, %v5932_v7, %v14072_v0  ;;  %v5312_v7 = vmax.f32 %v5252_v53, 0.0 }
 0x6bc   : > { %v14076_v55 = vpop.permute.xlu1 %14075 }
 0x6bd   : > { %v14078_v42 = vunpack.i.h.bf16 %v14076_v55  ;;  %v14077_v56 = vunpack.i.l.bf16 %v14076_v55 }
 0x6bf   : > { %v6673_v12 = vsel %vm3837_vm10, %v6613_v9, %v14077_v56  ;;  %v6674_v45 = vsel %vm3837_vm10, %v6614_v48, %v14078_v42 }
 0x6c0   : > { %v18901_v49 = vpop.f32.mrb[72].mxu0  ;;  %v18907_v58 = vpack.c.bf16 %v6674_v45, %v6673_v12  ;;  %v14081_v1 = vpop.permute.xlu1 %14080 }
 0x6c1   : > { %21735 = vst [vmem:[#allocation34_spill] sm:$0xff] %v18901_v49  ;;  %v12796_v40 = vpop.f32.mrb[73].mxu0  ;;  %v14083_v56 = vunpack.i.h.bf16 %v14081_v1  ;;  %v14082_v42 = vunpack.i.l.bf16 %v14081_v1 }
 0x6c2   : > { %v18909_v23 = vpop.f32.mrb[74].mxu0  ;;  %v6813_v0 = vrot.slane %v18907_v58, 4 }
 0x6c3   : > { %21737 = vst [vmem:[#allocation32_spill] sm:$0xff] %v18909_v23  ;;  %v12797_v55 = vpop.f32.mrb[75].mxu0  ;;  %v5555_v28 = vpop.permute.xlu0 %5554  ;;  %v6616_v16 = vsel %vm3770_vm9, %v18573_v57, %v14083_v56 }
 0x6c4   : > { %vm5733_vm4 = vcmp.eq.s32.totalorder %v5555_v28, 1  ;;  %v6814_v9 = vsel %vm3993_vm15, %v21739_v31, %v6813_v0  ;;  %v14091_v53 = vpop.permute.xlu1 %14090 }
 0x6c5   : > { %v18916_v40 = vsel %vm5733_vm4, %v5312_v7, 0.0  ;;  %12843 = vmatmul.mubr.msk.bf16.gmra.mrb[120].mxu0 %vm4091_vm3, %v6814_v9  ;;  %v21742_v7 = vld [vmem:[#allocation31_spill] sm:$0xff]  ;;  %v14093_v24 = vunpack.i.h.bf16 %v14091_v53  ;;  %v14092_v36 = vunpack.i.l.bf16 %v14091_v53 }
 0x6c6   : > { %v14159_v48 = vpack.i.bf16 %v21738_v6, %v18916_v40  ;;  %v21376_v12 = vrot.slane %v18916_v40, 1  ;;  %12846 = vmatprep.mubr.msk.bf16.mxu0 %vm21696_vm0, %v21648_v63  ;;  %v21743_v9 = vrot.slane %v21742_v7, 1 }
 0x6c7   : > { %v14086_v55 = vpop.permute.xlu0 %14085  ;;  %v6618_v57 = vsel %vm3770_vm9, %v18607_v13, %v14093_v24 }
 0x6c8   : > { %v18922_v45 = vpop.f32.mrb[76].mxu0  ;;  %v14088_v31 = vunpack.i.h.bf16 %v14086_v55  ;;  %v14087_v23 = vunpack.i.l.bf16 %v14086_v55  ;;  %14160 = vrot.lane.b32.xlu0 %v14159_v48, %s14638_s28  ;;  %v6090_v49 = vsel %vm3175_vm2, %v5974_v62, %v21743_v9  ;;  %v6615_v55 = vsel %vm3770_vm9, %v18559_v19, %v14082_v42 }
 0x6c9   : > { %21740 = vst [vmem:[#allocation58_spill] sm:$0xff] %v18922_v45  ;;  %v12800_v28 = vpop.f32.mrb[77].mxu0  ;;  %v6091_v45 = vsel %vm3175_vm2, %v21376_v12, %v5974_v62 }
 0x6ca   : > { %v18927_v1 = vpop.f32.mrb[78].mxu0  ;;  %v14164_v48 = vpack.i.bf16 %v6090_v49, %v6091_v45  ;;  %v6675_v7 = vsel %vm3837_vm10, %v6615_v55, %v14087_v23 }
 0x6cb   : > { %21741 = vst [vmem:[#allocation60_spill] sm:$0xff] %v18927_v1  ;;  %v12801_v28 = vpop.f32.mrb[79].mxu0  ;;  %v6676_v1 = vsel %vm3837_vm10, %v6616_v16, %v14088_v31  ;;  %v6617_v16 = vsel %vm3770_vm9, %v18598_v52, %v14092_v36 }
 0x6cc   : > { %v18943_v9 = vpack.c.bf16 %v6676_v1, %v6675_v7  ;;  %14165 = vrot.lane.b32.xlu1 %v14164_v48, %s14639_s19 }
 0x6cd   : > { %v14101_v49 = vpop.permute.xlu1 %14100 }
 0x6ce   : > { %v6815_v62 = vrot.slane %v18943_v9, 4  ;;  %v14102_v52 = vunpack.i.l.bf16 %v14101_v49 }
 0x6cf   : > { %v14096_v2 = vpop.permute.xlu0 %14095 }
 0x6d0   : > { %v14098_v12 = vunpack.i.h.bf16 %v14096_v2  ;;  %v14097_v19 = vunpack.i.l.bf16 %v14096_v2  ;;  %v18949_v56 = vpop.f32.mrb[80].mxu0  ;;  %v6816_v53 = vsel %vm3993_vm15, %v6813_v0, %v6815_v62  ;;  %v14103_v2 = vunpack.i.h.bf16 %v14101_v49 }
 0x6d1   : > { %v12804_v42 = vpop.f32.mrb[81].mxu0  ;;  %12847 = vmatmul.mubr.msk.bf16.gmra.mrb[124].mxu0 %vm4091_vm3, %v6816_v53  ;;  %v6619_v28 = vsel %vm3770_vm9, %v18630_v3, %v14102_v52 }
 0x6d2   : > { %v6678_v23 = vsel %vm3837_vm10, %v6618_v57, %v14098_v12  ;;  %v6677_v45 = vsel %vm3837_vm10, %v6617_v16, %v14097_v19  ;;  %v18956_v31 = vpop.f32.mrb[82].mxu0  ;;  %12850 = vmatprep.mubr.msk.bf16.mxu0 %vm21696_vm0, %v21648_v63  ;;  %v6620_v0 = vsel %vm3770_vm9, %v18639_v10, %v14103_v2 }
 0x6d3   : > { %v18959_v1 = vpack.c.bf16 %v6678_v23, %v6677_v45  ;;  %v12805_v13 = vpop.f32.mrb[83].mxu0 }
 0x6d5   : > { %v6817_v36 = vrot.slane %v18959_v1, 4  ;;  %v14111_v48 = vpop.permute.xlu1 %14110 }
 0x6d6   : > { %v14113_v49 = vunpack.i.h.bf16 %v14111_v48  ;;  %v14112_v23 = vunpack.i.l.bf16 %v14111_v48 }
 0x6d7   : > { %v14106_v24 = vpop.permute.xlu0 %14105  ;;  %v6818_v19 = vsel %vm3993_vm15, %v6815_v62, %v6817_v36 }
 0x6d8   : > { %v14108_v12 = vunpack.i.h.bf16 %v14106_v24  ;;  %v14107_v55 = vunpack.i.l.bf16 %v14106_v24  ;;  %v6621_v45 = vsel %vm3770_vm9, %v18665_v61, %v14112_v23  ;;  %v6622_v62 = vsel %vm3770_vm9, %v18674_v11, %v14113_v49 }
 0x6d9   : > { %12851 = vmatmul.mubr.msk.bf16.gmra.mrb[128].mxu0 %vm4091_vm3, %v6818_v19 }
 0x6da   : > { %v6680_v7 = vsel %vm3837_vm10, %v6620_v0, %v14108_v12  ;;  %v6679_v57 = vsel %vm3837_vm10, %v6619_v28, %v14107_v55  ;;  %12854 = vmatprep.mubr.msk.bf16.mxu0 %vm21696_vm0, %v21648_v63 }
 0x6db   : > { %v18971_v16 = vpack.c.bf16 %v6680_v7, %v6679_v57 }
 0x6dd   : > { %v6819_v10 = vrot.slane %v18971_v16, 4  ;;  %v14121_v13 = vpop.permute.xlu1 %14120 }
 0x6de   : > { %v14123_v55 = vunpack.i.h.bf16 %v14121_v13  ;;  %v14122_v0 = vunpack.i.l.bf16 %v14121_v13 }
 0x6df   : > { %v14116_v42 = vpop.permute.xlu0 %14115  ;;  %v6820_v24 = vsel %vm3993_vm15, %v6817_v36, %v6819_v10 }
 0x6e0   : > { %v14118_v3 = vunpack.i.h.bf16 %v14116_v42  ;;  %v14117_v53 = vunpack.i.l.bf16 %v14116_v42  ;;  %v6624_v7 = vsel %vm3770_vm9, %v18709_v39, %v14123_v55  ;;  %v6623_v36 = vsel %vm3770_vm9, %v18700_v30, %v14122_v0 }
 0x6e1   : > { %12855 = vmatmul.mubr.msk.bf16.gmra.mrb[132].mxu0 %vm4091_vm3, %v6820_v24 }
 0x6e2   : > { %v6681_v2 = vsel %vm3837_vm10, %v6621_v45, %v14117_v53  ;;  %v6682_v52 = vsel %vm3837_vm10, %v6622_v62, %v14118_v3  ;;  %12858 = vmatprep.mubr.msk.bf16.mxu0 %vm21696_vm0, %v21648_v63 }
 0x6e3   : > { %v18984_v12 = vpack.c.bf16 %v6682_v52, %v6681_v2 }
 0x6e5   : > { %v6821_v61 = vrot.slane %v18984_v12, 4  ;;  %v14131_v57 = vpop.permute.xlu1 %14130 }
 0x6e6   : > { %v14133_v3 = vunpack.i.h.bf16 %v14131_v57  ;;  %v14132_v53 = vunpack.i.l.bf16 %v14131_v57  ;;  %v21744_v57 = vld [vmem:[#allocation48_spill] sm:$0xff] }
 0x6e7   : > { %v14126_v28 = vpop.permute.xlu0 %14125  ;;  %v6822_v23 = vsel %vm3993_vm15, %v6819_v10, %v6821_v61 }
 0x6e8   : > { %v14128_v11 = vunpack.i.h.bf16 %v14126_v28  ;;  %v14127_v48 = vunpack.i.l.bf16 %v14126_v28  ;;  %v6625_v13 = vsel %vm3770_vm9, %v18731_v26, %v14132_v53  ;;  %v6626_v10 = vsel %vm3770_vm9, %v18740_v29, %v14133_v3 }
 0x6e9   : > { %12859 = vmatmul.mubr.msk.bf16.gmra.mrb[136].mxu0 %vm4091_vm3, %v6822_v23 }
 0x6ea   : > { %v6684_v19 = vsel %vm3837_vm10, %v6624_v7, %v14128_v11  ;;  %v6683_v49 = vsel %vm3837_vm10, %v6623_v36, %v14127_v48  ;;  %12862 = vmatprep.mubr.msk.bf16.mxu0 %vm21696_vm0, %v21648_v63 }
 0x6eb   : > { %v18997_v42 = vpack.c.bf16 %v6684_v19, %v6683_v49  ;;  %v5311_v19 = vadd.f32 %v18761_v25, %v21744_v57 }
 0x6ed   : > { %v6823_v39 = vrot.slane %v18997_v42, 4  ;;  %v14141_v2 = vpop.permute.xlu1 %14140 }
 0x6ee   : > { %v14143_v28 = vunpack.i.h.bf16 %v14141_v2  ;;  %v14142_v11 = vunpack.i.l.bf16 %v14141_v2  ;;  %v5853_v2 = vrot.slane %v18916_v40, 7 }
 0x6ef   : > { %v14136_v45 = vpop.permute.xlu0 %14135  ;;  %v6824_v55 = vsel %vm3993_vm15, %v6821_v61, %v6823_v39 }
 0x6f0   : > { %v14138_v30 = vunpack.i.h.bf16 %v14136_v45  ;;  %v14137_v62 = vunpack.i.l.bf16 %v14136_v45  ;;  %v6628_v36 = vsel %vm3770_vm9, %v18783_v37, %v14143_v28  ;;  %v6627_v61 = vsel %vm3770_vm9, %v18774_v43, %v14142_v11  ;;  %v11476_v43 = vld [vmem:[%s21230_s1 + $0x58] sm:$0xff] }
 0x6f1   : > { %12863 = vmatmul.mubr.msk.bf16.gmra.mrb[140].mxu0 %vm4091_vm3, %v6824_v55  ;;  %v5371_v45 = vmax.f32 %v5311_v19, 0.0  ;;  %vm8097_vm14 = vcmp.gt.f32.partialorder %v11476_v43, 0.0  ;;  %v21745_v19 = vrot.slane %v18841_v27, 1 }
 0x6f2   : > { %v6685_v52 = vsel %vm3837_vm10, %v6625_v13, %v14137_v62  ;;  %v6686_v24 = vsel %vm3837_vm10, %v6626_v10, %v14138_v30  ;;  %12866 = vmatprep.mubr.msk.bf16.mxu0 %vm21696_vm0, %v21648_v63 }
 0x6f3   : > { %v19010_v0 = vpack.c.bf16 %v6686_v24, %v6685_v52 }
 0x6f5   : > { %v6825_v26 = vrot.slane %v19010_v0, 4 }
 0x6f7   : > { %v14146_v48 = vpop.permute.xlu0 %14145  ;;  %v6826_v3 = vsel %vm3993_vm15, %v6823_v39, %v6825_v26  ;;  %v11477_v39 = vld [vmem:[%s21230_s1 + $0x60] sm:$0xff] }
 0x6f8   : > { %v14148_v29 = vunpack.i.h.bf16 %v14146_v48  ;;  %v14147_v7 = vunpack.i.l.bf16 %v14146_v48  ;;  %vm8098_vm11 = vcmp.gt.f32.partialorder %v11477_v39, 0.0  ;;  %v11478_v48 = vld [vmem:[%s21230_s1 + $0x68] sm:$0xff] }
 0x6f9   : > { %12867 = vmatmul.mubr.msk.bf16.gmra.mrb[144].mxu0 %vm4091_vm3, %v6826_v3  ;;  %vm8099_vm6 = vcmp.gt.f32.partialorder %v11478_v48, 0.0 }
 0x6fa   : > { %v6688_v49 = vsel %vm3837_vm10, %v6628_v36, %v14148_v29  ;;  %v6687_v23 = vsel %vm3837_vm10, %v6627_v61, %v14147_v7  ;;  %12870 = vmatprep.mubr.msk.bf16.mxu0 %vm21696_vm0, %v21648_v63 }
 0x6fb   : > { %v19025_v53 = vpack.c.bf16 %v6688_v49, %v6687_v23  ;;  %v14151_v37 = vpop.permute.xlu0 %14150  ;;  %v21746_v23 = vrot.slane %v18916_v40, 1 }
 0x6fc   : > { %v14153_v62 = vunpack.i.h.bf16 %v14151_v37  ;;  %v14152_v13 = vunpack.i.l.bf16 %v14151_v37 }
 0x6fd   : > { %v6827_v25 = vrot.slane %v19025_v53, 4 }
 0x6fe   : > { %v5732_v30 = vpop.permute.xlu1 %5731  ;;  %v6629_v61 = vsel %vm3770_vm9, %v18810_v15, %v14152_v13  ;;  %v6630_v57 = vsel %vm3770_vm9, %v18821_v60, %v14153_v62  ;;  %v8152_v13 = vsel %vm8098_vm11, 1, %v21614_v18 }
 0x6ff   : > { %vm5792_vm5 = vcmp.eq.s32.totalorder %v5732_v30, 1  ;;  %v6828_v11 = vsel %vm3993_vm15, %v6825_v26, %v6827_v25  ;;  %v8151_v26 = vsel %vm8097_vm14, 1, %v21614_v18  ;;  %v11480_v30 = vld [vmem:[%s21230_s1 + $0x78] sm:$0xff] }
 0x700   : > { %v19037_v10 = vsel %vm5792_vm5, %v5371_v45, 0.0  ;;  %v11479_v45 = vld [vmem:[%s21230_s1 + $0x70] sm:$0xff]  ;;  %vm8101_vm1 = vcmp.gt.f32.partialorder %v11480_v30, 0.0 }
 0x701   : > { %v14169_v52 = vpack.i.bf16 %v19037_v10, %v18841_v27  ;;  %v21377_v24 = vrot.slane %v19037_v10, 7  ;;  %v6032_v55 = vrot.slane %v19037_v10, 1  ;;  %12871 = vmatmul.mubr.msk.bf16.gmra.mrb[148].mxu0 %vm4091_vm3, %v6828_v11  ;;  %vm8100_vm7 = vcmp.gt.f32.partialorder %v11479_v45, 0.0  ;;  %v11482_v11 = vld [vmem:[%s21230_s1 + $0x88] sm:$0xff]  ;;  %v11488_v45 = vld [vmem:[%s21230_s1 + $0xb8] sm:$0xff] }
 0x702   : > { %v14156_v28 = vpop.permute.xlu1 %14155  ;;  %12874 = vmatprep.mubr.msk.bf16.mxu0 %vm21696_vm0, %v21648_v63  ;;  %v8154_v39 = vsel %vm8100_vm7, 1, %v21614_v18  ;;  %v8155_v48 = vsel %vm8101_vm1, 1, %v21614_v18  ;;  %vm8103_vm12 = vcmp.gt.f32.partialorder %v11482_v11, 0.0  ;;  %vm8109_vm7 = vcmp.gt.f32.partialorder %v11488_v45, 0.0  ;;  %v11491_v11 = vld [vmem:[%s21230_s1 + $0xd0] sm:$0xff] }
 0x703   : > { %v19054_v29 = vsel %vm3042_vm13, %v21377_v24, %v5853_v2  ;;  %v14158_v7 = vunpack.i.h.bf16 %v14156_v28  ;;  %v14157_v36 = vunpack.i.l.bf16 %v14156_v28  ;;  %14170 = vrot.lane.b32.xlu0 %v14169_v52, %s14638_s28  ;;  %v6033_v49 = vsel %vm3175_vm2, %v21745_v19, %v6032_v55  ;;  %v11481_v28 = vld [vmem:[%s21230_s1 + $0x80] sm:$0xff] }
 0x704   : > { %v6092_v3 = vsel %vm3175_vm2, %v6032_v55, %v21746_v23  ;;  %v8153_v52 = vsel %vm8099_vm6, 1, %v21614_v18  ;;  %vm8102_vm8 = vcmp.gt.f32.partialorder %v11481_v28, 0.0  ;;  %v11485_v23 = vld [vmem:[%s21230_s1 + $0xa0] sm:$0xff]  ;;  %v8163_v28 = vsel %vm8109_vm7, 1, %v21614_v18 }
 0x705   : > { %v6689_v37 = vsel %vm3837_vm10, %v6629_v61, %v14157_v36  ;;  %v6690_v15 = vsel %vm3837_vm10, %v6630_v57, %v14158_v7  ;;  %v14174_v43 = vpack.i.bf16 %v6092_v3, %v6033_v49  ;;  %v11484_v7 = vld [vmem:[%s21230_s1 + $0x98] sm:$0xff]  ;;  %v8156_v61 = vsel %vm8102_vm8, 1, %v21614_v18  ;;  %v11486_v3 = vld [vmem:[%s21230_s1 + $0xa8] sm:$0xff] }
 0x706   : > { %v19075_v60 = vpack.c.bf16 %v6690_v15, %v6689_v37  ;;  %v8157_v57 = vsel %vm8103_vm12, 1, %v21614_v18  ;;  %vm8105_vm5 = vcmp.gt.f32.partialorder %v11484_v7, 0.0  ;;  %vm8106_vm14 = vcmp.gt.f32.partialorder %v11485_v23, 0.0  ;;  %v11493_v7 = vld [vmem:[%s21230_s1 + $0xe0] sm:$0xff] }
 0x707   : > { %14175 = vrot.lane.b32.xlu1 %v14174_v43, %s14639_s19  ;;  %8210 = vperm.xlu0 %13547, %v8151_v26   ;;  %v8159_v15 = vsel %vm8105_vm5, 1, %v21614_v18  ;;  %vm8107_vm11 = vcmp.gt.f32.partialorder %v11486_v3, 0.0  ;;  %v11487_v43 = vld [vmem:[%s21230_s1 + $0xb0] sm:$0xff]  ;;  %v8160_v30 = vsel %vm8106_vm14, 1, %v21614_v18  ;;  %vm8112_vm12 = vcmp.gt.f32.partialorder %v11491_v11, 0.0 }
 0x708   : > { %v6829_v62 = vrot.slane %v19075_v60, 4  ;;  %vm8108_vm6 = vcmp.gt.f32.partialorder %v11487_v43, 0.0  ;;  %vm8114_vm5 = vcmp.gt.f32.partialorder %v11493_v7, 0.0  ;;  %v11495_v3 = vld [vmem:[%s21230_s1 + $0xf0] sm:$0xff] }
 0x709   : > { %v8168_v45 = vsel %vm8114_vm5, 1, %v21614_v18 }
 0x70a   : > { %v6830_v55 = vsel %vm3993_vm15, %v6827_v25, %v6829_v62  ;;  %v11483_v25 = vld [vmem:[%s21230_s1 + $0x90] sm:$0xff]  ;;  %v8161_v62 = vsel %vm8107_vm11, 1, %v21614_v18  ;;  %vm8116_vm11 = vcmp.gt.f32.partialorder %v11495_v3, 0.0 }
 0x70b   : > { %8213 = vperm.xlu1 %13548, %v8152_v13   ;;  %8216 = vperm.xlu0 %13547, %v8153_v52   ;;  %vm8104_vm4 = vcmp.gt.f32.partialorder %v11483_v25, 0.0  ;;  %v11489_v13 = vld [vmem:[%s21230_s1 + $0xc0] sm:$0xff]  ;;  %v11490_v52 = vld [vmem:[%s21230_s1 + $0xc8] sm:$0xff] }
 0x70c   : > { %12875 = vmatmul.mubr.msk.bf16.gmra.mrb[152].mxu0 %vm4091_vm3, %v6830_v55  ;;  %v19106_v36 = vpop.f32.mrb[84].mxu0  ;;  %v8158_v37 = vsel %vm8104_vm4, 1, %v21614_v18  ;;  %v8162_v55 = vsel %vm8108_vm6, 1, %v21614_v18  ;;  %vm8110_vm1 = vcmp.gt.f32.partialorder %v11489_v13, 0.0  ;;  %vm8111_vm8 = vcmp.gt.f32.partialorder %v11490_v52, 0.0  ;;  %v11498_v13 = vld [vmem:[%s21230_s1 + $0x108] sm:$0xff] }
 0x70d   : > { %13010 = vmatprep.mubr.msk.bf16.mxu0 %vm21696_vm0, %v21648_v63  ;;  %v12808_v26 = vpop.f32.mrb[85].mxu0  ;;  %v8165_v25 = vsel %vm8111_vm8, 1, %v21614_v18  ;;  %v8170_v52 = vsel %vm8116_vm11, 1, %v21614_v18 }
 0x70e   : > { %v19110_v19 = vpop.f32.mrb[86].mxu0  ;;  %v11494_v26 = vld [vmem:[%s21230_s1 + $0xe8] sm:$0xff] }
 0x70f   : > { %8219 = vperm.xlu1 %13548, %v8154_v39   ;;  %8222 = vperm.xlu0 %13547, %v8155_v48   ;;  %v12809_v49 = vpop.f32.mrb[87].mxu0  ;;  %v11492_v39 = vld [vmem:[%s21230_s1 + $0xd8] sm:$0xff]  ;;  %v8164_v48 = vsel %vm8110_vm1, 1, %v21614_v18  ;;  %vm8115_vm14 = vcmp.gt.f32.partialorder %v11494_v26, 0.0  ;;  %vm8119_vm1 = vcmp.gt.f32.partialorder %v11498_v13, 0.0 }
 0x710   : > { %vm8113_vm4 = vcmp.gt.f32.partialorder %v11492_v39, 0.0  ;;  %v11499_v39 = vld [vmem:[%s21230_s1 + $0x110] sm:$0xff] }
 0x711   : > { %vm8120_vm8 = vcmp.gt.f32.partialorder %v11499_v39, 0.0  ;;  %v11505_v39 = vld [vmem:[%s21230_s1 + $0x140] sm:$0xff] }
 0x712   : > { %v8174_v3 = vsel %vm8120_vm8, 1, %v21614_v18 }
 0x713   : > { %8225 = vperm.xlu1 %13548, %v8156_v61   ;;  %8228 = vperm.xlu0 %13547, %v8157_v57   ;;  %v8166_v61 = vsel %vm8112_vm12, 1, %v21614_v18  ;;  %v8167_v57 = vsel %vm8113_vm4, 1, %v21614_v18 }
 0x714   : > { %13011 = vmatmul.mubr.msk.bf16.vlgmr.msra.gmra.mrb[156].mxu0 %vm4091_vm3, %v18140_v38 }
 0x715   : > { %13014 = vmatprep.mubr.msk.bf16.mxu0 %vm21696_vm0, %v21648_v63 }
 0x717   : > { %8231 = vperm.xlu1 %13548, %v8158_v37   ;;  %8234 = vperm.xlu0 %13547, %v8159_v15   ;;  %v11496_v37 = vld [vmem:[%s21230_s1 + $0xf8] sm:$0xff] }
 0x718   : > { %vm8117_vm6 = vcmp.gt.f32.partialorder %v11496_v37, 0.0 }
 0x71b   : > { %8237 = vperm.xlu1 %13548, %v8160_v30   ;;  %8240 = vperm.xlu0 %13547, %v8161_v62   ;;  %v8169_v30 = vsel %vm8115_vm14, 1, %v21614_v18  ;;  %v11497_v62 = vld [vmem:[%s21230_s1 + $0x100] sm:$0xff] }
 0x71c   : > { %13015 = vmatmul.mubr.msk.bf16.gmra.mrb[160].mxu0 %vm4091_vm3, %v18187_v14  ;;  %vm8118_vm7 = vcmp.gt.f32.partialorder %v11497_v62, 0.0  ;;  %v11504_v62 = vld [vmem:[%s21230_s1 + $0x138] sm:$0xff] }
 0x71d   : > { %13018 = vmatprep.mubr.msk.bf16.mxu0 %vm21696_vm0, %v21648_v63  ;;  %v8172_v26 = vsel %vm8118_vm7, 1, %v21614_v18  ;;  %vm8125_vm11 = vcmp.gt.f32.partialorder %v11504_v62, 0.0 }
 0x71f   : > { %8243 = vperm.xlu1 %13548, %v8162_v55   ;;  %8246 = vperm.xlu0 %13547, %v8163_v28   ;;  %v8171_v55 = vsel %vm8117_vm6, 1, %v21614_v18  ;;  %vm8126_vm6 = vcmp.gt.f32.partialorder %v11505_v39, 0.0 }
 0x722   : > { %v19162_v49 = vpop.f32.mrb[88].mxu0 }
 0x723   : > { %8249 = vperm.xlu1 %13548, %v8164_v48   ;;  %8252 = vperm.xlu0 %13547, %v8165_v25   ;;  %v12812_v23 = vpop.f32.mrb[89].mxu0  ;;  %v11500_v48 = vld [vmem:[%s21230_s1 + $0x118] sm:$0xff] }
 0x724   : > { %13019 = vmatmul.mubr.msk.bf16.gmra.mrb[164].mxu0 %vm4091_vm3, %v18241_v46  ;;  %v19172_v15 = vpop.f32.mrb[90].mxu0  ;;  %vm8121_vm12 = vcmp.gt.f32.partialorder %v11500_v48, 0.0  ;;  %v11502_v23 = vld [vmem:[%s21230_s1 + $0x128] sm:$0xff] }
 0x725   : > { %13022 = vmatprep.mubr.msk.bf16.mxu0 %vm21696_vm0, %v21648_v63  ;;  %v12813_v43 = vpop.f32.mrb[91].mxu0  ;;  %v8175_v37 = vsel %vm8121_vm12, 1, %v21614_v18  ;;  %vm8123_vm5 = vcmp.gt.f32.partialorder %v11502_v23, 0.0  ;;  %v11506_v48 = vld [vmem:[%s21230_s1 + $0x148] sm:$0xff]  ;;  %v11507_v23 = vld [vmem:[%s21230_s1 + $0x150] sm:$0xff] }
 0x726   : > { %vm8127_vm7 = vcmp.gt.f32.partialorder %v11506_v48, 0.0  ;;  %v21752_v48 = vrot.slane %v21738_v6, 7  ;;  %v11509_v6 = vld [vmem:[%s21230_s1 + $0x160] sm:$0xff] }
 0x727   : > { %8255 = vperm.xlu1 %13548, %v8166_v61   ;;  %8258 = vperm.xlu0 %13547, %v8167_v57   ;;  %v8173_v61 = vsel %vm8119_vm1, 1, %v21614_v18  ;;  %v11501_v57 = vld [vmem:[%s21230_s1 + $0x120] sm:$0xff]  ;;  %v8181_v39 = vsel %vm8127_vm7, 1, %v21614_v18  ;;  %vm8128_vm1 = vcmp.gt.f32.partialorder %v11507_v23, 0.0 }
 0x728   : > { %vm8122_vm4 = vcmp.gt.f32.partialorder %v11501_v57, 0.0 }
 0x72b   : > { %8261 = vperm.xlu1 %13548, %v8168_v45   ;;  %8264 = vperm.xlu0 %13547, %v8169_v30   ;;  %v11503_v30 = vld [vmem:[%s21230_s1 + $0x130] sm:$0xff] }
 0x72c   : > { %13023 = vmatmul.mubr.msk.bf16.gmra.mrb[168].mxu0 %vm4091_vm3, %v18284_v32  ;;  %v19186_v28 = vpop.f32.mrb[92].mxu0  ;;  %vm8124_vm14 = vcmp.gt.f32.partialorder %v11503_v30, 0.0  ;;  %v11508_v30 = vld [vmem:[%s21230_s1 + $0x158] sm:$0xff] }
 0x72d   : > { %13026 = vmatprep.mubr.msk.bf16.mxu0 %vm21696_vm0, %v21648_v63  ;;  %v12816_v11 = vpop.f32.mrb[93].mxu0  ;;  %vm8129_vm8 = vcmp.gt.f32.partialorder %v11508_v30, 0.0 }
 0x72e   : > { %v19196_v25 = vpop.f32.mrb[94].mxu0  ;;  %v8177_v11 = vsel %vm8123_vm5, 1, %v21614_v18 }
 0x72f   : > { %8267 = vperm.xlu1 %13548, %v8170_v52   ;;  %21747 = vst [vmem:[#allocation38_spill] sm:$0xff] %v19196_v25  ;;  %8270 = vperm.xlu0 %13547, %v8171_v55   ;;  %v12817_v7 = vpop.f32.mrb[95].mxu0  ;;  %v8176_v55 = vsel %vm8122_vm4, 1, %v21614_v18  ;;  %vm8130_vm4 = vcmp.gt.f32.partialorder %v11509_v6, 0.0 }
 0x730   : > { %v8178_v7 = vsel %vm8124_vm14, 1, %v21614_v18 }
 0x733   : > { %8273 = vperm.xlu1 %13548, %v8172_v26   ;;  %8276 = vperm.xlu0 %13547, %v8173_v61   ;;  %v8179_v26 = vsel %vm8125_vm11, 1, %v21614_v18 }
 0x734   : > { %13027 = vmatmul.mubr.msk.bf16.gmra.mrb[172].mxu0 %vm4091_vm3, %v18328_v17  ;;  %v19210_v43 = vpop.f32.mrb[96].mxu0 }
 0x735   : > { %21748 = vst [vmem:[#allocation71_spill] sm:$0xff] %v19210_v43  ;;  %13030 = vmatprep.mubr.msk.bf16.mxu0 %vm21696_vm0, %v21648_v63  ;;  %v12820_v45 = vpop.f32.mrb[97].mxu0 }
 0x736   : > { %v19220_v13 = vpop.f32.mrb[98].mxu0 }
 0x737   : > { %8279 = vperm.xlu1 %13548, %v8174_v3   ;;  %21749 = vst [vmem:[#allocation35_spill] sm:$0xff] %v19220_v13  ;;  %8282 = vperm.xlu0 %13547, %v8175_v37   ;;  %v12821_v52 = vpop.f32.mrb[99].mxu0 }
 0x73a   : > { %v14161_v57 = vpop.permute.xlu0 %14160 }
 0x73b   : > { %8285 = vperm.xlu1 %13548, %v8176_v55   ;;  %8288 = vperm.xlu0 %13547, %v8177_v11   ;;  %v14163_v3 = vunpack.i.h.bf16 %v14161_v57  ;;  %v14162_v37 = vunpack.i.l.bf16 %v14161_v57  ;;  %v8180_v11 = vsel %vm8126_vm6, 1, %v21614_v18  ;;  %v5971_v57 = vsel %vm3042_vm13, %v5853_v2, %v21752_v48 }
 0x73c   : > { %13031 = vmatmul.mubr.msk.bf16.gmra.mrb[176].mxu0 %vm4091_vm3, %v18375_v59  ;;  %v19234_v61 = vpop.f32.mrb[100].mxu0 }
 0x73d   : > { %21750 = vst [vmem:[#allocation37_spill] sm:$0xff] %v19234_v61  ;;  %13034 = vmatprep.mubr.msk.bf16.mxu0 %vm21696_vm0, %v21648_v63  ;;  %v12824_v45 = vpop.f32.mrb[101].mxu0 }
 0x73e   : > { %v19244_v62 = vpop.f32.mrb[102].mxu0  ;;  %v14166_v55 = vpop.permute.xlu1 %14165 }
 0x73f   : > { %8291 = vperm.xlu1 %13548, %v8178_v7   ;;  %21751 = vst [vmem:[#allocation40_spill] sm:$0xff] %v19244_v62  ;;  %8294 = vperm.xlu0 %13547, %v8179_v26   ;;  %v12825_v52 = vpop.f32.mrb[103].mxu0  ;;  %v14168_v45 = vunpack.i.h.bf16 %v14166_v55  ;;  %v14167_v24 = vunpack.i.l.bf16 %v14166_v55  ;;  %v6574_v7 = vsel %vm3770_vm9, %v5971_v57, %v14163_v3  ;;  %v6573_v26 = vsel %vm3770_vm9, %v19054_v29, %v14162_v37  ;;  %v11511_v55 = vld [vmem:[%s21230_s1 + $0x170] sm:$0xff] }
 0x740   : > { %v11475_v52 = vld [vmem:[%s21230_s1 + $0x50] sm:$0xff]  ;;  %v8182_v29 = vsel %vm8128_vm1, 1, %v21614_v18  ;;  %v8183_v3 = vsel %vm8129_vm8, 1, %v21614_v18  ;;  %v8184_v57 = vsel %vm8130_vm4, 1, %v21614_v18  ;;  %vm8132_vm14 = vcmp.gt.f32.partialorder %v11511_v55, 0.0 }
 0x741   : > { %v6634_v40 = vsel %vm3837_vm10, %v6574_v7, %v14168_v45  ;;  %v6633_v2 = vsel %vm3837_vm10, %v6573_v26, %v14167_v24  ;;  %vm8096_vm12 = vcmp.gt.f32.partialorder %v11475_v52, 0.0  ;;  %v11510_v24 = vld [vmem:[%s21230_s1 + $0x168] sm:$0xff]  ;;  %v11512_v45 = vld [vmem:[%s21230_s1 + $0x178] sm:$0xff]  ;;  %v11513_v7 = vld [vmem:[%s21230_s1 + $0x180] sm:$0xff]  ;;  %v8186_v52 = vsel %vm8132_vm14, 1, %v21614_v18 }
 0x742   : > { %v6693_v23 = vpack.c.bf16 %v6634_v40, %v6633_v2  ;;  %v8150_v48 = vsel %vm8096_vm12, 1, %v21614_v18  ;;  %vm8131_vm5 = vcmp.gt.f32.partialorder %v11510_v24, 0.0  ;;  %vm8133_vm11 = vcmp.gt.f32.partialorder %v11512_v45, 0.0  ;;  %v21756_v2 = vld [vmem:[#allocation68_spill] sm:$0xff] }
 0x743   : > { %8297 = vperm.xlu1 %13548, %v8180_v11   ;;  %8300 = vperm.xlu0 %13547, %v8181_v39   ;;  %v8185_v26 = vsel %vm8131_vm5, 1, %v21614_v18  ;;  %vm8134_vm6 = vcmp.gt.f32.partialorder %v11513_v7, 0.0  ;;  %v8187_v24 = vsel %vm8133_vm11, 1, %v21614_v18 }
 0x744   : > { %13035 = vmatmul.mubr.msk.bf16.gmra.mrb[180].mxu0 %vm4091_vm3, %v18421_v34  ;;  %v19269_v37 = vpop.f32.mrb[104].mxu0  ;;  %12891 = vmatmul.mubr.msk.bf16.vlgmr.msra.gmra.mrb[152].mxu1 %vm4091_vm3, %v6693_v23  ;;  %v11514_v23 = vld [vmem:[%s21230_s1 + $0x188] sm:$0xff]  ;;  %v8188_v55 = vsel %vm8134_vm6, 1, %v21614_v18 }
 0x745   : > { %21753 = vst [vmem:[#allocation5_spill] sm:$0xff] %v19269_v37  ;;  %13038 = vmatprep.mubr.msk.bf16.mxu0 %vm21696_vm0, %v21648_v63  ;;  %v12828_v30 = vpop.f32.mrb[105].mxu0  ;;  %12894 = vmatprep.mubr.msk.bf16.mxu1 %vm21696_vm0, %v21648_v63  ;;  %vm8135_vm7 = vcmp.gt.f32.partialorder %v11514_v23, 0.0  ;;  %v21806_v37 = vld [vmem:[#allocation72_spill] sm:$0xff] }
 0x746   : > { %v19280_v11 = vpop.f32.mrb[106].mxu0 }
 0x747   : > { %8303 = vperm.xlu1 %13548, %v8182_v29   ;;  %21754 = vst [vmem:[#allocation62_spill] sm:$0xff] %v19280_v11  ;;  %8306 = vperm.xlu0 %13547, %v8183_v3   ;;  %v12829_v39 = vpop.f32.mrb[107].mxu0  ;;  %v11515_v29 = vld [vmem:[%s21230_s1 + $0x190] sm:$0xff] }
 0x748   : > { %vm8136_vm1 = vcmp.gt.f32.partialorder %v11515_v29, 0.0  ;;  %v11516_v39 = vld [vmem:[%s21230_s1 + $0x198] sm:$0xff] }
 0x749   : > { %v8190_v45 = vsel %vm8136_vm1, 1, %v21614_v18  ;;  %vm8137_vm8 = vcmp.gt.f32.partialorder %v11516_v39, 0.0 }
 0x74a   : > { %v8191_v29 = vsel %vm8137_vm8, 1, %v21614_v18 }
 0x74b   : > { %8207 = vperm.xlu1 %13548, %v8150_v48   ;;  %8309 = vperm.xlu0 %13547, %v8184_v57   ;;  %v11517_v48 = vld [vmem:[%s21230_s1 + $0x1a0] sm:$0xff]  ;;  %v8189_v57 = vsel %vm8135_vm7, 1, %v21614_v18 }
 0x74c   : > { %13039 = vmatmul.mubr.msk.bf16.gmra.mrb[184].mxu0 %vm4091_vm3, %v18468_v41  ;;  %v19296_v6 = vpop.f32.mrb[108].mxu0  ;;  %12895 = vmatmul.mubr.msk.bf16.gmra.mrb[156].mxu1 %vm4091_vm3, %v21756_v2  ;;  %vm8138_vm12 = vcmp.gt.f32.partialorder %v11517_v48, 0.0 }
 0x74d   : > { %21755 = vst [vmem:[#allocation64_spill] sm:$0xff] %v19296_v6  ;;  %13042 = vmatprep.mubr.msk.bf16.mxu0 %vm21696_vm0, %v21648_v63  ;;  %v12832_v40 = vpop.f32.mrb[109].mxu0  ;;  %12898 = vmatprep.mubr.msk.bf16.mxu1 %vm21696_vm0, %v21648_v63 }
 0x74e   : > { %v19308_v3 = vpop.f32.mrb[110].mxu0  ;;  %v11519_v40 = vld [vmem:[%s21230_s1 + $0x1b0] sm:$0xff] }
 0x74f   : > { %8312 = vperm.xlu1 %13548, %v8185_v26   ;;  %21757 = vst [vmem:[#allocation44_spill] sm:$0xff] %v19308_v3  ;;  %8315 = vperm.xlu0 %13547, %v8186_v52   ;;  %v12833_v30 = vpop.f32.mrb[111].mxu0  ;;  %v11518_v52 = vld [vmem:[%s21230_s1 + $0x1a8] sm:$0xff]  ;;  %vm8140_vm5 = vcmp.gt.f32.partialorder %v11519_v40, 0.0 }
 0x750   : > { %v8192_v30 = vsel %vm8138_vm12, 1, %v21614_v18  ;;  %vm8139_vm4 = vcmp.gt.f32.partialorder %v11518_v52, 0.0  ;;  %v8194_v39 = vsel %vm8140_vm5, 1, %v21614_v18 }
 0x753   : > { %8318 = vperm.xlu1 %13548, %v8187_v24   ;;  %8321 = vperm.xlu0 %13547, %v8188_v55   ;;  %v11521_v24 = vld [vmem:[%s21230_s1 + $0x1c0] sm:$0xff]  ;;  %v8193_v55 = vsel %vm8139_vm4, 1, %v21614_v18 }
 0x754   : > { %13043 = vmatmul.mubr.msk.bf16.gmra.mrb[188].mxu0 %vm4091_vm3, %v18521_v22  ;;  %v19324_v7 = vpop.f32.mrb[112].mxu0  ;;  %12899 = vmatmul.mubr.msk.bf16.gmra.mrb[160].mxu1 %vm4091_vm3, %v18063_v51  ;;  %v11520_v51 = vld [vmem:[%s21230_s1 + $0x1b8] sm:$0xff]  ;;  %vm8142_vm11 = vcmp.gt.f32.partialorder %v11521_v24, 0.0 }
 0x755   : > { %21758 = vst [vmem:[#allocation66_spill] sm:$0xff] %v19324_v7  ;;  %13046 = vmatprep.mubr.msk.bf16.mxu0 %vm21696_vm0, %v21648_v63  ;;  %v12836_v26 = vpop.f32.mrb[113].mxu0  ;;  %12902 = vmatprep.mubr.msk.bf16.mxu1 %vm21696_vm0, %v21648_v63  ;;  %vm8141_vm14 = vcmp.gt.f32.partialorder %v11520_v51, 0.0 }
 0x756   : > { %v19336_v2 = vpop.f32.mrb[114].mxu0  ;;  %v11523_v26 = vld [vmem:[%s21230_s1 + $0x1d0] sm:$0xff] }
 0x757   : > { %8324 = vperm.xlu1 %13548, %v8189_v57   ;;  %21759 = vst [vmem:[#allocation42_spill] sm:$0xff] %v19336_v2  ;;  %8327 = vperm.xlu0 %13547, %v8190_v45   ;;  %v12837_v23 = vpop.f32.mrb[115].mxu0  ;;  %v11522_v45 = vld [vmem:[%s21230_s1 + $0x1c8] sm:$0xff]  ;;  %vm8144_vm7 = vcmp.gt.f32.partialorder %v11523_v26, 0.0 }
 0x758   : > { %v8195_v23 = vsel %vm8141_vm14, 1, %v21614_v18  ;;  %vm8143_vm6 = vcmp.gt.f32.partialorder %v11522_v45, 0.0  ;;  %v8198_v24 = vsel %vm8144_vm7, 1, %v21614_v18 }
 0x759   : > { %v8197_v51 = vsel %vm8143_vm6, 1, %v21614_v18 }
 0x75b   : > { %8330 = vperm.xlu1 %13548, %v8191_v29   ;;  %8333 = vperm.xlu0 %13547, %v8192_v30   ;;  %v8196_v29 = vsel %vm8142_vm11, 1, %v21614_v18  ;;  %v11525_v30 = vld [vmem:[%s21230_s1 + $0x1e0] sm:$0xff] }
 0x75c   : > { %13047 = vmatmul.mubr.msk.bf16.gmra.mrb[192].mxu0 %vm4091_vm3, %v18579_v54  ;;  %v19352_v48 = vpop.f32.mrb[116].mxu0  ;;  %12903 = vmatmul.mubr.msk.bf16.gmra.mrb[164].mxu1 %vm4091_vm3, %v18140_v38  ;;  %v11524_v38 = vld [vmem:[%s21230_s1 + $0x1d8] sm:$0xff]  ;;  %vm8146_vm8 = vcmp.gt.f32.partialorder %v11525_v30, 0.0  ;;  %v21762_v30 = vrot.slane %v18802_v5, 7 }
 0x75d   : > { %21760 = vst [vmem:[#allocation45_spill] sm:$0xff] %v19352_v48  ;;  %13050 = vmatprep.mubr.msk.bf16.mxu0 %vm21696_vm0, %v21648_v63  ;;  %v12840_v57 = vpop.f32.mrb[117].mxu0  ;;  %12906 = vmatprep.mubr.msk.bf16.mxu1 %vm21696_vm0, %v21648_v63  ;;  %vm8145_vm1 = vcmp.gt.f32.partialorder %v11524_v38, 0.0  ;;  %v8200_v45 = vsel %vm8146_vm8, 1, %v21614_v18 }
 0x75e   : > { %v19364_v52 = vpop.f32.mrb[118].mxu0  ;;  %v8199_v57 = vsel %vm8145_vm1, 1, %v21614_v18 }
 0x75f   : > { %8336 = vperm.xlu1 %13548, %v8193_v55   ;;  %21761 = vst [vmem:[#allocation47_spill] sm:$0xff] %v19364_v52  ;;  %8339 = vperm.xlu0 %13547, %v8194_v39   ;;  %v12841_v40 = vpop.f32.mrb[119].mxu0  ;;  %v11526_v55 = vld [vmem:[%s21230_s1 + $0x1e8] sm:$0xff] }
 0x760   : > { %v11474_v39 = vld [vmem:[%s21230_s1 + $0x48] sm:$0xff]  ;;  %vm8147_vm12 = vcmp.gt.f32.partialorder %v11526_v55, 0.0 }
 0x761   : > { %vm8095_vm4 = vcmp.gt.f32.partialorder %v11474_v39, 0.0 }
 0x762   : > { %v8149_v26 = vsel %vm8095_vm4, 1, %v21614_v18 }
 0x763   : > { %8342 = vperm.xlu1 %13548, %v8195_v23   ;;  %8345 = vperm.xlu0 %13547, %v8196_v29   ;;  %v5911_v23 = vrot.slane %v18841_v27, 7 }
 0x764   : > { %13051 = vmatmul.mubr.msk.bf16.gmra.mrb[196].mxu0 %vm4091_vm3, %v18616_v47  ;;  %12907 = vmatmul.mubr.msk.bf16.gmra.mrb[168].mxu1 %vm4091_vm3, %v18187_v14  ;;  %v8201_v14 = vsel %vm8147_vm12, 1, %v21614_v18 }
 0x765   : > { %13054 = vmatprep.mubr.msk.bf16.mxu0 %vm21696_vm0, %v21648_v63  ;;  %12910 = vmatprep.mubr.msk.bf16.mxu1 %vm21696_vm0, %v21648_v63 }
 0x767   : > { %8348 = vperm.xlu1 %13548, %v8197_v51   ;;  %8351 = vperm.xlu0 %13547, %v8198_v24   ;;  %v5914_v51 = vsel %vm3042_vm13, %v21762_v30, %v5911_v23  ;;  %v21763_v24 = vrot.slane %v19037_v10, 7 }
 0x769   : > { %v5913_v55 = vsel %vm3042_vm13, %v5911_v23, %v21763_v24 }
 0x76b   : > { %8354 = vperm.xlu1 %13548, %v8199_v57   ;;  %8357 = vperm.xlu0 %13547, %v8200_v45  }
 0x76c   : > { %13055 = vmatmul.mubr.msk.bf16.gmra.mrb[200].mxu0 %vm4091_vm3, %v18648_v20  ;;  %12911 = vmatmul.mubr.msk.bf16.gmra.mrb[172].mxu1 %vm4091_vm3, %v18241_v46 }
 0x76d   : > { %13058 = vmatprep.mubr.msk.bf16.mxu0 %vm21696_vm0, %v21648_v63  ;;  %12914 = vmatprep.mubr.msk.bf16.mxu1 %vm21696_vm0, %v21648_v63 }
 0x76f   : > { %8360 = vperm.xlu1 %13548, %v8201_v14   ;;  %8204 = vperm.xlu0 %13547, %v8149_v26  }
 0x774   : > { %13059 = vmatmul.mubr.msk.bf16.gmra.mrb[204].mxu0 %vm4091_vm3, %v18683_v33  ;;  %12915 = vmatmul.mubr.msk.bf16.gmra.mrb[176].mxu1 %vm4091_vm3, %v18284_v32 }
 0x775   : > { %v14171_v40 = vpop.permute.xlu0 %14170  ;;  %13062 = vmatprep.mubr.msk.bf16.mxu0 %vm21696_vm0, %v21648_v63  ;;  %12918 = vmatprep.mubr.msk.bf16.mxu1 %vm21696_vm0, %v21648_v63 }
 0x776   : > { %v14173_v29 = vunpack.i.h.bf16 %v14171_v40  ;;  %v14172_v38 = vunpack.i.l.bf16 %v14171_v40 }
 0x778   : > { %v6632_v32 = vsel %vm3770_vm9, %v5913_v55, %v14173_v29  ;;  %v6631_v57 = vsel %vm3770_vm9, %v5914_v51, %v14172_v38 }
 0x779   : > { %v14176_v46 = vpop.permute.xlu1 %14175 }
 0x77a   : > { %v14178_v27 = vunpack.i.h.bf16 %v14176_v46  ;;  %v14177_v39 = vunpack.i.l.bf16 %v14176_v46 }
 0x77c   : > { %v19424_v45 = vsel %vm3837_vm10, %v6632_v32, %v14178_v27  ;;  %v19427_v14 = vsel %vm3837_vm10, %v6631_v57, %v14177_v39  ;;  %13063 = vmatmul.mubr.msk.bf16.gmra.mrb[208].mxu0 %vm4091_vm3, %v18718_v4  ;;  %12919 = vmatmul.mubr.msk.bf16.gmra.mrb[180].mxu1 %vm4091_vm3, %v18328_v17 }
 0x77d   : > { %13066 = vmatprep.mubr.msk.bf16.mxu0 %vm21696_vm0, %v21648_v63  ;;  %12922 = vmatprep.mubr.msk.bf16.mxu1 %vm21696_vm0, %v21648_v63 }
 0x784   : > { %13067 = vmatmul.mubr.msk.bf16.gmra.mrb[212].mxu0 %vm4091_vm3, %v18752_v50  ;;  %12923 = vmatmul.mubr.msk.bf16.gmra.mrb[184].mxu1 %vm4091_vm3, %v18375_v59 }
 0x785   : > { %13070 = vmatprep.mubr.msk.bf16.mxu0 %vm21696_vm0, %v21648_v63  ;;  %12926 = vmatprep.mubr.msk.bf16.mxu1 %vm21696_vm0, %v21648_v63 }
 0x786   : > { %v19443_v10 = vpop.permute.xlu0 %8210 }
 0x787   : > { %vm8367_vm14 = vcmp.eq.s32.totalorder %v19443_v10, 1 }
 0x78a   : > { %v19449_v26 = vpop.permute.xlu0 %8216 }
 0x78b   : > { %vm8369_vm6 = vcmp.eq.s32.totalorder %v19449_v26, 1 }
 0x78c   : > { %13071 = vmatmul.mubr.msk.bf16.gmra.mrb[216].mxu0 %vm4091_vm3, %v18794_v21  ;;  %12927 = vmatmul.mubr.msk.bf16.gmra.mrb[188].mxu1 %vm4091_vm3, %v18421_v34 }
 0x78d   : > { %13074 = vmatprep.mubr.msk.bf16.mxu0 %vm21696_vm0, %v21648_v63  ;;  %12930 = vmatprep.mubr.msk.bf16.mxu1 %vm21696_vm0, %v21648_v63 }
 0x78e   : > { %v19455_v17 = vpop.permute.xlu0 %8222 }
 0x78f   : > { %vm8371_vm1 = vcmp.eq.s32.totalorder %v19455_v17, 1 }
 0x792   : > { %v19461_v59 = vpop.permute.xlu0 %8228 }
 0x793   : > { %vm8373_vm12 = vcmp.eq.s32.totalorder %v19461_v59, 1 }
 0x794   : > { %13075 = vmatmul.mubr.msk.bf16.gmra.mrb[220].mxu0 %vm4091_vm3, %v18834_v44  ;;  %12931 = vmatmul.mubr.msk.bf16.gmra.mrb[192].mxu1 %vm4091_vm3, %v18468_v41 }
 0x795   : > { %13078 = vmatprep.mubr.msk.bf16.mxu0 %vm21696_vm0, %v21648_v63  ;;  %12934 = vmatprep.mubr.msk.bf16.mxu1 %vm21696_vm0, %v21648_v63 }
 0x796   : > { %v19471_v40 = vpop.permute.xlu0 %8234 }
 0x798   : > { %v19473_v34 = vpop.f32.mrb[120].mxu0 }
 0x799   : > { %21764 = vst [vmem:[#allocation39_spill] sm:$0xff] %v19473_v34  ;;  %v12844_v23 = vpop.f32.mrb[121].mxu0 }
 0x79a   : > { %v19477_v29 = vpop.f32.mrb[122].mxu0  ;;  %v19485_v41 = vpop.permute.xlu0 %8240 }
 0x79b   : > { %21765 = vst [vmem:[#allocation63_spill] sm:$0xff] %v19477_v29  ;;  %v12845_v38 = vpop.f32.mrb[123].mxu0 }
 0x79c   : > { %13079 = vmatmul.mubr.msk.bf16.gmra.mrb[224].mxu0 %vm4091_vm3, %v18907_v58  ;;  %12935 = vmatmul.mubr.msk.bf16.gmra.mrb[196].mxu1 %vm4091_vm3, %v18521_v22 }
 0x79d   : > { %13082 = vmatprep.mubr.msk.bf16.mxu0 %vm21696_vm0, %v21648_v63  ;;  %12938 = vmatprep.mubr.msk.bf16.mxu1 %vm21696_vm0, %v21648_v63 }
 0x79e   : > { %v19491_v46 = vpop.permute.xlu0 %8246 }
 0x7a2   : > { %v19501_v55 = vpop.permute.xlu0 %8252 }
 0x7a4   : > { %13083 = vmatmul.mubr.msk.bf16.gmra.mrb[228].mxu0 %vm4091_vm3, %v18943_v9  ;;  %v19493_v30 = vpop.f32.mrb[124].mxu0  ;;  %12939 = vmatmul.mubr.msk.bf16.gmra.mrb[200].mxu1 %vm4091_vm3, %v18579_v54 }
 0x7a5   : > { %13086 = vmatprep.mubr.msk.bf16.mxu0 %vm21696_vm0, %v21648_v63  ;;  %21766 = vst [vmem:[#allocation57_spill] sm:$0xff] %v19493_v30  ;;  %v12848_v51 = vpop.f32.mrb[125].mxu0  ;;  %12942 = vmatprep.mubr.msk.bf16.mxu1 %vm21696_vm0, %v21648_v63 }
 0x7a6   : > { %v19499_v22 = vpop.f32.mrb[126].mxu0  ;;  %v19515_v57 = vpop.permute.xlu0 %8258 }
 0x7a7   : > { %21767 = vst [vmem:[#allocation69_spill] sm:$0xff] %v19499_v22  ;;  %v12849_v24 = vpop.f32.mrb[127].mxu0 }
 0x7aa   : > { %v19527_v38 = vpop.permute.xlu0 %8264 }
 0x7ac   : > { %13087 = vmatmul.mubr.msk.bf16.gmra.mrb[232].mxu0 %vm4091_vm3, %v18959_v1  ;;  %v19507_v27 = vpop.f32.mrb[128].mxu0  ;;  %12943 = vmatmul.mubr.msk.bf16.gmra.mrb[204].mxu1 %vm4091_vm3, %v18616_v47 }
 0x7ad   : > { %13090 = vmatprep.mubr.msk.bf16.mxu0 %vm21696_vm0, %v21648_v63  ;;  %21768 = vst [vmem:[#allocation31_spill] sm:$0xff] %v19507_v27  ;;  %v12852_v54 = vpop.f32.mrb[129].mxu0  ;;  %12946 = vmatprep.mubr.msk.bf16.mxu1 %vm21696_vm0, %v21648_v63 }
 0x7ae   : > { %v19513_v39 = vpop.f32.mrb[130].mxu0  ;;  %v19533_v54 = vpop.permute.xlu1 %8213 }
 0x7af   : > { %21769 = vst [vmem:[#allocation48_spill] sm:$0xff] %v19513_v39  ;;  %v12853_v32 = vpop.f32.mrb[131].mxu0  ;;  %vm8368_vm11 = vcmp.eq.s32.totalorder %v19533_v54, 1 }
 0x7b0   : > { %v19537_v32 = vpop.permute.xlu0 %8270 }
 0x7b1   : > { %21772 = vst [vmem:[#allocation92_spill] sm:$0xff] %v19537_v32  ;;  %v21817_v32 = vld [vmem:[#allocation19_spill] sm:$0xff] }
 0x7b2   : > { %v19547_v18 = vpop.permute.xlu1 %8219 }
 0x7b3   : > { %vm8370_vm7 = vcmp.eq.s32.totalorder %v19547_v18, 1 }
 0x7b4   : > { %13091 = vmatmul.mubr.msk.bf16.gmra.mrb[236].mxu0 %vm4091_vm3, %v18971_v16  ;;  %v19521_v23 = vpop.f32.mrb[132].mxu0  ;;  %12947 = vmatmul.mubr.msk.bf16.gmra.mrb[208].mxu1 %vm4091_vm3, %v18648_v20 }
 0x7b5   : > { %13094 = vmatprep.mubr.msk.bf16.mxu0 %vm21696_vm0, %v21648_v63  ;;  %21770 = vst [vmem:[#allocation68_spill] sm:$0xff] %v19521_v23  ;;  %v12856_v47 = vpop.f32.mrb[133].mxu0  ;;  %12950 = vmatprep.mubr.msk.bf16.mxu1 %vm21696_vm0, %v21648_v63 }
 0x7b6   : > { %v19529_v51 = vpop.f32.mrb[134].mxu0 }
 0x7b7   : > { %21771 = vst [vmem:[#allocation91_spill] sm:$0xff] %v19529_v51  ;;  %v12857_v24 = vpop.f32.mrb[135].mxu0  ;;  %v19549_v51 = vpop.permute.xlu0 %8276 }
 0x7b8   : > { %21775 = vst [vmem:[#allocation95_spill] sm:$0xff] %v19549_v51 }
 0x7bb   : > { %v19565_v23 = vpop.permute.xlu0 %8282 }
 0x7bc   : > { %13095 = vmatmul.mubr.msk.bf16.gmra.mrb[240].mxu0 %vm4091_vm3, %v18984_v12  ;;  %v19539_v20 = vpop.f32.mrb[136].mxu0  ;;  %12951 = vmatmul.mubr.msk.bf16.gmra.mrb[212].mxu1 %vm4091_vm3, %v18683_v33  ;;  %21778 = vst [vmem:[#allocation98_spill] sm:$0xff] %v19565_v23 }
 0x7bd   : > { %13098 = vmatprep.mubr.msk.bf16.mxu0 %vm21696_vm0, %v21648_v63  ;;  %21773 = vst [vmem:[#allocation93_spill] sm:$0xff] %v19539_v20  ;;  %v12860_v47 = vpop.f32.mrb[137].mxu0  ;;  %12954 = vmatprep.mubr.msk.bf16.mxu1 %vm21696_vm0, %v21648_v63 }
 0x7be   : > { %v19545_v24 = vpop.f32.mrb[138].mxu0  ;;  %v19563_v47 = vpop.permute.xlu1 %8225 }
 0x7bf   : > { %21774 = vst [vmem:[#allocation94_spill] sm:$0xff] %v19545_v24  ;;  %v12861_v5 = vpop.f32.mrb[139].mxu0  ;;  %vm8372_vm8 = vcmp.eq.s32.totalorder %v19563_v47, 1  ;;  %v14591_v47 = vld [vmem:[%s21237_s8 + $0x50] sm:$0xff]  }
 0x7c4   : > { %13099 = vmatmul.mubr.msk.bf16.gmra.mrb[244].mxu0 %vm4091_vm3, %v18997_v42  ;;  %v19555_v20 = vpop.f32.mrb[140].mxu0  ;;  %12955 = vmatmul.mubr.msk.bf16.gmra.mrb[216].mxu1 %vm4091_vm3, %v18718_v4  ;;  %v14587_v4 = vld [vmem:[%s21237_s8 + $0x30] sm:$0xff]  }
 0x7c5   : > { %13102 = vmatprep.mubr.msk.bf16.mxu0 %vm21696_vm0, %v21648_v63  ;;  %21776 = vst [vmem:[#allocation96_spill] sm:$0xff] %v19555_v20  ;;  %v12864_v33 = vpop.f32.mrb[141].mxu0  ;;  %12958 = vmatprep.mubr.msk.bf16.mxu1 %vm21696_vm0, %v21648_v63  ;;  %v19582_v20 = vpop.permute.xlu0 %8288 }
 0x7c6   : > { %v19561_v5 = vpop.f32.mrb[142].mxu0  ;;  %13118 = vmatprep.subr.bf16.mxu1 %v14587_v4  ;;  %21780 = vst [vmem:[#allocation100_spill] sm:$0xff] %v19582_v20 }
 0x7c7   : > { %21777 = vst [vmem:[#allocation97_spill] sm:$0xff] %v19561_v5  ;;  %v12865_v24 = vpop.f32.mrb[143].mxu0  ;;  %v19578_v5 = vpop.permute.xlu1 %8231  ;;  %13119 = vmatpush3.bf16.msra.mxu1 %v14587_v4 }
 0x7c8   : > { %vm8374_vm4 = vcmp.eq.s32.totalorder %v19578_v5, 1 }
 0x7cc   : > { %13103 = vmatmul.mubr.msk.bf16.gmra.mrb[248].mxu0 %vm4091_vm3, %v19010_v0  ;;  %v19574_v33 = vpop.f32.mrb[144].mxu0  ;;  %12959 = vmatmul.mubr.msk.bf16.gmra.mrb[220].mxu1 %vm4091_vm3, %v18752_v50  ;;  %v19592_v50 = vpop.permute.xlu0 %8294 }
 0x7cd   : > { %13106 = vmatprep.mubr.msk.bf16.mxu0 %vm21696_vm0, %v21648_v63  ;;  %21779 = vst [vmem:[#allocation99_spill] sm:$0xff] %v19574_v33  ;;  %v12868_v24 = vpop.f32.mrb[145].mxu0  ;;  %12962 = vmatprep.mubr.msk.bf16.mxu1 %vm21696_vm0, %v21648_v63  ;;  %v19588_v33 = vpop.permute.xlu1 %8237  ;;  %21782 = vst [vmem:[#allocation102_spill] sm:$0xff] %v19592_v50 }
 0x7ce   : > { %v19584_v39 = vpop.f32.mrb[146].mxu0 }
 0x7cf   : > { %21781 = vst [vmem:[#allocation101_spill] sm:$0xff] %v19584_v39  ;;  %v12869_v27 = vpop.f32.mrb[147].mxu0 }
 0x7d0   : > { %v19604_v39 = vpop.permute.xlu0 %8300 }
 0x7d1   : > { %21785 = vst [vmem:[#allocation105_spill] sm:$0xff] %v19604_v39 }
 0x7d4   : > { %13107 = vmatmul.mubr.msk.bf16.gmra.mrb[252].mxu0 %vm4091_vm3, %v19025_v53  ;;  %v19594_v24 = vpop.f32.mrb[148].mxu0  ;;  %12963 = vmatmul.mubr.msk.bf16.gmra.mrb[224].mxu1 %vm4091_vm3, %v18794_v21  ;;  %v19602_v53 = vpop.permute.xlu1 %8243 }
 0x7d5   : > { %13110 = vmatprep.mubr.msk.bf16.mxu0 %vm21696_vm0, %v21648_v63  ;;  %21783 = vst [vmem:[#allocation103_spill] sm:$0xff] %v19594_v24  ;;  %v12872_v22 = vpop.f32.mrb[149].mxu0  ;;  %12966 = vmatprep.mubr.msk.bf16.mxu1 %vm21696_vm0, %v21648_v63  ;;  %v19620_v24 = vpop.permute.xlu0 %8306 }
 0x7d6   : > { %v19600_v27 = vpop.f32.mrb[150].mxu0  ;;  %21788 = vst [vmem:[#allocation108_spill] sm:$0xff] %v19620_v24 }
 0x7d7   : > { %21784 = vst [vmem:[#allocation104_spill] sm:$0xff] %v19600_v27  ;;  %v12873_v4 = vpop.f32.mrb[151].mxu0 }
 0x7d8   : > { %v19616_v4 = vpop.permute.xlu1 %8249 }
 0x7dc   : > { %13111 = vmatmul.mubr.msk.bf16.gmra.mrb[0].mxu0 %vm4091_vm3, %v19075_v60  ;;  %12967 = vmatmul.mubr.msk.bf16.gmra.mrb[228].mxu1 %vm4091_vm3, %v18834_v44  ;;  %v21789_v60 = vpack.c.bf16 %v19424_v45, %v19427_v14  ;;  %v19628_v44 = vpop.permute.xlu1 %8255  ;;  %v14588_v45 = vld [vmem:[%s21237_s8 + $0x38] sm:$0xff]  }
 0x7dd   : > { %13114 = vmatprep.mubr.msk.bf16.mxu0 %vm21696_vm0, %v21648_v63  ;;  %12970 = vmatprep.mubr.msk.bf16.mxu1 %vm21696_vm0, %v21648_v63 }
 0x7de   : > { %13120 = vmatprep.subr.bf16.mxu1 %v14588_v45 }
 0x7df   : > { %v19612_v21 = vpop.f32.mrb[152].mxu0  ;;  %13121 = vmatpush3.bf16.msra.mxu1 %v14588_v45 }
 0x7e0   : > { %21786 = vst [vmem:[#allocation106_spill] sm:$0xff] %v19612_v21  ;;  %v12876_v22 = vpop.f32.mrb[153].mxu0  ;;  %v19638_v34 = vpop.permute.xlu1 %8261 }
 0x7e1   : > { %v19618_v27 = vpop.f32.mrb[154].mxu0  ;;  %v19634_v22 = vpop.permute.xlu0 %8309 }
 0x7e2   : > { %21787 = vst [vmem:[#allocation107_spill] sm:$0xff] %v19618_v27  ;;  %v12877_v30 = vpop.f32.mrb[155].mxu0  ;;  %21790 = vst [vmem:[#allocation109_spill] sm:$0xff] %v19634_v22 }
 0x7e4   : > { %13115 = vmatmul.mubr.msk.bf16.gmra.mrb[4].mxu0 %vm4091_vm3, %v21789_v60  ;;  %12971 = vmatmul.mubr.msk.bf16.gmra.mrb[232].mxu1 %vm4091_vm3, %v18907_v58  ;;  %v19653_v22 = vpop.permute.xlu1 %8267 }
 0x7e5   : > { %12974 = vmatprep.mubr.msk.bf16.mxu1 %vm21696_vm0, %v21648_v63  ;;  %v19643_v58 = vpop.permute.xlu0 %8315  ;;  %21792 = vst [vmem:[#allocation111_spill] sm:$0xff] %v19653_v22 }
 0x7e6   : > { %21791 = vst [vmem:[#allocation110_spill] sm:$0xff] %v19643_v58 }
 0x7e7   : > { %v19630_v21 = vpop.f32.mrb[156].mxu0 }
 0x7e8   : > { %v13012_v27 = vpop.f32.mrb[157].mxu0  ;;  %v19663_v52 = vpop.permute.xlu1 %8273 }
 0x7e9   : > { %v19636_v29 = vpop.f32.mrb[158].mxu0  ;;  %v19655_v24 = vpop.permute.xlu0 %8321  ;;  %21794 = vst [vmem:[#allocation113_spill] sm:$0xff] %v19663_v52 }
 0x7ea   : > { %v13013_v30 = vpop.f32.mrb[159].mxu0  ;;  %21793 = vst [vmem:[#allocation112_spill] sm:$0xff] %v19655_v24 }
 0x7ec   : > { %12975 = vmatmul.mubr.msk.bf16.gmra.mrb[236].mxu1 %vm4091_vm3, %v18943_v9  ;;  %v19671_v24 = vpop.permute.xlu1 %8279 }
 0x7ed   : > { %12978 = vmatprep.mubr.msk.bf16.mxu1 %vm21696_vm0, %v21648_v63  ;;  %v19667_v45 = vpop.permute.xlu0 %8327  ;;  %21796 = vst [vmem:[#allocation115_spill] sm:$0xff] %v19671_v24 }
 0x7ee   : > { %21795 = vst [vmem:[#allocation114_spill] sm:$0xff] %v19667_v45 }
 0x7ef   : > { %v19647_v14 = vpop.f32.mrb[160].mxu0 }
 0x7f0   : > { %v13016_v27 = vpop.f32.mrb[161].mxu0  ;;  %v19681_v7 = vpop.permute.xlu1 %8285 }
 0x7f1   : > { %v19651_v60 = vpop.f32.mrb[162].mxu0  ;;  %21798 = vst [vmem:[#allocation117_spill] sm:$0xff] %v19681_v7 }
 0x7f2   : > { %v13017_v30 = vpop.f32.mrb[163].mxu0 }
 0x7f4   : > { %12979 = vmatmul.mubr.msk.bf16.gmra.mrb[240].mxu1 %vm4091_vm3, %v18959_v1  ;;  %v19677_v1 = vpop.permute.xlu0 %8333 }
 0x7f5   : > { %12982 = vmatprep.mubr.msk.bf16.mxu1 %vm21696_vm0, %v21648_v63  ;;  %21797 = vst [vmem:[#allocation116_spill] sm:$0xff] %v19677_v1 }
 0x7f7   : > { %v19659_v58 = vpop.f32.mrb[164].mxu0 }
 0x7f8   : > { %v13020_v9 = vpop.f32.mrb[165].mxu0  ;;  %v19683_v45 = vpop.permute.xlu0 %8339 }
 0x7f9   : > { %v19665_v27 = vpop.f32.mrb[166].mxu0  ;;  %21799 = vst [vmem:[#allocation118_spill] sm:$0xff] %v19683_v45 }
 0x7fa   : > { %v13021_v30 = vpop.f32.mrb[167].mxu0 }
 0x7fc   : > { %12983 = vmatmul.mubr.msk.bf16.gmra.mrb[244].mxu1 %vm4091_vm3, %v18971_v16  ;;  %v19695_v3 = vpop.permute.xlu0 %8345 }
 0x7fd   : > { %12986 = vmatprep.mubr.msk.bf16.mxu1 %vm21696_vm0, %v21648_v63  ;;  %21801 = vst [vmem:[#allocation120_spill] sm:$0xff] %v19695_v3  ;;  %v14589_v3 = vld [vmem:[%s21237_s8 + $0x40] sm:$0xff]  }
 0x7fe   : > { %13122 = vmatprep.subr.bf16.mxu1 %v14589_v3 }
 0x7ff   : > { %v19673_v48 = vpop.f32.mrb[168].mxu0  ;;  %13123 = vmatpush3.bf16.msra.mxu1 %v14589_v3 }
 0x800   : > { %v13024_v9 = vpop.f32.mrb[169].mxu0 }
 0x801   : > { %v19679_v39 = vpop.f32.mrb[170].mxu0  ;;  %v19693_v9 = vpop.permute.xlu1 %8291 }
 0x802   : > { %v13025_v2 = vpop.f32.mrb[171].mxu0  ;;  %21800 = vst [vmem:[#allocation119_spill] sm:$0xff] %v19693_v9 }
 0x804   : > { %12987 = vmatmul.mubr.msk.bf16.gmra.mrb[248].mxu1 %vm4091_vm3, %v18984_v12 }
 0x805   : > { %12990 = vmatprep.mubr.msk.bf16.mxu1 %vm21696_vm0, %v21648_v63  ;;  %v19703_v45 = vpop.permute.xlu1 %8297 }
 0x806   : > { %21802 = vst [vmem:[#allocation121_spill] sm:$0xff] %v19703_v45 }
 0x807   : > { %v19687_v16 = vpop.f32.mrb[172].mxu0 }
 0x808   : > { %v13028_v30 = vpop.f32.mrb[173].mxu0 }
 0x809   : > { %v19691_v50 = vpop.f32.mrb[174].mxu0  ;;  %v19707_v30 = vpop.permute.xlu0 %8351 }
 0x80a   : > { %v13029_v1 = vpop.f32.mrb[175].mxu0  ;;  %21803 = vst [vmem:[#allocation122_spill] sm:$0xff] %v19707_v30 }
 0x80c   : > { %12991 = vmatmul.mubr.msk.bf16.gmra.mrb[252].mxu1 %vm4091_vm3, %v18997_v42  ;;  %v19714_v42 = vpop.permute.xlu1 %8303 }
 0x80d   : > { %12994 = vmatprep.mubr.msk.bf16.mxu1 %vm21696_vm0, %v21648_v63  ;;  %21804 = vst [vmem:[#allocation123_spill] sm:$0xff] %v19714_v42  ;;  %v19718_v63 = vpop.permute.xlu0 %8357 }
 0x80e   : > { %21805 = vst [vmem:[#allocation124_spill] sm:$0xff] %v19718_v63 }
 0x80f   : > { %v19699_v2 = vpop.f32.mrb[176].mxu0 }
 0x810   : > { %v13032_v12 = vpop.f32.mrb[177].mxu0 }
 0x811   : > { %v19705_v6 = vpop.f32.mrb[178].mxu0 }
 0x812   : > { %v13033_v1 = vpop.f32.mrb[179].mxu0 }
 0x814   : > { %12995 = vmatmul.mubr.msk.bf16.gmra.mrb[0].mxu1 %vm4091_vm3, %v19010_v0  ;;  %v19726_v0 = vld [vmem:[%s21236_s7] ss:$0 sm:$0xff] }
 0x817   : > { %v19716_v9 = vpop.f32.mrb[180].mxu0  ;;  %v7348_v30 = vpop.f32.mrb[152].mxu1 }
 0x818   : > { %v13036_v12 = vpop.f32.mrb[181].mxu0  ;;  %v7349_v1 = vadd.f32 %v7348_v30, %v18832_v35  ;;  %v12892_v11 = vpop.f32.mrb[153].mxu1 }
 0x819   : > { %v19720_v45 = vpop.f32.mrb[182].mxu0  ;;  %v7351_v42 = vpop.f32.mrb[154].mxu1  ;;  %v21807_v11 = vld [vmem:[#allocation73_spill] sm:$0xff] }
 0x81a   : > { %v13037_v20 = vpop.f32.mrb[183].mxu0  ;;  %v7870_v7 = vadd.f32 %v19630_v21, %v7349_v1  ;;  %v7352_v23 = vadd.f32 %v7351_v42, %v21806_v37  ;;  %v12893_v63 = vpop.f32.mrb[155].mxu1  ;;  %v21809_v37 = vld [vmem:[#allocation74_spill] sm:$0xff] }
 0x81b   : > { %v8205_v12 = vpop.permute.xlu0 %8204  ;;  %v8208_v35 = vpop.permute.xlu1 %8207  ;;  %v21810_v63 = vld [vmem:[#allocation70_spill] sm:$0xff] }
 0x81c   : > { %v7931_v3 = vadd.f32 %v19726_v0, %v7870_v7  ;;  %v7871_v62 = vadd.f32 %v19636_v29, %v7352_v23  ;;  %vm8365_vm0 = vcmp.eq.s32.totalorder %v8205_v12, 1  ;;  %vm8366_vm5 = vcmp.eq.s32.totalorder %v8208_v35, 1 }
 0x81e   : > { %v7985_v20 = vadd.f32 %v7931_v3, %v21807_v11  ;;  %v7932_v30 = vadd.f32 %v19726_v0, %v7871_v62  ;;  %v21812_v62 = vld [vmem:[#allocation50_spill] sm:$0xff] }
 0x81f   : > { %v19732_v24 = vpop.f32.mrb[184].mxu0  ;;  %v7356_v21 = vpop.f32.mrb[156].mxu1 }
 0x820   : > { %v13040_v61 = vpop.f32.mrb[185].mxu0  ;;  %v19738_v1 = vsel %vm8365_vm0, %v7985_v20, 0.0  ;;  %v7986_v42 = vadd.f32 %v7932_v30, %v21809_v37  ;;  %v7357_v7 = vadd.f32 %v7356_v21, %v21810_v63  ;;  %v12896_v29 = vpop.f32.mrb[157].mxu1  ;;  %v21814_v37 = vld [vmem:[#allocation75_spill] sm:$0xff]  ;;  %vm8375_vm0 = vcmp.eq.s32.totalorder %v19471_v40, 1 }
 0x821   : > { %v19736_v51 = vpop.f32.mrb[186].mxu0  ;;  %21808 = vst [vmem:[#allocation72_spill] sm:$0xff] %v19738_v1  ;;  %v7359_v23 = vpop.f32.mrb[158].mxu1  ;;  %v21386_v11 = vrot.slane %v19738_v1, 7 }
 0x822   : > { %v13041_v13 = vpop.f32.mrb[187].mxu0  ;;  %v19742_v52 = vsel %vm8366_vm5, %v7986_v42, 0.0  ;;  %v7872_v3 = vadd.f32 %v19647_v14, %v7357_v7  ;;  %v7360_v61 = vadd.f32 %v7359_v23, %v21812_v62  ;;  %v12897_v12 = vpop.f32.mrb[159].mxu1  ;;  %v21815_v62 = vld [vmem:[#allocation76_spill] sm:$0xff]  ;;  %vm8376_vm5 = vcmp.eq.s32.totalorder %v19588_v33, 1 }
 0x823   : > { %21811 = vst [vmem:[#allocation73_spill] sm:$0xff] %v19742_v52  ;;  %v8474_v20 = vrot.slane %v19742_v52, 7  ;;  %v21816_v12 = vld [vmem:[#allocation17_spill] sm:$0xff] }
 0x824   : > { %v7933_v21 = vadd.f32 %v19726_v0, %v7872_v3  ;;  %v7873_v13 = vadd.f32 %v19651_v60, %v7360_v61  ;;  %v8582_v60 = vrot.slane %v19742_v52, 1 }
 0x825   : > { %v19758_v14 = vsel %vm3042_vm13, %v21386_v11, %v8474_v20 }
 0x826   : > { %21813 = vst [vmem:[#allocation74_spill] sm:$0xff] %v19758_v14  ;;  %v7987_v42 = vadd.f32 %v7933_v21, %v21814_v37  ;;  %v7934_v63 = vadd.f32 %v19726_v0, %v7873_v13 }
 0x827   : > { %v19752_v35 = vpop.f32.mrb[188].mxu0  ;;  %v7364_v23 = vpop.f32.mrb[160].mxu1 }
 0x828   : > { %v13044_v7 = vpop.f32.mrb[189].mxu0  ;;  %v8421_v3 = vsel %vm8367_vm14, %v7987_v42, 0.0  ;;  %v7988_v61 = vadd.f32 %v7934_v63, %v21815_v62  ;;  %v7365_v30 = vadd.f32 %v7364_v23, %v21816_v12  ;;  %v12900_v11 = vpop.f32.mrb[161].mxu1  ;;  %v21821_v12 = vld [vmem:[#allocation78_spill] sm:$0xff]  ;;  %vm8377_vm14 = vcmp.eq.s32.totalorder %v19485_v41, 1 }
 0x829   : > { %v19763_v29 = vpop.f32.mrb[190].mxu0  ;;  %v8475_v21 = vrot.slane %v8421_v3, 7  ;;  %v8583_v37 = vrot.slane %v8421_v3, 1  ;;  %v7367_v13 = vpop.f32.mrb[162].mxu1  ;;  %v21388_v7 = vrot.slane %v19738_v1, 1 }
 0x82a   : > { %v13045_v43 = vpop.f32.mrb[191].mxu0  ;;  %v8422_v10 = vsel %vm8368_vm11, %v7988_v61, 0.0  ;;  %v7874_v14 = vadd.f32 %v19659_v58, %v7365_v30  ;;  %v7368_v25 = vadd.f32 %v7367_v13, %v21817_v32  ;;  %v12901_v52 = vpop.f32.mrb[163].mxu1  ;;  %v21822_v13 = vld [vmem:[#allocation21_spill] sm:$0xff]  ;;  %vm8378_vm11 = vcmp.eq.s32.totalorder %v19602_v53, 1 }
 0x82b   : > { %v8476_v42 = vrot.slane %v8422_v10, 7  ;;  %v8584_v22 = vrot.slane %v8422_v10, 1  ;;  %v14179_v63 = vpack.i.bf16 %v8422_v10, %v8421_v3  ;;  %v19774_v43 = vsel %vm3042_vm13, %v8474_v20, %v8475_v21  ;;  %v21820_v20 = vld [vmem:[#allocation77_spill] sm:$0xff] }
 0x82c   : > { %v7935_v54 = vadd.f32 %v19726_v0, %v7874_v14  ;;  %v7875_v11 = vadd.f32 %v19665_v27, %v7368_v25  ;;  %v19780_v23 = vsel %vm3175_vm2, %v8582_v60, %v8583_v37  ;;  %v19786_v52 = vsel %vm3175_vm2, %v21388_v7, %v8582_v60 }
 0x82d   : > { %21818 = vst [vmem:[#allocation70_spill] sm:$0xff] %v19780_v23  ;;  %21819 = vst [vmem:[#allocation50_spill] sm:$0xff] %v19786_v52  ;;  %14180 = vrot.lane.b32.xlu0 %v14179_v63, %s14638_s28  ;;  %v8685_v58 = vsel %vm3175_vm2, %v8583_v37, %v8584_v22  ;;  %v19795_v25 = vsel %vm3042_vm13, %v8475_v21, %v8476_v42 }
 0x82e   : > { %v7989_v30 = vadd.f32 %v7935_v54, %v21820_v20  ;;  %v7936_v14 = vadd.f32 %v19726_v0, %v7875_v11 }
 0x82f   : > { %v19788_v32 = vpop.f32.mrb[192].mxu0  ;;  %v7372_v62 = vpop.f32.mrb[164].mxu1 }
 0x830   : > { %v13048_v60 = vpop.f32.mrb[193].mxu0  ;;  %v8423_v61 = vsel %vm8369_vm6, %v7989_v30, 0.0  ;;  %v7990_v37 = vadd.f32 %v7936_v14, %v21821_v12  ;;  %v7373_v10 = vadd.f32 %v7372_v62, %v21822_v13  ;;  %v12904_v63 = vpop.f32.mrb[165].mxu1  ;;  %vm8379_vm6 = vcmp.eq.s32.totalorder %v19491_v46, 1 }
 0x831   : > { %v19802_v3 = vpop.f32.mrb[194].mxu0  ;;  %v8477_v7 = vrot.slane %v8423_v61, 7  ;;  %v8585_v27 = vrot.slane %v8423_v61, 1  ;;  %v7375_v54 = vpop.f32.mrb[166].mxu1  ;;  %v21823_v60 = vld [vmem:[#allocation23_spill] sm:$0xff] }
 0x832   : > { %v13049_v21 = vpop.f32.mrb[195].mxu0  ;;  %v8424_v20 = vsel %vm8370_vm7, %v7990_v37, 0.0  ;;  %v7876_v11 = vadd.f32 %v19673_v48, %v7373_v10  ;;  %v7376_v26 = vadd.f32 %v7375_v54, %v21823_v60  ;;  %v12905_v52 = vpop.f32.mrb[167].mxu1  ;;  %v14590_v48 = vld [vmem:[%s21237_s8 + $0x48] sm:$0xff]   ;;  %v21825_v54 = vld [vmem:[#allocation80_spill] sm:$0xff]  ;;  %vm8380_vm7 = vcmp.eq.s32.totalorder %v19616_v4, 1 }
 0x833   : > { %v8478_v23 = vrot.slane %v8424_v20, 7  ;;  %v8586_v1 = vrot.slane %v8424_v20, 1  ;;  %v14184_v30 = vpack.i.bf16 %v8424_v20, %v8423_v61  ;;  %v8684_v14 = vsel %vm3175_vm2, %v8584_v22, %v8585_v27  ;;  %13124 = vmatprep.subr.bf16.mxu1 %v14590_v48 }
 0x834   : > { %v7937_v62 = vadd.f32 %v19726_v0, %v7876_v11  ;;  %v7877_v12 = vadd.f32 %v19679_v39, %v7376_v26  ;;  %v14189_v18 = vpack.i.bf16 %v8684_v14, %v8685_v58  ;;  %v19815_v13 = vsel %vm3042_vm13, %v8476_v42, %v8477_v7  ;;  %v21824_v39 = vld [vmem:[#allocation79_spill] sm:$0xff]  ;;  %13125 = vmatpush3.bf16.msra.mxu1 %v14590_v48 }
 0x835   : > { %14185 = vrot.lane.b32.xlu1 %v14184_v30, %s14638_s28  ;;  %v8683_v22 = vsel %vm3175_vm2, %v8585_v27, %v8586_v1  ;;  %v19827_v61 = vsel %vm3042_vm13, %v8477_v7, %v8478_v23  ;;  %v21826_v27 = vld [vmem:[#allocation25_spill] sm:$0xff]  ;;  %13126 = vmatprep.subr.bf16.mxu1 %v14591_v47 }
 0x836   : > { %v7991_v58 = vadd.f32 %v7937_v62, %v21824_v39  ;;  %v7938_v42 = vadd.f32 %v19726_v0, %v7877_v12  ;;  %v21827_v12 = vld [vmem:[#allocation27_spill] sm:$0xff] }
 0x837   : > { %v19820_v52 = vpop.f32.mrb[196].mxu0  ;;  %v7380_v21 = vpop.f32.mrb[168].mxu1 }
 0x838   : > { %v13052_v37 = vpop.f32.mrb[197].mxu0  ;;  %v8425_v63 = vsel %vm8371_vm1, %v7991_v58, 0.0  ;;  %v7992_v20 = vadd.f32 %v7938_v42, %v21825_v54  ;;  %v7381_v11 = vadd.f32 %v7380_v21, %v21826_v27  ;;  %v12908_v7 = vpop.f32.mrb[169].mxu1  ;;  %13127 = vmatpush3.bf16.msra.mxu1 %v14591_v47  ;;  %vm8381_vm1 = vcmp.eq.s32.totalorder %v19501_v55, 1 }
 0x839   : > { %v19832_v10 = vpop.f32.mrb[198].mxu0  ;;  %v8479_v26 = vrot.slane %v8425_v63, 7  ;;  %v8587_v30 = vrot.slane %v8425_v63, 1  ;;  %v7383_v14 = vpop.f32.mrb[170].mxu1  ;;  %14190 = vrot.lane.b32.xlu1 %v14189_v18, %s14639_s19 }
 0x83a   : > { %v13053_v60 = vpop.f32.mrb[199].mxu0  ;;  %v8426_v62 = vsel %vm8372_vm8, %v7992_v20, 0.0  ;;  %v7878_v17 = vadd.f32 %v19687_v16, %v7381_v11  ;;  %v7384_v39 = vadd.f32 %v7383_v14, %v21827_v12  ;;  %v12909_v48 = vpop.f32.mrb[171].mxu1  ;;  %v21828_v11 = vld [vmem:[#allocation81_spill] sm:$0xff]  ;;  %vm8382_vm8 = vcmp.eq.s32.totalorder %v19628_v44, 1 }
 0x83b   : > { %v8480_v58 = vrot.slane %v8426_v62, 7  ;;  %v8588_v37 = vrot.slane %v8426_v62, 1  ;;  %v14194_v42 = vpack.i.bf16 %v8426_v62, %v8425_v63  ;;  %v8682_v21 = vsel %vm3175_vm2, %v8586_v1, %v8587_v30  ;;  %v21829_v62 = vld [vmem:[#allocation82_spill] sm:$0xff] }
 0x83c   : > { %v7939_v54 = vadd.f32 %v19726_v0, %v7878_v17  ;;  %v7879_v18 = vadd.f32 %v19691_v50, %v7384_v39  ;;  %v14199_v20 = vpack.i.bf16 %v8682_v21, %v8683_v22  ;;  %v19849_v16 = vsel %vm3042_vm13, %v8478_v23, %v8479_v26  ;;  %v21830_v17 = vld [vmem:[#allocation29_spill] sm:$0xff] }
 0x83d   : > { %14195 = vrot.lane.b32.xlu0 %v14194_v42, %s14638_s28  ;;  %v8681_v1 = vsel %vm3175_vm2, %v8587_v30, %v8588_v37  ;;  %v19858_v63 = vsel %vm3042_vm13, %v8479_v26, %v8480_v58  ;;  %v14592_v30 = vld [vmem:[%s21237_s8 + $0x58] sm:$0xff]  }
 0x83e   : > { %v7993_v60 = vadd.f32 %v7939_v54, %v21828_v11  ;;  %v7940_v50 = vadd.f32 %v19726_v0, %v7879_v18  ;;  %13128 = vmatprep.subr.bf16.mxu1 %v14592_v30  ;;  %v21831_v18 = vld [vmem:[#allocation30_spill] sm:$0xff] }
 0x83f   : > { %v19851_v27 = vpop.f32.mrb[200].mxu0  ;;  %v7388_v7 = vpop.f32.mrb[172].mxu1  ;;  %13129 = vmatpush3.bf16.msra.mxu1 %v14592_v30 }
 0x840   : > { %v13056_v22 = vpop.f32.mrb[201].mxu0  ;;  %v8427_v14 = vsel %vm8373_vm12, %v7993_v60, 0.0  ;;  %v7994_v26 = vadd.f32 %v7940_v50, %v21829_v62  ;;  %v7389_v12 = vadd.f32 %v7388_v7, %v21830_v17  ;;  %v12912_v48 = vpop.f32.mrb[173].mxu1  ;;  %vm8383_vm12 = vcmp.eq.s32.totalorder %v19515_v57, 1 }
 0x841   : > { %v19863_v23 = vpop.f32.mrb[202].mxu0  ;;  %v8481_v42 = vrot.slane %v8427_v14, 7  ;;  %v8589_v21 = vrot.slane %v8427_v14, 1  ;;  %v7391_v47 = vpop.f32.mrb[174].mxu1  ;;  %14200 = vrot.lane.b32.xlu0 %v14199_v20, %s14639_s19 }
 0x842   : > { %v13057_v39 = vpop.f32.mrb[203].mxu0  ;;  %v8428_v59 = vsel %vm8374_vm4, %v7994_v26, 0.0  ;;  %v7880_v54 = vadd.f32 %v19699_v2, %v7389_v12  ;;  %v7392_v11 = vadd.f32 %v7391_v47, %v21831_v18  ;;  %v12913_v60 = vpop.f32.mrb[175].mxu1  ;;  %v21833_v47 = vld [vmem:[#allocation84_spill] sm:$0xff]  ;;  %vm8384_vm4 = vcmp.eq.s32.totalorder %v19638_v34, 1 }
 0x843   : > { %v8482_v50 = vrot.slane %v8428_v59, 7  ;;  %v8590_v22 = vrot.slane %v8428_v59, 1  ;;  %v14204_v7 = vpack.i.bf16 %v8428_v59, %v8427_v14  ;;  %v8680_v62 = vsel %vm3175_vm2, %v8588_v37, %v8589_v21  ;;  %v21832_v37 = vld [vmem:[#allocation83_spill] sm:$0xff] }
 0x844   : > { %v7941_v5 = vadd.f32 %v19726_v0, %v7880_v54  ;;  %v7881_v17 = vadd.f32 %v19705_v6, %v7392_v11  ;;  %v14209_v39 = vpack.i.bf16 %v8680_v62, %v8681_v1  ;;  %v19880_v20 = vsel %vm3042_vm13, %v8480_v58, %v8481_v42 }
 0x845   : > { %14205 = vrot.lane.b32.xlu0 %v14204_v7, %s14638_s28  ;;  %v8679_v30 = vsel %vm3175_vm2, %v8589_v21, %v8590_v22  ;;  %v19889_v14 = vsel %vm3042_vm13, %v8481_v42, %v8482_v50  ;;  %v21834_v21 = vld [vmem:[#allocation34_spill] sm:$0xff] }
 0x846   : > { %v7995_v26 = vadd.f32 %v7941_v5, %v21832_v37  ;;  %v7942_v6 = vadd.f32 %v19726_v0, %v7881_v17  ;;  %14210 = vrot.lane.b32.xlu1 %v14209_v39, %s14639_s19  ;;  %v21835_v17 = vld [vmem:[#allocation32_spill] sm:$0xff] }
 0x847   : > { %v19882_v2 = vpop.f32.mrb[204].mxu0  ;;  %v7396_v12 = vpop.f32.mrb[176].mxu1 }
 0x848   : > { %v13060_v1 = vpop.f32.mrb[205].mxu0  ;;  %v8429_v48 = vsel %vm8375_vm0, %v7995_v26, 0.0  ;;  %v7996_v59 = vadd.f32 %v7942_v6, %v21833_v47  ;;  %v7397_v54 = vadd.f32 %v7396_v12, %v21834_v21  ;;  %v12916_v42 = vpop.f32.mrb[177].mxu1  ;;  %vm8385_vm0 = vcmp.eq.s32.totalorder %v19527_v38, 1 }
 0x849   : > { %v19895_v58 = vpop.f32.mrb[206].mxu0  ;;  %v8483_v11 = vrot.slane %v8429_v48, 7  ;;  %v8591_v60 = vrot.slane %v8429_v48, 1  ;;  %v7399_v7 = vpop.f32.mrb[178].mxu1 }
 0x84a   : > { %v13061_v18 = vpop.f32.mrb[207].mxu0  ;;  %v8430_v62 = vsel %vm8376_vm5, %v7996_v59, 0.0  ;;  %v7882_v5 = vadd.f32 %v19716_v9, %v7397_v54  ;;  %v7400_v40 = vadd.f32 %v7399_v7, %v21835_v17  ;;  %v12917_v39 = vpop.f32.mrb[179].mxu1  ;;  %v21837_v7 = vld [vmem:[#allocation86_spill] sm:$0xff] }
 0x84b   : > { %v8484_v37 = vrot.slane %v8430_v62, 7  ;;  %v8592_v1 = vrot.slane %v8430_v62, 1  ;;  %v14214_v26 = vpack.i.bf16 %v8430_v62, %v8429_v48  ;;  %v8678_v6 = vsel %vm3175_vm2, %v8590_v22, %v8591_v60  ;;  %v21836_v22 = vld [vmem:[#allocation85_spill] sm:$0xff] }
 0x84c   : > { %v7943_v12 = vadd.f32 %v19726_v0, %v7882_v5  ;;  %v7883_v47 = vadd.f32 %v19720_v45, %v7400_v40  ;;  %v14219_v33 = vpack.i.bf16 %v8678_v6, %v8679_v30  ;;  %v19908_v21 = vsel %vm3042_vm13, %v8482_v50, %v8483_v11 }
 0x84d   : > { %14215 = vrot.lane.b32.xlu1 %v14214_v26, %s14638_s28  ;;  %v8677_v9 = vsel %vm3175_vm2, %v8591_v60, %v8592_v1  ;;  %v19917_v48 = vsel %vm3042_vm13, %v8483_v11, %v8484_v37  ;;  %v21838_v60 = vld [vmem:[#allocation58_spill] sm:$0xff] }
 0x84e   : > { %v7997_v54 = vadd.f32 %v7943_v12, %v21836_v22  ;;  %v7944_v45 = vadd.f32 %v19726_v0, %v7883_v47  ;;  %14220 = vrot.lane.b32.xlu0 %v14219_v33, %s14639_s19  ;;  %v21839_v47 = vld [vmem:[#allocation60_spill] sm:$0xff] }
 0x84f   : > { %v19910_v59 = vpop.f32.mrb[208].mxu0  ;;  %v7404_v18 = vpop.f32.mrb[180].mxu1 }
 0x850   : > { %v13064_v30 = vpop.f32.mrb[209].mxu0  ;;  %v8431_v42 = vsel %vm8377_vm14, %v7997_v54, 0.0  ;;  %v7998_v62 = vadd.f32 %v7944_v45, %v21837_v7  ;;  %v7405_v5 = vadd.f32 %v7404_v18, %v21838_v60  ;;  %v12920_v11 = vpop.f32.mrb[181].mxu1 }
 0x851   : > { %v19923_v50 = vpop.f32.mrb[210].mxu0  ;;  %v8485_v40 = vrot.slane %v8431_v42, 7  ;;  %v8593_v39 = vrot.slane %v8431_v42, 1  ;;  %v7407_v26 = vpop.f32.mrb[182].mxu1 }
 0x852   : > { %v13065_v17 = vpop.f32.mrb[211].mxu0  ;;  %v8432_v6 = vsel %vm8378_vm11, %v7998_v62, 0.0  ;;  %v7884_v12 = vadd.f32 %v19732_v24, %v7405_v5  ;;  %v7408_v41 = vadd.f32 %v7407_v26, %v21839_v47  ;;  %v12921_v33 = vpop.f32.mrb[183].mxu1  ;;  %v21841_v26 = vld [vmem:[#allocation88_spill] sm:$0xff] }
 0x853   : > { %v8486_v22 = vrot.slane %v8432_v6, 7  ;;  %v8594_v30 = vrot.slane %v8432_v6, 1  ;;  %v14224_v54 = vpack.i.bf16 %v8432_v6, %v8431_v42  ;;  %v8676_v45 = vsel %vm3175_vm2, %v8592_v1, %v8593_v39  ;;  %v21840_v1 = vld [vmem:[#allocation87_spill] sm:$0xff] }
 0x854   : > { %v7945_v18 = vadd.f32 %v19726_v0, %v7884_v12  ;;  %v7885_v7 = vadd.f32 %v19736_v51, %v7408_v41  ;;  %v14229_v53 = vpack.i.bf16 %v8676_v45, %v8677_v9  ;;  %v19936_v60 = vsel %vm3042_vm13, %v8484_v37, %v8485_v40 }
 0x855   : > { %14225 = vrot.lane.b32.xlu0 %v14224_v54, %s14638_s28  ;;  %v8675_v24 = vsel %vm3175_vm2, %v8593_v39, %v8594_v30  ;;  %v19945_v42 = vsel %vm3042_vm13, %v8485_v40, %v8486_v22 }
 0x856   : > { %v7999_v5 = vadd.f32 %v7945_v18, %v21840_v1  ;;  %v7946_v51 = vadd.f32 %v19726_v0, %v7885_v7  ;;  %14230 = vrot.lane.b32.xlu1 %v14229_v53, %s14639_s19 }
 0x857   : > { %v19938_v62 = vpop.f32.mrb[212].mxu0  ;;  %v7412_v17 = vpop.f32.mrb[184].mxu1 }
 0x858   : > { %v13068_v9 = vpop.f32.mrb[213].mxu0  ;;  %v8433_v11 = vsel %vm8379_vm6, %v7999_v5, 0.0  ;;  %v8000_v6 = vadd.f32 %v7946_v51, %v21841_v26  ;;  %v7413_v39 = vadd.f32 %v7412_v17, %v18949_v56  ;;  %v12924_v40 = vpop.f32.mrb[185].mxu1 }
 0x859   : > { %v19951_v37 = vpop.f32.mrb[214].mxu0  ;;  %v8487_v47 = vrot.slane %v8433_v11, 7  ;;  %v8595_v41 = vrot.slane %v8433_v11, 1  ;;  %v7415_v33 = vpop.f32.mrb[186].mxu1 }
 0x85a   : > { %v13069_v12 = vpop.f32.mrb[215].mxu0  ;;  %v8434_v54 = vsel %vm8380_vm7, %v8000_v6, 0.0  ;;  %v7886_v45 = vadd.f32 %v19752_v35, %v7413_v39  ;;  %v7416_v46 = vadd.f32 %v7415_v33, %v18956_v31  ;;  %v12925_v18 = vpop.f32.mrb[187].mxu1  ;;  %v21843_v39 = vld [vmem:[#allocation90_spill] sm:$0xff] }
 0x85b   : > { %v8488_v7 = vrot.slane %v8434_v54, 7  ;;  %v8596_v53 = vrot.slane %v8434_v54, 1  ;;  %v14234_v1 = vpack.i.bf16 %v8434_v54, %v8433_v11  ;;  %v8674_v5 = vsel %vm3175_vm2, %v8594_v30, %v8595_v41  ;;  %v21842_v30 = vld [vmem:[#allocation89_spill] sm:$0xff] }
 0x85c   : > { %v7947_v56 = vadd.f32 %v19726_v0, %v7886_v45  ;;  %v7887_v51 = vadd.f32 %v19763_v29, %v7416_v46  ;;  %v14239_v4 = vpack.i.bf16 %v8674_v5, %v8675_v24  ;;  %v19964_v9 = vsel %vm3042_vm13, %v8486_v22, %v8487_v47 }
 0x85d   : > { %14235 = vrot.lane.b32.xlu1 %v14234_v1, %s14638_s28  ;;  %v8673_v31 = vsel %vm3175_vm2, %v8595_v41, %v8596_v53  ;;  %v19973_v35 = vsel %vm3042_vm13, %v8487_v47, %v8488_v7 }
 0x85e   : > { %v8001_v11 = vadd.f32 %v7947_v56, %v21842_v30  ;;  %v7948_v29 = vadd.f32 %v19726_v0, %v7887_v51  ;;  %14240 = vrot.lane.b32.xlu0 %v14239_v4, %s14639_s19 }
 0x85f   : > { %v19966_v17 = vpop.f32.mrb[216].mxu0  ;;  %v7420_v26 = vpop.f32.mrb[188].mxu1 }
 0x860   : > { %v13072_v24 = vpop.f32.mrb[217].mxu0  ;;  %v8435_v6 = vsel %vm8381_vm1, %v8001_v11, 0.0  ;;  %v8002_v12 = vadd.f32 %v7948_v29, %v21843_v39  ;;  %v7421_v40 = vadd.f32 %v7420_v26, %v19106_v36  ;;  %v12928_v47 = vpop.f32.mrb[189].mxu1 }
 0x861   : > { %v19979_v22 = vpop.f32.mrb[218].mxu0  ;;  %v8489_v33 = vrot.slane %v8435_v6, 7  ;;  %v8597_v54 = vrot.slane %v8435_v6, 1  ;;  %v7423_v45 = vpop.f32.mrb[190].mxu1  ;;  %v21844_v24 = vld [vmem:[#allocation2_spill] sm:$0xff] }
 0x862   : > { %v13073_v41 = vpop.f32.mrb[219].mxu0  ;;  %v8436_v46 = vsel %vm8382_vm8, %v8002_v12, 0.0  ;;  %v7888_v18 = vadd.f32 %v19788_v32, %v7421_v40  ;;  %v7424_v55 = vadd.f32 %v7423_v45, %v19110_v19  ;;  %v12929_v1 = vpop.f32.mrb[191].mxu1  ;;  %v21845_v12 = vld [vmem:[#allocation59_spill] sm:$0xff] }
 0x863   : > { %v8490_v5 = vrot.slane %v8436_v46, 7  ;;  %v8598_v56 = vrot.slane %v8436_v46, 1  ;;  %v14244_v51 = vpack.i.bf16 %v8436_v46, %v8435_v6  ;;  %v8672_v4 = vsel %vm3175_vm2, %v8596_v53, %v8597_v54  ;;  %v20003_v53 = vpop.permute.xlu1 %8312 }
 0x864   : > { %v7949_v36 = vadd.f32 %v19726_v0, %v7888_v18  ;;  %v7889_v30 = vadd.f32 %v19802_v3, %v7424_v55  ;;  %v14249_v44 = vpack.i.bf16 %v8672_v4, %v8673_v31  ;;  %v19992_v11 = vsel %vm3042_vm13, %v8488_v7, %v8489_v33 }
 0x865   : > { %14245 = vrot.lane.b32.xlu0 %v14244_v51, %s14638_s28  ;;  %v8671_v19 = vsel %vm3175_vm2, %v8597_v54, %v8598_v56  ;;  %v20001_v32 = vsel %vm3042_vm13, %v8489_v33, %v8490_v5 }
 0x866   : > { %v8003_v3 = vadd.f32 %v7949_v36, %v21844_v24  ;;  %v7950_v31 = vadd.f32 %v19726_v0, %v7889_v30  ;;  %14250 = vrot.lane.b32.xlu1 %v14249_v44, %s14639_s19 }
 0x867   : > { %v19994_v29 = vpop.f32.mrb[220].mxu0  ;;  %v7428_v6 = vpop.f32.mrb[192].mxu1 }
 0x868   : > { %v13076_v26 = vpop.f32.mrb[221].mxu0  ;;  %v8437_v39 = vsel %vm8383_vm12, %v8003_v3, 0.0  ;;  %v8004_v40 = vadd.f32 %v7950_v31, %v21845_v12  ;;  %v7429_v41 = vadd.f32 %v7428_v6, %v19162_v49  ;;  %v12932_v33 = vpop.f32.mrb[193].mxu1  ;;  %v21848_v31 = vld [vmem:[#allocation3_spill] sm:$0xff]  ;;  %v21849_v12 = vld [vmem:[#allocation33_spill] sm:$0xff] }
 0x869   : > { %v20009_v7 = vpop.f32.mrb[222].mxu0  ;;  %v8491_v54 = vrot.slane %v8437_v39, 7  ;;  %v8599_v45 = vrot.slane %v8437_v39, 1  ;;  %v7431_v46 = vpop.f32.mrb[194].mxu1 }
 0x86a   : > { %v13077_v47 = vpop.f32.mrb[223].mxu0  ;;  %v8438_v18 = vsel %vm8384_vm4, %v8004_v40, 0.0  ;;  %v7890_v55 = vadd.f32 %v19820_v52, %v7429_v41  ;;  %v7432_v57 = vadd.f32 %v7431_v46, %v19172_v15  ;;  %v12933_v1 = vpop.f32.mrb[195].mxu1 }
 0x86b   : > { %v8492_v51 = vrot.slane %v8438_v18, 7  ;;  %v8600_v4 = vrot.slane %v8438_v18, 1  ;;  %v14254_v36 = vpack.i.bf16 %v8438_v18, %v8437_v39  ;;  %v8670_v30 = vsel %vm3175_vm2, %v8598_v56, %v8599_v45  ;;  %v20033_v56 = vpop.permute.xlu1 %8318  ;;  %v21851_v1 = vld [vmem:[#allocation38_spill] sm:$0xff] }
 0x86c   : > { %v7951_v49 = vadd.f32 %v19726_v0, %v7890_v55  ;;  %v7891_v44 = vadd.f32 %v19832_v10, %v7432_v57  ;;  %v14259_v34 = vpack.i.bf16 %v8670_v30, %v8671_v19  ;;  %v20022_v24 = vsel %vm3042_vm13, %v8490_v5, %v8491_v54 }
 0x86d   : > { %21846 = vst [vmem:[#allocation75_spill] sm:$0xff] %v20022_v24  ;;  %14255 = vrot.lane.b32.xlu1 %v14254_v36, %s14638_s28  ;;  %v8669_v15 = vsel %vm3175_vm2, %v8599_v45, %v8600_v4  ;;  %v20031_v52 = vsel %vm3042_vm13, %v8491_v54, %v8492_v51  ;;  %v21850_v54 = vld [vmem:[#allocation111_spill] sm:$0xff] }
 0x86e   : > { %21847 = vst [vmem:[#allocation76_spill] sm:$0xff] %v20031_v52  ;;  %v8005_v10 = vadd.f32 %v7951_v49, %v21848_v31  ;;  %v7952_v19 = vadd.f32 %v19726_v0, %v7891_v44  ;;  %14260 = vrot.lane.b32.xlu0 %v14259_v34, %s14639_s19  ;;  %vm8386_vm5 = vcmp.eq.s32.totalorder %v21850_v54, 1  ;;  %v21907_v52 = vld [vmem:[#allocation109_spill] sm:$0xff] }
 0x86f   : > { %v20024_v3 = vpop.f32.mrb[224].mxu0  ;;  %v7436_v6 = vpop.f32.mrb[196].mxu1 }
 0x870   : > { %v13080_v26 = vpop.f32.mrb[225].mxu0  ;;  %v8439_v39 = vsel %vm8385_vm0, %v8005_v10, 0.0  ;;  %v8006_v40 = vadd.f32 %v7952_v19, %v21849_v12  ;;  %v7437_v41 = vadd.f32 %v7436_v6, %v19186_v28  ;;  %v12936_v33 = vpop.f32.mrb[197].mxu1 }
 0x871   : > { %v20039_v5 = vpop.f32.mrb[226].mxu0  ;;  %v8493_v45 = vrot.slane %v8439_v39, 7  ;;  %v8601_v46 = vrot.slane %v8439_v39, 1  ;;  %v7439_v18 = vpop.f32.mrb[198].mxu1  ;;  %v21856_v33 = vld [vmem:[#allocation61_spill] sm:$0xff] }
 0x872   : > { %v13081_v47 = vpop.f32.mrb[227].mxu0  ;;  %v8440_v55 = vsel %vm8386_vm5, %v8006_v40, 0.0  ;;  %v7892_v57 = vadd.f32 %v19851_v27, %v7437_v41  ;;  %v7440_v38 = vadd.f32 %v7439_v18, %v21851_v1  ;;  %v12937_v36 = vpop.f32.mrb[199].mxu1 }
 0x873   : > { %v8494_v30 = vrot.slane %v8440_v55, 7  ;;  %v8602_v49 = vrot.slane %v8440_v55, 1  ;;  %v14264_v44 = vpack.i.bf16 %v8440_v55, %v8439_v39  ;;  %v8668_v34 = vsel %vm3175_vm2, %v8600_v4, %v8601_v46  ;;  %v20063_v4 = vpop.permute.xlu1 %8324  ;;  %v21854_v39 = vld [vmem:[#allocation4_spill] sm:$0xff] }
 0x874   : > { %v7953_v28 = vadd.f32 %v19726_v0, %v7892_v57  ;;  %v7893_v31 = vadd.f32 %v19863_v23, %v7440_v38  ;;  %v14269_v10 = vpack.i.bf16 %v8668_v34, %v8669_v15  ;;  %v20052_v19 = vsel %vm3042_vm13, %v8492_v51, %v8493_v45  ;;  %v21855_v51 = vld [vmem:[#allocation92_spill] sm:$0xff]  ;;  %v21858_v57 = vld [vmem:[#allocation113_spill] sm:$0xff] }
 0x875   : > { %21852 = vst [vmem:[#allocation17_spill] sm:$0xff] %v20052_v19  ;;  %14265 = vrot.lane.b32.xlu1 %v14264_v44, %s14638_s28  ;;  %v8667_v27 = vsel %vm3175_vm2, %v8601_v46, %v8602_v49  ;;  %v20061_v6 = vsel %vm3042_vm13, %v8493_v45, %v8494_v30  ;;  %vm8387_vm14 = vcmp.eq.s32.totalorder %v21855_v51, 1  ;;  %v21857_v46 = vld [vmem:[#allocation71_spill] sm:$0xff]  ;;  %vm8388_vm11 = vcmp.eq.s32.totalorder %v21858_v57, 1 }
 0x876   : > { %21853 = vst [vmem:[#allocation19_spill] sm:$0xff] %v20061_v6  ;;  %v8007_v23 = vadd.f32 %v7953_v28, %v21854_v39  ;;  %v7954_v15 = vadd.f32 %v19726_v0, %v7893_v31  ;;  %v21859_v28 = vld [vmem:[#allocation35_spill] sm:$0xff] }
 0x877   : > { %v20054_v26 = vpop.f32.mrb[228].mxu0  ;;  %v7444_v41 = vpop.f32.mrb[200].mxu1 }
 0x878   : > { %v13084_v12 = vpop.f32.mrb[229].mxu0  ;;  %v8441_v47 = vsel %vm8387_vm14, %v8007_v23, 0.0  ;;  %v8008_v54 = vadd.f32 %v7954_v15, %v21856_v33  ;;  %v7445_v18 = vadd.f32 %v7444_v41, %v21857_v46  ;;  %v12940_v45 = vpop.f32.mrb[201].mxu1 }
 0x879   : > { %v20068_v40 = vpop.f32.mrb[230].mxu0  ;;  %v8495_v1 = vrot.slane %v8441_v47, 7  ;;  %v8603_v38 = vrot.slane %v8441_v47, 1  ;;  %v7447_v36 = vpop.f32.mrb[202].mxu1  ;;  %14270 = vrot.lane.b32.xlu1 %v14269_v10, %s14639_s19 }
 0x87a   : > { %v13085_v55 = vpop.f32.mrb[231].mxu0  ;;  %v8442_v44 = vsel %vm8388_vm11, %v8008_v54, 0.0  ;;  %v7894_v34 = vadd.f32 %v19882_v2, %v7445_v18  ;;  %v7448_v31 = vadd.f32 %v7447_v36, %v21859_v28  ;;  %v12941_v39 = vpop.f32.mrb[203].mxu1  ;;  %v21862_v18 = vld [vmem:[#allocation36_spill] sm:$0xff] }
 0x87b   : > { %v8496_v23 = vrot.slane %v8442_v44, 7  ;;  %v8604_v12 = vrot.slane %v8442_v44, 1  ;;  %v14274_v15 = vpack.i.bf16 %v8442_v44, %v8441_v47  ;;  %v8666_v51 = vsel %vm3175_vm2, %v8602_v49, %v8603_v38  ;;  %v20093_v49 = vpop.permute.xlu1 %8330  ;;  %v21866_v39 = vld [vmem:[#allocation115_spill] sm:$0xff] }
 0x87c   : > { %v7955_v41 = vadd.f32 %v19726_v0, %v7894_v34  ;;  %v7895_v33 = vadd.f32 %v19895_v58, %v7448_v31  ;;  %v14279_v46 = vpack.i.bf16 %v8666_v51, %v8667_v27  ;;  %v20082_v10 = vsel %vm3042_vm13, %v8494_v30, %v8495_v1  ;;  %v21863_v30 = vld [vmem:[#allocation95_spill] sm:$0xff]  ;;  %v21865_v34 = vld [vmem:[#allocation37_spill] sm:$0xff] }
 0x87d   : > { %21860 = vst [vmem:[#allocation77_spill] sm:$0xff] %v20082_v10  ;;  %14275 = vrot.lane.b32.xlu0 %v14274_v15, %s14638_s28  ;;  %v8665_v2 = vsel %vm3175_vm2, %v8603_v38, %v8604_v12  ;;  %v20091_v47 = vsel %vm3042_vm13, %v8495_v1, %v8496_v23  ;;  %vm8389_vm6 = vcmp.eq.s32.totalorder %v21863_v30, 1  ;;  %v21864_v38 = vld [vmem:[#allocation6_spill] sm:$0xff]  ;;  %vm8390_vm7 = vcmp.eq.s32.totalorder %v21866_v39, 1 }
 0x87e   : > { %21861 = vst [vmem:[#allocation78_spill] sm:$0xff] %v20091_v47  ;;  %v8009_v58 = vadd.f32 %v7955_v41, %v21862_v18  ;;  %v7956_v27 = vadd.f32 %v19726_v0, %v7895_v33  ;;  %14280 = vrot.lane.b32.xlu1 %v14279_v46, %s14639_s19  ;;  %v21867_v18 = vld [vmem:[#allocation40_spill] sm:$0xff] }
 0x87f   : > { %v20084_v54 = vpop.f32.mrb[232].mxu0  ;;  %v7452_v57 = vpop.f32.mrb[204].mxu1 }
 0x880   : > { %v13088_v55 = vpop.f32.mrb[233].mxu0  ;;  %v8443_v36 = vsel %vm8389_vm6, %v8009_v58, 0.0  ;;  %v8010_v44 = vadd.f32 %v7956_v27, %v21864_v38  ;;  %v7453_v1 = vadd.f32 %v7452_v57, %v21865_v34  ;;  %v12944_v31 = vpop.f32.mrb[205].mxu1 }
 0x881   : > { %v20099_v45 = vpop.f32.mrb[234].mxu0  ;;  %v8497_v15 = vrot.slane %v8443_v36, 7  ;;  %v8605_v51 = vrot.slane %v8443_v36, 1  ;;  %v7455_v41 = vpop.f32.mrb[206].mxu1 }
 0x882   : > { %v13089_v28 = vpop.f32.mrb[235].mxu0  ;;  %v8444_v33 = vsel %vm8390_vm7, %v8010_v44, 0.0  ;;  %v7896_v46 = vadd.f32 %v19910_v59, %v7453_v1  ;;  %v7456_v55 = vadd.f32 %v7455_v41, %v21867_v18  ;;  %v12945_v30 = vpop.f32.mrb[207].mxu1  ;;  %v21870_v1 = vld [vmem:[#allocation7_spill] sm:$0xff]  ;;  %v21873_v18 = vld [vmem:[#allocation5_spill] sm:$0xff]  ;;  %vm8400_vm7 = vcmp.eq.s32.totalorder %v21907_v52, 1 }
 0x883   : > { %v8498_v47 = vrot.slane %v8444_v33, 7  ;;  %v8606_v10 = vrot.slane %v8444_v33, 1  ;;  %v14284_v58 = vpack.i.bf16 %v8444_v33, %v8443_v36  ;;  %v8664_v27 = vsel %vm3175_vm2, %v8604_v12, %v8605_v51  ;;  %v20123_v12 = vpop.permute.xlu1 %8336 }
 0x884   : > { %v7957_v57 = vadd.f32 %v19726_v0, %v7896_v46  ;;  %v7897_v38 = vadd.f32 %v19923_v50, %v7456_v55  ;;  %v14289_v34 = vpack.i.bf16 %v8664_v27, %v8665_v2  ;;  %v20112_v28 = vsel %vm3042_vm13, %v8496_v23, %v8497_v15  ;;  %v21871_v23 = vld [vmem:[#allocation98_spill] sm:$0xff] }
 0x885   : > { %21868 = vst [vmem:[#allocation21_spill] sm:$0xff] %v20112_v28  ;;  %14285 = vrot.lane.b32.xlu1 %v14284_v58, %s14638_s28  ;;  %v8663_v59 = vsel %vm3175_vm2, %v8605_v51, %v8606_v10  ;;  %v20121_v36 = vsel %vm3042_vm13, %v8497_v15, %v8498_v47  ;;  %vm8391_vm1 = vcmp.eq.s32.totalorder %v21871_v23, 1  ;;  %v21872_v51 = vld [vmem:[#allocation8_spill] sm:$0xff]  ;;  %v21874_v58 = vld [vmem:[#allocation117_spill] sm:$0xff] }
 0x886   : > { %21869 = vst [vmem:[#allocation23_spill] sm:$0xff] %v20121_v36  ;;  %v8011_v50 = vadd.f32 %v7957_v57, %v21870_v1  ;;  %v7958_v2 = vadd.f32 %v19726_v0, %v7897_v38  ;;  %14290 = vrot.lane.b32.xlu0 %v14289_v34, %s14639_s19  ;;  %vm8392_vm8 = vcmp.eq.s32.totalorder %v21874_v58, 1 }
 0x887   : > { %v20114_v44 = vpop.f32.mrb[236].mxu0  ;;  %v7460_v41 = vpop.f32.mrb[208].mxu1 }
 0x888   : > { %v13092_v31 = vpop.f32.mrb[237].mxu0  ;;  %v8445_v33 = vsel %vm8391_vm1, %v8011_v50, 0.0  ;;  %v8012_v46 = vadd.f32 %v7958_v2, %v21872_v51  ;;  %v7461_v15 = vadd.f32 %v7460_v41, %v21873_v18  ;;  %v12948_v30 = vpop.f32.mrb[209].mxu1  ;;  %vm8401_vm1 = vcmp.eq.s32.totalorder %v20003_v53, 1 }
 0x889   : > { %v20129_v39 = vpop.f32.mrb[238].mxu0  ;;  %v8499_v27 = vrot.slane %v8445_v33, 7  ;;  %v8607_v57 = vrot.slane %v8445_v33, 1  ;;  %v7463_v38 = vpop.f32.mrb[210].mxu1  ;;  %v21875_v31 = vld [vmem:[#allocation62_spill] sm:$0xff] }
 0x88a   : > { %v13093_v55 = vpop.f32.mrb[239].mxu0  ;;  %v8446_v1 = vsel %vm8392_vm8, %v8012_v46, 0.0  ;;  %v7898_v34 = vadd.f32 %v19938_v62, %v7461_v15  ;;  %v7464_v23 = vadd.f32 %v7463_v38, %v21875_v31  ;;  %v12949_v36 = vpop.f32.mrb[211].mxu1 }
 0x88b   : > { %v8500_v28 = vrot.slane %v8446_v1, 7  ;;  %v8608_v6 = vrot.slane %v8446_v1, 1  ;;  %v14294_v50 = vpack.i.bf16 %v8446_v1, %v8445_v33  ;;  %v8662_v2 = vsel %vm3175_vm2, %v8606_v10, %v8607_v57  ;;  %v20153_v10 = vpop.permute.xlu1 %8342  ;;  %v21878_v33 = vld [vmem:[#allocation65_spill] sm:$0xff] }
 0x88c   : > { %v7959_v41 = vadd.f32 %v19726_v0, %v7898_v34  ;;  %v7899_v51 = vadd.f32 %v19951_v37, %v7464_v23  ;;  %v14299_v18 = vpack.i.bf16 %v8662_v2, %v8663_v59  ;;  %v20142_v55 = vsel %vm3042_vm13, %v8498_v47, %v8499_v27  ;;  %v21879_v47 = vld [vmem:[#allocation100_spill] sm:$0xff] }
 0x88d   : > { %21876 = vst [vmem:[#allocation79_spill] sm:$0xff] %v20142_v55  ;;  %14295 = vrot.lane.b32.xlu0 %v14294_v50, %s14638_s28  ;;  %v8661_v62 = vsel %vm3175_vm2, %v8607_v57, %v8608_v6  ;;  %v20151_v36 = vsel %vm3042_vm13, %v8499_v27, %v8500_v28  ;;  %vm8393_vm12 = vcmp.eq.s32.totalorder %v21879_v47, 1  ;;  %v21880_v57 = vld [vmem:[#allocation9_spill] sm:$0xff]  ;;  %v21881_v34 = vld [vmem:[#allocation64_spill] sm:$0xff]  ;;  %v21882_v50 = vld [vmem:[#allocation119_spill] sm:$0xff] }
 0x88e   : > { %21877 = vst [vmem:[#allocation80_spill] sm:$0xff] %v20151_v36  ;;  %v8013_v37 = vadd.f32 %v7959_v41, %v21878_v33  ;;  %v7960_v59 = vadd.f32 %v19726_v0, %v7899_v51  ;;  %14300 = vrot.lane.b32.xlu1 %v14299_v18, %s14639_s19  ;;  %vm8394_vm4 = vcmp.eq.s32.totalorder %v21882_v50, 1 }
 0x88f   : > { %v20144_v46 = vpop.f32.mrb[240].mxu0  ;;  %v7468_v58 = vpop.f32.mrb[212].mxu1 }
 0x890   : > { %v13096_v15 = vpop.f32.mrb[241].mxu0  ;;  %v8447_v38 = vsel %vm8393_vm12, %v8013_v37, 0.0  ;;  %v8014_v1 = vadd.f32 %v7960_v59, %v21880_v57  ;;  %v7469_v27 = vadd.f32 %v7468_v58, %v21881_v34  ;;  %v12952_v23 = vpop.f32.mrb[213].mxu1  ;;  %vm8403_vm12 = vcmp.eq.s32.totalorder %v20033_v56, 1 }
 0x891   : > { %v20159_v30 = vpop.f32.mrb[242].mxu0  ;;  %v8501_v2 = vrot.slane %v8447_v38, 7  ;;  %v8609_v41 = vrot.slane %v8447_v38, 1  ;;  %v7471_v51 = vpop.f32.mrb[214].mxu1  ;;  %v21883_v15 = vld [vmem:[#allocation44_spill] sm:$0xff] }
 0x892   : > { %v13097_v31 = vpop.f32.mrb[243].mxu0  ;;  %v8448_v33 = vsel %vm8394_vm4, %v8014_v1, 0.0  ;;  %v7900_v18 = vadd.f32 %v19966_v17, %v7469_v27  ;;  %v7472_v47 = vadd.f32 %v7471_v51, %v21883_v15  ;;  %v12953_v36 = vpop.f32.mrb[215].mxu1 }
 0x893   : > { %v8502_v55 = vrot.slane %v8448_v33, 7  ;;  %v8610_v19 = vrot.slane %v8448_v33, 1  ;;  %v14304_v37 = vpack.i.bf16 %v8448_v33, %v8447_v38  ;;  %v8660_v59 = vsel %vm3175_vm2, %v8608_v6, %v8609_v41  ;;  %v20183_v6 = vpop.permute.xlu1 %8348  ;;  %v21886_v38 = vld [vmem:[#allocation10_spill] sm:$0xff] }
 0x894   : > { %v7961_v58 = vadd.f32 %v19726_v0, %v7900_v18  ;;  %v7901_v57 = vadd.f32 %v19979_v22, %v7472_v47  ;;  %v14309_v34 = vpack.i.bf16 %v8660_v59, %v8661_v62  ;;  %v20172_v31 = vsel %vm3042_vm13, %v8500_v28, %v8501_v2  ;;  %v21887_v28 = vld [vmem:[#allocation102_spill] sm:$0xff] }
 0x895   : > { %21884 = vst [vmem:[#allocation25_spill] sm:$0xff] %v20172_v31  ;;  %14305 = vrot.lane.b32.xlu1 %v14304_v37, %s14638_s28  ;;  %v8659_v17 = vsel %vm3175_vm2, %v8609_v41, %v8610_v19  ;;  %v20181_v36 = vsel %vm3042_vm13, %v8501_v2, %v8502_v55  ;;  %vm8395_vm0 = vcmp.eq.s32.totalorder %v21887_v28, 1  ;;  %v21888_v41 = vld [vmem:[#allocation41_spill] sm:$0xff]  ;;  %v21889_v18 = vld [vmem:[#allocation66_spill] sm:$0xff] }
 0x896   : > { %21885 = vst [vmem:[#allocation27_spill] sm:$0xff] %v20181_v36  ;;  %v8015_v22 = vadd.f32 %v7961_v58, %v21886_v38  ;;  %v7962_v62 = vadd.f32 %v19726_v0, %v7901_v57  ;;  %14310 = vrot.lane.b32.xlu0 %v14309_v34, %s14639_s19  ;;  %v21890_v37 = vld [vmem:[#allocation121_spill] sm:$0xff]  ;;  %v21891_v38 = vld [vmem:[#allocation42_spill] sm:$0xff] }
 0x897   : > { %v20174_v1 = vpop.f32.mrb[244].mxu0  ;;  %v7476_v50 = vpop.f32.mrb[216].mxu1  ;;  %vm8396_vm5 = vcmp.eq.s32.totalorder %v21890_v37, 1 }
 0x898   : > { %v13100_v27 = vpop.f32.mrb[245].mxu0  ;;  %v8449_v51 = vsel %vm8395_vm0, %v8015_v22, 0.0  ;;  %v8016_v33 = vadd.f32 %v7962_v62, %v21888_v41  ;;  %v7477_v2 = vadd.f32 %v7476_v50, %v21889_v18  ;;  %v12956_v47 = vpop.f32.mrb[217].mxu1  ;;  %v20201_v50 = vld [vmem:[%s21236_s7] ss:$0 sm:$0xff]  ;;  %vm8405_vm0 = vcmp.eq.s32.totalorder %v20063_v4, 1 }
 0x899   : > { %v20189_v23 = vpop.f32.mrb[246].mxu0  ;;  %v8503_v59 = vrot.slane %v8449_v51, 7  ;;  %v8611_v58 = vrot.slane %v8449_v51, 1  ;;  %v7479_v0 = vpop.f32.mrb[218].mxu1  ;;  %v21895_v47 = vld [vmem:[#allocation67_spill] sm:$0xff] }
 0x89a   : > { %v13101_v15 = vpop.f32.mrb[247].mxu0  ;;  %v8450_v57 = vsel %vm8396_vm5, %v8016_v33, 0.0  ;;  %v7902_v34 = vadd.f32 %v19994_v29, %v7477_v2  ;;  %v7480_v27 = vadd.f32 %v7479_v0, %v21891_v38  ;;  %v12957_v28 = vpop.f32.mrb[219].mxu1  ;;  %v14594_v4 = vld [vmem:[%s21237_s8 + $0x8] sm:$0xff]  }
 0x89b   : > { %v8504_v36 = vrot.slane %v8450_v57, 7  ;;  %v8612_v31 = vrot.slane %v8450_v57, 1  ;;  %v14314_v22 = vpack.i.bf16 %v8450_v57, %v8449_v51  ;;  %v8658_v62 = vsel %vm3175_vm2, %v8610_v19, %v8611_v58  ;;  %v20218_v15 = vpop.permute.xlu1 %8354 }
 0x89c   : > { %v7963_v41 = vadd.f32 %v20201_v50, %v7902_v34  ;;  %v7903_v33 = vadd.f32 %v20009_v7, %v7480_v27  ;;  %v14319_v18 = vpack.i.bf16 %v8658_v62, %v8659_v17  ;;  %v20207_v29 = vsel %vm3042_vm13, %v8502_v55, %v8503_v59  ;;  %21894 = vst [vmem:[#allocation29_spill] sm:$0xff] %v20218_v15  ;;  %v21896_v55 = vld [vmem:[#allocation105_spill] sm:$0xff] }
 0x89d   : > { %21892 = vst [vmem:[#allocation81_spill] sm:$0xff] %v20207_v29  ;;  %14315 = vrot.lane.b32.xlu0 %v14314_v22, %s14638_s28  ;;  %v8657_v19 = vsel %vm3175_vm2, %v8611_v58, %v8612_v31  ;;  %v20216_v51 = vsel %vm3042_vm13, %v8503_v59, %v8504_v36  ;;  %vm8397_vm14 = vcmp.eq.s32.totalorder %v21896_v55, 1  ;;  %v21897_v58 = vld [vmem:[#allocation11_spill] sm:$0xff]  ;;  %v21898_v27 = vld [vmem:[#allocation45_spill] sm:$0xff] }
 0x89e   : > { %21893 = vst [vmem:[#allocation82_spill] sm:$0xff] %v20216_v51  ;;  %v8017_v7 = vadd.f32 %v7963_v41, %v21895_v47  ;;  %v7964_v17 = vadd.f32 %v20201_v50, %v7903_v33  ;;  %14320 = vrot.lane.b32.xlu1 %v14319_v18, %s14639_s19  ;;  %v21899_v22 = vld [vmem:[#allocation123_spill] sm:$0xff]  ;;  %v20232_v33 = vld [vmem:[%s21237_s8] sm:$0xff]  }
 0x89f   : > { %v20209_v2 = vpop.f32.mrb[248].mxu0  ;;  %v7484_v57 = vpop.f32.mrb[220].mxu1  ;;  %vm8398_vm11 = vcmp.eq.s32.totalorder %v21899_v22, 1  ;;  %13178 = vmatprep.subr.bf16.mxu1 %v20232_v33 }
 0x8a0   : > { %v13104_v37 = vpop.f32.mrb[249].mxu0  ;;  %v8451_v34 = vsel %vm8397_vm14, %v8017_v7, 0.0  ;;  %v8018_v38 = vadd.f32 %v7964_v17, %v21897_v58  ;;  %v7485_v59 = vadd.f32 %v7484_v57, %v21898_v27  ;;  %v12960_v47 = vpop.f32.mrb[221].mxu1  ;;  %vm8407_vm14 = vcmp.eq.s32.totalorder %v20093_v49, 1 }
 0x8a1   : > { %v20224_v0 = vpop.f32.mrb[250].mxu0  ;;  %v8505_v62 = vrot.slane %v8451_v34, 7  ;;  %v8613_v41 = vrot.slane %v8451_v34, 1  ;;  %v7487_v55 = vpop.f32.mrb[222].mxu1 }
 0x8a2   : > { %v13105_v28 = vpop.f32.mrb[251].mxu0  ;;  %v8452_v18 = vsel %vm8398_vm11, %v8018_v38, 0.0  ;;  %v7904_v37 = vadd.f32 %v20024_v3, %v7485_v59  ;;  %v14181_v17 = vpop.permute.xlu0 %14180 }
 0x8a3   : > { %v8506_v7 = vrot.slane %v8452_v18, 7  ;;  %v8614_v51 = vrot.slane %v8452_v18, 1  ;;  %v12961_v58 = vpop.f32.mrb[223].mxu1  ;;  %v20236_v57 = vpop.permute.xlu1 %8360  ;;  %v21901_v28 = vld [vmem:[#allocation47_spill] sm:$0xff]  ;;  %v14324_v47 = vpack.i.bf16 %v8452_v18, %v8451_v34  ;;  %v8656_v29 = vsel %vm3175_vm2, %v8612_v31, %v8613_v41 }
 0x8a4   : > { %21900 = vst [vmem:[#allocation30_spill] sm:$0xff] %v20236_v57  ;;  %v7965_v27 = vadd.f32 %v20201_v50, %v7904_v37  ;;  %v7488_v22 = vadd.f32 %v7487_v55, %v21901_v28  ;;  %v14329_v3 = vpack.i.bf16 %v8656_v29, %v8657_v19  ;;  %v20248_v58 = vsel %vm3042_vm13, %v8504_v36, %v8505_v62  ;;  %v21904_v37 = vld [vmem:[#allocation12_spill] sm:$0xff] }
 0x8a5   : > { %v8655_v59 = vsel %vm3175_vm2, %v8613_v41, %v8614_v51  ;;  %21902 = vst [vmem:[#allocation83_spill] sm:$0xff] %v20248_v58  ;;  %v20252_v57 = vsel %vm3042_vm13, %v8505_v62, %v8506_v7  ;;  %v14182_v34 = vunpack.i.l.bf16 %v14181_v17  ;;  %14325 = vrot.lane.b32.xlu1 %v14324_v47, %s14638_s28  ;;  %v21905_v29 = vld [vmem:[#allocation108_spill] sm:$0xff]  ;;  %v14183_v19 = vunpack.i.h.bf16 %v14181_v17 }
 0x8a6   : > { %21903 = vst [vmem:[#allocation84_spill] sm:$0xff] %v20252_v57  ;;  %v8019_v55 = vadd.f32 %v7965_v27, %v21904_v37  ;;  %v7905_v18 = vadd.f32 %v20039_v5, %v7488_v22  ;;  %vm8399_vm6 = vcmp.eq.s32.totalorder %v21905_v29, 1  ;;  %14330 = vrot.lane.b32.xlu0 %v14329_v3, %s14639_s19  ;;  %v21906_v57 = vld [vmem:[#allocation39_spill] sm:$0xff] }
 0x8a7   : > { %v20242_v38 = vpop.f32.mrb[252].mxu0  ;;  %v7492_v36 = vpop.f32.mrb[224].mxu1  ;;  %v9123_v17 = vsel %vm3770_vm9, %v19774_v43, %v14182_v34  ;;  %v21908_v3 = vld [vmem:[#allocation43_spill] sm:$0xff] }
 0x8a8   : > { %v13108_v31 = vpop.f32.mrb[253].mxu0  ;;  %v8453_v28 = vsel %vm8399_vm6, %v8019_v55, 0.0  ;;  %v7966_v62 = vadd.f32 %v20201_v50, %v7905_v18  ;;  %v7493_v58 = vadd.f32 %v7492_v36, %v21906_v57  ;;  %v14186_v27 = vpop.permute.xlu1 %14185  ;;  %v9124_v57 = vsel %vm3770_vm9, %v19795_v25, %v14183_v19  ;;  %v21909_v36 = vld [vmem:[#allocation63_spill] sm:$0xff] }
 0x8a9   : > { %v20259_v41 = vpop.f32.mrb[254].mxu0  ;;  %v8507_v5 = vrot.slane %v8453_v28, 7  ;;  %v8615_v22 = vrot.slane %v8453_v28, 1  ;;  %v12964_v47 = vpop.f32.mrb[225].mxu1  ;;  %v14188_v18 = vunpack.i.h.bf16 %v14186_v27  ;;  %vm8409_vm6 = vcmp.eq.s32.totalorder %v20123_v12, 1 }
 0x8aa   : > { %v13109_v37 = vpop.f32.mrb[255].mxu0  ;;  %v8020_v31 = vadd.f32 %v7966_v62, %v21908_v3  ;;  %v7906_v55 = vadd.f32 %v20054_v26, %v7493_v58  ;;  %v7495_v29 = vpop.f32.mrb[226].mxu1 }
 0x8ab   : > { %v7496_v37 = vadd.f32 %v7495_v29, %v21909_v36  ;;  %v12965_v52 = vpop.f32.mrb[227].mxu1  ;;  %v8654_v47 = vsel %vm3175_vm2, %v8614_v51, %v8615_v22  ;;  %v20279_v26 = vsel %vm3042_vm13, %v8506_v7, %v8507_v5  ;;  %v21911_v51 = vld [vmem:[#allocation46_spill] sm:$0xff]  ;;  %v14187_v29 = vunpack.i.l.bf16 %v14186_v27 }
 0x8ac   : > { %v20274_v24 = vsel %vm8400_vm7, %v8020_v31, 0.0  ;;  %v7967_v15 = vadd.f32 %v20201_v50, %v7906_v55  ;;  %v14191_v43 = vpop.permute.xlu1 %14190  ;;  %v14339_v34 = vpack.i.bf16 %v8654_v47, %v8655_v59  ;;  %21910 = vst [vmem:[#allocation34_spill] sm:$0xff] %v20279_v26  ;;  %v21913_v27 = vld [vmem:[#allocation110_spill] sm:$0xff] }
 0x8ad   : > { %v8508_v58 = vrot.slane %v20274_v24, 7  ;;  %v8616_v25 = vrot.slane %v20274_v24, 1  ;;  %v7907_v19 = vadd.f32 %v20068_v40, %v7496_v37  ;;  %v14193_v62 = vunpack.i.h.bf16 %v14191_v43 }
 0x8ae   : > { %v8021_v31 = vadd.f32 %v7967_v15, %v21911_v51  ;;  %v14192_v36 = vunpack.i.l.bf16 %v14191_v43  ;;  %v14334_v55 = vpack.i.bf16 %v20274_v24, %v8453_v28  ;;  %14340 = vrot.lane.b32.xlu1 %v14339_v34, %s14639_s19  ;;  %vm8402_vm8 = vcmp.eq.s32.totalorder %v21913_v27, 1 }
 0x8af   : > { %v20284_v3 = vpop.f32.mrb[0].mxu0  ;;  %v7968_v7 = vadd.f32 %v20201_v50, %v7907_v19  ;;  %v9178_v52 = vsel %vm3837_vm10, %v9124_v57, %v14193_v62  ;;  %v7500_v26 = vpop.f32.mrb[228].mxu1  ;;  %v8653_v40 = vsel %vm3175_vm2, %v8615_v22, %v8616_v25  ;;  %v20297_v15 = vsel %vm3042_vm13, %v8507_v5, %v8508_v58  ;;  %v21914_v57 = vld [vmem:[#allocation57_spill] sm:$0xff] }
 0x8b0   : > { %v13112_v59 = vpop.f32.mrb[1].mxu0  ;;  %21912 = vst [vmem:[#allocation32_spill] sm:$0xff] %v20297_v15  ;;  %v8455_v24 = vsel %vm8401_vm1, %v8021_v31, 0.0  ;;  %v9177_v28 = vsel %vm3837_vm10, %v9123_v17, %v14192_v36  ;;  %14335 = vrot.lane.b32.xlu0 %v14334_v55, %s14638_s28  ;;  %v7501_v37 = vadd.f32 %v7500_v26, %v21914_v57  ;;  %v14196_v43 = vpop.permute.xlu0 %14195  ;;  %v21915_v19 = vld [vmem:[#allocation13_spill] sm:$0xff]  ;;  %v9125_v17 = vsel %vm3770_vm9, %v19815_v13, %v14187_v29 }
 0x8b1   : > { %v20291_v47 = vpop.f32.mrb[2].mxu0  ;;  %v8617_v22 = vrot.slane %v8455_v24, 1  ;;  %v8022_v62 = vadd.f32 %v7968_v7, %v21915_v19  ;;  %v20307_v5 = vpack.c.bf16 %v9178_v52, %v9177_v28  ;;  %v12968_v51 = vpop.f32.mrb[229].mxu1  ;;  %v21916_v59 = vld [vmem:[#allocation112_spill] sm:$0xff]  ;;  %v8509_v53 = vrot.slane %v8455_v24, 7  ;;  %v21917_v52 = vld [vmem:[#allocation69_spill] sm:$0xff] }
 0x8b2   : > { %v13113_v34 = vpop.f32.mrb[3].mxu0  ;;  %vm8404_vm4 = vcmp.eq.s32.totalorder %v21916_v59, 1  ;;  %v9126_v31 = vsel %vm3770_vm9, %v19827_v61, %v14188_v18  ;;  %v7908_v26 = vadd.f32 %v20084_v54, %v7501_v37  ;;  %v7503_v36 = vpop.f32.mrb[230].mxu1  ;;  %v14198_v7 = vunpack.i.h.bf16 %v14196_v43 }
 0x8b3   : > { %v20317_v55 = vsel %vm8402_vm8, %v8022_v62, 0.0  ;;  %v7504_v28 = vadd.f32 %v7503_v36, %v21917_v52  ;;  %v12969_v57 = vpop.f32.mrb[231].mxu1  ;;  %v8652_v34 = vsel %vm3175_vm2, %v8616_v25, %v8617_v22  ;;  %v14197_v18 = vunpack.i.l.bf16 %v14196_v43  ;;  %v21918_v36 = vld [vmem:[#allocation14_spill] sm:$0xff] }
 0x8b4   : > { %v8618_v13 = vrot.slane %v20317_v55, 1  ;;  %v7969_v61 = vadd.f32 %v20201_v50, %v7908_v26  ;;  %v14201_v54 = vpop.permute.xlu0 %14200  ;;  %v9306_v51 = vrot.slane %v20307_v5, 4  ;;  %v14344_v25 = vpack.i.bf16 %v20317_v55, %v8455_v24 }
 0x8b5   : > { %v7909_v29 = vadd.f32 %v20099_v45, %v7504_v28  ;;  %v14203_v27 = vunpack.i.h.bf16 %v14201_v54  ;;  %v14202_v37 = vunpack.i.l.bf16 %v14201_v54  ;;  %v14349_v19 = vpack.i.bf16 %v8652_v34, %v8653_v40 }
 0x8b6   : > { %v8023_v52 = vadd.f32 %v7969_v61, %v21918_v36  ;;  %v20333_v15 = vsel %vm3175_vm2, %v8617_v22, %v8618_v13  ;;  %v20343_v24 = vsel %vm3042_vm13, %v8508_v58, %v8509_v53  ;;  %14345 = vrot.lane.b32.xlu1 %v14344_v25, %s14638_s28  ;;  %v9127_v56 = vsel %vm3770_vm9, %v19849_v16, %v14197_v18 }
 0x8b7   : > { %v20326_v62 = vpop.f32.mrb[4].mxu0  ;;  %v7970_v45 = vadd.f32 %v20201_v50, %v7909_v29  ;;  %v9180_v43 = vsel %vm3837_vm10, %v9126_v31, %v14203_v27  ;;  %v9179_v26 = vsel %vm3837_vm10, %v9125_v17, %v14202_v37  ;;  %v7508_v54 = vpop.f32.mrb[232].mxu1  ;;  %14350 = vrot.lane.b32.xlu0 %v14349_v19, %s14639_s19  ;;  %v21919_v31 = vld [vmem:[#allocation31_spill] sm:$0xff]  ;;  %v21920_v29 = vrot.slane %v20317_v55, 7  ;;  %v21921_v37 = vld [vmem:[#allocation49_spill] sm:$0xff] }
 0x8b8   : > { %v13116_v57 = vpop.f32.mrb[5].mxu0  ;;  %v20347_v40 = vsel %vm8403_vm12, %v8023_v52, 0.0  ;;  %v20349_v22 = vpack.c.bf16 %v9180_v43, %v9179_v26  ;;  %v7509_v34 = vadd.f32 %v7508_v54, %v21919_v31  ;;  %v14206_v17 = vpop.permute.xlu0 %14205  ;;  %v9128_v27 = vsel %vm3770_vm9, %v19858_v63, %v14198_v7  ;;  %v21923_v63 = vld [vmem:[#allocation48_spill] sm:$0xff] }
 0x8b9   : > { %v20339_v28 = vpop.f32.mrb[6].mxu0  ;;  %v20358_v58 = vsel %vm3042_vm13, %v8509_v53, %v21920_v29  ;;  %v8024_v36 = vadd.f32 %v7970_v45, %v21921_v37  ;;  %v14208_v52 = vunpack.i.h.bf16 %v14206_v17  ;;  %v12972_v19 = vpop.f32.mrb[233].mxu1  ;;  %v21922_v57 = vld [vmem:[#allocation114_spill] sm:$0xff]  ;;  %v8619_v43 = vrot.slane %v20347_v40, 1 }
 0x8ba   : > { %v13117_v61 = vpop.f32.mrb[7].mxu0  ;;  %v14211_v25 = vpop.permute.xlu1 %14210  ;;  %vm8406_vm5 = vcmp.eq.s32.totalorder %v21922_v57, 1  ;;  %v7910_v26 = vadd.f32 %v20114_v44, %v7509_v34  ;;  %v9307_v45 = vrot.slane %v20349_v22, 4  ;;  %v14207_v19 = vunpack.i.l.bf16 %v14206_v17 }
 0x8bb   : > { %v14213_v54 = vunpack.i.h.bf16 %v14211_v25  ;;  %v14212_v53 = vunpack.i.l.bf16 %v14211_v25  ;;  %v7511_v31 = vpop.f32.mrb[234].mxu1  ;;  %v21393_v61 = vrot.slane %v20347_v40, 7  ;;  %v20371_v16 = vsel %vm8404_vm4, %v8024_v36, 0.0 }
 0x8bc   : > { %v7512_v7 = vadd.f32 %v7511_v31, %v21923_v63  ;;  %v12973_v18 = vpop.f32.mrb[235].mxu1  ;;  %v8620_v29 = vrot.slane %v20371_v16, 1  ;;  %v7971_v37 = vadd.f32 %v20201_v50, %v7910_v26  ;;  %v9130_v44 = vsel %vm3770_vm9, %v19889_v14, %v14208_v52  ;;  %v21924_v31 = vld [vmem:[#allocation15_spill] sm:$0xff] }
 0x8bd   : > { %v9182_v34 = vsel %vm3837_vm10, %v9128_v27, %v14213_v54  ;;  %v9181_v25 = vsel %vm3837_vm10, %v9127_v56, %v14212_v53  ;;  %v9308_v36 = vsel %vm3993_vm15, %v9306_v51, %v9307_v45  ;;  %v14354_v17 = vpack.i.bf16 %v20371_v16, %v20347_v40 }
 0x8be   : > { %v7911_v59 = vadd.f32 %v20129_v39, %v7512_v7  ;;  %v8025_v63 = vadd.f32 %v7971_v37, %v21924_v31  ;;  %v20384_v18 = vpack.c.bf16 %v9182_v34, %v9181_v25  ;;  %13130 = vmatprep.mubr.msk.bf16.mxu1 %vm4091_vm3, %v9308_v36  ;;  %v8650_v14 = vsel %vm3175_vm2, %v8618_v13, %v8619_v43  ;;  %v21926_v7 = vld [vmem:[#allocation68_spill] sm:$0xff] }
 0x8bf   : > { %v14359_v39 = vpack.i.bf16 %v8650_v14, %v20333_v15  ;;  %v7516_v27 = vpop.f32.mrb[236].mxu1  ;;  %v14216_v51 = vpop.permute.xlu1 %14215  ;;  %v8649_v52 = vsel %vm3175_vm2, %v8619_v43, %v8620_v29  ;;  %v21925_v26 = vrot.slane %v20317_v55, 7  ;;  %v8512_v13 = vrot.slane %v20371_v16, 7  ;;  %14355 = vrot.lane.b32.xlu0 %v14354_v17, %s14638_s28 }
 0x8c0   : > { %v7972_v56 = vadd.f32 %v20201_v50, %v7911_v59  ;;  %v8459_v53 = vsel %vm8405_vm0, %v8025_v63, 0.0  ;;  %v9309_v15 = vrot.slane %v20384_v18, 4  ;;  %v7517_v37 = vadd.f32 %v7516_v27, %v21926_v7  ;;  %v12976_v43 = vpop.f32.mrb[237].mxu1  ;;  %v14221_v34 = vpop.permute.xlu0 %14220  ;;  %v21927_v59 = vld [vmem:[#allocation16_spill] sm:$0xff]  ;;  %v21929_v7 = vld [vmem:[#allocation91_spill] sm:$0xff] }
 0x8c1   : > { %v20402_v54 = vsel %vm3042_vm13, %v21925_v26, %v21393_v61  ;;  %v8621_v25 = vrot.slane %v8459_v53, 1  ;;  %v9129_v55 = vsel %vm3770_vm9, %v19880_v20, %v14207_v19  ;;  %14360 = vrot.lane.b32.xlu1 %v14359_v39, %s14639_s19  ;;  %v14218_v16 = vunpack.i.h.bf16 %v14216_v51  ;;  %v7519_v31 = vpop.f32.mrb[238].mxu1  ;;  %v21928_v63 = vld [vmem:[#allocation116_spill] sm:$0xff] }
 0x8c2   : > { %v8026_v36 = vadd.f32 %v7972_v56, %v21927_v59  ;;  %vm8408_vm11 = vcmp.eq.s32.totalorder %v21928_v63, 1  ;;  %v8513_v17 = vrot.slane %v8459_v53, 7  ;;  %v9310_v14 = vsel %vm3993_vm15, %v9307_v45, %v9309_v15  ;;  %v12977_v19 = vpop.f32.mrb[239].mxu1 }
 0x8c3   : > { %v7912_v27 = vadd.f32 %v20144_v46, %v7517_v37  ;;  %v14223_v20 = vunpack.i.h.bf16 %v14221_v34  ;;  %v14217_v39 = vunpack.i.l.bf16 %v14216_v51  ;;  %v14222_v26 = vunpack.i.l.bf16 %v14221_v34  ;;  %13131 = vmatmul.mubr.msk.bf16.vlgmr.msra.gmra.mrb[4].mxu1 %vm4091_vm3, %v9310_v14 }
 0x8c4   : > { %v20424_v56 = vsel %vm8406_vm5, %v8026_v36, 0.0  ;;  %v7520_v43 = vadd.f32 %v7519_v31, %v21929_v7  ;;  %13179 = vmatpush3.bf16.msra.mxu1 %v20232_v33  ;;  %v8648_v34 = vsel %vm3175_vm2, %v8620_v29, %v8621_v25  ;;  %v14595_v36 = vld [vmem:[%s21237_s8 + $0x10] sm:$0xff]   ;;  %v21930_v31 = vld [vmem:[#allocation18_spill] sm:$0xff]  ;;  %v21932_v7 = vld [vmem:[#allocation93_spill] sm:$0xff]  ;;  %vm8411_vm8 = vcmp.eq.s32.totalorder %v20153_v10, 1 }
 0x8c5   : > { %v8514_v59 = vrot.slane %v20424_v56, 7  ;;  %v8622_v61 = vrot.slane %v20424_v56, 1  ;;  %v7973_v45 = vadd.f32 %v20201_v50, %v7912_v27  ;;  %v9184_v46 = vsel %vm3837_vm10, %v9130_v44, %v14223_v20  ;;  %13180 = vmatprep.subr.bf16.mxu1 %v14594_v4 }
 0x8c6   : > { %v9183_v57 = vsel %vm3837_vm10, %v9129_v55, %v14222_v26  ;;  %v7913_v37 = vadd.f32 %v20159_v30, %v7520_v43  ;;  %v14364_v51 = vpack.i.bf16 %v20424_v56, %v8459_v53  ;;  %v14369_v44 = vpack.i.bf16 %v8648_v34, %v8649_v52 }
 0x8c7   : > { %v8027_v14 = vadd.f32 %v7973_v45, %v21930_v31  ;;  %v20442_v27 = vpack.c.bf16 %v9184_v46, %v9183_v57  ;;  %v20446_v33 = vsel %vm3175_vm2, %v8621_v25, %v8622_v61  ;;  %v7524_v29 = vpop.f32.mrb[240].mxu1  ;;  %v14226_v53 = vpop.permute.xlu0 %14225  ;;  %v21931_v55 = vrot.slane %v20347_v40, 7  ;;  %v21933_v46 = vld [vmem:[#allocation51_spill] sm:$0xff] }
 0x8c8   : > { %v7974_v30 = vadd.f32 %v20201_v50, %v7913_v37  ;;  %14365 = vrot.lane.b32.xlu1 %v14364_v51, %s14638_s28  ;;  %v20459_v52 = vsel %vm3042_vm13, %v8512_v13, %v8513_v17  ;;  %v20465_v25 = vsel %vm3042_vm13, %v8513_v17, %v8514_v59  ;;  %v9131_v40 = vsel %vm3770_vm9, %v19908_v21, %v14217_v39  ;;  %v12980_v43 = vpop.f32.mrb[241].mxu1  ;;  %v14231_v45 = vpop.permute.xlu1 %14230  ;;  %v20479_v21 = vld [vmem:[%s21230_s1 + $0x1f0] sm:$0xff] }
 0x8c9   : > { %v20455_v20 = vsel %vm3042_vm13, %v21931_v55, %v8512_v13  ;;  %v8461_v19 = vsel %vm8407_vm14, %v8027_v14, 0.0  ;;  %v9132_v26 = vsel %vm3770_vm9, %v19917_v48, %v14218_v16  ;;  %14370 = vrot.lane.b32.xlu0 %v14369_v44, %s14639_s19  ;;  %v7525_v13 = vadd.f32 %v7524_v29, %v21932_v7  ;;  %13181 = vmatpush3.bf16.msra.mxu1 %v14594_v4  ;;  %v7527_v49 = vpop.f32.mrb[242].mxu1  ;;  %v21934_v48 = vld [vmem:[#allocation118_spill] sm:$0xff] }
 0x8ca   : > { %v8028_v57 = vadd.f32 %v7974_v30, %v21933_v46  ;;  %v14228_v17 = vunpack.i.h.bf16 %v14226_v53  ;;  %v14227_v37 = vunpack.i.l.bf16 %v14226_v53  ;;  %v14233_v51 = vunpack.i.h.bf16 %v14231_v45  ;;  %13182 = vmatprep.subr.bf16.mxu1 %v14595_v36  ;;  %v12981_v4 = vpop.f32.mrb[243].mxu1  ;;  %v21935_v30 = vld [vmem:[#allocation94_spill] sm:$0xff]  ;;  %v21936_v46 = vld [vmem:[#allocation20_spill] sm:$0xff] }
 0x8cb   : > { %vm8410_vm7 = vcmp.eq.s32.totalorder %v21934_v48, 1  ;;  %v8515_v16 = vrot.slane %v8461_v19, 7  ;;  %v8623_v39 = vrot.slane %v8461_v19, 1  ;;  %v7914_v34 = vadd.f32 %v20174_v1, %v7525_v13 }
 0x8cc   : > { %v14232_v31 = vunpack.i.l.bf16 %v14231_v45  ;;  %v20485_v14 = vsel %vm8408_vm11, %v8028_v57, 0.0  ;;  %v9186_v44 = vsel %vm3837_vm10, %v9132_v26, %v14233_v51  ;;  %v7528_v29 = vadd.f32 %v7527_v49, %v21935_v30  ;;  %v21938_v30 = vld [vmem:[#allocation52_spill] sm:$0xff] }
 0x8cd   : > { %v9311_v53 = vrot.slane %v20442_v27, 4  ;;  %v8516_v55 = vrot.slane %v20485_v14, 7  ;;  %v8624_v7 = vrot.slane %v20485_v14, 1  ;;  %v7975_v43 = vadd.f32 %v20201_v50, %v7914_v34  ;;  %13183 = vmatpush3.bf16.msra.mxu1 %v14595_v36 }
 0x8ce   : > { %v9185_v1 = vsel %vm3837_vm10, %v9131_v40, %v14232_v31  ;;  %vm8148_vm1 = vcmp.gt.f32.partialorder %v20479_v21, 0.0  ;;  %v7915_v13 = vadd.f32 %v20189_v23, %v7528_v29  ;;  %v14374_v45 = vpack.i.bf16 %v20485_v14, %v8461_v19  ;;  %v21937_v31 = vld [vmem:[#allocation96_spill] sm:$0xff]  ;;  %v21944_v21 = vld [vmem:[#allocation53_spill] sm:$0xff] }
 0x8cf   : > { %v20495_v63 = vpack.c.bf16 %v9186_v44, %v9185_v1  ;;  %v9312_v26 = vsel %vm3993_vm15, %v9309_v15, %v9311_v53  ;;  %v8029_v57 = vadd.f32 %v7975_v43, %v21936_v46  ;;  %v8646_v40 = vsel %vm3175_vm2, %v8622_v61, %v8623_v39  ;;  %v7532_v61 = vpop.f32.mrb[244].mxu1  ;;  %v14236_v49 = vpop.permute.xlu1 %14235  ;;  %v21940_v46 = vld [vmem:[#allocation97_spill] sm:$0xff] }
 0x8d0   : > { %13134 = vmatprep.mubr.msk.bf16.mxu1 %vm4091_vm3, %v9312_v26  ;;  %v8645_v36 = vsel %vm3175_vm2, %v8623_v39, %v8624_v7  ;;  %v20512_v23 = vsel %vm3042_vm13, %v8514_v59, %v8515_v16  ;;  %v7976_v19 = vadd.f32 %v20201_v50, %v7915_v13  ;;  %14375 = vrot.lane.b32.xlu0 %v14374_v45, %s14638_s28  ;;  %v12984_v14 = vpop.f32.mrb[245].mxu1  ;;  %v14241_v44 = vpop.permute.xlu0 %14240  ;;  %v14238_v12 = vunpack.i.h.bf16 %v14236_v49 }
 0x8d1   : > { %v9313_v15 = vrot.slane %v20495_v63, 4  ;;  %v14379_v51 = vpack.i.bf16 %v8646_v40, %v20446_v33  ;;  %v20521_v39 = vsel %vm3042_vm13, %v8515_v16, %v8516_v55  ;;  %v8463_v56 = vsel %vm8409_vm6, %v8029_v57, 0.0  ;;  %v7535_v43 = vpop.f32.mrb[246].mxu1  ;;  %v21941_v14 = vld [vmem:[#allocation22_spill] sm:$0xff] }
 0x8d2   : > { %v9133_v59 = vsel %vm3770_vm9, %v19936_v60, %v14227_v37  ;;  %v9134_v34 = vsel %vm3770_vm9, %v19945_v42, %v14228_v17  ;;  %v7533_v4 = vadd.f32 %v7532_v61, %v21937_v31  ;;  %v8625_v33 = vrot.slane %v8463_v56, 1  ;;  %v14596_v60 = vld [vmem:[%s21237_s8 + $0x18] sm:$0xff]   ;;  %v21939_v42 = vld [vmem:[#allocation120_spill] sm:$0xff]  ;;  %v12985_v26 = vpop.f32.mrb[247].mxu1 }
 0x8d3   : > { %v8030_v29 = vadd.f32 %v7976_v19, %v21938_v30  ;;  %v9314_v16 = vsel %vm3993_vm15, %v9311_v53, %v9313_v15  ;;  %14380 = vrot.lane.b32.xlu1 %v14379_v51, %s14639_s19  ;;  %vm8412_vm12 = vcmp.eq.s32.totalorder %v21939_v42, 1  ;;  %v8517_v17 = vrot.slane %v8463_v56, 7  ;;  %13184 = vmatprep.subr.bf16.mxu1 %v14596_v60 }
 0x8d4   : > { %v7916_v37 = vadd.f32 %v20209_v2, %v7533_v4  ;;  %v14237_v1 = vunpack.i.l.bf16 %v14236_v49  ;;  %v14243_v13 = vunpack.i.h.bf16 %v14241_v44  ;;  %13135 = vmatmul.mubr.msk.bf16.gmra.mrb[8].mxu1 %vm4091_vm3, %v9314_v16  ;;  %v14242_v45 = vunpack.i.l.bf16 %v14241_v44 }
 0x8d5   : > { %v8464_v53 = vsel %vm8410_vm7, %v8030_v29, 0.0  ;;  %v7536_v57 = vadd.f32 %v7535_v43, %v21940_v46  ;;  %v8644_v40 = vsel %vm3175_vm2, %v8624_v7, %v8625_v33  ;;  %13185 = vmatpush3.bf16.msra.mxu1 %v14596_v60  ;;  %v20557_v29 = vsel %vm3042_vm13, %v8516_v55, %v8517_v17  ;;  %v21943_v60 = vld [vmem:[#allocation99_spill] sm:$0xff] }
 0x8d6   : > { %v8518_v19 = vrot.slane %v8464_v53, 7  ;;  %v8626_v51 = vrot.slane %v8464_v53, 1  ;;  %v7977_v61 = vadd.f32 %v20201_v50, %v7916_v37  ;;  %v9188_v2 = vsel %vm3837_vm10, %v9134_v34, %v14243_v13 }
 0x8d7   : > { %v9187_v49 = vsel %vm3837_vm10, %v9133_v59, %v14242_v45  ;;  %v7917_v31 = vadd.f32 %v20224_v0, %v7536_v57  ;;  %v14384_v48 = vpack.i.bf16 %v8464_v53, %v8463_v56  ;;  %v14389_v4 = vpack.i.bf16 %v8644_v40, %v8645_v36  ;;  %v7540_v0 = vpop.f32.mrb[248].mxu1  ;;  %v14246_v36 = vpop.permute.xlu0 %14245  ;;  %v21945_v40 = vld [vmem:[#allocation122_spill] sm:$0xff] }
 0x8d8   : > { %v8031_v44 = vadd.f32 %v7977_v61, %v21941_v14  ;;  %v20551_v30 = vpack.c.bf16 %v9188_v2, %v9187_v49  ;;  %v8643_v7 = vsel %vm3175_vm2, %v8625_v33, %v8626_v51  ;;  %vm8413_vm4 = vcmp.eq.s32.totalorder %v20183_v6, 1  ;;  %v12988_v13 = vpop.f32.mrb[249].mxu1  ;;  %v14251_v26 = vpop.permute.xlu1 %14250  ;;  %v21946_v49 = vld [vmem:[#allocation101_spill] sm:$0xff] }
 0x8d9   : > { %v7978_v34 = vadd.f32 %v20201_v50, %v7917_v31  ;;  %14385 = vrot.lane.b32.xlu1 %v14384_v48, %s14638_s28  ;;  %14390 = vrot.lane.b32.xlu0 %v14389_v4, %s14639_s19  ;;  %v21942_v56 = vmov 0   ;;  %v20570_v33 = vsel %vm3042_vm13, %v8517_v17, %v8518_v19  ;;  %v9135_v16 = vsel %vm3770_vm9, %v19964_v9, %v14237_v1  ;;  %v7543_v17 = vpop.f32.mrb[250].mxu1 }
 0x8da   : > { %v20566_v59 = vsel %vm8148_vm1, 1, %v21942_v56  ;;  %v8465_v55 = vsel %vm8411_vm8, %v8031_v44, 0.0  ;;  %v9136_v43 = vsel %vm3770_vm9, %v19973_v35, %v14238_v12  ;;  %v7541_v37 = vadd.f32 %v7540_v0, %v21943_v60  ;;  %v12989_v1 = vpop.f32.mrb[251].mxu1  ;;  %v21947_v56 = vld [vmem:[#allocation24_spill] sm:$0xff] }
 0x8db   : > { %v8032_v53 = vadd.f32 %v7978_v34, %v21944_v21  ;;  %v14248_v45 = vunpack.i.h.bf16 %v14246_v36  ;;  %v14247_v46 = vunpack.i.l.bf16 %v14246_v36  ;;  %v14253_v57 = vunpack.i.h.bf16 %v14251_v26 }
 0x8dc   : > { %vm8414_vm0 = vcmp.eq.s32.totalorder %v21945_v40, 1  ;;  %v8519_v10 = vrot.slane %v8465_v55, 7  ;;  %v8627_v61 = vrot.slane %v8465_v55, 1  ;;  %v7918_v2 = vadd.f32 %v20242_v38, %v7541_v37 }
 0x8dd   : > { %v14252_v9 = vunpack.i.l.bf16 %v14251_v26  ;;  %v20584_v35 = vsel %vm8412_vm12, %v8032_v53, 0.0  ;;  %v9190_v12 = vsel %vm3837_vm10, %v9136_v43, %v14253_v57  ;;  %v7544_v31 = vadd.f32 %v7543_v17, %v21946_v49  ;;  %v21948_v57 = vld [vmem:[#allocation103_spill] sm:$0xff] }
 0x8de   : > { %v9315_v48 = vrot.slane %v20551_v30, 4  ;;  %v8520_v4 = vrot.slane %v20584_v35, 7  ;;  %v8628_v14 = vrot.slane %v20584_v35, 1  ;;  %v7979_v44 = vadd.f32 %v20201_v50, %v7918_v2 }
 0x8df   : > { %v9189_v38 = vsel %vm3837_vm10, %v9135_v16, %v14252_v9  ;;  %v7919_v42 = vadd.f32 %v20259_v41, %v7544_v31  ;;  %v14394_v36 = vpack.i.bf16 %v20584_v35, %v8465_v55  ;;  %v8642_v60 = vsel %vm3175_vm2, %v8626_v51, %v8627_v61  ;;  %v7548_v13 = vpop.f32.mrb[252].mxu1  ;;  %v14256_v26 = vpop.permute.xlu1 %14255  ;;  %v21949_v9 = vld [vmem:[#allocation54_spill] sm:$0xff] }
 0x8e0   : > { %v20593_v34 = vpack.c.bf16 %v9190_v12, %v9189_v38  ;;  %v9316_v0 = vsel %vm3993_vm15, %v9313_v15, %v9315_v48  ;;  %v8033_v43 = vadd.f32 %v7979_v44, %v21947_v56  ;;  %v8641_v16 = vsel %vm3175_vm2, %v8627_v61, %v8628_v14  ;;  %v12992_v61 = vpop.f32.mrb[253].mxu1  ;;  %v14261_v2 = vpop.permute.xlu0 %14260  ;;  %v21950_v44 = vld [vmem:[#allocation104_spill] sm:$0xff] }
 0x8e1   : > { %13138 = vmatprep.mubr.msk.bf16.mxu1 %vm4091_vm3, %v9316_v0  ;;  %v20608_v37 = vsel %vm3042_vm13, %v8518_v19, %v8519_v10  ;;  %v7980_v15 = vadd.f32 %v20201_v50, %v7919_v42  ;;  %14395 = vrot.lane.b32.xlu0 %v14394_v36, %s14638_s28  ;;  %v14399_v55 = vpack.i.bf16 %v8642_v60, %v8643_v7  ;;  %v14258_v6 = vunpack.i.h.bf16 %v14256_v26  ;;  %v7551_v35 = vpop.f32.mrb[254].mxu1  ;;  %v21954_v61 = vld [vmem:[#allocation75_spill] sm:$0xff] }
 0x8e2   : > { %v9317_v41 = vrot.slane %v20593_v34, 4  ;;  %v20615_v21 = vsel %vm3042_vm13, %v8519_v10, %v8520_v4  ;;  %v8467_v51 = vsel %vm8413_vm4, %v8033_v43, 0.0  ;;  %v9137_v19 = vsel %vm3770_vm9, %v19992_v11, %v14247_v46  ;;  %v14597_v11 = vld [vmem:[%s21237_s8 + $0x20] sm:$0xff]   ;;  %v12993_v49 = vpop.f32.mrb[255].mxu1 }
 0x8e3   : > { %v9138_v53 = vsel %vm3770_vm9, %v20001_v32, %v14248_v45  ;;  %v7549_v17 = vadd.f32 %v7548_v13, %v21948_v57  ;;  %v8629_v7 = vrot.slane %v8467_v51, 1  ;;  %v8034_v1 = vadd.f32 %v7980_v15, %v21949_v9  ;;  %14400 = vrot.lane.b32.xlu1 %v14399_v55, %s14639_s19  ;;  %13186 = vmatprep.subr.bf16.mxu1 %v14597_v11  ;;  %v21951_v55 = vld [vmem:[#allocation26_spill] sm:$0xff]  ;;  %v21957_v49 = vld [vmem:[#allocation76_spill] sm:$0xff] }
 0x8e4   : > { %v9318_v10 = vsel %vm3993_vm15, %v9315_v48, %v9317_v41  ;;  %v8521_v32 = vrot.slane %v8467_v51, 7  ;;  %v14257_v46 = vunpack.i.l.bf16 %v14256_v26  ;;  %v14263_v12 = vunpack.i.h.bf16 %v14261_v2  ;;  %13187 = vmatpush3.bf16.msra.mxu1 %v14597_v11 }
 0x8e5   : > { %v7920_v45 = vadd.f32 %v20284_v3, %v7549_v17  ;;  %13139 = vmatmul.mubr.msk.bf16.gmra.mrb[12].mxu1 %vm4091_vm3, %v9318_v10  ;;  %v8468_v31 = vsel %vm8414_vm0, %v8034_v1, 0.0  ;;  %v14262_v48 = vunpack.i.l.bf16 %v14261_v2  ;;  %v7552_v38 = vadd.f32 %v7551_v35, %v21950_v44  ;;  %v21956_v35 = vld [vmem:[#allocation55_spill] sm:$0xff] }
 0x8e6   : > { %v8640_v42 = vsel %vm3175_vm2, %v8628_v14, %v8629_v7  ;;  %v8522_v0 = vrot.slane %v8468_v31, 7  ;;  %v8630_v36 = vrot.slane %v8468_v31, 1  ;;  %v9192_v3 = vsel %vm3837_vm10, %v9138_v53, %v14263_v12  ;;  %v21952_v53 = vld [vmem:[#allocation29_spill] sm:$0xff]  ;;  %v21958_v44 = vld [vmem:[#allocation107_spill] sm:$0xff] }
 0x8e7   : > { %v7981_v56 = vadd.f32 %v20201_v50, %v7920_v45  ;;  %v9191_v43 = vsel %vm3837_vm10, %v9137_v19, %v14262_v48  ;;  %v7921_v60 = vadd.f32 %v20291_v47, %v7552_v38  ;;  %8363 = vperm.xlu1 %13548, %v20566_v59   ;;  %v14404_v40 = vpack.i.bf16 %v8640_v42, %v8641_v16  ;;  %v7556_v47 = vpop.f32.mrb[0].mxu1  ;;  %v14266_v59 = vpop.permute.xlu1 %14265 }
 0x8e8   : > { %v14409_v15 = vpack.i.bf16 %v8468_v31, %v8467_v51  ;;  %v20645_v26 = vpack.c.bf16 %v9192_v3, %v9191_v43  ;;  %v8639_v14 = vsel %vm3175_vm2, %v8629_v7, %v8630_v36  ;;  %v20651_v57 = vsel %vm3042_vm13, %v8520_v4, %v8521_v32  ;;  %v21953_v51 = vld [vmem:[#allocation124_spill] sm:$0xff]  ;;  %v21955_v4 = vld [vmem:[#allocation106_spill] sm:$0xff]  ;;  %v12996_v9 = vpop.f32.mrb[1].mxu1 }
 0x8e9   : > { %v8035_v13 = vadd.f32 %v7981_v56, %v21951_v55  ;;  %vm8415_vm5 = vcmp.eq.s32.totalorder %v21952_v53, 1  ;;  %v7982_v19 = vadd.f32 %v20201_v50, %v7921_v60  ;;  %14405 = vrot.lane.b32.xlu0 %v14404_v40, %s14639_s19  ;;  %v20658_v16 = vsel %vm3042_vm13, %v8521_v32, %v8522_v0  ;;  %v7559_v45 = vpop.f32.mrb[2].mxu1  ;;  %v21959_v53 = vld [vmem:[#allocation28_spill] sm:$0xff] }
 0x8ea   : > { %vm8416_vm14 = vcmp.eq.s32.totalorder %v21953_v51, 1  ;;  %v9139_v2 = vsel %vm3770_vm9, %v21954_v61, %v14257_v46  ;;  %v7557_v7 = vadd.f32 %v7556_v47, %v21955_v4  ;;  %v9319_v12 = vrot.slane %v20645_v26, 4  ;;  %v12997_v42 = vpop.f32.mrb[3].mxu1  ;;  %v21960_v51 = vld [vmem:[#allocation30_spill] sm:$0xff] }
 0x8eb   : > { %v8469_v17 = vsel %vm8415_vm5, %v8035_v13, 0.0  ;;  %v8036_v11 = vadd.f32 %v7982_v19, %v21956_v35  ;;  %v9140_v32 = vsel %vm3770_vm9, %v21957_v49, %v14258_v6  ;;  %v14268_v48 = vunpack.i.h.bf16 %v14266_v59  ;;  %v14271_v3 = vpop.permute.xlu1 %14270 }
 0x8ec   : > { %v8523_v1 = vrot.slane %v8469_v17, 7  ;;  %v8631_v10 = vrot.slane %v8469_v17, 1  ;;  %v7922_v31 = vadd.f32 %v20326_v62, %v7557_v7  ;;  %v7560_v38 = vadd.f32 %v7559_v45, %v21958_v44  ;;  %v21963_v44 = vld [vmem:[#allocation73_spill] sm:$0xff] }
 0x8ed   : > { %v20670_v46 = vsel %vm8416_vm14, %v8036_v11, 0.0  ;;  %v9320_v56 = vsel %vm3993_vm15, %v9317_v41, %v9319_v12  ;;  %14410 = vrot.lane.b32.xlu0 %v14409_v15, %s14638_s28  ;;  %v14598_v41 = vld [vmem:[%s21237_s8 + $0x28] sm:$0xff]   ;;  %v14272_v15 = vunpack.i.l.bf16 %v14271_v3  ;;  %v14267_v47 = vunpack.i.l.bf16 %v14266_v59 }
 0x8ee   : > { %v8638_v43 = vsel %vm3175_vm2, %v8630_v36, %v8631_v10  ;;  %v20680_v6 = vsel %vm3042_vm13, %v8522_v0, %v8523_v1  ;;  %v8524_v62 = vrot.slane %v20670_v46, 7  ;;  %v8632_v60 = vrot.slane %v20670_v46, 1  ;;  %13142 = vmatprep.mubr.msk.bf16.mxu1 %vm4091_vm3, %v9320_v56  ;;  %13188 = vmatprep.subr.bf16.mxu1 %v14598_v41  ;;  %v21962_v11 = vld [vmem:[#allocation19_spill] sm:$0xff] }
 0x8ef   : > { %v7983_v40 = vadd.f32 %v20201_v50, %v7922_v31  ;;  %v20686_v55 = vadd.f32 %v20339_v28, %v7560_v38  ;;  %v14273_v36 = vunpack.i.h.bf16 %v14271_v3  ;;  %v14414_v0 = vpack.i.bf16 %v20670_v46, %v8469_v17  ;;  %13189 = vmatpush3.bf16.msra.mxu1 %v14598_v41  ;;  %v14276_v49 = vpop.permute.xlu0 %14275  ;;  %v21964_v38 = vld [vmem:[#allocation72_spill] sm:$0xff] }
 0x8f0   : > { %v14419_v13 = vpack.i.bf16 %v8638_v43, %v8639_v14  ;;  %v8637_v50 = vsel %vm3175_vm2, %v8631_v10, %v8632_v60  ;;  %v20700_v28 = vsel %vm3042_vm13, %v8523_v1, %v8524_v62  ;;  %vm8417_vm11 = vcmp.eq.s32.totalorder %v21960_v51, 1  ;;  %v14281_v4 = vpop.permute.xlu1 %14280  ;;  %v21961_v10 = vld [vmem:[#allocation17_spill] sm:$0xff]  ;;  %v21968_v51 = vld [vmem:[#allocation70_spill] sm:$0xff] }
 0x8f1   : > { %v8037_v19 = vadd.f32 %v7983_v40, %v21959_v53  ;;  %v9194_v61 = vsel %vm3837_vm10, %v9140_v32, %v14273_v36  ;;  %v9193_v17 = vsel %vm3837_vm10, %v9139_v2, %v14272_v15  ;;  %14415 = vrot.lane.b32.xlu1 %v14414_v0, %s14638_s28  ;;  %v14283_v9 = vunpack.i.h.bf16 %v14281_v4  ;;  %v20736_v15 = vld [vmem:[%s21237_s8 + $0x60] sm:$0xff]   ;;  %v21966_v53 = vld [vmem:[#allocation77_spill] sm:$0xff] }
 0x8f2   : > { %14420 = vrot.lane.b32.xlu0 %v14419_v13, %s14639_s19  ;;  %v20709_v59 = vpack.c.bf16 %v9194_v61, %v9193_v17  ;;  %v14282_v1 = vunpack.i.l.bf16 %v14281_v4  ;;  %v9141_v35 = vsel %vm3770_vm9, %v21961_v10, %v14267_v47  ;;  %v9142_v2 = vsel %vm3770_vm9, %v21962_v11, %v14268_v48  ;;  %13238 = vmatprep.subr.bf16.mxu1 %v20736_v15  ;;  %v21967_v47 = vld [vmem:[#allocation78_spill] sm:$0xff] }
 0x8f3   : > { %v20707_v14 = vsel %vm8417_vm11, %v8037_v19, 0.0  ;;  %v9196_v32 = vsel %vm3837_vm10, %v9142_v2, %v14283_v9  ;;  %v21965_v42 = vpack.i.bf16 %v21963_v44, %v21964_v38  ;;  %v14278_v40 = vunpack.i.h.bf16 %v14276_v49  ;;  %v21969_v61 = vld [vmem:[#allocation50_spill] sm:$0xff]  ;;  %v21971_v44 = vld [vmem:[#allocation21_spill] sm:$0xff] }
 0x8f4   : > { %v8633_v7 = vrot.slane %v20707_v14, 1  ;;  %v9321_v45 = vrot.slane %v20709_v59, 4  ;;  %v9195_v31 = vsel %vm3837_vm10, %v9141_v35, %v14282_v1  ;;  %v14277_v41 = vunpack.i.l.bf16 %v14276_v49 }
 0x8f5   : > { %v20727_v3 = vpack.c.bf16 %v9196_v32, %v9195_v31  ;;  %v21970_v17 = vpack.i.bf16 %v21968_v51, %v21969_v61  ;;  %v21974_v61 = vld [vmem:[#allocation80_spill] sm:$0xff] }
 0x8f6   : > { %14430 = vrot.lane.b32.xlu0 %v21965_v42, %s14638_s28  ;;  %v8636_v56 = vsel %vm3175_vm2, %v8632_v60, %v8633_v7  ;;  %v9322_v48 = vsel %vm3993_vm15, %v9319_v12, %v9321_v45  ;;  %v9143_v19 = vsel %vm3770_vm9, %v21966_v53, %v14277_v41 }
 0x8f7   : > { %v14424_v43 = vpack.i.bf16 %v8636_v56, %v8637_v50  ;;  %13143 = vmatmul.mubr.msk.bf16.gmra.mrb[16].mxu1 %vm4091_vm3, %v9322_v48  ;;  %v9323_v36 = vrot.slane %v20727_v3, 4  ;;  %v9144_v50 = vsel %vm3770_vm9, %v21967_v47, %v14278_v40  ;;  %v14286_v4 = vpop.permute.xlu1 %14285  ;;  %v21972_v56 = vld [vmem:[#allocation23_spill] sm:$0xff] }
 0x8f8   : > { %v14291_v0 = vpop.permute.xlu0 %14290  ;;  %v14288_v35 = vunpack.i.h.bf16 %v14286_v4  ;;  %v14287_v11 = vunpack.i.l.bf16 %v14286_v4 }
 0x8f9   : > { %14425 = vrot.lane.b32.xlu1 %v14424_v43, %s14639_s19  ;;  %v9324_v60 = vsel %vm3993_vm15, %v9321_v45, %v9323_v36  ;;  %v14293_v12 = vunpack.i.h.bf16 %v14291_v0  ;;  %v14292_v13 = vunpack.i.l.bf16 %v14291_v0 }
 0x8fa   : > { %13146 = vmatprep.mubr.msk.bf16.mxu1 %vm4091_vm3, %v9324_v60  ;;  %v9145_v42 = vsel %vm3770_vm9, %v21971_v44, %v14287_v11  ;;  %v9146_v48 = vsel %vm3770_vm9, %v21972_v56, %v14288_v35 }
 0x8fb   : > { %v9198_v9 = vsel %vm3837_vm10, %v9144_v50, %v14293_v12  ;;  %v9197_v1 = vsel %vm3837_vm10, %v9143_v19, %v14292_v13  ;;  %v21973_v50 = vld [vmem:[#allocation79_spill] sm:$0xff] }
 0x8fc   : > { %v20751_v10 = vpack.c.bf16 %v9198_v9, %v9197_v1 }
 0x8fd   : > { %14435 = vrot.lane.b32.xlu1 %v21970_v17, %s14639_s19 }
 0x8fe   : > { %v9325_v2 = vrot.slane %v20751_v10, 4 }
 0x8ff   : > { %v14296_v43 = vpop.permute.xlu0 %14295 }
 0x900   : > { %v9326_v45 = vsel %vm3993_vm15, %v9323_v36, %v9325_v2  ;;  %v14301_v49 = vpop.permute.xlu1 %14300  ;;  %v14298_v60 = vunpack.i.h.bf16 %v14296_v43  ;;  %v14297_v36 = vunpack.i.l.bf16 %v14296_v43 }
 0x901   : > { %v14303_v32 = vunpack.i.h.bf16 %v14301_v49  ;;  %v14302_v31 = vunpack.i.l.bf16 %v14301_v49  ;;  %13147 = vmatmul.mubr.msk.bf16.gmra.mrb[20].mxu1 %vm4091_vm3, %v9326_v45 }
 0x902   : > { %v9147_v51 = vsel %vm3770_vm9, %v21973_v50, %v14297_v36  ;;  %v9148_v17 = vsel %vm3770_vm9, %v21974_v61, %v14298_v60  ;;  %v21977_v61 = vld [vmem:[#allocation81_spill] sm:$0xff] }
 0x903   : > { %v9200_v40 = vsel %vm3837_vm10, %v9146_v48, %v14303_v32  ;;  %v9199_v41 = vsel %vm3837_vm10, %v9145_v42, %v14302_v31  ;;  %v21975_v42 = vld [vmem:[#allocation25_spill] sm:$0xff]  ;;  %v21976_v48 = vld [vmem:[#allocation27_spill] sm:$0xff] }
 0x904   : > { %v20762_v0 = vpack.c.bf16 %v9200_v40, %v9199_v41 }
 0x906   : > { %v9327_v12 = vrot.slane %v20762_v0, 4 }
 0x907   : > { %v14306_v4 = vpop.permute.xlu1 %14305 }
 0x908   : > { %v14311_v13 = vpop.permute.xlu0 %14310  ;;  %v9328_v53 = vsel %vm3993_vm15, %v9325_v2, %v9327_v12  ;;  %v14308_v11 = vunpack.i.h.bf16 %v14306_v4  ;;  %v14307_v45 = vunpack.i.l.bf16 %v14306_v4  ;;  %v21978_v4 = vld [vmem:[#allocation82_spill] sm:$0xff] }
 0x909   : > { %v14313_v19 = vunpack.i.h.bf16 %v14311_v13  ;;  %v14312_v47 = vunpack.i.l.bf16 %v14311_v13  ;;  %13150 = vmatprep.mubr.msk.bf16.mxu1 %vm4091_vm3, %v9328_v53 }
 0x90a   : > { %v9149_v56 = vsel %vm3770_vm9, %v21975_v42, %v14307_v45  ;;  %v9150_v43 = vsel %vm3770_vm9, %v21976_v48, %v14308_v11 }
 0x90b   : > { %v9202_v9 = vsel %vm3837_vm10, %v9148_v17, %v14313_v19  ;;  %v9201_v1 = vsel %vm3837_vm10, %v9147_v51, %v14312_v47 }
 0x90c   : > { %v20773_v35 = vpack.c.bf16 %v9202_v9, %v9201_v1 }
 0x90e   : > { %v9329_v2 = vrot.slane %v20773_v35, 4 }
 0x90f   : > { %v14316_v60 = vpop.permute.xlu0 %14315 }
 0x910   : > { %v9330_v49 = vsel %vm3993_vm15, %v9327_v12, %v9329_v2  ;;  %v14321_v32 = vpop.permute.xlu1 %14320  ;;  %v14318_v13 = vunpack.i.h.bf16 %v14316_v60  ;;  %v14317_v53 = vunpack.i.l.bf16 %v14316_v60 }
 0x911   : > { %v14323_v31 = vunpack.i.h.bf16 %v14321_v32  ;;  %v14322_v44 = vunpack.i.l.bf16 %v14321_v32  ;;  %13151 = vmatmul.mubr.msk.bf16.gmra.mrb[24].mxu1 %vm4091_vm3, %v9330_v49 }
 0x912   : > { %v9151_v17 = vsel %vm3770_vm9, %v21977_v61, %v14317_v53  ;;  %v9152_v9 = vsel %vm3770_vm9, %v21978_v4, %v14318_v13 }
 0x913   : > { %v9204_v40 = vsel %vm3837_vm10, %v9150_v43, %v14323_v31  ;;  %v9203_v41 = vsel %vm3837_vm10, %v9149_v56, %v14322_v44  ;;  %v21979_v43 = vld [vmem:[#allocation83_spill] sm:$0xff] }
 0x914   : > { %v20784_v36 = vpack.c.bf16 %v9204_v40, %v9203_v41  ;;  %v21980_v41 = vld [vmem:[#allocation84_spill] sm:$0xff] }
 0x916   : > { %v9331_v12 = vrot.slane %v20784_v36, 4 }
 0x917   : > { %v14326_v1 = vpop.permute.xlu1 %14325 }
 0x918   : > { %v9332_v19 = vsel %vm3993_vm15, %v9329_v2, %v9331_v12  ;;  %v14331_v47 = vpop.permute.xlu0 %14330  ;;  %v14328_v32 = vunpack.i.h.bf16 %v14326_v1  ;;  %v14327_v2 = vunpack.i.l.bf16 %v14326_v1  ;;  %v21981_v1 = vld [vmem:[#allocation34_spill] sm:$0xff] }
 0x919   : > { %13154 = vmatprep.mubr.msk.bf16.mxu1 %vm4091_vm3, %v9332_v19  ;;  %v14333_v50 = vunpack.i.h.bf16 %v14331_v47  ;;  %v14332_v51 = vunpack.i.l.bf16 %v14331_v47 }
 0x91a   : > { %v9153_v40 = vsel %vm3770_vm9, %v21979_v43, %v14327_v2  ;;  %v9154_v60 = vsel %vm3770_vm9, %v21980_v41, %v14328_v32 }
 0x91b   : > { %v9206_v11 = vsel %vm3837_vm10, %v9152_v9, %v14333_v50  ;;  %v9205_v45 = vsel %vm3837_vm10, %v9151_v17, %v14332_v51 }
 0x91c   : > { %v20795_v49 = vpack.c.bf16 %v9206_v11, %v9205_v45  ;;  %v21982_v45 = vld [vmem:[#allocation32_spill] sm:$0xff] }
 0x91e   : > { %v9333_v31 = vrot.slane %v20795_v49, 4 }
 0x920   : > { %v14341_v44 = vpop.permute.xlu1 %14340  ;;  %v9334_v42 = vsel %vm3993_vm15, %v9331_v12, %v9333_v31 }
 0x921   : > { %v14343_v56 = vunpack.i.h.bf16 %v14341_v44  ;;  %v14342_v48 = vunpack.i.l.bf16 %v14341_v44  ;;  %13155 = vmatmul.mubr.msk.bf16.gmra.mrb[28].mxu1 %vm4091_vm3, %v9334_v42 }
 0x922   : > { %v14336_v47 = vpop.permute.xlu0 %14335 }
 0x923   : > { %v9208_v13 = vsel %vm3837_vm10, %v9154_v60, %v14343_v56  ;;  %v9207_v53 = vsel %vm3837_vm10, %v9153_v40, %v14342_v48  ;;  %v14338_v12 = vunpack.i.h.bf16 %v14336_v47  ;;  %v14337_v51 = vunpack.i.l.bf16 %v14336_v47 }
 0x924   : > { %v20806_v19 = vpack.c.bf16 %v9208_v13, %v9207_v53 }
 0x925   : > { %v9155_v11 = vsel %vm3770_vm9, %v21981_v1, %v14337_v51  ;;  %v9156_v32 = vsel %vm3770_vm9, %v21982_v45, %v14338_v12 }
 0x926   : > { %v9335_v50 = vrot.slane %v20806_v19, 4 }
 0x928   : > { %v9336_v61 = vsel %vm3993_vm15, %v9333_v31, %v9335_v50  ;;  %v14346_v42 = vpop.permute.xlu1 %14345 }
 0x929   : > { %13158 = vmatprep.mubr.msk.bf16.mxu1 %vm4091_vm3, %v9336_v61  ;;  %v14351_v17 = vpop.permute.xlu0 %14350  ;;  %v14348_v48 = vunpack.i.h.bf16 %v14346_v42  ;;  %v14347_v43 = vunpack.i.l.bf16 %v14346_v42 }
 0x92a   : > { %v14353_v4 = vunpack.i.h.bf16 %v14351_v17  ;;  %v14352_v9 = vunpack.i.l.bf16 %v14351_v17 }
 0x92b   : > { %v9157_v53 = vsel %vm3770_vm9, %v20343_v24, %v14347_v43  ;;  %v9158_v47 = vsel %vm3770_vm9, %v20358_v58, %v14348_v48 }
 0x92c   : > { %v9210_v2 = vsel %vm3837_vm10, %v9156_v32, %v14353_v4  ;;  %v9209_v44 = vsel %vm3837_vm10, %v9155_v11, %v14352_v9 }
 0x92d   : > { %v20817_v56 = vpack.c.bf16 %v9210_v2, %v9209_v44 }
 0x92f   : > { %v9337_v31 = vrot.slane %v20817_v56, 4 }
 0x931   : > { %v9338_v40 = vsel %vm3993_vm15, %v9335_v50, %v9337_v31  ;;  %v14356_v12 = vpop.permute.xlu0 %14355 }
 0x932   : > { %13159 = vmatmul.mubr.msk.bf16.gmra.mrb[32].mxu1 %vm4091_vm3, %v9338_v40  ;;  %v14358_v4 = vunpack.i.h.bf16 %v14356_v12  ;;  %v14357_v50 = vunpack.i.l.bf16 %v14356_v12 }
 0x933   : > { %v14361_v41 = vpop.permute.xlu1 %14360 }
 0x934   : > { %v14363_v60 = vunpack.i.h.bf16 %v14361_v41  ;;  %v14362_v13 = vunpack.i.l.bf16 %v14361_v41  ;;  %v9159_v24 = vsel %vm3770_vm9, %v20402_v54, %v14357_v50  ;;  %v9160_v58 = vsel %vm3770_vm9, %v20455_v20, %v14358_v4 }
 0x936   : > { %v9212_v51 = vsel %vm3837_vm10, %v9158_v47, %v14363_v60  ;;  %v9211_v61 = vsel %vm3837_vm10, %v9157_v53, %v14362_v13 }
 0x937   : > { %v20828_v17 = vpack.c.bf16 %v9212_v51, %v9211_v61 }
 0x939   : > { %v9339_v9 = vrot.slane %v20828_v17, 4 }
 0x93a   : > { %v14366_v42 = vpop.permute.xlu1 %14365 }
 0x93b   : > { %v14371_v1 = vpop.permute.xlu0 %14370  ;;  %v9340_v32 = vsel %vm3993_vm15, %v9337_v31, %v9339_v9  ;;  %v14368_v40 = vunpack.i.h.bf16 %v14366_v42  ;;  %v14367_v41 = vunpack.i.l.bf16 %v14366_v42 }
 0x93c   : > { %v14373_v11 = vunpack.i.h.bf16 %v14371_v1  ;;  %v14372_v45 = vunpack.i.l.bf16 %v14371_v1  ;;  %13162 = vmatprep.mubr.msk.bf16.mxu1 %vm4091_vm3, %v9340_v32 }
 0x93d   : > { %v9161_v53 = vsel %vm3770_vm9, %v20459_v52, %v14367_v41  ;;  %v9162_v47 = vsel %vm3770_vm9, %v20465_v25, %v14368_v40 }
 0x93e   : > { %v9214_v2 = vsel %vm3837_vm10, %v9160_v58, %v14373_v11  ;;  %v9213_v44 = vsel %vm3837_vm10, %v9159_v24, %v14372_v45 }
 0x93f   : > { %v20839_v48 = vpack.c.bf16 %v9214_v2, %v9213_v44 }
 0x941   : > { %v9341_v43 = vrot.slane %v20839_v48, 4 }
 0x942   : > { %v14376_v54 = vpop.permute.xlu0 %14375 }
 0x943   : > { %v9342_v31 = vsel %vm3993_vm15, %v9339_v9, %v9341_v43  ;;  %v14378_v61 = vunpack.i.h.bf16 %v14376_v54  ;;  %v14377_v4 = vunpack.i.l.bf16 %v14376_v54 }
 0x944   : > { %13163 = vmatmul.mubr.msk.bf16.gmra.mrb[36].mxu1 %vm4091_vm3, %v9342_v31 }
 0x945   : > { %v14381_v60 = vpop.permute.xlu1 %14380  ;;  %v9163_v32 = vsel %vm3770_vm9, %v20512_v23, %v14377_v4  ;;  %v9164_v52 = vsel %vm3770_vm9, %v20521_v39, %v14378_v61 }
 0x946   : > { %v14383_v20 = vunpack.i.h.bf16 %v14381_v60  ;;  %v14382_v13 = vunpack.i.l.bf16 %v14381_v60 }
 0x948   : > { %v9216_v12 = vsel %vm3837_vm10, %v9162_v47, %v14383_v20  ;;  %v9215_v51 = vsel %vm3837_vm10, %v9161_v53, %v14382_v13 }
 0x949   : > { %v20850_v50 = vpack.c.bf16 %v9216_v12, %v9215_v51 }
 0x94b   : > { %v14391_v9 = vpop.permute.xlu0 %14390  ;;  %v9343_v1 = vrot.slane %v20850_v50, 4  ;;  %v14386_v44 = vpop.permute.xlu1 %14385 }
 0x94c   : > { %v14393_v11 = vunpack.i.h.bf16 %v14391_v9  ;;  %v14392_v45 = vunpack.i.l.bf16 %v14391_v9  ;;  %v14388_v40 = vunpack.i.h.bf16 %v14386_v44  ;;  %v14387_v41 = vunpack.i.l.bf16 %v14386_v44 }
 0x94d   : > { %v9344_v25 = vsel %vm3993_vm15, %v9341_v43, %v9343_v1 }
 0x94e   : > { %v9218_v24 = vsel %vm3837_vm10, %v9164_v52, %v14393_v11  ;;  %v9217_v58 = vsel %vm3837_vm10, %v9163_v32, %v14392_v45  ;;  %13166 = vmatprep.mubr.msk.bf16.mxu1 %vm4091_vm3, %v9344_v25  ;;  %v9165_v54 = vsel %vm3770_vm9, %v20557_v29, %v14387_v41  ;;  %v9166_v20 = vsel %vm3770_vm9, %v20570_v33, %v14388_v40 }
 0x94f   : > { %v20861_v2 = vpack.c.bf16 %v9218_v24, %v9217_v58 }
 0x951   : > { %v9345_v42 = vrot.slane %v20861_v2, 4 }
 0x953   : > { %v9346_v23 = vsel %vm3993_vm15, %v9343_v1, %v9345_v42  ;;  %v14396_v31 = vpop.permute.xlu0 %14395 }
 0x954   : > { %13167 = vmatmul.mubr.msk.bf16.gmra.mrb[40].mxu1 %vm4091_vm3, %v9346_v23  ;;  %v14398_v47 = vunpack.i.h.bf16 %v14396_v31  ;;  %v14397_v12 = vunpack.i.l.bf16 %v14396_v31 }
 0x955   : > { %v14401_v39 = vpop.permute.xlu1 %14400 }
 0x956   : > { %v14403_v43 = vunpack.i.h.bf16 %v14401_v39  ;;  %v14402_v60 = vunpack.i.l.bf16 %v14401_v39  ;;  %v9167_v11 = vsel %vm3770_vm9, %v20608_v37, %v14397_v12  ;;  %v9168_v29 = vsel %vm3770_vm9, %v20615_v21, %v14398_v47  ;;  %v14610_v37 = vld [vmem:[%s21236_s7] ss:$0 sm:$0xff] }
 0x957   : > { %v7984_v21 = vadd.f32 %v14610_v37, %v20686_v55 }
 0x958   : > { %v9220_v13 = vsel %vm3837_vm10, %v9166_v20, %v14403_v43  ;;  %v9219_v53 = vsel %vm3837_vm10, %v9165_v54, %v14402_v60  ;;  %v21983_v20 = vld [vmem:[#allocation56_spill] sm:$0xff] }
 0x959   : > { %v20872_v51 = vpack.c.bf16 %v9220_v13, %v9219_v53  ;;  %v8038_v55 = vadd.f32 %v7984_v21, %v21983_v20 }
 0x95b   : > { %v14406_v61 = vpop.permute.xlu0 %14405  ;;  %v9347_v4 = vrot.slane %v20872_v51, 4 }
 0x95c   : > { %v14408_v9 = vunpack.i.h.bf16 %v14406_v61  ;;  %v14407_v1 = vunpack.i.l.bf16 %v14406_v61 }
 0x95d   : > { %v9348_v33 = vsel %vm3993_vm15, %v9345_v42, %v9347_v4 }
 0x95e   : > { %v9222_v45 = vsel %vm3837_vm10, %v9168_v29, %v14408_v9  ;;  %v9221_v32 = vsel %vm3837_vm10, %v9167_v11, %v14407_v1  ;;  %13170 = vmatprep.mubr.msk.bf16.mxu1 %vm4091_vm3, %v9348_v33  ;;  %v21985_v11 = vrot.slane %v21964_v38, 1 }
 0x95f   : > { %v20883_v52 = vpack.c.bf16 %v9222_v45, %v9221_v32  ;;  %v14411_v25 = vpop.permute.xlu0 %14410 }
 0x960   : > { %v14413_v58 = vunpack.i.h.bf16 %v14411_v25  ;;  %v14412_v44 = vunpack.i.l.bf16 %v14411_v25 }
 0x961   : > { %v9349_v24 = vrot.slane %v20883_v52, 4 }
 0x962   : > { %v9169_v39 = vsel %vm3770_vm9, %v20651_v57, %v14412_v44  ;;  %v9170_v31 = vsel %vm3770_vm9, %v20658_v16, %v14413_v58 }
 0x963   : > { %v9350_v42 = vsel %vm3993_vm15, %v9347_v4, %v9349_v24  ;;  %v21984_v4 = vrot.slane %v21964_v38, 7 }
 0x964   : > { %v14421_v40 = vpop.permute.xlu0 %14420  ;;  %13171 = vmatmul.mubr.msk.bf16.gmra.mrb[44].mxu1 %vm4091_vm3, %v9350_v42 }
 0x965   : > { %v14423_v41 = vunpack.i.h.bf16 %v14421_v40  ;;  %v14422_v23 = vunpack.i.l.bf16 %v14421_v40 }
 0x966   : > { %v8364_v54 = vpop.permute.xlu1 %8363 }
 0x967   : > { %v9224_v43 = vsel %vm3837_vm10, %v9170_v31, %v14423_v41  ;;  %v9223_v60 = vsel %vm3837_vm10, %v9169_v39, %v14422_v23  ;;  %vm8418_vm6 = vcmp.eq.s32.totalorder %v8364_v54, 1 }
 0x968   : > { %v20899_v13 = vpack.c.bf16 %v9224_v43, %v9223_v60  ;;  %v20901_v53 = vsel %vm8418_vm6, %v8038_v55, 0.0  ;;  %v14431_v58 = vpop.permute.xlu0 %14430  ;;  %v21986_v60 = vld [vmem:[#allocation74_spill] sm:$0xff] }
 0x969   : > { %v14439_v47 = vpack.i.bf16 %v20901_v53, %v20707_v14  ;;  %v8526_v57 = vrot.slane %v20901_v53, 7  ;;  %v8634_v12 = vrot.slane %v20901_v53, 1  ;;  %v14433_v21 = vunpack.i.h.bf16 %v14431_v58 }
 0x96a   : > { %v9351_v16 = vrot.slane %v20899_v13, 4  ;;  %v14416_v61 = vpop.permute.xlu1 %14415  ;;  %v14432_v38 = vunpack.i.l.bf16 %v14431_v58 }
 0x96b   : > { %v8580_v9 = vsel %vm3042_vm13, %v8526_v57, %v21984_v4  ;;  %v8635_v1 = vsel %vm3175_vm2, %v8633_v7, %v8634_v12  ;;  %v8688_v29 = vsel %vm3175_vm2, %v8634_v12, %v21985_v11  ;;  %14440 = vrot.lane.b32.xlu0 %v14439_v47, %s14638_s28  ;;  %v14418_v33 = vunpack.i.h.bf16 %v14416_v61  ;;  %v14602_v4 = vld [vmem:[%s21237_s8 + $0x78] sm:$0xff]  }
 0x96c   : > { %v14417_v45 = vunpack.i.l.bf16 %v14416_v61  ;;  %v9352_v32 = vsel %vm3993_vm15, %v9349_v24, %v9351_v16  ;;  %v14444_v25 = vpack.i.bf16 %v8688_v29, %v8635_v1  ;;  %v9122_v54 = vsel %vm3770_vm9, %v21986_v60, %v14433_v21  ;;  %v14600_v61 = vld [vmem:[%s21237_s8 + $0x68] sm:$0xff]  }
 0x96d   : > { %13174 = vmatprep.mubr.msk.bf16.mxu1 %vm4091_vm3, %v9352_v32  ;;  %v9172_v40 = vsel %vm3770_vm9, %v20700_v28, %v14418_v33  ;;  %v9121_v20 = vsel %vm3770_vm9, %v8580_v9, %v14432_v38 }
 0x96e   : > { %v14426_v44 = vpop.permute.xlu1 %14425  ;;  %14445 = vrot.lane.b32.xlu1 %v14444_v25, %s14639_s19  ;;  %v9171_v42 = vsel %vm3770_vm9, %v20680_v6, %v14417_v45 }
 0x96f   : > { %v14428_v37 = vunpack.i.h.bf16 %v14426_v44  ;;  %v14427_v7 = vunpack.i.l.bf16 %v14426_v44 }
 0x971   : > { %v9226_v41 = vsel %vm3837_vm10, %v9172_v40, %v14428_v37  ;;  %v9225_v24 = vsel %vm3837_vm10, %v9171_v42, %v14427_v7 }
 0x972   : > { %v20932_v23 = vpack.c.bf16 %v9226_v41, %v9225_v24  ;;  %v14436_v39 = vpop.permute.xlu1 %14435 }
 0x973   : > { %v14438_v31 = vunpack.i.h.bf16 %v14436_v39  ;;  %v14437_v43 = vunpack.i.l.bf16 %v14436_v39 }
 0x974   : > { %v9353_v55 = vrot.slane %v20932_v23, 4 }
 0x975   : > { %v9176_v6 = vsel %vm3837_vm10, %v9122_v54, %v14438_v31  ;;  %v9175_v28 = vsel %vm3837_vm10, %v9121_v20, %v14437_v43 }
 0x976   : > { %v9354_v47 = vsel %vm3993_vm15, %v9351_v16, %v9353_v55  ;;  %v9229_v12 = vpack.c.bf16 %v9176_v6, %v9175_v28  ;;  %v14601_v16 = vld [vmem:[%s21237_s8 + $0x70] sm:$0xff]  }
 0x977   : > { %13175 = vmatmul.mubr.msk.bf16.gmra.mrb[48].mxu1 %vm4091_vm3, %v9354_v47 }
 0x978   : > { %13190 = vmatprep.mubr.msk.bf16.mxu1 %vm4091_vm3, %v9229_v12 }
 0x97f   : > { %13191 = vmatmul.mubr.msk.bf16.vlgmr.msra.gmra.mrb[4].mxu1 %vm4091_vm3, %v20307_v5  ;;  %v14603_v5 = vld [vmem:[%s21237_s8 + $0x80] sm:$0xff]  }
 0x980   : > { %13239 = vmatpush3.bf16.msra.mxu1 %v20736_v15  ;;  %13194 = vmatprep.mubr.msk.bf16.mxu1 %vm4091_vm3, %v20349_v22  ;;  %v14604_v22 = vld [vmem:[%s21237_s8 + $0x88] sm:$0xff]   ;;  %v8525_v15 = vrot.slane %v20707_v14, 7 }
 0x981   : > { %13240 = vmatprep.subr.bf16.mxu1 %v14600_v61 }
 0x982   : > { %v8528_v33 = vsel %vm3042_vm13, %v8524_v62, %v8525_v15 }
 0x984   : > { %13241 = vmatpush3.bf16.msra.mxu1 %v14600_v61 }
 0x985   : > { %13242 = vmatprep.subr.bf16.mxu1 %v14601_v16 }
 0x987   : > { %13195 = vmatmul.mubr.msk.bf16.gmra.mrb[8].mxu1 %vm4091_vm3, %v20384_v18 }
 0x988   : > { %13198 = vmatprep.mubr.msk.bf16.mxu1 %vm4091_vm3, %v20442_v27  ;;  %13243 = vmatpush3.bf16.msra.mxu1 %v14601_v16 }
 0x989   : > { %13244 = vmatprep.subr.bf16.mxu1 %v14602_v4 }
 0x98c   : > { %13245 = vmatpush3.bf16.msra.mxu1 %v14602_v4 }
 0x98d   : > { %13246 = vmatprep.subr.bf16.mxu1 %v14603_v5 }
 0x98f   : > { %13199 = vmatmul.mubr.msk.bf16.gmra.mrb[12].mxu1 %vm4091_vm3, %v20495_v63 }
 0x990   : > { %13202 = vmatprep.mubr.msk.bf16.mxu1 %vm4091_vm3, %v20551_v30  ;;  %13247 = vmatpush3.bf16.msra.mxu1 %v14603_v5 }
 0x991   : > { %13248 = vmatprep.subr.bf16.mxu1 %v14604_v22 }
 0x994   : > { %13249 = vmatpush3.bf16.msra.mxu1 %v14604_v22 }
 0x997   : > { %13203 = vmatmul.mubr.msk.bf16.gmra.mrb[16].mxu1 %vm4091_vm3, %v20593_v34 }
 0x998   : > { %13206 = vmatprep.mubr.msk.bf16.mxu1 %vm4091_vm3, %v20645_v26 }
 0x99f   : > { %13207 = vmatmul.mubr.msk.bf16.gmra.mrb[20].mxu1 %vm4091_vm3, %v20709_v59 }
 0x9a0   : > { %13210 = vmatprep.mubr.msk.bf16.mxu1 %vm4091_vm3, %v20727_v3 }
 0x9a7   : > { %13211 = vmatmul.mubr.msk.bf16.gmra.mrb[24].mxu1 %vm4091_vm3, %v20751_v10 }
 0x9a8   : > { %13214 = vmatprep.mubr.msk.bf16.mxu1 %vm4091_vm3, %v20762_v0 }
 0x9af   : > { %13215 = vmatmul.mubr.msk.bf16.gmra.mrb[28].mxu1 %vm4091_vm3, %v20773_v35 }
 0x9b0   : > { %13218 = vmatprep.mubr.msk.bf16.mxu1 %vm4091_vm3, %v20784_v36 }
 0x9b7   : > { %13219 = vmatmul.mubr.msk.bf16.gmra.mrb[32].mxu1 %vm4091_vm3, %v20795_v49 }
 0x9b8   : > { %13222 = vmatprep.mubr.msk.bf16.mxu1 %vm4091_vm3, %v20806_v19 }
 0x9bf   : > { %13223 = vmatmul.mubr.msk.bf16.gmra.mrb[36].mxu1 %vm4091_vm3, %v20817_v56 }
 0x9c0   : > { %13226 = vmatprep.mubr.msk.bf16.mxu1 %vm4091_vm3, %v20828_v17 }
 0x9c7   : > { %13227 = vmatmul.mubr.msk.bf16.gmra.mrb[40].mxu1 %vm4091_vm3, %v20839_v48 }
 0x9c8   : > { %13230 = vmatprep.mubr.msk.bf16.mxu1 %vm4091_vm3, %v20850_v50 }
 0x9cf   : > { %13231 = vmatmul.mubr.msk.bf16.gmra.mrb[44].mxu1 %vm4091_vm3, %v20861_v2 }
 0x9d0   : > { %13234 = vmatprep.mubr.msk.bf16.mxu1 %vm4091_vm3, %v20872_v51 }
 0x9d7   : > { %13235 = vmatmul.mubr.msk.bf16.gmra.mrb[48].mxu1 %vm4091_vm3, %v20883_v52 }
 0x9d8   : > { %13250 = vmatprep.mubr.msk.bf16.mxu1 %vm4091_vm3, %v20384_v18  ;;  %v8527_v18 = vsel %vm3042_vm13, %v8525_v15, %v8526_v57  ;;  %vm10599_vm13 = vcmask 93184  }
 0x9dd   : > { %v14441_v9 = vpop.permute.xlu0 %14440 }
 0x9de   : > { %v14443_v1 = vunpack.i.h.bf16 %v14441_v9  ;;  %v14442_v11 = vunpack.i.l.bf16 %v14441_v9 }
 0x9df   : > { %13251 = vmatmul.mubr.msk.bf16.vlgmr.msra.gmra.mrb[4].mxu1 %vm4091_vm3, %v20442_v27 }
 0x9e0   : > { %v14446_v29 = vpop.permute.xlu1 %14445  ;;  %13254 = vmatprep.mubr.msk.bf16.mxu1 %vm4091_vm3, %v20495_v63  ;;  %v9173_v32 = vsel %vm3770_vm9, %v8528_v33, %v14442_v11  ;;  %v9174_v27 = vsel %vm3770_vm9, %v8527_v18, %v14443_v1 }
 0x9e1   : > { %v14448_v14 = vunpack.i.h.bf16 %v14446_v29  ;;  %v14447_v45 = vunpack.i.l.bf16 %v14446_v29 }
 0x9e3   : > { %v9227_v25 = vsel %vm3837_vm10, %v9173_v32, %v14447_v45  ;;  %v9228_v63 = vsel %vm3837_vm10, %v9174_v27, %v14448_v14 }
 0x9e4   : > { %v9255_v58 = vpack.c.bf16 %v9228_v63, %v9227_v25 }
 0x9e7   : > { %13255 = vmatmul.mubr.msk.bf16.gmra.mrb[8].mxu1 %vm4091_vm3, %v20551_v30 }
 0x9e8   : > { %13258 = vmatprep.mubr.msk.bf16.mxu1 %vm4091_vm3, %v20593_v34 }
 0x9ef   : > { %13259 = vmatmul.mubr.msk.bf16.gmra.mrb[12].mxu1 %vm4091_vm3, %v20645_v26 }
 0x9f0   : > { %13262 = vmatprep.mubr.msk.bf16.mxu1 %vm4091_vm3, %v20709_v59 }
 0x9f7   : > { %13263 = vmatmul.mubr.msk.bf16.gmra.mrb[16].mxu1 %vm4091_vm3, %v20727_v3 }
 0x9f8   : > { %13266 = vmatprep.mubr.msk.bf16.mxu1 %vm4091_vm3, %v20751_v10 }
 0x9ff   : > { %13267 = vmatmul.mubr.msk.bf16.gmra.mrb[20].mxu1 %vm4091_vm3, %v20762_v0 }
 0xa00   : > { %13270 = vmatprep.mubr.msk.bf16.mxu1 %vm4091_vm3, %v20773_v35 }
 0xa07   : > { %13271 = vmatmul.mubr.msk.bf16.gmra.mrb[24].mxu1 %vm4091_vm3, %v20784_v36 }
 0xa08   : > { %13274 = vmatprep.mubr.msk.bf16.mxu1 %vm4091_vm3, %v20795_v49 }
 0xa0f   : > { %13275 = vmatmul.mubr.msk.bf16.gmra.mrb[28].mxu1 %vm4091_vm3, %v20806_v19 }
 0xa10   : > { %13278 = vmatprep.mubr.msk.bf16.mxu1 %vm4091_vm3, %v20817_v56 }
 0xa17   : > { %13279 = vmatmul.mubr.msk.bf16.gmra.mrb[32].mxu1 %vm4091_vm3, %v20828_v17 }
 0xa18   : > { %13282 = vmatprep.mubr.msk.bf16.mxu1 %vm4091_vm3, %v20839_v48 }
 0xa1f   : > { %13283 = vmatmul.mubr.msk.bf16.gmra.mrb[36].mxu1 %vm4091_vm3, %v20850_v50 }
 0xa20   : > { %13286 = vmatprep.mubr.msk.bf16.mxu1 %vm4091_vm3, %v20861_v2 }
 0xa27   : > { %13287 = vmatmul.mubr.msk.bf16.gmra.mrb[40].mxu1 %vm4091_vm3, %v20872_v51 }
 0xa28   : > { %13290 = vmatprep.mubr.msk.bf16.mxu1 %vm4091_vm3, %v20883_v52 }
 0xa2f   : > { %13291 = vmatmul.mubr.msk.bf16.gmra.mrb[44].mxu1 %vm4091_vm3, %v20899_v13 }
 0xa30   : > { %13294 = vmatprep.mubr.msk.bf16.mxu1 %vm4091_vm3, %v20932_v23 }
 0xa37   : > { %13295 = vmatmul.mubr.msk.bf16.gmra.mrb[48].mxu1 %vm4091_vm3, %v9255_v58 }
 0xab2   : > { %v13252_v30 = vpop.f32.mrb[4].mxu1 }
 0xab3   : > { %v10361_v34 = vadd.f32 %v13252_v30, %v21069_v8  ;;  %v10113_v26 = vpop.f32.mrb[5].mxu1 }
 0xab4   : > { %v10359_v46 = vadd.f32 %v21069_v8, %v10113_v26  ;;  %v13253_v62 = vpop.f32.mrb[6].mxu1 }
 0xab5   : > { %v11695_v59 = vpack.c.bf16 %v10361_v34, %v10361_v34  ;;  %v10362_v3 = vadd.f32 %v13253_v62, %v21069_v8  ;;  %v10116_v10 = vpop.f32.mrb[7].mxu1 }
 0xab6   : > { %v11693_v0 = vpack.c.bf16 %v10359_v46, %v10359_v46  ;;  %v10360_v35 = vadd.f32 %v21069_v8, %v10116_v10 }
 0xab7   : > { %10602 = vst.msk [vmem:[%s21075_s12 + $0x8] sm:$0xf] %vm10599_vm13, %v11695_v59  ;;  %v11696_v36 = vpack.c.bf16 %v10362_v3, %v10362_v3 }
 0xab8   : > { %10600 = vst.msk [vmem:[%s21075_s12] sm:$0xf] %vm10599_vm13, %v11693_v0  ;;  %v11694_v49 = vpack.c.bf16 %v10360_v35, %v10360_v35 }
 0xab9   : > { %10603 = vst.msk [vmem:[%s21075_s12 + $0xc] sm:$0xf] %vm10599_vm13, %v11696_v36 }
 0xaba   : > { %10601 = vst.msk [vmem:[%s21075_s12 + $0x4] sm:$0xf] %vm10599_vm13, %v11694_v49  ;;  %v13256_v19 = vpop.f32.mrb[8].mxu1 }
 0xabb   : > { %v10365_v56 = vadd.f32 %v13256_v19, %v21069_v8  ;;  %v10129_v17 = vpop.f32.mrb[9].mxu1 }
 0xabc   : > { %v10363_v48 = vadd.f32 %v21069_v8, %v10129_v17  ;;  %v13257_v50 = vpop.f32.mrb[10].mxu1 }
 0xabd   : > { %v11699_v2 = vpack.c.bf16 %v10365_v56, %v10365_v56  ;;  %v10366_v51 = vadd.f32 %v13257_v50, %v21069_v8  ;;  %v10132_v52 = vpop.f32.mrb[11].mxu1 }
 0xabe   : > { %v11697_v13 = vpack.c.bf16 %v10363_v48, %v10363_v48  ;;  %v10364_v53 = vadd.f32 %v21069_v8, %v10132_v52 }
 0xabf   : > { %10606 = vst.msk [vmem:[%s21075_s12 + $0x18] sm:$0xf] %vm10599_vm13, %v11699_v2  ;;  %v11700_v57 = vpack.c.bf16 %v10366_v51, %v10366_v51 }
 0xac0   : > { %10604 = vst.msk [vmem:[%s21075_s12 + $0x10] sm:$0xf] %vm10599_vm13, %v11697_v13  ;;  %v11698_v44 = vpack.c.bf16 %v10364_v53, %v10364_v53 }
 0xac1   : > { %10607 = vst.msk [vmem:[%s21075_s12 + $0x1c] sm:$0xf] %vm10599_vm13, %v11700_v57 }
 0xac2   : > { %10605 = vst.msk [vmem:[%s21075_s12 + $0x14] sm:$0xf] %vm10599_vm13, %v11698_v44  ;;  %v13260_v37 = vpop.f32.mrb[12].mxu1 }
 0xac3   : > { %v10369_v7 = vadd.f32 %v13260_v37, %v21069_v8  ;;  %v10145_v21 = vpop.f32.mrb[13].mxu1 }
 0xac4   : > { %v10367_v38 = vadd.f32 %v21069_v8, %v10145_v21  ;;  %v13261_v42 = vpop.f32.mrb[14].mxu1 }
 0xac5   : > { %v11703_v40 = vpack.c.bf16 %v10369_v7, %v10369_v7  ;;  %v10370_v41 = vadd.f32 %v13261_v42, %v21069_v8  ;;  %v10148_v24 = vpop.f32.mrb[15].mxu1 }
 0xac6   : > { %v11701_v23 = vpack.c.bf16 %v10367_v38, %v10367_v38  ;;  %v10368_v39 = vadd.f32 %v21069_v8, %v10148_v24 }
 0xac7   : > { %10610 = vst.msk [vmem:[%s21075_s12 + $0x28] sm:$0xf] %vm10599_vm13, %v11703_v40  ;;  %v11704_v31 = vpack.c.bf16 %v10370_v41, %v10370_v41 }
 0xac8   : > { %10608 = vst.msk [vmem:[%s21075_s12 + $0x20] sm:$0xf] %vm10599_vm13, %v11701_v23  ;;  %v11702_v43 = vpack.c.bf16 %v10368_v39, %v10368_v39 }
 0xac9   : > { %10611 = vst.msk [vmem:[%s21075_s12 + $0x2c] sm:$0xf] %vm10599_vm13, %v11704_v31 }
 0xaca   : > { %10609 = vst.msk [vmem:[%s21075_s12 + $0x24] sm:$0xf] %vm10599_vm13, %v11702_v43  ;;  %v13264_v60 = vpop.f32.mrb[16].mxu1 }
 0xacb   : > { %v10373_v54 = vadd.f32 %v13264_v60, %v21069_v8  ;;  %v10161_v20 = vpop.f32.mrb[17].mxu1 }
 0xacc   : > { %v10371_v55 = vadd.f32 %v21069_v8, %v10161_v20  ;;  %v13265_v6 = vpop.f32.mrb[18].mxu1 }
 0xacd   : > { %v11707_v28 = vpack.c.bf16 %v10373_v54, %v10373_v54  ;;  %v10374_v47 = vadd.f32 %v13265_v6, %v21069_v8  ;;  %v10164_v12 = vpop.f32.mrb[19].mxu1 }
 0xace   : > { %v11705_v61 = vpack.c.bf16 %v10371_v55, %v10371_v55  ;;  %v10372_v16 = vadd.f32 %v21069_v8, %v10164_v12 }
 0xacf   : > { %10614 = vst.msk [vmem:[%s21075_s12 + $0x38] sm:$0xf] %vm10599_vm13, %v11707_v28  ;;  %v11708_v4 = vpack.c.bf16 %v10374_v47, %v10374_v47 }
 0xad0   : > { %10612 = vst.msk [vmem:[%s21075_s12 + $0x30] sm:$0xf] %vm10599_vm13, %v11705_v61  ;;  %v11706_v5 = vpack.c.bf16 %v10372_v16, %v10372_v16 }
 0xad1   : > { %10615 = vst.msk [vmem:[%s21075_s12 + $0x3c] sm:$0xf] %vm10599_vm13, %v11708_v4 }
 0xad2   : > { %10613 = vst.msk [vmem:[%s21075_s12 + $0x34] sm:$0xf] %vm10599_vm13, %v11706_v5  ;;  %v13268_v22 = vpop.f32.mrb[20].mxu1 }
 0xad3   : > { %v10377_v15 = vadd.f32 %v13268_v22, %v21069_v8  ;;  %v10177_v9 = vpop.f32.mrb[21].mxu1 }
 0xad4   : > { %v10375_v1 = vadd.f32 %v21069_v8, %v10177_v9  ;;  %v13269_v11 = vpop.f32.mrb[22].mxu1 }
 0xad5   : > { %v11711_v29 = vpack.c.bf16 %v10377_v15, %v10377_v15  ;;  %v10378_v33 = vadd.f32 %v13269_v11, %v21069_v8  ;;  %v10180_v18 = vpop.f32.mrb[23].mxu1 }
 0xad6   : > { %v11709_v14 = vpack.c.bf16 %v10375_v1, %v10375_v1  ;;  %v10376_v45 = vadd.f32 %v21069_v8, %v10180_v18 }
 0xad7   : > { %10618 = vst.msk [vmem:[%s21075_s12 + $0x48] sm:$0xf] %vm10599_vm13, %v11711_v29  ;;  %v11712_v32 = vpack.c.bf16 %v10378_v33, %v10378_v33 }
 0xad8   : > { %10616 = vst.msk [vmem:[%s21075_s12 + $0x40] sm:$0xf] %vm10599_vm13, %v11709_v14  ;;  %v11710_v27 = vpack.c.bf16 %v10376_v45, %v10376_v45 }
 0xad9   : > { %10619 = vst.msk [vmem:[%s21075_s12 + $0x4c] sm:$0xf] %vm10599_vm13, %v11712_v32 }
 0xada   : > { %10617 = vst.msk [vmem:[%s21075_s12 + $0x44] sm:$0xf] %vm10599_vm13, %v11710_v27  ;;  %v13272_v25 = vpop.f32.mrb[24].mxu1 }
 0xadb   : > { %v10381_v63 = vadd.f32 %v13272_v25, %v21069_v8  ;;  %v10193_v58 = vpop.f32.mrb[25].mxu1 }
 0xadc   : > { %v10379_v30 = vadd.f32 %v21069_v8, %v10193_v58  ;;  %v13273_v34 = vpop.f32.mrb[26].mxu1 }
 0xadd   : > { %v11715_v26 = vpack.c.bf16 %v10381_v63, %v10381_v63  ;;  %v10382_v46 = vadd.f32 %v13273_v34, %v21069_v8  ;;  %v10196_v62 = vpop.f32.mrb[27].mxu1 }
 0xade   : > { %v11713_v59 = vpack.c.bf16 %v10379_v30, %v10379_v30  ;;  %v10380_v3 = vadd.f32 %v21069_v8, %v10196_v62 }
 0xadf   : > { %10622 = vst.msk [vmem:[%s21075_s12 + $0x58] sm:$0xf] %vm10599_vm13, %v11715_v26  ;;  %v11716_v10 = vpack.c.bf16 %v10382_v46, %v10382_v46 }
 0xae0   : > { %10620 = vst.msk [vmem:[%s21075_s12 + $0x50] sm:$0xf] %vm10599_vm13, %v11713_v59  ;;  %v11714_v0 = vpack.c.bf16 %v10380_v3, %v10380_v3 }
 0xae1   : > { %10623 = vst.msk [vmem:[%s21075_s12 + $0x5c] sm:$0xf] %vm10599_vm13, %v11716_v10 }
 0xae2   : > { %10621 = vst.msk [vmem:[%s21075_s12 + $0x54] sm:$0xf] %vm10599_vm13, %v11714_v0  ;;  %v13276_v35 = vpop.f32.mrb[28].mxu1 }
 0xae3   : > { %v10385_v36 = vadd.f32 %v13276_v35, %v21069_v8  ;;  %v10209_v49 = vpop.f32.mrb[29].mxu1 }
 0xae4   : > { %v10383_v19 = vadd.f32 %v21069_v8, %v10209_v49  ;;  %v13277_v56 = vpop.f32.mrb[30].mxu1 }
 0xae5   : > { %v11719_v17 = vpack.c.bf16 %v10385_v36, %v10385_v36  ;;  %v10386_v48 = vadd.f32 %v13277_v56, %v21069_v8  ;;  %v10212_v50 = vpop.f32.mrb[31].mxu1 }
 0xae6   : > { %v11717_v2 = vpack.c.bf16 %v10383_v19, %v10383_v19  ;;  %v10384_v51 = vadd.f32 %v21069_v8, %v10212_v50 }
 0xae7   : > { %10626 = vst.msk [vmem:[%s21075_s12 + $0x68] sm:$0xf] %vm10599_vm13, %v11719_v17  ;;  %v11720_v52 = vpack.c.bf16 %v10386_v48, %v10386_v48 }
 0xae8   : > { %10624 = vst.msk [vmem:[%s21075_s12 + $0x60] sm:$0xf] %vm10599_vm13, %v11717_v2  ;;  %v11718_v13 = vpack.c.bf16 %v10384_v51, %v10384_v51 }
 0xae9   : > { %10627 = vst.msk [vmem:[%s21075_s12 + $0x6c] sm:$0xf] %vm10599_vm13, %v11720_v52 }
 0xaea   : > { %10625 = vst.msk [vmem:[%s21075_s12 + $0x64] sm:$0xf] %vm10599_vm13, %v11718_v13  ;;  %v13280_v53 = vpop.f32.mrb[32].mxu1 }
 0xaeb   : > { %v10389_v57 = vadd.f32 %v13280_v53, %v21069_v8  ;;  %v10225_v44 = vpop.f32.mrb[33].mxu1 }
 0xaec   : > { %v10387_v37 = vadd.f32 %v21069_v8, %v10225_v44  ;;  %v13281_v7 = vpop.f32.mrb[34].mxu1 }
 0xaed   : > { %v11723_v21 = vpack.c.bf16 %v10389_v57, %v10389_v57  ;;  %v10390_v38 = vadd.f32 %v13281_v7, %v21069_v8  ;;  %v10228_v42 = vpop.f32.mrb[35].mxu1 }
 0xaee   : > { %v11721_v40 = vpack.c.bf16 %v10387_v37, %v10387_v37  ;;  %v10388_v41 = vadd.f32 %v21069_v8, %v10228_v42 }
 0xaef   : > { %10630 = vst.msk [vmem:[%s21075_s12 + $0x78] sm:$0xf] %vm10599_vm13, %v11723_v21  ;;  %v11724_v24 = vpack.c.bf16 %v10390_v38, %v10390_v38 }
 0xaf0   : > { %10628 = vst.msk [vmem:[%s21075_s12 + $0x70] sm:$0xf] %vm10599_vm13, %v11721_v40  ;;  %v11722_v23 = vpack.c.bf16 %v10388_v41, %v10388_v41 }
 0xaf1   : > { %10631 = vst.msk [vmem:[%s21075_s12 + $0x7c] sm:$0xf] %vm10599_vm13, %v11724_v24 }
 0xaf2   : > { %10629 = vst.msk [vmem:[%s21075_s12 + $0x74] sm:$0xf] %vm10599_vm13, %v11722_v23  ;;  %v13284_v39 = vpop.f32.mrb[36].mxu1 }
 0xaf3   : > { %v10393_v31 = vadd.f32 %v13284_v39, %v21069_v8  ;;  %v10241_v43 = vpop.f32.mrb[37].mxu1 }
 0xaf4   : > { %v10391_v60 = vadd.f32 %v21069_v8, %v10241_v43  ;;  %v13285_v54 = vpop.f32.mrb[38].mxu1 }
 0xaf5   : > { %v11727_v20 = vpack.c.bf16 %v10393_v31, %v10393_v31  ;;  %v10394_v55 = vadd.f32 %v13285_v54, %v21069_v8  ;;  %v10244_v6 = vpop.f32.mrb[39].mxu1 }
 0xaf6   : > { %v11725_v28 = vpack.c.bf16 %v10391_v60, %v10391_v60  ;;  %v10392_v47 = vadd.f32 %v21069_v8, %v10244_v6 }
 0xaf7   : > { %10634 = vst.msk [vmem:[%s21075_s12 + $0x88] sm:$0xf] %vm10599_vm13, %v11727_v20  ;;  %v11728_v12 = vpack.c.bf16 %v10394_v55, %v10394_v55 }
 0xaf8   : > { %10632 = vst.msk [vmem:[%s21075_s12 + $0x80] sm:$0xf] %vm10599_vm13, %v11725_v28  ;;  %v11726_v61 = vpack.c.bf16 %v10392_v47, %v10392_v47 }
 0xaf9   : > { %10635 = vst.msk [vmem:[%s21075_s12 + $0x8c] sm:$0xf] %vm10599_vm13, %v11728_v12 }
 0xafa   : > { %10633 = vst.msk [vmem:[%s21075_s12 + $0x84] sm:$0xf] %vm10599_vm13, %v11726_v61  ;;  %v13288_v16 = vpop.f32.mrb[40].mxu1 }
 0xafb   : > { %v10397_v4 = vadd.f32 %v13288_v16, %v21069_v8  ;;  %v10257_v5 = vpop.f32.mrb[41].mxu1 }
 0xafc   : > { %v10395_v22 = vadd.f32 %v21069_v8, %v10257_v5  ;;  %v13289_v15 = vpop.f32.mrb[42].mxu1 }
 0xafd   : > { %v11731_v9 = vpack.c.bf16 %v10397_v4, %v10397_v4  ;;  %v10398_v1 = vadd.f32 %v13289_v15, %v21069_v8  ;;  %v10260_v11 = vpop.f32.mrb[43].mxu1 }
 0xafe   : > { %v11729_v29 = vpack.c.bf16 %v10395_v22, %v10395_v22  ;;  %v10396_v33 = vadd.f32 %v21069_v8, %v10260_v11 }
 0xaff   : > { %10638 = vst.msk [vmem:[%s21075_s12 + $0x98] sm:$0xf] %vm10599_vm13, %v11731_v9  ;;  %v11732_v18 = vpack.c.bf16 %v10398_v1, %v10398_v1 }
 0xb00   : > { %10636 = vst.msk [vmem:[%s21075_s12 + $0x90] sm:$0xf] %vm10599_vm13, %v11729_v29  ;;  %v11730_v14 = vpack.c.bf16 %v10396_v33, %v10396_v33 }
 0xb01   : > { %10639 = vst.msk [vmem:[%s21075_s12 + $0x9c] sm:$0xf] %vm10599_vm13, %v11732_v18 }
 0xb02   : > { %10637 = vst.msk [vmem:[%s21075_s12 + $0x94] sm:$0xf] %vm10599_vm13, %v11730_v14  ;;  %v13292_v45 = vpop.f32.mrb[44].mxu1 }
 0xb03   : > { %v10401_v32 = vadd.f32 %v13292_v45, %v21069_v8  ;;  %v10273_v27 = vpop.f32.mrb[45].mxu1 }
 0xb04   : > { %v10399_v25 = vadd.f32 %v21069_v8, %v10273_v27  ;;  %v13293_v63 = vpop.f32.mrb[46].mxu1 }
 0xb05   : > { %v11735_v58 = vpack.c.bf16 %v10401_v32, %v10401_v32  ;;  %v10402_v30 = vadd.f32 %v13293_v63, %v21069_v8  ;;  %v10276_v34 = vpop.f32.mrb[47].mxu1 }
 0xb06   : > { %v11733_v26 = vpack.c.bf16 %v10399_v25, %v10399_v25  ;;  %v10400_v46 = vadd.f32 %v21069_v8, %v10276_v34 }
 0xb07   : > { %10642 = vst.msk [vmem:[%s21075_s12 + $0xa8] sm:$0xf] %vm10599_vm13, %v11735_v58  ;;  %v11736_v62 = vpack.c.bf16 %v10402_v30, %v10402_v30 }
 0xb08   : > { %10640 = vst.msk [vmem:[%s21075_s12 + $0xa0] sm:$0xf] %vm10599_vm13, %v11733_v26  ;;  %v11734_v59 = vpack.c.bf16 %v10400_v46, %v10400_v46 }
 0xb09   : > { %10643 = vst.msk [vmem:[%s21075_s12 + $0xac] sm:$0xf] %vm10599_vm13, %v11736_v62 }
 0xb0a   : > { %10641 = vst.msk [vmem:[%s21075_s12 + $0xa4] sm:$0xf] %vm10599_vm13, %v11734_v59  ;;  %v13296_v3 = vpop.f32.mrb[48].mxu1 }
 0xb0b   : > { %v10405_v10 = vadd.f32 %v13296_v3, %v21069_v8  ;;  %v10289_v0 = vpop.f32.mrb[49].mxu1 }
 0xb0c   : > { %v10403_v35 = vadd.f32 %v21069_v8, %v10289_v0  ;;  %v13297_v36 = vpop.f32.mrb[50].mxu1 }
 0xb0d   : > { %v11739_v49 = vpack.c.bf16 %v10405_v10, %v10405_v10  ;;  %v10406_v19 = vadd.f32 %v13297_v36, %v21069_v8  ;;  %v10292_v56 = vpop.f32.mrb[51].mxu1 }
 0xb0e   : > { %v11737_v17 = vpack.c.bf16 %v10403_v35, %v10403_v35  ;;  %v10404_v48 = vadd.f32 %v21069_v8, %v10292_v56 }
 0xb0f   : > { %10646 = vst.msk [vmem:[%s21075_s12 + $0xb8] sm:$0xf] %vm10599_vm13, %v11739_v49  ;;  %v11740_v50 = vpack.c.bf16 %v10406_v19, %v10406_v19 }
 0xb10   : > { %10644 = vst.msk [vmem:[%s21075_s12 + $0xb0] sm:$0xf] %vm10599_vm13, %v11737_v17  ;;  %v11738_v2 = vpack.c.bf16 %v10404_v48, %v10404_v48 }
 0xb11   : > { %10647 = vst.msk [vmem:[%s21075_s12 + $0xbc] sm:$0xf] %vm10599_vm13, %v11740_v50 }
 0xb12   : > { %10645 = vst.msk [vmem:[%s21075_s12 + $0xb4] sm:$0xf] %vm10599_vm13, %v11738_v2 }
 0xb13 PF: > { %s20_s15 = sadd.s32 1, %s14633_s15   ;;  %s21987_s13 = smov %s14629_s14 }
 0xb14   : > { %p17_p5 = scmp.ge.s32.totalorder %s20_s15, 4   ;;  %s21988_s14 = smov %s21990_s16 }
 0xb16   :  { %19 = sbr.rel (!%p17_p5) target bundleno = 2 (0x2), region = 104 }

</bundles_post_ra>
